<compile_context>
chip_gen: v5e
topology: v5e:2x2
jax: 0.10.0
libtpu: 0.0.40
codegen_flags: <defaults>
</compile_context>

<pallas_src>
import functools

import jax
import jax.numpy as jnp
from jax.experimental import pallas as pl
from jax.experimental.pallas import tpu as pltpu

_VMEM_LIMIT = 32 * 1024 * 1024  # raises v5e's 16 MiB default, safe on v6e/v7x


def _sds(start, size, stride):
    """pl.ds with optional stride (stride == 1 -> plain dynamic slice)."""
    if stride == 1:
        return pl.ds(start, size)
    return pl.ds(start, size, stride=stride)


# ----------------------------------------------------------------------------
# Kernels
# ----------------------------------------------------------------------------
def _stem_kernel(x_ref, w_ref, b_ref, o_ref, xpad_ref, hpad_ref,
                 *, c_in, c_out, l_in, l1, l2):
    """conv1d(k=7, s=2, p=3) + folded BN + ReLU + maxpool1d(k=3, s=2, p=1)
    for one batch element, entirely in VMEM."""
    # Zero-padded copy of the input (padding=3).
    xpad_ref[...] = jnp.zeros((l_in + 6, c_in), jnp.float32)
    xpad_ref[pl.ds(3, l_in), :] = x_ref[0].astype(jnp.float32)

    # Conv as 7*c_in broadcast FMAs on the VPU (K is tiny; skip the MXU).
    acc = jnp.zeros((l1, c_out), jnp.float32)
    for t in range(7):
        xs = xpad_ref[_sds(t, l1, 2), :]                               # (l1, c_in)
        for c in range(c_in):
            w_row = w_ref[pl.ds(t * c_in + c, 1), :].astype(jnp.float32)  # (1, c_out)
            acc = acc + xs[:, c:c + 1] * w_row
    h = jnp.maximum(acc + b_ref[...], 0.0)                             # (l1, c_out)

    # MaxPool(k=3, s=2, p=1).  Zero padding is equivalent to -inf here since
    # every pooling window contains at least one (>= 0) post-ReLU value.
    hpad_ref[...] = jnp.zeros((l1 + 2, c_out), jnp.float32)
    hpad_ref[pl.ds(1, l1), :] = h
    left = hpad_ref[_sds(0, l2, 2), :]
    mid = hpad_ref[_sds(1, l2, 2), :]
    right = hpad_ref[_sds(2, l2, 2), :]
    o_ref[0] = jnp.maximum(jnp.maximum(left, mid), right).astype(o_ref.dtype)


def _block_kernel(x_ref, w1_ref, b1_ref, w2_ref, b2_ref, *rest,
                  stride, has_down, c_in, c_out, l_in, l_out):
    """One fused ResNet BasicBlock (conv+BN+ReLU, conv+BN, optional 1x1
    downsample, residual add, ReLU) for one batch element."""
    if has_down:
        wd_ref, bd_ref, o_ref, xpad_ref, hpad_ref = rest
    else:
        o_ref, xpad_ref, hpad_ref = rest

    # Zero-padded copy of the input (conv padding=1).
    xpad_ref[...] = jnp.zeros((l_in + 2, c_in), jnp.float32)
    xpad_ref[pl.ds(1, l_in), :] = x_ref[0].astype(jnp.float32)

    # conv1 + BN + ReLU: 3 shifted bf16 matmuls -> f32 accumulator.
    acc = jnp.zeros((l_out, c_out), jnp.float32)
    for t in range(3):
        xs = xpad_ref[_sds(t, l_out, stride), :].astype(jnp.bfloat16)
        wt = w1_ref[pl.ds(t * c_in, c_in), :]
        acc = acc + jnp.dot(xs, wt, preferred_element_type=jnp.float32)
    h1 = jnp.maximum(acc + b1_ref[...], 0.0)

    # conv2 + BN (stride 1).
    hpad_ref[...] = jnp.zeros((l_out + 2, c_out), jnp.float32)
    hpad_ref[pl.ds(1, l_out), :] = h1
    acc2 = jnp.zeros((l_out, c_out), jnp.float32)
    for t in range(3):
        hs = hpad_ref[pl.ds(t, l_out), :].astype(jnp.bfloat16)
        wt = w2_ref[pl.ds(t * c_out, c_out), :]
        acc2 = acc2 + jnp.dot(hs, wt, preferred_element_type=jnp.float32)
    acc2 = acc2 + b2_ref[...]

    # Residual branch.
    if has_down:      # 1x1 conv (stride=s) + folded BN
        xs_d = xpad_ref[_sds(1, l_out, stride), :].astype(jnp.bfloat16)
        ident = jnp.dot(xs_d, wd_ref[...],
                        preferred_element_type=jnp.float32) + bd_ref[...]
    else:             # identity (stride == 1, c_in == c_out)
        ident = xpad_ref[pl.ds(1, l_out), :]

    o_ref[0] = jnp.maximum(acc2 + ident, 0.0).astype(o_ref.dtype)


def _fc_kernel(x_ref, w_ref, b_ref, o_ref, acc_ref):
    """K-tiled matmul + bias (encodeFC)."""
    k = pl.program_id(0)

    @pl.when(k == 0)
    def _():
        acc_ref[...] = jnp.zeros_like(acc_ref)

    acc_ref[...] += jnp.dot(x_ref[...], w_ref[...],
                            preferred_element_type=jnp.float32)

    @pl.when(k == pl.num_programs(0) - 1)
    def _():
        o_ref[...] = (acc_ref[...] + b_ref[...]).astype(o_ref.dtype)


# ----------------------------------------------------------------------------
# pallas_call wrappers
# ----------------------------------------------------------------------------
def stem_call(x, w, b):
    B, L, C_in = x.shape
    C_out = w.shape[1]
    L1 = (L - 1) // 2 + 1
    L2 = (L1 - 1) // 2 + 1
    kernel = functools.partial(_stem_kernel, c_in=C_in, c_out=C_out,
                               l_in=L, l1=L1, l2=L2)
    return pl.pallas_call(
        kernel,
        out_shape=jax.ShapeDtypeStruct((B, L2, C_out), jnp.bfloat16),
        grid=(B,),
        in_specs=[pl.BlockSpec((1, L, C_in), lambda b_: (b_, 0, 0)),
                  pl.BlockSpec((7 * C_in, C_out), lambda b_: (0, 0)),
                  pl.BlockSpec((1, C_out), lambda b_: (0, 0))],
        out_specs=pl.BlockSpec((1, L2, C_out), lambda b_: (b_, 0, 0)),
        scratch_shapes=[pltpu.VMEM((L + 6, C_in), jnp.float32),
                        pltpu.VMEM((L1 + 2, C_out), jnp.float32)],
        compiler_params=pltpu.CompilerParams(
            dimension_semantics=("parallel",),
            vmem_limit_bytes=_VMEM_LIMIT),
    )(x, w, b)


def block_call(x, blk, *, stride):
    B, L_in, C_in = x.shape
    C_out = blk["b1"].shape[1]
    L_out = (L_in - 1) // stride + 1
    has_down = "wd" in blk

    kernel = functools.partial(_block_kernel, stride=stride, has_down=has_down,
                               c_in=C_in, c_out=C_out, l_in=L_in, l_out=L_out)

    in_specs = [pl.BlockSpec((1, L_in, C_in), lambda b_: (b_, 0, 0)),
                pl.BlockSpec((3 * C_in, C_out), lambda b_: (0, 0)),
                pl.BlockSpec((1, C_out), lambda b_: (0, 0)),
                pl.BlockSpec((3 * C_out, C_out), lambda b_: (0, 0)),
                pl.BlockSpec((1, C_out), lambda b_: (0, 0))]
    args = [x, blk["w1"], blk["b1"], blk["w2"], blk["b2"]]
    if has_down:
        in_specs += [pl.BlockSpec((C_in, C_out), lambda b_: (0, 0)),
                     pl.BlockSpec((1, C_out), lambda b_: (0, 0))]
        args += [blk["wd"], blk["bd"]]

    flops = 2 * B * L_out * C_out * (3 * C_in + 3 * C_out
                                     + (C_in if has_down else 0))
    bytes_accessed = ((B * L_in * C_in + B * L_out * C_out) * 2
                      + (3 * C_in * C_out + 3 * C_out * C_out
                         + (C_in * C_out if has_down else 0)) * 2)

    return pl.pallas_call(
        kernel,
        out_shape=jax.ShapeDtypeStruct((B, L_out, C_out), jnp.bfloat16),
        grid=(B,),
        in_specs=in_specs,
        out_specs=pl.BlockSpec((1, L_out, C_out), lambda b_: (b_, 0, 0)),
        scratch_shapes=[pltpu.VMEM((L_in + 2, C_in), jnp.float32),
                        pltpu.VMEM((L_out + 2, C_out), jnp.float32)],
        compiler_params=pltpu.CompilerParams(
            dimension_semantics=("parallel",),
            vmem_limit_bytes=_VMEM_LIMIT),
        cost_estimate=pl.CostEstimate(flops=flops, transcendentals=0,
                                      bytes_accessed=bytes_accessed),
    )(*args)


def fc_call(x2d, w, b):
    M, K = x2d.shape
    _, N = w.shape
    tk = next(t for t in (4096, 2048, 1024, 512, 256) if K % t == 0)
    return pl.pallas_call(
        _fc_kernel,
        out_shape=jax.ShapeDtypeStruct((M, N), jnp.float32),
        grid=(K // tk,),
        in_specs=[pl.BlockSpec((M, tk), lambda k: (0, k)),
                  pl.BlockSpec((tk, N), lambda k: (k, 0)),
                  pl.BlockSpec((1, N), lambda k: (0, 0))],
        out_specs=pl.BlockSpec((M, N), lambda k: (0, 0)),
        scratch_shapes=[pltpu.VMEM((M, N), jnp.float32)],
        compiler_params=pltpu.CompilerParams(
            dimension_semantics=("arbitrary",),
            vmem_limit_bytes=_VMEM_LIMIT),
        cost_estimate=pl.CostEstimate(flops=2 * M * K * N, transcendentals=0,
                                      bytes_accessed=2 * (M * K + K * N) + 4 * M * N),
    )(x2d, w, b)


# ----------------------------------------------------------------------------
# Forward pass
# ----------------------------------------------------------------------------
@jax.jit
def encoder1d_forward(p, x_ncw):
    """x_ncw: (B, C_in, L) as in the PyTorch module -> (B, encode_dim) f32."""
    x = jnp.transpose(x_ncw, (0, 2, 1)).astype(jnp.bfloat16)   # NCW -> NLC once
    h = stem_call(x, p["stem_w"], p["stem_b"])
    h = block_call(h, p["layer1"][0], stride=1)
    h = block_call(h, p["layer1"][1], stride=1)
    h = block_call(h, p["layer2"][0], stride=2)
    h = block_call(h, p["layer2"][1], stride=1)
    h = block_call(h, p["layer3"][0], stride=2)
    h = block_call(h, p["layer3"][1], stride=1)
    flat = h.reshape(h.shape[0], -1)          # (B, region_height*256), row = l*256+c
    return fc_call(flat, p["fc_w"], p["fc_b"])


# ----------------------------------------------------------------------------
# Deterministic raw parameters (PyTorch layout) + one-time repacking
# ----------------------------------------------------------------------------
def _bn(c):
    return dict(gamma=jnp.ones((c,), jnp.float32),
                beta=jnp.zeros((c,), jnp.float32),
                mean=jnp.zeros((c,), jnp.float32),
                var=jnp.ones((c,), jnp.float32))


def _conv_w(key, c_out, c_in, k):
    return jax.random.normal(key, (c_out, c_in, k), jnp.float32) * 0.05


def _block_raw(key, c_in, c_out, downsample):
    keys = jax.random.split(key, 3)
    p = dict(conv1_w=_conv_w(keys[0], c_out, c_in, 3), bn1=_bn(c_out),
             conv2_w=_conv_w(keys[1], c_out, c_out, 3), bn2=_bn(c_out))
    if downsample:
        p["down_w"] = _conv_w(keys[2], c_out, c_in, 1)
        p["down_bn"] = _bn(c_out)
    return p


def make_params(key, in_ch, region_height, encode_dim):
    ks = jax.random.split(key, 8)
    return dict(
        conv1_w=_conv_w(ks[0], 64, in_ch, 7), bn1=_bn(64),
        layer1=[_block_raw(ks[1], 64, 64, False), _block_raw(ks[2], 64, 64, False)],
        layer2=[_block_raw(ks[3], 64, 128, True), _block_raw(ks[4], 128, 128, False)],
        layer3=[_block_raw(ks[5], 128, 256, True), _block_raw(ks[6], 256, 256, False)],
        fc_w=jax.random.normal(ks[7], (encode_dim, 256 * region_height),
                               jnp.float32) * 0.02,
        fc_b=jnp.zeros((encode_dim,), jnp.float32),
    )


def _fold_conv_bn(w, bn, eps=1e-5):
    """Fold eval-mode BN into the conv; repack (C_out, C_in, K) -> (K*C_in, C_out) bf16."""
    scale = bn["gamma"] / jnp.sqrt(bn["var"] + eps)
    w_f = w * scale[:, None, None]
    b_f = (bn["beta"] - bn["mean"] * scale).reshape(1, -1)
    c_out, c_in, k = w.shape
    w_mat = jnp.transpose(w_f, (2, 1, 0)).reshape(k * c_in, c_out)
    return w_mat.astype(jnp.bfloat16), b_f.astype(jnp.float32)


def _prep_block(raw):
    w1, b1 = _fold_conv_bn(raw["conv1_w"], raw["bn1"])
    w2, b2 = _fold_conv_bn(raw["conv2_w"], raw["bn2"])
    blk = dict(w1=w1, b1=b1, w2=w2, b2=b2)
    if "down_w" in raw:
        wd, bd = _fold_conv_bn(raw["down_w"], raw["down_bn"])
        blk["wd"] = wd        # (C_in, C_out) since k == 1
        blk["bd"] = bd
    return blk


def prepare_params(raw, region_height):
    """One-time repack: BN folding, tap-major weight layout, bf16 casts, and a
    permutation of fc_w so the channels-last flatten matches the PyTorch
    (B, 256, L).view(B, -1) column order."""
    stem_w, stem_b = _fold_conv_bn(raw["conv1_w"], raw["bn1"])
    e = raw["fc_w"].shape[0]
    fc = raw["fc_w"].reshape(e, 256, region_height)                     # [e, c, l]
    fc = jnp.transpose(fc, (2, 1, 0)).reshape(region_height * 256, e)   # row = l*256+c
    return dict(
        stem_w=stem_w, stem_b=stem_b,
        layer1=[_prep_block(b) for b in raw["layer1"]],
        layer2=[_prep_block(b) for b in raw["layer2"]],
        layer3=[_prep_block(b) for b in raw["layer3"]],
        fc_w=fc.astype(jnp.bfloat16),
        fc_b=raw["fc_b"].reshape(1, e).astype(jnp.float32),
    )


# ----------------------------------------------------------------------------
if __name__ == "__main__":
    # Small shapes: batch=2, in_channels=1, region_height=8 -> input length is
    # 16 * region_height = 128 (the trunk downsamples time by 16x).
    B, C_IN, REGION_H, ENCODE_DIM = 2, 1, 8, 16
    L = 16 * REGION_H

    key = jax.random.PRNGKey(0)
    pkey, xkey = jax.random.split(key)
    raw = make_params(pkey, C_IN, REGION_H, ENCODE_DIM)
    params = prepare_params(raw, REGION_H)
    x = jax.random.normal(xkey, (B, C_IN, L), jnp.float32)

    code = encoder1d_forward(params, x)
    code = jax.block_until_ready(code)
    assert code.shape == (B, ENCODE_DIM), code.shape
    assert bool(jnp.all(jnp.isfinite(code)))
    print("KERNEL_OK")
</pallas_src>

<mosaic_0001>
module attributes {stable_mosaic.version = 11 : i64} {
  func.func @_stem_kernel(%arg0: i32, %arg1: memref<1x128x1xbf16, #tpu.memory_space<vmem>>, %arg2: memref<7x64xbf16, #tpu.memory_space<vmem>>, %arg3: memref<1x64xf32, #tpu.memory_space<vmem>>, %arg4: memref<1x32x64xbf16, #tpu.memory_space<vmem>>, %arg5: memref<134x1xf32, #tpu.memory_space<vmem>>, %arg6: memref<66x64xf32, #tpu.memory_space<vmem>>) attributes {dimension_semantics = [#tpu.dimension_semantics<parallel>], iteration_bounds = array<i64: 2>, scalar_prefetch = 0 : i64, scratch_operands = 2 : i64, tpu.core_type = #tpu.core_type<tc>, window_params = [{transform_indices = @transform_0, window_bounds = array<i64: 1, 128, 1>}, {pipeline_mode = #tpu.pipeline_mode<synchronous>, transform_indices = @transform_1, window_bounds = array<i64: 7, 64>}, {pipeline_mode = #tpu.pipeline_mode<synchronous>, transform_indices = @transform_2, window_bounds = array<i64: 1, 64>}, {transform_indices = @transform_3, window_bounds = array<i64: 1, 32, 64>}]} {
    %cst = arith.constant 0.000000e+00 : f32
    %0 = vector.broadcast %cst : f32 to vector<134x1xf32>
    %c0 = arith.constant 0 : index
    %c0_0 = arith.constant 0 : index
    %1 = vector.load %arg5[%c0, %c0_0] : memref<134x1xf32, #tpu.memory_space<vmem>>, vector<134x1xf32>
    tpu.vector_store %arg5[%c0, %c0_0], %0 {strides = array<i32>} : memref<134x1xf32, #tpu.memory_space<vmem>>, vector<134x1xf32>,
    %c0_1 = arith.constant 0 : index
    %c0_2 = arith.constant 0 : index
    %c0_3 = arith.constant 0 : index
    %2 = vector.load %arg1[%c0_1, %c0_2, %c0_3] : memref<1x128x1xbf16, #tpu.memory_space<vmem>>, vector<1x128x1xbf16>
    %3 = vector.shape_cast %2 : vector<1x128x1xbf16> to vector<128x1xbf16>
    %4 = arith.extf %3 : vector<128x1xbf16> to vector<128x1xf32>
    %c3 = arith.constant 3 : index
    %c0_4 = arith.constant 0 : index
    %5 = vector.load %arg5[%c3, %c0_4] : memref<134x1xf32, #tpu.memory_space<vmem>>, vector<128x1xf32>
    tpu.vector_store %arg5[%c3, %c0_4], %4 {strides = array<i32>} : memref<134x1xf32, #tpu.memory_space<vmem>>, vector<128x1xf32>,
    %cst_5 = arith.constant 0.000000e+00 : f32
    %6 = vector.broadcast %cst_5 : f32 to vector<64x64xf32>
    %c0_6 = arith.constant 0 : index
    %c0_7 = arith.constant 0 : index
    %7 = tpu.strided_load %arg5[%c0_6, %c0_7] {strides = array<i32: 2, 1>} : memref<134x1xf32, #tpu.memory_space<vmem>>, vector<64x1xf32>
    %c0_8 = arith.constant 0 : index
    %c0_9 = arith.constant 0 : index
    %8 = vector.load %arg2[%c0_8, %c0_9] : memref<7x64xbf16, #tpu.memory_space<vmem>>, vector<1x64xbf16>
    %9 = arith.extf %8 : vector<1x64xbf16> to vector<1x64xf32>
    %10 = vector.broadcast %7 : vector<64x1xf32> to vector<64x64xf32>
    %11 = vector.broadcast %9 : vector<1x64xf32> to vector<64x64xf32>
    %12 = arith.mulf %10, %11 : vector<64x64xf32>
    %13 = arith.addf %6, %12 : vector<64x64xf32>
    %c1 = arith.constant 1 : index
    %c0_10 = arith.constant 0 : index
    %14 = tpu.strided_load %arg5[%c1, %c0_10] {strides = array<i32: 2, 1>} : memref<134x1xf32, #tpu.memory_space<vmem>>, vector<64x1xf32>
    %c1_11 = arith.constant 1 : index
    %c0_12 = arith.constant 0 : index
    %15 = vector.load %arg2[%c1_11, %c0_12] : memref<7x64xbf16, #tpu.memory_space<vmem>>, vector<1x64xbf16>
    %16 = arith.extf %15 : vector<1x64xbf16> to vector<1x64xf32>
    %17 = vector.broadcast %14 : vector<64x1xf32> to vector<64x64xf32>
    %18 = vector.broadcast %16 : vector<1x64xf32> to vector<64x64xf32>
    %19 = arith.mulf %17, %18 : vector<64x64xf32>
    %20 = arith.addf %13, %19 : vector<64x64xf32>
    %c2 = arith.constant 2 : index
    %c0_13 = arith.constant 0 : index
    %21 = tpu.strided_load %arg5[%c2, %c0_13] {strides = array<i32: 2, 1>} : memref<134x1xf32, #tpu.memory_space<vmem>>, vector<64x1xf32>
    %c2_14 = arith.constant 2 : index
    %c0_15 = arith.constant 0 : index
    %22 = vector.load %arg2[%c2_14, %c0_15] : memref<7x64xbf16, #tpu.memory_space<vmem>>, vector<1x64xbf16>
    %23 = arith.extf %22 : vector<1x64xbf16> to vector<1x64xf32>
    %24 = vector.broadcast %21 : vector<64x1xf32> to vector<64x64xf32>
    %25 = vector.broadcast %23 : vector<1x64xf32> to vector<64x64xf32>
    %26 = arith.mulf %24, %25 : vector<64x64xf32>
    %27 = arith.addf %20, %26 : vector<64x64xf32>
    %c3_16 = arith.constant 3 : index
    %c0_17 = arith.constant 0 : index
    %28 = tpu.strided_load %arg5[%c3_16, %c0_17] {strides = array<i32: 2, 1>} : memref<134x1xf32, #tpu.memory_space<vmem>>, vector<64x1xf32>
    %c3_18 = arith.constant 3 : index
    %c0_19 = arith.constant 0 : index
    %29 = vector.load %arg2[%c3_18, %c0_19] : memref<7x64xbf16, #tpu.memory_space<vmem>>, vector<1x64xbf16>
    %30 = arith.extf %29 : vector<1x64xbf16> to vector<1x64xf32>
    %31 = vector.broadcast %28 : vector<64x1xf32> to vector<64x64xf32>
    %32 = vector.broadcast %30 : vector<1x64xf32> to vector<64x64xf32>
    %33 = arith.mulf %31, %32 : vector<64x64xf32>
    %34 = arith.addf %27, %33 : vector<64x64xf32>
    %c4 = arith.constant 4 : index
    %c0_20 = arith.constant 0 : index
    %35 = tpu.strided_load %arg5[%c4, %c0_20] {strides = array<i32: 2, 1>} : memref<134x1xf32, #tpu.memory_space<vmem>>, vector<64x1xf32>
    %c4_21 = arith.constant 4 : index
    %c0_22 = arith.constant 0 : index
    %36 = vector.load %arg2[%c4_21, %c0_22] : memref<7x64xbf16, #tpu.memory_space<vmem>>, vector<1x64xbf16>
    %37 = arith.extf %36 : vector<1x64xbf16> to vector<1x64xf32>
    %38 = vector.broadcast %35 : vector<64x1xf32> to vector<64x64xf32>
    %39 = vector.broadcast %37 : vector<1x64xf32> to vector<64x64xf32>
    %40 = arith.mulf %38, %39 : vector<64x64xf32>
    %41 = arith.addf %34, %40 : vector<64x64xf32>
    %c5 = arith.constant 5 : index
    %c0_23 = arith.constant 0 : index
    %42 = tpu.strided_load %arg5[%c5, %c0_23] {strides = array<i32: 2, 1>} : memref<134x1xf32, #tpu.memory_space<vmem>>, vector<64x1xf32>
    %c5_24 = arith.constant 5 : index
    %c0_25 = arith.constant 0 : index
    %43 = vector.load %arg2[%c5_24, %c0_25] : memref<7x64xbf16, #tpu.memory_space<vmem>>, vector<1x64xbf16>
    %44 = arith.extf %43 : vector<1x64xbf16> to vector<1x64xf32>
    %45 = vector.broadcast %42 : vector<64x1xf32> to vector<64x64xf32>
    %46 = vector.broadcast %44 : vector<1x64xf32> to vector<64x64xf32>
    %47 = arith.mulf %45, %46 : vector<64x64xf32>
    %48 = arith.addf %41, %47 : vector<64x64xf32>
    %c6 = arith.constant 6 : index
    %c0_26 = arith.constant 0 : index
    %49 = tpu.strided_load %arg5[%c6, %c0_26] {strides = array<i32: 2, 1>} : memref<134x1xf32, #tpu.memory_space<vmem>>, vector<64x1xf32>
    %c6_27 = arith.constant 6 : index
    %c0_28 = arith.constant 0 : index
    %50 = vector.load %arg2[%c6_27, %c0_28] : memref<7x64xbf16, #tpu.memory_space<vmem>>, vector<1x64xbf16>
    %51 = arith.extf %50 : vector<1x64xbf16> to vector<1x64xf32>
    %52 = vector.broadcast %49 : vector<64x1xf32> to vector<64x64xf32>
    %53 = vector.broadcast %51 : vector<1x64xf32> to vector<64x64xf32>
    %54 = arith.mulf %52, %53 : vector<64x64xf32>
    %55 = arith.addf %48, %54 : vector<64x64xf32>
    %c0_29 = arith.constant 0 : index
    %c0_30 = arith.constant 0 : index
    %56 = vector.load %arg3[%c0_29, %c0_30] : memref<1x64xf32, #tpu.memory_space<vmem>>, vector<1x64xf32>
    %57 = vector.broadcast %56 : vector<1x64xf32> to vector<64x64xf32>
    %58 = arith.addf %55, %57 : vector<64x64xf32>
    %cst_31 = arith.constant 0.000000e+00 : f32
    %59 = vector.broadcast %cst_31 : f32 to vector<64x64xf32>
    %60 = arith.maximumf %58, %59 : vector<64x64xf32>
    %cst_32 = arith.constant 0.000000e+00 : f32
    %61 = vector.broadcast %cst_32 : f32 to vector<66x64xf32>
    %c0_33 = arith.constant 0 : index
    %c0_34 = arith.constant 0 : index
    %62 = vector.load %arg6[%c0_33, %c0_34] : memref<66x64xf32, #tpu.memory_space<vmem>>, vector<66x64xf32>
    tpu.vector_store %arg6[%c0_33, %c0_34], %61 {strides = array<i32>} : memref<66x64xf32, #tpu.memory_space<vmem>>, vector<66x64xf32>,
    %c1_35 = arith.constant 1 : index
    %c0_36 = arith.constant 0 : index
    %63 = vector.load %arg6[%c1_35, %c0_36] : memref<66x64xf32, #tpu.memory_space<vmem>>, vector<64x64xf32>
    tpu.vector_store %arg6[%c1_35, %c0_36], %60 {strides = array<i32>} : memref<66x64xf32, #tpu.memory_space<vmem>>, vector<64x64xf32>,
    %c0_37 = arith.constant 0 : index
    %c0_38 = arith.constant 0 : index
    %64 = tpu.strided_load %arg6[%c0_37, %c0_38] {strides = array<i32: 2, 1>} : memref<66x64xf32, #tpu.memory_space<vmem>>, vector<32x64xf32>
    %c1_39 = arith.constant 1 : index
    %c0_40 = arith.constant 0 : index
    %65 = tpu.strided_load %arg6[%c1_39, %c0_40] {strides = array<i32: 2, 1>} : memref<66x64xf32, #tpu.memory_space<vmem>>, vector<32x64xf32>
    %c2_41 = arith.constant 2 : index
    %c0_42 = arith.constant 0 : index
    %66 = tpu.strided_load %arg6[%c2_41, %c0_42] {strides = array<i32: 2, 1>} : memref<66x64xf32, #tpu.memory_space<vmem>>, vector<32x64xf32>
    %67 = arith.maximumf %64, %65 : vector<32x64xf32>
    %68 = arith.maximumf %67, %66 : vector<32x64xf32>
    %69 = arith.truncf %68 : vector<32x64xf32> to vector<32x64xbf16>
    %c0_43 = arith.constant 0 : index
    %c0_44 = arith.constant 0 : index
    %c0_45 = arith.constant 0 : index
    %70 = vector.load %arg4[%c0_43, %c0_44, %c0_45] : memref<1x32x64xbf16, #tpu.memory_space<vmem>>, vector<1x32x64xbf16>
    %71 = vector.shape_cast %70 : vector<1x32x64xbf16> to vector<32x64xbf16>
    %72 = vector.shape_cast %69 : vector<32x64xbf16> to vector<1x32x64xbf16>
    tpu.vector_store %arg4[%c0_43, %c0_44, %c0_45], %72 {strides = array<i32>} : memref<1x32x64xbf16, #tpu.memory_space<vmem>>, vector<1x32x64xbf16>,
    return
  }
  func.func @transform_0(%arg0: i32) -> (i32, i32, i32) {
    %c0_i32 = arith.constant 0 : i32
    %c0_i32_0 = arith.constant 0 : i32
    %c0_i32_1 = arith.constant 0 : i32
    return %arg0, %c0_i32, %c0_i32_0 : i32, i32, i32
  }
  func.func @transform_1(%arg0: i32) -> (i32, i32) {
    %c0_i32 = arith.constant 0 : i32
    %c0_i32_0 = arith.constant 0 : i32
    %c0_i32_1 = arith.constant 0 : i32
    return %c0_i32, %c0_i32_0 : i32, i32
  }
  func.func @transform_2(%arg0: i32) -> (i32, i32) {
    %c0_i32 = arith.constant 0 : i32
    %c0_i32_0 = arith.constant 0 : i32
    %c0_i32_1 = arith.constant 0 : i32
    return %c0_i32, %c0_i32_0 : i32, i32
  }
  func.func @transform_3(%arg0: i32) -> (i32, i32, i32) {
    %c0_i32 = arith.constant 0 : i32
    %c0_i32_0 = arith.constant 0 : i32
    %c0_i32_1 = arith.constant 0 : i32
    return %arg0, %c0_i32, %c0_i32_0 : i32, i32, i32
  }
}

module attributes {stable_mosaic.version = 11 : i64} {
  func.func @_block_kernel(%arg0: i32, %arg1: memref<1x32x64xbf16, #tpu.memory_space<vmem>>, %arg2: memref<192x64xbf16, #tpu.memory_space<vmem>>, %arg3: memref<1x64xf32, #tpu.memory_space<vmem>>, %arg4: memref<192x64xbf16, #tpu.memory_space<vmem>>, %arg5: memref<1x64xf32, #tpu.memory_space<vmem>>, %arg6: memref<1x32x64xbf16, #tpu.memory_space<vmem>>, %arg7: memref<34x64xf32, #tpu.memory_space<vmem>>, %arg8: memref<34x64xf32, #tpu.memory_space<vmem>>) attributes {dimension_semantics = [#tpu.dimension_semantics<parallel>], iteration_bounds = array<i64: 2>, scalar_prefetch = 0 : i64, scratch_operands = 2 : i64, tpu.core_type = #tpu.core_type<tc>, window_params = [{transform_indices = @transform_0, window_bounds = array<i64: 1, 32, 64>}, {pipeline_mode = #tpu.pipeline_mode<synchronous>, transform_indices = @transform_1, window_bounds = array<i64: 192, 64>}, {pipeline_mode = #tpu.pipeline_mode<synchronous>, transform_indices = @transform_2, window_bounds = array<i64: 1, 64>}, {pipeline_mode = #tpu.pipeline_mode<synchronous>, transform_indices = @transform_3, window_bounds = array<i64: 192, 64>}, {pipeline_mode = #tpu.pipeline_mode<synchronous>, transform_indices = @transform_4, window_bounds = array<i64: 1, 64>}, {transform_indices = @transform_5, window_bounds = array<i64: 1, 32, 64>}]} {
    %cst = arith.constant 0.000000e+00 : f32
    %0 = vector.broadcast %cst : f32 to vector<34x64xf32>
    %c0 = arith.constant 0 : index
    %c0_0 = arith.constant 0 : index
    %1 = vector.load %arg7[%c0, %c0_0] : memref<34x64xf32, #tpu.memory_space<vmem>>, vector<34x64xf32>
    tpu.vector_store %arg7[%c0, %c0_0], %0 {strides = array<i32>} : memref<34x64xf32, #tpu.memory_space<vmem>>, vector<34x64xf32>,
    %c0_1 = arith.constant 0 : index
    %c0_2 = arith.constant 0 : index
    %c0_3 = arith.constant 0 : index
    %2 = vector.load %arg1[%c0_1, %c0_2, %c0_3] : memref<1x32x64xbf16, #tpu.memory_space<vmem>>, vector<1x32x64xbf16>
    %3 = vector.shape_cast %2 : vector<1x32x64xbf16> to vector<32x64xbf16>
    %4 = arith.extf %3 : vector<32x64xbf16> to vector<32x64xf32>
    %c1 = arith.constant 1 : index
    %c0_4 = arith.constant 0 : index
    %5 = vector.load %arg7[%c1, %c0_4] : memref<34x64xf32, #tpu.memory_space<vmem>>, vector<32x64xf32>
    tpu.vector_store %arg7[%c1, %c0_4], %4 {strides = array<i32>} : memref<34x64xf32, #tpu.memory_space<vmem>>, vector<32x64xf32>,
    %cst_5 = arith.constant 0.000000e+00 : f32
    %6 = vector.broadcast %cst_5 : f32 to vector<32x64xf32>
    %c0_6 = arith.constant 0 : index
    %c0_7 = arith.constant 0 : index
    %7 = vector.load %arg7[%c0_6, %c0_7] : memref<34x64xf32, #tpu.memory_space<vmem>>, vector<32x64xf32>
    %8 = arith.truncf %7 : vector<32x64xf32> to vector<32x64xbf16>
    %c0_8 = arith.constant 0 : index
    %c0_9 = arith.constant 0 : index
    %9 = vector.load %arg2[%c0_8, %c0_9] : memref<192x64xbf16, #tpu.memory_space<vmem>>, vector<64x64xbf16>
    %cst_10 = arith.constant dense<0.000000e+00> : vector<32x64xf32>
    %10 = tpu.matmul %8, %9, %cst_10 {dimension_numbers = #tpu.dot_dimension_numbers<[1], [0], [0], [1], [0, 0, 1, 1], [], []>} : vector<32x64xbf16>, vector<64x64xbf16>, vector<32x64xf32> -> vector<32x64xf32>
    %11 = arith.addf %6, %10 : vector<32x64xf32>
    %c1_11 = arith.constant 1 : index
    %c0_12 = arith.constant 0 : index
    %12 = vector.load %arg7[%c1_11, %c0_12] : memref<34x64xf32, #tpu.memory_space<vmem>>, vector<32x64xf32>
    %13 = arith.truncf %12 : vector<32x64xf32> to vector<32x64xbf16>
    %c64 = arith.constant 64 : index
    %c0_13 = arith.constant 0 : index
    %14 = vector.load %arg2[%c64, %c0_13] : memref<192x64xbf16, #tpu.memory_space<vmem>>, vector<64x64xbf16>
    %cst_14 = arith.constant dense<0.000000e+00> : vector<32x64xf32>
    %15 = tpu.matmul %13, %14, %cst_14 {dimension_numbers = #tpu.dot_dimension_numbers<[1], [0], [0], [1], [0, 0, 1, 1], [], []>} : vector<32x64xbf16>, vector<64x64xbf16>, vector<32x64xf32> -> vector<32x64xf32>
    %16 = arith.addf %11, %15 : vector<32x64xf32>
    %c2 = arith.constant 2 : index
    %c0_15 = arith.constant 0 : index
    %17 = vector.load %arg7[%c2, %c0_15] : memref<34x64xf32, #tpu.memory_space<vmem>>, vector<32x64xf32>
    %18 = arith.truncf %17 : vector<32x64xf32> to vector<32x64xbf16>
    %c128 = arith.constant 128 : index
    %c0_16 = arith.constant 0 : index
    %19 = vector.load %arg2[%c128, %c0_16] : memref<192x64xbf16, #tpu.memory_space<vmem>>, vector<64x64xbf16>
    %cst_17 = arith.constant dense<0.000000e+00> : vector<32x64xf32>
    %20 = tpu.matmul %18, %19, %cst_17 {dimension_numbers = #tpu.dot_dimension_numbers<[1], [0], [0], [1], [0, 0, 1, 1], [], []>} : vector<32x64xbf16>, vector<64x64xbf16>, vector<32x64xf32> -> vector<32x64xf32>
    %21 = arith.addf %16, %20 : vector<32x64xf32>
    %c0_18 = arith.constant 0 : index
    %c0_19 = arith.constant 0 : index
    %22 = vector.load %arg3[%c0_18, %c0_19] : memref<1x64xf32, #tpu.memory_space<vmem>>, vector<1x64xf32>
    %23 = vector.broadcast %22 : vector<1x64xf32> to vector<32x64xf32>
    %24 = arith.addf %21, %23 : vector<32x64xf32>
    %cst_20 = arith.constant 0.000000e+00 : f32
    %25 = vector.broadcast %cst_20 : f32 to vector<32x64xf32>
    %26 = arith.maximumf %24, %25 : vector<32x64xf32>
    %cst_21 = arith.constant 0.000000e+00 : f32
    %27 = vector.broadcast %cst_21 : f32 to vector<34x64xf32>
    %c0_22 = arith.constant 0 : index
    %c0_23 = arith.constant 0 : index
    %28 = vector.load %arg8[%c0_22, %c0_23] : memref<34x64xf32, #tpu.memory_space<vmem>>, vector<34x64xf32>
    tpu.vector_store %arg8[%c0_22, %c0_23], %27 {strides = array<i32>} : memref<34x64xf32, #tpu.memory_space<vmem>>, vector<34x64xf32>,
    %c1_24 = arith.constant 1 : index
    %c0_25 = arith.constant 0 : index
    %29 = vector.load %arg8[%c1_24, %c0_25] : memref<34x64xf32, #tpu.memory_space<vmem>>, vector<32x64xf32>
    tpu.vector_store %arg8[%c1_24, %c0_25], %26 {strides = array<i32>} : memref<34x64xf32, #tpu.memory_space<vmem>>, vector<32x64xf32>,
    %cst_26 = arith.constant 0.000000e+00 : f32
    %30 = vector.broadcast %cst_26 : f32 to vector<32x64xf32>
    %c0_27 = arith.constant 0 : index
    %c0_28 = arith.constant 0 : index
    %31 = vector.load %arg8[%c0_27, %c0_28] : memref<34x64xf32, #tpu.memory_space<vmem>>, vector<32x64xf32>
    %32 = arith.truncf %31 : vector<32x64xf32> to vector<32x64xbf16>
    %c0_29 = arith.constant 0 : index
    %c0_30 = arith.constant 0 : index
    %33 = vector.load %arg4[%c0_29, %c0_30] : memref<192x64xbf16, #tpu.memory_space<vmem>>, vector<64x64xbf16>
    %cst_31 = arith.constant dense<0.000000e+00> : vector<32x64xf32>
    %34 = tpu.matmul %32, %33, %cst_31 {dimension_numbers = #tpu.dot_dimension_numbers<[1], [0], [0], [1], [0, 0, 1, 1], [], []>} : vector<32x64xbf16>, vector<64x64xbf16>, vector<32x64xf32> -> vector<32x64xf32>
    %35 = arith.addf %30, %34 : vector<32x64xf32>
    %c1_32 = arith.constant 1 : index
    %c0_33 = arith.constant 0 : index
    %36 = vector.load %arg8[%c1_32, %c0_33] : memref<34x64xf32, #tpu.memory_space<vmem>>, vector<32x64xf32>
    %37 = arith.truncf %36 : vector<32x64xf32> to vector<32x64xbf16>
    %c64_34 = arith.constant 64 : index
    %c0_35 = arith.constant 0 : index
    %38 = vector.load %arg4[%c64_34, %c0_35] : memref<192x64xbf16, #tpu.memory_space<vmem>>, vector<64x64xbf16>
    %cst_36 = arith.constant dense<0.000000e+00> : vector<32x64xf32>
    %39 = tpu.matmul %37, %38, %cst_36 {dimension_numbers = #tpu.dot_dimension_numbers<[1], [0], [0], [1], [0, 0, 1, 1], [], []>} : vector<32x64xbf16>, vector<64x64xbf16>, vector<32x64xf32> -> vector<32x64xf32>
    %40 = arith.addf %35, %39 : vector<32x64xf32>
    %c2_37 = arith.constant 2 : index
    %c0_38 = arith.constant 0 : index
    %41 = vector.load %arg8[%c2_37, %c0_38] : memref<34x64xf32, #tpu.memory_space<vmem>>, vector<32x64xf32>
    %42 = arith.truncf %41 : vector<32x64xf32> to vector<32x64xbf16>
    %c128_39 = arith.constant 128 : index
    %c0_40 = arith.constant 0 : index
    %43 = vector.load %arg4[%c128_39, %c0_40] : memref<192x64xbf16, #tpu.memory_space<vmem>>, vector<64x64xbf16>
    %cst_41 = arith.constant dense<0.000000e+00> : vector<32x64xf32>
    %44 = tpu.matmul %42, %43, %cst_41 {dimension_numbers = #tpu.dot_dimension_numbers<[1], [0], [0], [1], [0, 0, 1, 1], [], []>} : vector<32x64xbf16>, vector<64x64xbf16>, vector<32x64xf32> -> vector<32x64xf32>
    %45 = arith.addf %40, %44 : vector<32x64xf32>
    %c0_42 = arith.constant 0 : index
    %c0_43 = arith.constant 0 : index
    %46 = vector.load %arg5[%c0_42, %c0_43] : memref<1x64xf32, #tpu.memory_space<vmem>>, vector<1x64xf32>
    %47 = vector.broadcast %46 : vector<1x64xf32> to vector<32x64xf32>
    %48 = arith.addf %45, %47 : vector<32x64xf32>
    %c1_44 = arith.constant 1 : index
    %c0_45 = arith.constant 0 : index
    %49 = vector.load %arg7[%c1_44, %c0_45] : memref<34x64xf32, #tpu.memory_space<vmem>>, vector<32x64xf32>
    %50 = arith.addf %48, %49 : vector<32x64xf32>
    %cst_46 = arith.constant 0.000000e+00 : f32
    %51 = vector.broadcast %cst_46 : f32 to vector<32x64xf32>
    %52 = arith.maximumf %50, %51 : vector<32x64xf32>
    %53 = arith.truncf %52 : vector<32x64xf32> to vector<32x64xbf16>
    %c0_47 = arith.constant 0 : index
    %c0_48 = arith.constant 0 : index
    %c0_49 = arith.constant 0 : index
    %54 = vector.load %arg6[%c0_47, %c0_48, %c0_49] : memref<1x32x64xbf16, #tpu.memory_space<vmem>>, vector<1x32x64xbf16>
    %55 = vector.shape_cast %54 : vector<1x32x64xbf16> to vector<32x64xbf16>
    %56 = vector.shape_cast %53 : vector<32x64xbf16> to vector<1x32x64xbf16>
    tpu.vector_store %arg6[%c0_47, %c0_48, %c0_49], %56 {strides = array<i32>} : memref<1x32x64xbf16, #tpu.memory_space<vmem>>, vector<1x32x64xbf16>,
    return
  }
  func.func @transform_0(%arg0: i32) -> (i32, i32, i32) {
    %c0_i32 = arith.constant 0 : i32
    %c0_i32_0 = arith.constant 0 : i32
    %c0_i32_1 = arith.constant 0 : i32
    return %arg0, %c0_i32, %c0_i32_0 : i32, i32, i32
  }
  func.func @transform_1(%arg0: i32) -> (i32, i32) {
    %c0_i32 = arith.constant 0 : i32
    %c0_i32_0 = arith.constant 0 : i32
    %c0_i32_1 = arith.constant 0 : i32
    return %c0_i32, %c0_i32_0 : i32, i32
  }
  func.func @transform_2(%arg0: i32) -> (i32, i32) {
    %c0_i32 = arith.constant 0 : i32
    %c0_i32_0 = arith.constant 0 : i32
    %c0_i32_1 = arith.constant 0 : i32
    return %c0_i32, %c0_i32_0 : i32, i32
  }
  func.func @transform_3(%arg0: i32) -> (i32, i32) {
    %c0_i32 = arith.constant 0 : i32
    %c0_i32_0 = arith.constant 0 : i32
    %c0_i32_1 = arith.constant 0 : i32
    return %c0_i32, %c0_i32_0 : i32, i32
  }
  func.func @transform_4(%arg0: i32) -> (i32, i32) {
    %c0_i32 = arith.constant 0 : i32
    %c0_i32_0 = arith.constant 0 : i32
    %c0_i32_1 = arith.constant 0 : i32
    return %c0_i32, %c0_i32_0 : i32, i32
  }
  func.func @transform_5(%arg0: i32) -> (i32, i32, i32) {
    %c0_i32 = arith.constant 0 : i32
    %c0_i32_0 = arith.constant 0 : i32
    %c0_i32_1 = arith.constant 0 : i32
    return %arg0, %c0_i32, %c0_i32_0 : i32, i32, i32
  }
}

module attributes {stable_mosaic.version = 11 : i64} {
  func.func @_block_kernel(%arg0: i32, %arg1: memref<1x32x64xbf16, #tpu.memory_space<vmem>>, %arg2: memref<192x128xbf16, #tpu.memory_space<vmem>>, %arg3: memref<1x128xf32, #tpu.memory_space<vmem>>, %arg4: memref<384x128xbf16, #tpu.memory_space<vmem>>, %arg5: memref<1x128xf32, #tpu.memory_space<vmem>>, %arg6: memref<64x128xbf16, #tpu.memory_space<vmem>>, %arg7: memref<1x128xf32, #tpu.memory_space<vmem>>, %arg8: memref<1x16x128xbf16, #tpu.memory_space<vmem>>, %arg9: memref<34x64xf32, #tpu.memory_space<vmem>>, %arg10: memref<18x128xf32, #tpu.memory_space<vmem>>) attributes {dimension_semantics = [#tpu.dimension_semantics<parallel>], iteration_bounds = array<i64: 2>, scalar_prefetch = 0 : i64, scratch_operands = 2 : i64, tpu.core_type = #tpu.core_type<tc>, window_params = [{transform_indices = @transform_0, window_bounds = array<i64: 1, 32, 64>}, {pipeline_mode = #tpu.pipeline_mode<synchronous>, transform_indices = @transform_1, window_bounds = array<i64: 192, 128>}, {pipeline_mode = #tpu.pipeline_mode<synchronous>, transform_indices = @transform_2, window_bounds = array<i64: 1, 128>}, {pipeline_mode = #tpu.pipeline_mode<synchronous>, transform_indices = @transform_3, window_bounds = array<i64: 384, 128>}, {pipeline_mode = #tpu.pipeline_mode<synchronous>, transform_indices = @transform_4, window_bounds = array<i64: 1, 128>}, {pipeline_mode = #tpu.pipeline_mode<synchronous>, transform_indices = @transform_5, window_bounds = array<i64: 64, 128>}, {pipeline_mode = #tpu.pipeline_mode<synchronous>, transform_indices = @transform_6, window_bounds = array<i64: 1, 128>}, {transform_indices = @transform_7, window_bounds = array<i64: 1, 16, 128>}]} {
    %cst = arith.constant 0.000000e+00 : f32
    %0 = vector.broadcast %cst : f32 to vector<34x64xf32>
    %c0 = arith.constant 0 : index
    %c0_0 = arith.constant 0 : index
    %1 = vector.load %arg9[%c0, %c0_0] : memref<34x64xf32, #tpu.memory_space<vmem>>, vector<34x64xf32>
    tpu.vector_store %arg9[%c0, %c0_0], %0 {strides = array<i32>} : memref<34x64xf32, #tpu.memory_space<vmem>>, vector<34x64xf32>,
    %c0_1 = arith.constant 0 : index
    %c0_2 = arith.constant 0 : index
    %c0_3 = arith.constant 0 : index
    %2 = vector.load %arg1[%c0_1, %c0_2, %c0_3] : memref<1x32x64xbf16, #tpu.memory_space<vmem>>, vector<1x32x64xbf16>
    %3 = vector.shape_cast %2 : vector<1x32x64xbf16> to vector<32x64xbf16>
    %4 = arith.extf %3 : vector<32x64xbf16> to vector<32x64xf32>
    %c1 = arith.constant 1 : index
    %c0_4 = arith.constant 0 : index
    %5 = vector.load %arg9[%c1, %c0_4] : memref<34x64xf32, #tpu.memory_space<vmem>>, vector<32x64xf32>
    tpu.vector_store %arg9[%c1, %c0_4], %4 {strides = array<i32>} : memref<34x64xf32, #tpu.memory_space<vmem>>, vector<32x64xf32>,
    %cst_5 = arith.constant 0.000000e+00 : f32
    %6 = vector.broadcast %cst_5 : f32 to vector<16x128xf32>
    %c0_6 = arith.constant 0 : index
    %c0_7 = arith.constant 0 : index
    %7 = tpu.strided_load %arg9[%c0_6, %c0_7] {strides = array<i32: 2, 1>} : memref<34x64xf32, #tpu.memory_space<vmem>>, vector<16x64xf32>
    %8 = arith.truncf %7 : vector<16x64xf32> to vector<16x64xbf16>
    %c0_8 = arith.constant 0 : index
    %c0_9 = arith.constant 0 : index
    %9 = vector.load %arg2[%c0_8, %c0_9] : memref<192x128xbf16, #tpu.memory_space<vmem>>, vector<64x128xbf16>
    %cst_10 = arith.constant dense<0.000000e+00> : vector<16x128xf32>
    %10 = tpu.matmul %8, %9, %cst_10 {dimension_numbers = #tpu.dot_dimension_numbers<[1], [0], [0], [1], [0, 0, 1, 1], [], []>} : vector<16x64xbf16>, vector<64x128xbf16>, vector<16x128xf32> -> vector<16x128xf32>
    %11 = arith.addf %6, %10 : vector<16x128xf32>
    %c1_11 = arith.constant 1 : index
    %c0_12 = arith.constant 0 : index
    %12 = tpu.strided_load %arg9[%c1_11, %c0_12] {strides = array<i32: 2, 1>} : memref<34x64xf32, #tpu.memory_space<vmem>>, vector<16x64xf32>
    %13 = arith.truncf %12 : vector<16x64xf32> to vector<16x64xbf16>
    %c64 = arith.constant 64 : index
    %c0_13 = arith.constant 0 : index
    %14 = vector.load %arg2[%c64, %c0_13] : memref<192x128xbf16, #tpu.memory_space<vmem>>, vector<64x128xbf16>
    %cst_14 = arith.constant dense<0.000000e+00> : vector<16x128xf32>
    %15 = tpu.matmul %13, %14, %cst_14 {dimension_numbers = #tpu.dot_dimension_numbers<[1], [0], [0], [1], [0, 0, 1, 1], [], []>} : vector<16x64xbf16>, vector<64x128xbf16>, vector<16x128xf32> -> vector<16x128xf32>
    %16 = arith.addf %11, %15 : vector<16x128xf32>
    %c2 = arith.constant 2 : index
    %c0_15 = arith.constant 0 : index
    %17 = tpu.strided_load %arg9[%c2, %c0_15] {strides = array<i32: 2, 1>} : memref<34x64xf32, #tpu.memory_space<vmem>>, vector<16x64xf32>
    %18 = arith.truncf %17 : vector<16x64xf32> to vector<16x64xbf16>
    %c128 = arith.constant 128 : index
    %c0_16 = arith.constant 0 : index
    %19 = vector.load %arg2[%c128, %c0_16] : memref<192x128xbf16, #tpu.memory_space<vmem>>, vector<64x128xbf16>
    %cst_17 = arith.constant dense<0.000000e+00> : vector<16x128xf32>
    %20 = tpu.matmul %18, %19, %cst_17 {dimension_numbers = #tpu.dot_dimension_numbers<[1], [0], [0], [1], [0, 0, 1, 1], [], []>} : vector<16x64xbf16>, vector<64x128xbf16>, vector<16x128xf32> -> vector<16x128xf32>
    %21 = arith.addf %16, %20 : vector<16x128xf32>
    %c0_18 = arith.constant 0 : index
    %c0_19 = arith.constant 0 : index
    %22 = vector.load %arg3[%c0_18, %c0_19] : memref<1x128xf32, #tpu.memory_space<vmem>>, vector<1x128xf32>
    %23 = vector.broadcast %22 : vector<1x128xf32> to vector<16x128xf32>
    %24 = arith.addf %21, %23 : vector<16x128xf32>
    %cst_20 = arith.constant 0.000000e+00 : f32
    %25 = vector.broadcast %cst_20 : f32 to vector<16x128xf32>
    %26 = arith.maximumf %24, %25 : vector<16x128xf32>
    %cst_21 = arith.constant 0.000000e+00 : f32
    %27 = vector.broadcast %cst_21 : f32 to vector<18x128xf32>
    %c0_22 = arith.constant 0 : index
    %c0_23 = arith.constant 0 : index
    %28 = vector.load %arg10[%c0_22, %c0_23] : memref<18x128xf32, #tpu.memory_space<vmem>>, vector<18x128xf32>
    tpu.vector_store %arg10[%c0_22, %c0_23], %27 {strides = array<i32>} : memref<18x128xf32, #tpu.memory_space<vmem>>, vector<18x128xf32>,
    %c1_24 = arith.constant 1 : index
    %c0_25 = arith.constant 0 : index
    %29 = vector.load %arg10[%c1_24, %c0_25] : memref<18x128xf32, #tpu.memory_space<vmem>>, vector<16x128xf32>
    tpu.vector_store %arg10[%c1_24, %c0_25], %26 {strides = array<i32>} : memref<18x128xf32, #tpu.memory_space<vmem>>, vector<16x128xf32>,
    %cst_26 = arith.constant 0.000000e+00 : f32
    %30 = vector.broadcast %cst_26 : f32 to vector<16x128xf32>
    %c0_27 = arith.constant 0 : index
    %c0_28 = arith.constant 0 : index
    %31 = vector.load %arg10[%c0_27, %c0_28] : memref<18x128xf32, #tpu.memory_space<vmem>>, vector<16x128xf32>
    %32 = arith.truncf %31 : vector<16x128xf32> to vector<16x128xbf16>
    %c0_29 = arith.constant 0 : index
    %c0_30 = arith.constant 0 : index
    %33 = vector.load %arg4[%c0_29, %c0_30] : memref<384x128xbf16, #tpu.memory_space<vmem>>, vector<128x128xbf16>
    %cst_31 = arith.constant dense<0.000000e+00> : vector<16x128xf32>
    %34 = tpu.matmul %32, %33, %cst_31 {dimension_numbers = #tpu.dot_dimension_numbers<[1], [0], [0], [1], [0, 0, 1, 1], [], []>} : vector<16x128xbf16>, vector<128x128xbf16>, vector<16x128xf32> -> vector<16x128xf32>
    %35 = arith.addf %30, %34 : vector<16x128xf32>
    %c1_32 = arith.constant 1 : index
    %c0_33 = arith.constant 0 : index
    %36 = vector.load %arg10[%c1_32, %c0_33] : memref<18x128xf32, #tpu.memory_space<vmem>>, vector<16x128xf32>
    %37 = arith.truncf %36 : vector<16x128xf32> to vector<16x128xbf16>
    %c128_34 = arith.constant 128 : index
    %c0_35 = arith.constant 0 : index
    %38 = vector.load %arg4[%c128_34, %c0_35] : memref<384x128xbf16, #tpu.memory_space<vmem>>, vector<128x128xbf16>
    %cst_36 = arith.constant dense<0.000000e+00> : vector<16x128xf32>
    %39 = tpu.matmul %37, %38, %cst_36 {dimension_numbers = #tpu.dot_dimension_numbers<[1], [0], [0], [1], [0, 0, 1, 1], [], []>} : vector<16x128xbf16>, vector<128x128xbf16>, vector<16x128xf32> -> vector<16x128xf32>
    %40 = arith.addf %35, %39 : vector<16x128xf32>
    %c2_37 = arith.constant 2 : index
    %c0_38 = arith.constant 0 : index
    %41 = vector.load %arg10[%c2_37, %c0_38] : memref<18x128xf32, #tpu.memory_space<vmem>>, vector<16x128xf32>
    %42 = arith.truncf %41 : vector<16x128xf32> to vector<16x128xbf16>
    %c256 = arith.constant 256 : index
    %c0_39 = arith.constant 0 : index
    %43 = vector.load %arg4[%c256, %c0_39] : memref<384x128xbf16, #tpu.memory_space<vmem>>, vector<128x128xbf16>
    %cst_40 = arith.constant dense<0.000000e+00> : vector<16x128xf32>
    %44 = tpu.matmul %42, %43, %cst_40 {dimension_numbers = #tpu.dot_dimension_numbers<[1], [0], [0], [1], [0, 0, 1, 1], [], []>} : vector<16x128xbf16>, vector<128x128xbf16>, vector<16x128xf32> -> vector<16x128xf32>
    %45 = arith.addf %40, %44 : vector<16x128xf32>
    %c0_41 = arith.constant 0 : index
    %c0_42 = arith.constant 0 : index
    %46 = vector.load %arg5[%c0_41, %c0_42] : memref<1x128xf32, #tpu.memory_space<vmem>>, vector<1x128xf32>
    %47 = vector.broadcast %46 : vector<1x128xf32> to vector<16x128xf32>
    %48 = arith.addf %45, %47 : vector<16x128xf32>
    %c1_43 = arith.constant 1 : index
    %c0_44 = arith.constant 0 : index
    %49 = tpu.strided_load %arg9[%c1_43, %c0_44] {strides = array<i32: 2, 1>} : memref<34x64xf32, #tpu.memory_space<vmem>>, vector<16x64xf32>
    %50 = arith.truncf %49 : vector<16x64xf32> to vector<16x64xbf16>
    %c0_45 = arith.constant 0 : index
    %c0_46 = arith.constant 0 : index
    %51 = vector.load %arg6[%c0_45, %c0_46] : memref<64x128xbf16, #tpu.memory_space<vmem>>, vector<64x128xbf16>
    %cst_47 = arith.constant dense<0.000000e+00> : vector<16x128xf32>
    %52 = tpu.matmul %50, %51, %cst_47 {dimension_numbers = #tpu.dot_dimension_numbers<[1], [0], [0], [1], [0, 0, 1, 1], [], []>} : vector<16x64xbf16>, vector<64x128xbf16>, vector<16x128xf32> -> vector<16x128xf32>
    %c0_48 = arith.constant 0 : index
    %c0_49 = arith.constant 0 : index
    %53 = vector.load %arg7[%c0_48, %c0_49] : memref<1x128xf32, #tpu.memory_space<vmem>>, vector<1x128xf32>
    %54 = vector.broadcast %53 : vector<1x128xf32> to vector<16x128xf32>
    %55 = arith.addf %52, %54 : vector<16x128xf32>
    %56 = arith.addf %48, %55 : vector<16x128xf32>
    %cst_50 = arith.constant 0.000000e+00 : f32
    %57 = vector.broadcast %cst_50 : f32 to vector<16x128xf32>
    %58 = arith.maximumf %56, %57 : vector<16x128xf32>
    %59 = arith.truncf %58 : vector<16x128xf32> to vector<16x128xbf16>
    %c0_51 = arith.constant 0 : index
    %c0_52 = arith.constant 0 : index
    %c0_53 = arith.constant 0 : index
    %60 = vector.load %arg8[%c0_51, %c0_52, %c0_53] : memref<1x16x128xbf16, #tpu.memory_space<vmem>>, vector<1x16x128xbf16>
    %61 = vector.shape_cast %60 : vector<1x16x128xbf16> to vector<16x128xbf16>
    %62 = vector.shape_cast %59 : vector<16x128xbf16> to vector<1x16x128xbf16>
    tpu.vector_store %arg8[%c0_51, %c0_52, %c0_53], %62 {strides = array<i32>} : memref<1x16x128xbf16, #tpu.memory_space<vmem>>, vector<1x16x128xbf16>,
    return
  }
  func.func @transform_0(%arg0: i32) -> (i32, i32, i32) {
    %c0_i32 = arith.constant 0 : i32
    %c0_i32_0 = arith.constant 0 : i32
    %c0_i32_1 = arith.constant 0 : i32
    return %arg0, %c0_i32, %c0_i32_0 : i32, i32, i32
  }
  func.func @transform_1(%arg0: i32) -> (i32, i32) {
    %c0_i32 = arith.constant 0 : i32
    %c0_i32_0 = arith.constant 0 : i32
    %c0_i32_1 = arith.constant 0 : i32
    return %c0_i32, %c0_i32_0 : i32, i32
  }
  func.func @transform_2(%arg0: i32) -> (i32, i32) {
    %c0_i32 = arith.constant 0 : i32
    %c0_i32_0 = arith.constant 0 : i32
    %c0_i32_1 = arith.constant 0 : i32
    return %c0_i32, %c0_i32_0 : i32, i32
  }
  func.func @transform_3(%arg0: i32) -> (i32, i32) {
    %c0_i32 = arith.constant 0 : i32
    %c0_i32_0 = arith.constant 0 : i32
    %c0_i32_1 = arith.constant 0 : i32
    return %c0_i32, %c0_i32_0 : i32, i32
  }
  func.func @transform_4(%arg0: i32) -> (i32, i32) {
    %c0_i32 = arith.constant 0 : i32
    %c0_i32_0 = arith.constant 0 : i32
    %c0_i32_1 = arith.constant 0 : i32
    return %c0_i32, %c0_i32_0 : i32, i32
  }
  func.func @transform_5(%arg0: i32) -> (i32, i32) {
    %c0_i32 = arith.constant 0 : i32
    %c0_i32_0 = arith.constant 0 : i32
    %c0_i32_1 = arith.constant 0 : i32
    return %c0_i32, %c0_i32_0 : i32, i32
  }
  func.func @transform_6(%arg0: i32) -> (i32, i32) {
    %c0_i32 = arith.constant 0 : i32
    %c0_i32_0 = arith.constant 0 : i32
    %c0_i32_1 = arith.constant 0 : i32
    return %c0_i32, %c0_i32_0 : i32, i32
  }
  func.func @transform_7(%arg0: i32) -> (i32, i32, i32) {
    %c0_i32 = arith.constant 0 : i32
    %c0_i32_0 = arith.constant 0 : i32
    %c0_i32_1 = arith.constant 0 : i32
    return %arg0, %c0_i32, %c0_i32_0 : i32, i32, i32
  }
}

module attributes {stable_mosaic.version = 11 : i64} {
  func.func @_block_kernel(%arg0: i32, %arg1: memref<1x32x64xbf16, #tpu.memory_space<vmem>>, %arg2: memref<192x64xbf16, #tpu.memory_space<vmem>>, %arg3: memref<1x64xf32, #tpu.memory_space<vmem>>, %arg4: memref<192x64xbf16, #tpu.memory_space<vmem>>, %arg5: memref<1x64xf32, #tpu.memory_space<vmem>>, %arg6: memref<1x32x64xbf16, #tpu.memory_space<vmem>>, %arg7: memref<34x64xf32, #tpu.memory_space<vmem>>, %arg8: memref<34x64xf32, #tpu.memory_space<vmem>>) attributes {dimension_semantics = [#tpu.dimension_semantics<parallel>], iteration_bounds = array<i64: 2>, scalar_prefetch = 0 : i64, scratch_operands = 2 : i64, tpu.core_type = #tpu.core_type<tc>, window_params = [{transform_indices = @transform_0, window_bounds = array<i64: 1, 32, 64>}, {pipeline_mode = #tpu.pipeline_mode<synchronous>, transform_indices = @transform_1, window_bounds = array<i64: 192, 64>}, {pipeline_mode = #tpu.pipeline_mode<synchronous>, transform_indices = @transform_2, window_bounds = array<i64: 1, 64>}, {pipeline_mode = #tpu.pipeline_mode<synchronous>, transform_indices = @transform_3, window_bounds = array<i64: 192, 64>}, {pipeline_mode = #tpu.pipeline_mode<synchronous>, transform_indices = @transform_4, window_bounds = array<i64: 1, 64>}, {transform_indices = @transform_5, window_bounds = array<i64: 1, 32, 64>}]} {
    %cst = arith.constant 0.000000e+00 : f32
    %0 = vector.broadcast %cst : f32 to vector<34x64xf32>
    %c0 = arith.constant 0 : index
    %c0_0 = arith.constant 0 : index
    %1 = vector.load %arg7[%c0, %c0_0] : memref<34x64xf32, #tpu.memory_space<vmem>>, vector<34x64xf32>
    tpu.vector_store %arg7[%c0, %c0_0], %0 {strides = array<i32>} : memref<34x64xf32, #tpu.memory_space<vmem>>, vector<34x64xf32>,
    %c0_1 = arith.constant 0 : index
    %c0_2 = arith.constant 0 : index
    %c0_3 = arith.constant 0 : index
    %2 = vector.load %arg1[%c0_1, %c0_2, %c0_3] : memref<1x32x64xbf16, #tpu.memory_space<vmem>>, vector<1x32x64xbf16>
    %3 = vector.shape_cast %2 : vector<1x32x64xbf16> to vector<32x64xbf16>
    %4 = arith.extf %3 : vector<32x64xbf16> to vector<32x64xf32>
    %c1 = arith.constant 1 : index
    %c0_4 = arith.constant 0 : index
    %5 = vector.load %arg7[%c1, %c0_4] : memref<34x64xf32, #tpu.memory_space<vmem>>, vector<32x64xf32>
    tpu.vector_store %arg7[%c1, %c0_4], %4 {strides = array<i32>} : memref<34x64xf32, #tpu.memory_space<vmem>>, vector<32x64xf32>,
    %cst_5 = arith.constant 0.000000e+00 : f32
    %6 = vector.broadcast %cst_5 : f32 to vector<32x64xf32>
    %c0_6 = arith.constant 0 : index
    %c0_7 = arith.constant 0 : index
    %7 = vector.load %arg7[%c0_6, %c0_7] : memref<34x64xf32, #tpu.memory_space<vmem>>, vector<32x64xf32>
    %8 = arith.truncf %7 : vector<32x64xf32> to vector<32x64xbf16>
    %c0_8 = arith.constant 0 : index
    %c0_9 = arith.constant 0 : index
    %9 = vector.load %arg2[%c0_8, %c0_9] : memref<192x64xbf16, #tpu.memory_space<vmem>>, vector<64x64xbf16>
    %cst_10 = arith.constant dense<0.000000e+00> : vector<32x64xf32>
    %10 = tpu.matmul %8, %9, %cst_10 {dimension_numbers = #tpu.dot_dimension_numbers<[1], [0], [0], [1], [0, 0, 1, 1], [], []>} : vector<32x64xbf16>, vector<64x64xbf16>, vector<32x64xf32> -> vector<32x64xf32>
    %11 = arith.addf %6, %10 : vector<32x64xf32>
    %c1_11 = arith.constant 1 : index
    %c0_12 = arith.constant 0 : index
    %12 = vector.load %arg7[%c1_11, %c0_12] : memref<34x64xf32, #tpu.memory_space<vmem>>, vector<32x64xf32>
    %13 = arith.truncf %12 : vector<32x64xf32> to vector<32x64xbf16>
    %c64 = arith.constant 64 : index
    %c0_13 = arith.constant 0 : index
    %14 = vector.load %arg2[%c64, %c0_13] : memref<192x64xbf16, #tpu.memory_space<vmem>>, vector<64x64xbf16>
    %cst_14 = arith.constant dense<0.000000e+00> : vector<32x64xf32>
    %15 = tpu.matmul %13, %14, %cst_14 {dimension_numbers = #tpu.dot_dimension_numbers<[1], [0], [0], [1], [0, 0, 1, 1], [], []>} : vector<32x64xbf16>, vector<64x64xbf16>, vector<32x64xf32> -> vector<32x64xf32>
    %16 = arith.addf %11, %15 : vector<32x64xf32>
    %c2 = arith.constant 2 : index
    %c0_15 = arith.constant 0 : index
    %17 = vector.load %arg7[%c2, %c0_15] : memref<34x64xf32, #tpu.memory_space<vmem>>, vector<32x64xf32>
    %18 = arith.truncf %17 : vector<32x64xf32> to vector<32x64xbf16>
    %c128 = arith.constant 128 : index
    %c0_16 = arith.constant 0 : index
    %19 = vector.load %arg2[%c128, %c0_16] : memref<192x64xbf16, #tpu.memory_space<vmem>>, vector<64x64xbf16>
    %cst_17 = arith.constant dense<0.000000e+00> : vector<32x64xf32>
    %20 = tpu.matmul %18, %19, %cst_17 {dimension_numbers = #tpu.dot_dimension_numbers<[1], [0], [0], [1], [0, 0, 1, 1], [], []>} : vector<32x64xbf16>, vector<64x64xbf16>, vector<32x64xf32> -> vector<32x64xf32>
    %21 = arith.addf %16, %20 : vector<32x64xf32>
    %c0_18 = arith.constant 0 : index
    %c0_19 = arith.constant 0 : index
    %22 = vector.load %arg3[%c0_18, %c0_19] : memref<1x64xf32, #tpu.memory_space<vmem>>, vector<1x64xf32>
    %23 = vector.broadcast %22 : vector<1x64xf32> to vector<32x64xf32>
    %24 = arith.addf %21, %23 : vector<32x64xf32>
    %cst_20 = arith.constant 0.000000e+00 : f32
    %25 = vector.broadcast %cst_20 : f32 to vector<32x64xf32>
    %26 = arith.maximumf %24, %25 : vector<32x64xf32>
    %cst_21 = arith.constant 0.000000e+00 : f32
    %27 = vector.broadcast %cst_21 : f32 to vector<34x64xf32>
    %c0_22 = arith.constant 0 : index
    %c0_23 = arith.constant 0 : index
    %28 = vector.load %arg8[%c0_22, %c0_23] : memref<34x64xf32, #tpu.memory_space<vmem>>, vector<34x64xf32>
    tpu.vector_store %arg8[%c0_22, %c0_23], %27 {strides = array<i32>} : memref<34x64xf32, #tpu.memory_space<vmem>>, vector<34x64xf32>,
    %c1_24 = arith.constant 1 : index
    %c0_25 = arith.constant 0 : index
    %29 = vector.load %arg8[%c1_24, %c0_25] : memref<34x64xf32, #tpu.memory_space<vmem>>, vector<32x64xf32>
    tpu.vector_store %arg8[%c1_24, %c0_25], %26 {strides = array<i32>} : memref<34x64xf32, #tpu.memory_space<vmem>>, vector<32x64xf32>,
    %cst_26 = arith.constant 0.000000e+00 : f32
    %30 = vector.broadcast %cst_26 : f32 to vector<32x64xf32>
    %c0_27 = arith.constant 0 : index
    %c0_28 = arith.constant 0 : index
    %31 = vector.load %arg8[%c0_27, %c0_28] : memref<34x64xf32, #tpu.memory_space<vmem>>, vector<32x64xf32>
    %32 = arith.truncf %31 : vector<32x64xf32> to vector<32x64xbf16>
    %c0_29 = arith.constant 0 : index
    %c0_30 = arith.constant 0 : index
    %33 = vector.load %arg4[%c0_29, %c0_30] : memref<192x64xbf16, #tpu.memory_space<vmem>>, vector<64x64xbf16>
    %cst_31 = arith.constant dense<0.000000e+00> : vector<32x64xf32>
    %34 = tpu.matmul %32, %33, %cst_31 {dimension_numbers = #tpu.dot_dimension_numbers<[1], [0], [0], [1], [0, 0, 1, 1], [], []>} : vector<32x64xbf16>, vector<64x64xbf16>, vector<32x64xf32> -> vector<32x64xf32>
    %35 = arith.addf %30, %34 : vector<32x64xf32>
    %c1_32 = arith.constant 1 : index
    %c0_33 = arith.constant 0 : index
    %36 = vector.load %arg8[%c1_32, %c0_33] : memref<34x64xf32, #tpu.memory_space<vmem>>, vector<32x64xf32>
    %37 = arith.truncf %36 : vector<32x64xf32> to vector<32x64xbf16>
    %c64_34 = arith.constant 64 : index
    %c0_35 = arith.constant 0 : index
    %38 = vector.load %arg4[%c64_34, %c0_35] : memref<192x64xbf16, #tpu.memory_space<vmem>>, vector<64x64xbf16>
    %cst_36 = arith.constant dense<0.000000e+00> : vector<32x64xf32>
    %39 = tpu.matmul %37, %38, %cst_36 {dimension_numbers = #tpu.dot_dimension_numbers<[1], [0], [0], [1], [0, 0, 1, 1], [], []>} : vector<32x64xbf16>, vector<64x64xbf16>, vector<32x64xf32> -> vector<32x64xf32>
    %40 = arith.addf %35, %39 : vector<32x64xf32>
    %c2_37 = arith.constant 2 : index
    %c0_38 = arith.constant 0 : index
    %41 = vector.load %arg8[%c2_37, %c0_38] : memref<34x64xf32, #tpu.memory_space<vmem>>, vector<32x64xf32>
    %42 = arith.truncf %41 : vector<32x64xf32> to vector<32x64xbf16>
    %c128_39 = arith.constant 128 : index
    %c0_40 = arith.constant 0 : index
    %43 = vector.load %arg4[%c128_39, %c0_40] : memref<192x64xbf16, #tpu.memory_space<vmem>>, vector<64x64xbf16>
    %cst_41 = arith.constant dense<0.000000e+00> : vector<32x64xf32>
    %44 = tpu.matmul %42, %43, %cst_41 {dimension_numbers = #tpu.dot_dimension_numbers<[1], [0], [0], [1], [0, 0, 1, 1], [], []>} : vector<32x64xbf16>, vector<64x64xbf16>, vector<32x64xf32> -> vector<32x64xf32>
    %45 = arith.addf %40, %44 : vector<32x64xf32>
    %c0_42 = arith.constant 0 : index
    %c0_43 = arith.constant 0 : index
    %46 = vector.load %arg5[%c0_42, %c0_43] : memref<1x64xf32, #tpu.memory_space<vmem>>, vector<1x64xf32>
    %47 = vector.broadcast %46 : vector<1x64xf32> to vector<32x64xf32>
    %48 = arith.addf %45, %47 : vector<32x64xf32>
    %c1_44 = arith.constant 1 : index
    %c0_45 = arith.constant 0 : index
    %49 = vector.load %arg7[%c1_44, %c0_45] : memref<34x64xf32, #tpu.memory_space<vmem>>, vector<32x64xf32>
    %50 = arith.addf %48, %49 : vector<32x64xf32>
    %cst_46 = arith.constant 0.000000e+00 : f32
    %51 = vector.broadcast %cst_46 : f32 to vector<32x64xf32>
    %52 = arith.maximumf %50, %51 : vector<32x64xf32>
    %53 = arith.truncf %52 : vector<32x64xf32> to vector<32x64xbf16>
    %c0_47 = arith.constant 0 : index
    %c0_48 = arith.constant 0 : index
    %c0_49 = arith.constant 0 : index
    %54 = vector.load %arg6[%c0_47, %c0_48, %c0_49] : memref<1x32x64xbf16, #tpu.memory_space<vmem>>, vector<1x32x64xbf16>
    %55 = vector.shape_cast %54 : vector<1x32x64xbf16> to vector<32x64xbf16>
    %56 = vector.shape_cast %53 : vector<32x64xbf16> to vector<1x32x64xbf16>
    tpu.vector_store %arg6[%c0_47, %c0_48, %c0_49], %56 {strides = array<i32>} : memref<1x32x64xbf16, #tpu.memory_space<vmem>>, vector<1x32x64xbf16>,
    return
  }
  func.func @transform_0(%arg0: i32) -> (i32, i32, i32) {
    %c0_i32 = arith.constant 0 : i32
    %c0_i32_0 = arith.constant 0 : i32
    %c0_i32_1 = arith.constant 0 : i32
    return %arg0, %c0_i32, %c0_i32_0 : i32, i32, i32
  }
  func.func @transform_1(%arg0: i32) -> (i32, i32) {
    %c0_i32 = arith.constant 0 : i32
    %c0_i32_0 = arith.constant 0 : i32
    %c0_i32_1 = arith.constant 0 : i32
    return %c0_i32, %c0_i32_0 : i32, i32
  }
  func.func @transform_2(%arg0: i32) -> (i32, i32) {
    %c0_i32 = arith.constant 0 : i32
    %c0_i32_0 = arith.constant 0 : i32
    %c0_i32_1 = arith.constant 0 : i32
    return %c0_i32, %c0_i32_0 : i32, i32
  }
  func.func @transform_3(%arg0: i32) -> (i32, i32) {
    %c0_i32 = arith.constant 0 : i32
    %c0_i32_0 = arith.constant 0 : i32
    %c0_i32_1 = arith.constant 0 : i32
    return %c0_i32, %c0_i32_0 : i32, i32
  }
  func.func @transform_4(%arg0: i32) -> (i32, i32) {
    %c0_i32 = arith.constant 0 : i32
    %c0_i32_0 = arith.constant 0 : i32
    %c0_i32_1 = arith.constant 0 : i32
    return %c0_i32, %c0_i32_0 : i32, i32
  }
  func.func @transform_5(%arg0: i32) -> (i32, i32, i32) {
    %c0_i32 = arith.constant 0 : i32
    %c0_i32_0 = arith.constant 0 : i32
    %c0_i32_1 = arith.constant 0 : i32
    return %arg0, %c0_i32, %c0_i32_0 : i32, i32, i32
  }
}

module attributes {stable_mosaic.version = 11 : i64} {
  func.func @_block_kernel(%arg0: i32, %arg1: memref<1x16x128xbf16, #tpu.memory_space<vmem>>, %arg2: memref<384x128xbf16, #tpu.memory_space<vmem>>, %arg3: memref<1x128xf32, #tpu.memory_space<vmem>>, %arg4: memref<384x128xbf16, #tpu.memory_space<vmem>>, %arg5: memref<1x128xf32, #tpu.memory_space<vmem>>, %arg6: memref<1x16x128xbf16, #tpu.memory_space<vmem>>, %arg7: memref<18x128xf32, #tpu.memory_space<vmem>>, %arg8: memref<18x128xf32, #tpu.memory_space<vmem>>) attributes {dimension_semantics = [#tpu.dimension_semantics<parallel>], iteration_bounds = array<i64: 2>, scalar_prefetch = 0 : i64, scratch_operands = 2 : i64, tpu.core_type = #tpu.core_type<tc>, window_params = [{transform_indices = @transform_0, window_bounds = array<i64: 1, 16, 128>}, {pipeline_mode = #tpu.pipeline_mode<synchronous>, transform_indices = @transform_1, window_bounds = array<i64: 384, 128>}, {pipeline_mode = #tpu.pipeline_mode<synchronous>, transform_indices = @transform_2, window_bounds = array<i64: 1, 128>}, {pipeline_mode = #tpu.pipeline_mode<synchronous>, transform_indices = @transform_3, window_bounds = array<i64: 384, 128>}, {pipeline_mode = #tpu.pipeline_mode<synchronous>, transform_indices = @transform_4, window_bounds = array<i64: 1, 128>}, {transform_indices = @transform_5, window_bounds = array<i64: 1, 16, 128>}]} {
    %cst = arith.constant 0.000000e+00 : f32
    %0 = vector.broadcast %cst : f32 to vector<18x128xf32>
    %c0 = arith.constant 0 : index
    %c0_0 = arith.constant 0 : index
    %1 = vector.load %arg7[%c0, %c0_0] : memref<18x128xf32, #tpu.memory_space<vmem>>, vector<18x128xf32>
    tpu.vector_store %arg7[%c0, %c0_0], %0 {strides = array<i32>} : memref<18x128xf32, #tpu.memory_space<vmem>>, vector<18x128xf32>,
    %c0_1 = arith.constant 0 : index
    %c0_2 = arith.constant 0 : index
    %c0_3 = arith.constant 0 : index
    %2 = vector.load %arg1[%c0_1, %c0_2, %c0_3] : memref<1x16x128xbf16, #tpu.memory_space<vmem>>, vector<1x16x128xbf16>
    %3 = vector.shape_cast %2 : vector<1x16x128xbf16> to vector<16x128xbf16>
    %4 = arith.extf %3 : vector<16x128xbf16> to vector<16x128xf32>
    %c1 = arith.constant 1 : index
    %c0_4 = arith.constant 0 : index
    %5 = vector.load %arg7[%c1, %c0_4] : memref<18x128xf32, #tpu.memory_space<vmem>>, vector<16x128xf32>
    tpu.vector_store %arg7[%c1, %c0_4], %4 {strides = array<i32>} : memref<18x128xf32, #tpu.memory_space<vmem>>, vector<16x128xf32>,
    %cst_5 = arith.constant 0.000000e+00 : f32
    %6 = vector.broadcast %cst_5 : f32 to vector<16x128xf32>
    %c0_6 = arith.constant 0 : index
    %c0_7 = arith.constant 0 : index
    %7 = vector.load %arg7[%c0_6, %c0_7] : memref<18x128xf32, #tpu.memory_space<vmem>>, vector<16x128xf32>
    %8 = arith.truncf %7 : vector<16x128xf32> to vector<16x128xbf16>
    %c0_8 = arith.constant 0 : index
    %c0_9 = arith.constant 0 : index
    %9 = vector.load %arg2[%c0_8, %c0_9] : memref<384x128xbf16, #tpu.memory_space<vmem>>, vector<128x128xbf16>
    %cst_10 = arith.constant dense<0.000000e+00> : vector<16x128xf32>
    %10 = tpu.matmul %8, %9, %cst_10 {dimension_numbers = #tpu.dot_dimension_numbers<[1], [0], [0], [1], [0, 0, 1, 1], [], []>} : vector<16x128xbf16>, vector<128x128xbf16>, vector<16x128xf32> -> vector<16x128xf32>
    %11 = arith.addf %6, %10 : vector<16x128xf32>
    %c1_11 = arith.constant 1 : index
    %c0_12 = arith.constant 0 : index
    %12 = vector.load %arg7[%c1_11, %c0_12] : memref<18x128xf32, #tpu.memory_space<vmem>>, vector<16x128xf32>
    %13 = arith.truncf %12 : vector<16x128xf32> to vector<16x128xbf16>
    %c128 = arith.constant 128 : index
    %c0_13 = arith.constant 0 : index
    %14 = vector.load %arg2[%c128, %c0_13] : memref<384x128xbf16, #tpu.memory_space<vmem>>, vector<128x128xbf16>
    %cst_14 = arith.constant dense<0.000000e+00> : vector<16x128xf32>
    %15 = tpu.matmul %13, %14, %cst_14 {dimension_numbers = #tpu.dot_dimension_numbers<[1], [0], [0], [1], [0, 0, 1, 1], [], []>} : vector<16x128xbf16>, vector<128x128xbf16>, vector<16x128xf32> -> vector<16x128xf32>
    %16 = arith.addf %11, %15 : vector<16x128xf32>
    %c2 = arith.constant 2 : index
    %c0_15 = arith.constant 0 : index
    %17 = vector.load %arg7[%c2, %c0_15] : memref<18x128xf32, #tpu.memory_space<vmem>>, vector<16x128xf32>
    %18 = arith.truncf %17 : vector<16x128xf32> to vector<16x128xbf16>
    %c256 = arith.constant 256 : index
    %c0_16 = arith.constant 0 : index
    %19 = vector.load %arg2[%c256, %c0_16] : memref<384x128xbf16, #tpu.memory_space<vmem>>, vector<128x128xbf16>
    %cst_17 = arith.constant dense<0.000000e+00> : vector<16x128xf32>
    %20 = tpu.matmul %18, %19, %cst_17 {dimension_numbers = #tpu.dot_dimension_numbers<[1], [0], [0], [1], [0, 0, 1, 1], [], []>} : vector<16x128xbf16>, vector<128x128xbf16>, vector<16x128xf32> -> vector<16x128xf32>
    %21 = arith.addf %16, %20 : vector<16x128xf32>
    %c0_18 = arith.constant 0 : index
    %c0_19 = arith.constant 0 : index
    %22 = vector.load %arg3[%c0_18, %c0_19] : memref<1x128xf32, #tpu.memory_space<vmem>>, vector<1x128xf32>
    %23 = vector.broadcast %22 : vector<1x128xf32> to vector<16x128xf32>
    %24 = arith.addf %21, %23 : vector<16x128xf32>
    %cst_20 = arith.constant 0.000000e+00 : f32
    %25 = vector.broadcast %cst_20 : f32 to vector<16x128xf32>
    %26 = arith.maximumf %24, %25 : vector<16x128xf32>
    %cst_21 = arith.constant 0.000000e+00 : f32
    %27 = vector.broadcast %cst_21 : f32 to vector<18x128xf32>
    %c0_22 = arith.constant 0 : index
    %c0_23 = arith.constant 0 : index
    %28 = vector.load %arg8[%c0_22, %c0_23] : memref<18x128xf32, #tpu.memory_space<vmem>>, vector<18x128xf32>
    tpu.vector_store %arg8[%c0_22, %c0_23], %27 {strides = array<i32>} : memref<18x128xf32, #tpu.memory_space<vmem>>, vector<18x128xf32>,
    %c1_24 = arith.constant 1 : index
    %c0_25 = arith.constant 0 : index
    %29 = vector.load %arg8[%c1_24, %c0_25] : memref<18x128xf32, #tpu.memory_space<vmem>>, vector<16x128xf32>
    tpu.vector_store %arg8[%c1_24, %c0_25], %26 {strides = array<i32>} : memref<18x128xf32, #tpu.memory_space<vmem>>, vector<16x128xf32>,
    %cst_26 = arith.constant 0.000000e+00 : f32
    %30 = vector.broadcast %cst_26 : f32 to vector<16x128xf32>
    %c0_27 = arith.constant 0 : index
    %c0_28 = arith.constant 0 : index
    %31 = vector.load %arg8[%c0_27, %c0_28] : memref<18x128xf32, #tpu.memory_space<vmem>>, vector<16x128xf32>
    %32 = arith.truncf %31 : vector<16x128xf32> to vector<16x128xbf16>
    %c0_29 = arith.constant 0 : index
    %c0_30 = arith.constant 0 : index
    %33 = vector.load %arg4[%c0_29, %c0_30] : memref<384x128xbf16, #tpu.memory_space<vmem>>, vector<128x128xbf16>
    %cst_31 = arith.constant dense<0.000000e+00> : vector<16x128xf32>
    %34 = tpu.matmul %32, %33, %cst_31 {dimension_numbers = #tpu.dot_dimension_numbers<[1], [0], [0], [1], [0, 0, 1, 1], [], []>} : vector<16x128xbf16>, vector<128x128xbf16>, vector<16x128xf32> -> vector<16x128xf32>
    %35 = arith.addf %30, %34 : vector<16x128xf32>
    %c1_32 = arith.constant 1 : index
    %c0_33 = arith.constant 0 : index
    %36 = vector.load %arg8[%c1_32, %c0_33] : memref<18x128xf32, #tpu.memory_space<vmem>>, vector<16x128xf32>
    %37 = arith.truncf %36 : vector<16x128xf32> to vector<16x128xbf16>
    %c128_34 = arith.constant 128 : index
    %c0_35 = arith.constant 0 : index
    %38 = vector.load %arg4[%c128_34, %c0_35] : memref<384x128xbf16, #tpu.memory_space<vmem>>, vector<128x128xbf16>
    %cst_36 = arith.constant dense<0.000000e+00> : vector<16x128xf32>
    %39 = tpu.matmul %37, %38, %cst_36 {dimension_numbers = #tpu.dot_dimension_numbers<[1], [0], [0], [1], [0, 0, 1, 1], [], []>} : vector<16x128xbf16>, vector<128x128xbf16>, vector<16x128xf32> -> vector<16x128xf32>
    %40 = arith.addf %35, %39 : vector<16x128xf32>
    %c2_37 = arith.constant 2 : index
    %c0_38 = arith.constant 0 : index
    %41 = vector.load %arg8[%c2_37, %c0_38] : memref<18x128xf32, #tpu.memory_space<vmem>>, vector<16x128xf32>
    %42 = arith.truncf %41 : vector<16x128xf32> to vector<16x128xbf16>
    %c256_39 = arith.constant 256 : index
    %c0_40 = arith.constant 0 : index
    %43 = vector.load %arg4[%c256_39, %c0_40] : memref<384x128xbf16, #tpu.memory_space<vmem>>, vector<128x128xbf16>
    %cst_41 = arith.constant dense<0.000000e+00> : vector<16x128xf32>
    %44 = tpu.matmul %42, %43, %cst_41 {dimension_numbers = #tpu.dot_dimension_numbers<[1], [0], [0], [1], [0, 0, 1, 1], [], []>} : vector<16x128xbf16>, vector<128x128xbf16>, vector<16x128xf32> -> vector<16x128xf32>
    %45 = arith.addf %40, %44 : vector<16x128xf32>
    %c0_42 = arith.constant 0 : index
    %c0_43 = arith.constant 0 : index
    %46 = vector.load %arg5[%c0_42, %c0_43] : memref<1x128xf32, #tpu.memory_space<vmem>>, vector<1x128xf32>
    %47 = vector.broadcast %46 : vector<1x128xf32> to vector<16x128xf32>
    %48 = arith.addf %45, %47 : vector<16x128xf32>
    %c1_44 = arith.constant 1 : index
    %c0_45 = arith.constant 0 : index
    %49 = vector.load %arg7[%c1_44, %c0_45] : memref<18x128xf32, #tpu.memory_space<vmem>>, vector<16x128xf32>
    %50 = arith.addf %48, %49 : vector<16x128xf32>
    %cst_46 = arith.constant 0.000000e+00 : f32
    %51 = vector.broadcast %cst_46 : f32 to vector<16x128xf32>
    %52 = arith.maximumf %50, %51 : vector<16x128xf32>
    %53 = arith.truncf %52 : vector<16x128xf32> to vector<16x128xbf16>
    %c0_47 = arith.constant 0 : index
    %c0_48 = arith.constant 0 : index
    %c0_49 = arith.constant 0 : index
    %54 = vector.load %arg6[%c0_47, %c0_48, %c0_49] : memref<1x16x128xbf16, #tpu.memory_space<vmem>>, vector<1x16x128xbf16>
    %55 = vector.shape_cast %54 : vector<1x16x128xbf16> to vector<16x128xbf16>
    %56 = vector.shape_cast %53 : vector<16x128xbf16> to vector<1x16x128xbf16>
    tpu.vector_store %arg6[%c0_47, %c0_48, %c0_49], %56 {strides = array<i32>} : memref<1x16x128xbf16, #tpu.memory_space<vmem>>, vector<1x16x128xbf16>,
    return
  }
  func.func @transform_0(%arg0: i32) -> (i32, i32, i32) {
    %c0_i32 = arith.constant 0 : i32
    %c0_i32_0 = arith.constant 0 : i32
    %c0_i32_1 = arith.constant 0 : i32
    return %arg0, %c0_i32, %c0_i32_0 : i32, i32, i32
  }
  func.func @transform_1(%arg0: i32) -> (i32, i32) {
    %c0_i32 = arith.constant 0 : i32
    %c0_i32_0 = arith.constant 0 : i32
    %c0_i32_1 = arith.constant 0 : i32
    return %c0_i32, %c0_i32_0 : i32, i32
  }
  func.func @transform_2(%arg0: i32) -> (i32, i32) {
    %c0_i32 = arith.constant 0 : i32
    %c0_i32_0 = arith.constant 0 : i32
    %c0_i32_1 = arith.constant 0 : i32
    return %c0_i32, %c0_i32_0 : i32, i32
  }
  func.func @transform_3(%arg0: i32) -> (i32, i32) {
    %c0_i32 = arith.constant 0 : i32
    %c0_i32_0 = arith.constant 0 : i32
    %c0_i32_1 = arith.constant 0 : i32
    return %c0_i32, %c0_i32_0 : i32, i32
  }
  func.func @transform_4(%arg0: i32) -> (i32, i32) {
    %c0_i32 = arith.constant 0 : i32
    %c0_i32_0 = arith.constant 0 : i32
    %c0_i32_1 = arith.constant 0 : i32
    return %c0_i32, %c0_i32_0 : i32, i32
  }
  func.func @transform_5(%arg0: i32) -> (i32, i32, i32) {
    %c0_i32 = arith.constant 0 : i32
    %c0_i32_0 = arith.constant 0 : i32
    %c0_i32_1 = arith.constant 0 : i32
    return %arg0, %c0_i32, %c0_i32_0 : i32, i32, i32
  }
}

module attributes {stable_mosaic.version = 11 : i64} {
  func.func @_block_kernel(%arg0: i32, %arg1: memref<1x16x128xbf16, #tpu.memory_space<vmem>>, %arg2: memref<384x256xbf16, #tpu.memory_space<vmem>>, %arg3: memref<1x256xf32, #tpu.memory_space<vmem>>, %arg4: memref<768x256xbf16, #tpu.memory_space<vmem>>, %arg5: memref<1x256xf32, #tpu.memory_space<vmem>>, %arg6: memref<128x256xbf16, #tpu.memory_space<vmem>>, %arg7: memref<1x256xf32, #tpu.memory_space<vmem>>, %arg8: memref<1x8x256xbf16, #tpu.memory_space<vmem>>, %arg9: memref<18x128xf32, #tpu.memory_space<vmem>>, %arg10: memref<10x256xf32, #tpu.memory_space<vmem>>) attributes {dimension_semantics = [#tpu.dimension_semantics<parallel>], iteration_bounds = array<i64: 2>, scalar_prefetch = 0 : i64, scratch_operands = 2 : i64, tpu.core_type = #tpu.core_type<tc>, window_params = [{transform_indices = @transform_0, window_bounds = array<i64: 1, 16, 128>}, {pipeline_mode = #tpu.pipeline_mode<synchronous>, transform_indices = @transform_1, window_bounds = array<i64: 384, 256>}, {pipeline_mode = #tpu.pipeline_mode<synchronous>, transform_indices = @transform_2, window_bounds = array<i64: 1, 256>}, {pipeline_mode = #tpu.pipeline_mode<synchronous>, transform_indices = @transform_3, window_bounds = array<i64: 768, 256>}, {pipeline_mode = #tpu.pipeline_mode<synchronous>, transform_indices = @transform_4, window_bounds = array<i64: 1, 256>}, {pipeline_mode = #tpu.pipeline_mode<synchronous>, transform_indices = @transform_5, window_bounds = array<i64: 128, 256>}, {pipeline_mode = #tpu.pipeline_mode<synchronous>, transform_indices = @transform_6, window_bounds = array<i64: 1, 256>}, {transform_indices = @transform_7, window_bounds = array<i64: 1, 8, 256>}]} {
    %cst = arith.constant 0.000000e+00 : f32
    %0 = vector.broadcast %cst : f32 to vector<18x128xf32>
    %c0 = arith.constant 0 : index
    %c0_0 = arith.constant 0 : index
    %1 = vector.load %arg9[%c0, %c0_0] : memref<18x128xf32, #tpu.memory_space<vmem>>, vector<18x128xf32>
    tpu.vector_store %arg9[%c0, %c0_0], %0 {strides = array<i32>} : memref<18x128xf32, #tpu.memory_space<vmem>>, vector<18x128xf32>,
    %c0_1 = arith.constant 0 : index
    %c0_2 = arith.constant 0 : index
    %c0_3 = arith.constant 0 : index
    %2 = vector.load %arg1[%c0_1, %c0_2, %c0_3] : memref<1x16x128xbf16, #tpu.memory_space<vmem>>, vector<1x16x128xbf16>
    %3 = vector.shape_cast %2 : vector<1x16x128xbf16> to vector<16x128xbf16>
    %4 = arith.extf %3 : vector<16x128xbf16> to vector<16x128xf32>
    %c1 = arith.constant 1 : index
    %c0_4 = arith.constant 0 : index
    %5 = vector.load %arg9[%c1, %c0_4] : memref<18x128xf32, #tpu.memory_space<vmem>>, vector<16x128xf32>
    tpu.vector_store %arg9[%c1, %c0_4], %4 {strides = array<i32>} : memref<18x128xf32, #tpu.memory_space<vmem>>, vector<16x128xf32>,
    %cst_5 = arith.constant 0.000000e+00 : f32
    %6 = vector.broadcast %cst_5 : f32 to vector<8x256xf32>
    %c0_6 = arith.constant 0 : index
    %c0_7 = arith.constant 0 : index
    %7 = tpu.strided_load %arg9[%c0_6, %c0_7] {strides = array<i32: 2, 1>} : memref<18x128xf32, #tpu.memory_space<vmem>>, vector<8x128xf32>
    %8 = arith.truncf %7 : vector<8x128xf32> to vector<8x128xbf16>
    %c0_8 = arith.constant 0 : index
    %c0_9 = arith.constant 0 : index
    %9 = vector.load %arg2[%c0_8, %c0_9] : memref<384x256xbf16, #tpu.memory_space<vmem>>, vector<128x256xbf16>
    %cst_10 = arith.constant dense<0.000000e+00> : vector<8x256xf32>
    %10 = tpu.matmul %8, %9, %cst_10 {dimension_numbers = #tpu.dot_dimension_numbers<[1], [0], [0], [1], [0, 0, 1, 1], [], []>} : vector<8x128xbf16>, vector<128x256xbf16>, vector<8x256xf32> -> vector<8x256xf32>
    %11 = arith.addf %6, %10 : vector<8x256xf32>
    %c1_11 = arith.constant 1 : index
    %c0_12 = arith.constant 0 : index
    %12 = tpu.strided_load %arg9[%c1_11, %c0_12] {strides = array<i32: 2, 1>} : memref<18x128xf32, #tpu.memory_space<vmem>>, vector<8x128xf32>
    %13 = arith.truncf %12 : vector<8x128xf32> to vector<8x128xbf16>
    %c128 = arith.constant 128 : index
    %c0_13 = arith.constant 0 : index
    %14 = vector.load %arg2[%c128, %c0_13] : memref<384x256xbf16, #tpu.memory_space<vmem>>, vector<128x256xbf16>
    %cst_14 = arith.constant dense<0.000000e+00> : vector<8x256xf32>
    %15 = tpu.matmul %13, %14, %cst_14 {dimension_numbers = #tpu.dot_dimension_numbers<[1], [0], [0], [1], [0, 0, 1, 1], [], []>} : vector<8x128xbf16>, vector<128x256xbf16>, vector<8x256xf32> -> vector<8x256xf32>
    %16 = arith.addf %11, %15 : vector<8x256xf32>
    %c2 = arith.constant 2 : index
    %c0_15 = arith.constant 0 : index
    %17 = tpu.strided_load %arg9[%c2, %c0_15] {strides = array<i32: 2, 1>} : memref<18x128xf32, #tpu.memory_space<vmem>>, vector<8x128xf32>
    %18 = arith.truncf %17 : vector<8x128xf32> to vector<8x128xbf16>
    %c256 = arith.constant 256 : index
    %c0_16 = arith.constant 0 : index
    %19 = vector.load %arg2[%c256, %c0_16] : memref<384x256xbf16, #tpu.memory_space<vmem>>, vector<128x256xbf16>
    %cst_17 = arith.constant dense<0.000000e+00> : vector<8x256xf32>
    %20 = tpu.matmul %18, %19, %cst_17 {dimension_numbers = #tpu.dot_dimension_numbers<[1], [0], [0], [1], [0, 0, 1, 1], [], []>} : vector<8x128xbf16>, vector<128x256xbf16>, vector<8x256xf32> -> vector<8x256xf32>
    %21 = arith.addf %16, %20 : vector<8x256xf32>
    %c0_18 = arith.constant 0 : index
    %c0_19 = arith.constant 0 : index
    %22 = vector.load %arg3[%c0_18, %c0_19] : memref<1x256xf32, #tpu.memory_space<vmem>>, vector<1x256xf32>
    %23 = vector.broadcast %22 : vector<1x256xf32> to vector<8x256xf32>
    %24 = arith.addf %21, %23 : vector<8x256xf32>
    %cst_20 = arith.constant 0.000000e+00 : f32
    %25 = vector.broadcast %cst_20 : f32 to vector<8x256xf32>
    %26 = arith.maximumf %24, %25 : vector<8x256xf32>
    %cst_21 = arith.constant 0.000000e+00 : f32
    %27 = vector.broadcast %cst_21 : f32 to vector<10x256xf32>
    %c0_22 = arith.constant 0 : index
    %c0_23 = arith.constant 0 : index
    %28 = vector.load %arg10[%c0_22, %c0_23] : memref<10x256xf32, #tpu.memory_space<vmem>>, vector<10x256xf32>
    tpu.vector_store %arg10[%c0_22, %c0_23], %27 {strides = array<i32>} : memref<10x256xf32, #tpu.memory_space<vmem>>, vector<10x256xf32>,
    %c1_24 = arith.constant 1 : index
    %c0_25 = arith.constant 0 : index
    %29 = vector.load %arg10[%c1_24, %c0_25] : memref<10x256xf32, #tpu.memory_space<vmem>>, vector<8x256xf32>
    tpu.vector_store %arg10[%c1_24, %c0_25], %26 {strides = array<i32>} : memref<10x256xf32, #tpu.memory_space<vmem>>, vector<8x256xf32>,
    %cst_26 = arith.constant 0.000000e+00 : f32
    %30 = vector.broadcast %cst_26 : f32 to vector<8x256xf32>
    %c0_27 = arith.constant 0 : index
    %c0_28 = arith.constant 0 : index
    %31 = vector.load %arg10[%c0_27, %c0_28] : memref<10x256xf32, #tpu.memory_space<vmem>>, vector<8x256xf32>
    %32 = arith.truncf %31 : vector<8x256xf32> to vector<8x256xbf16>
    %c0_29 = arith.constant 0 : index
    %c0_30 = arith.constant 0 : index
    %33 = vector.load %arg4[%c0_29, %c0_30] : memref<768x256xbf16, #tpu.memory_space<vmem>>, vector<256x256xbf16>
    %cst_31 = arith.constant dense<0.000000e+00> : vector<8x256xf32>
    %34 = tpu.matmul %32, %33, %cst_31 {dimension_numbers = #tpu.dot_dimension_numbers<[1], [0], [0], [1], [0, 0, 1, 1], [], []>} : vector<8x256xbf16>, vector<256x256xbf16>, vector<8x256xf32> -> vector<8x256xf32>
    %35 = arith.addf %30, %34 : vector<8x256xf32>
    %c1_32 = arith.constant 1 : index
    %c0_33 = arith.constant 0 : index
    %36 = vector.load %arg10[%c1_32, %c0_33] : memref<10x256xf32, #tpu.memory_space<vmem>>, vector<8x256xf32>
    %37 = arith.truncf %36 : vector<8x256xf32> to vector<8x256xbf16>
    %c256_34 = arith.constant 256 : index
    %c0_35 = arith.constant 0 : index
    %38 = vector.load %arg4[%c256_34, %c0_35] : memref<768x256xbf16, #tpu.memory_space<vmem>>, vector<256x256xbf16>
    %cst_36 = arith.constant dense<0.000000e+00> : vector<8x256xf32>
    %39 = tpu.matmul %37, %38, %cst_36 {dimension_numbers = #tpu.dot_dimension_numbers<[1], [0], [0], [1], [0, 0, 1, 1], [], []>} : vector<8x256xbf16>, vector<256x256xbf16>, vector<8x256xf32> -> vector<8x256xf32>
    %40 = arith.addf %35, %39 : vector<8x256xf32>
    %c2_37 = arith.constant 2 : index
    %c0_38 = arith.constant 0 : index
    %41 = vector.load %arg10[%c2_37, %c0_38] : memref<10x256xf32, #tpu.memory_space<vmem>>, vector<8x256xf32>
    %42 = arith.truncf %41 : vector<8x256xf32> to vector<8x256xbf16>
    %c512 = arith.constant 512 : index
    %c0_39 = arith.constant 0 : index
    %43 = vector.load %arg4[%c512, %c0_39] : memref<768x256xbf16, #tpu.memory_space<vmem>>, vector<256x256xbf16>
    %cst_40 = arith.constant dense<0.000000e+00> : vector<8x256xf32>
    %44 = tpu.matmul %42, %43, %cst_40 {dimension_numbers = #tpu.dot_dimension_numbers<[1], [0], [0], [1], [0, 0, 1, 1], [], []>} : vector<8x256xbf16>, vector<256x256xbf16>, vector<8x256xf32> -> vector<8x256xf32>
    %45 = arith.addf %40, %44 : vector<8x256xf32>
    %c0_41 = arith.constant 0 : index
    %c0_42 = arith.constant 0 : index
    %46 = vector.load %arg5[%c0_41, %c0_42] : memref<1x256xf32, #tpu.memory_space<vmem>>, vector<1x256xf32>
    %47 = vector.broadcast %46 : vector<1x256xf32> to vector<8x256xf32>
    %48 = arith.addf %45, %47 : vector<8x256xf32>
    %c1_43 = arith.constant 1 : index
    %c0_44 = arith.constant 0 : index
    %49 = tpu.strided_load %arg9[%c1_43, %c0_44] {strides = array<i32: 2, 1>} : memref<18x128xf32, #tpu.memory_space<vmem>>, vector<8x128xf32>
    %50 = arith.truncf %49 : vector<8x128xf32> to vector<8x128xbf16>
    %c0_45 = arith.constant 0 : index
    %c0_46 = arith.constant 0 : index
    %51 = vector.load %arg6[%c0_45, %c0_46] : memref<128x256xbf16, #tpu.memory_space<vmem>>, vector<128x256xbf16>
    %cst_47 = arith.constant dense<0.000000e+00> : vector<8x256xf32>
    %52 = tpu.matmul %50, %51, %cst_47 {dimension_numbers = #tpu.dot_dimension_numbers<[1], [0], [0], [1], [0, 0, 1, 1], [], []>} : vector<8x128xbf16>, vector<128x256xbf16>, vector<8x256xf32> -> vector<8x256xf32>
    %c0_48 = arith.constant 0 : index
    %c0_49 = arith.constant 0 : index
    %53 = vector.load %arg7[%c0_48, %c0_49] : memref<1x256xf32, #tpu.memory_space<vmem>>, vector<1x256xf32>
    %54 = vector.broadcast %53 : vector<1x256xf32> to vector<8x256xf32>
    %55 = arith.addf %52, %54 : vector<8x256xf32>
    %56 = arith.addf %48, %55 : vector<8x256xf32>
    %cst_50 = arith.constant 0.000000e+00 : f32
    %57 = vector.broadcast %cst_50 : f32 to vector<8x256xf32>
    %58 = arith.maximumf %56, %57 : vector<8x256xf32>
    %59 = arith.truncf %58 : vector<8x256xf32> to vector<8x256xbf16>
    %c0_51 = arith.constant 0 : index
    %c0_52 = arith.constant 0 : index
    %c0_53 = arith.constant 0 : index
    %60 = vector.load %arg8[%c0_51, %c0_52, %c0_53] : memref<1x8x256xbf16, #tpu.memory_space<vmem>>, vector<1x8x256xbf16>
    %61 = vector.shape_cast %60 : vector<1x8x256xbf16> to vector<8x256xbf16>
    %62 = vector.shape_cast %59 : vector<8x256xbf16> to vector<1x8x256xbf16>
    tpu.vector_store %arg8[%c0_51, %c0_52, %c0_53], %62 {strides = array<i32>} : memref<1x8x256xbf16, #tpu.memory_space<vmem>>, vector<1x8x256xbf16>,
    return
  }
  func.func @transform_0(%arg0: i32) -> (i32, i32, i32) {
    %c0_i32 = arith.constant 0 : i32
    %c0_i32_0 = arith.constant 0 : i32
    %c0_i32_1 = arith.constant 0 : i32
    return %arg0, %c0_i32, %c0_i32_0 : i32, i32, i32
  }
  func.func @transform_1(%arg0: i32) -> (i32, i32) {
    %c0_i32 = arith.constant 0 : i32
    %c0_i32_0 = arith.constant 0 : i32
    %c0_i32_1 = arith.constant 0 : i32
    return %c0_i32, %c0_i32_0 : i32, i32
  }
  func.func @transform_2(%arg0: i32) -> (i32, i32) {
    %c0_i32 = arith.constant 0 : i32
    %c0_i32_0 = arith.constant 0 : i32
    %c0_i32_1 = arith.constant 0 : i32
    return %c0_i32, %c0_i32_0 : i32, i32
  }
  func.func @transform_3(%arg0: i32) -> (i32, i32) {
    %c0_i32 = arith.constant 0 : i32
    %c0_i32_0 = arith.constant 0 : i32
    %c0_i32_1 = arith.constant 0 : i32
    return %c0_i32, %c0_i32_0 : i32, i32
  }
  func.func @transform_4(%arg0: i32) -> (i32, i32) {
    %c0_i32 = arith.constant 0 : i32
    %c0_i32_0 = arith.constant 0 : i32
    %c0_i32_1 = arith.constant 0 : i32
    return %c0_i32, %c0_i32_0 : i32, i32
  }
  func.func @transform_5(%arg0: i32) -> (i32, i32) {
    %c0_i32 = arith.constant 0 : i32
    %c0_i32_0 = arith.constant 0 : i32
    %c0_i32_1 = arith.constant 0 : i32
    return %c0_i32, %c0_i32_0 : i32, i32
  }
  func.func @transform_6(%arg0: i32) -> (i32, i32) {
    %c0_i32 = arith.constant 0 : i32
    %c0_i32_0 = arith.constant 0 : i32
    %c0_i32_1 = arith.constant 0 : i32
    return %c0_i32, %c0_i32_0 : i32, i32
  }
  func.func @transform_7(%arg0: i32) -> (i32, i32, i32) {
    %c0_i32 = arith.constant 0 : i32
    %c0_i32_0 = arith.constant 0 : i32
    %c0_i32_1 = arith.constant 0 : i32
    return %arg0, %c0_i32, %c0_i32_0 : i32, i32, i32
  }
}

module attributes {stable_mosaic.version = 11 : i64} {
  func.func @_block_kernel(%arg0: i32, %arg1: memref<1x8x256xbf16, #tpu.memory_space<vmem>>, %arg2: memref<768x256xbf16, #tpu.memory_space<vmem>>, %arg3: memref<1x256xf32, #tpu.memory_space<vmem>>, %arg4: memref<768x256xbf16, #tpu.memory_space<vmem>>, %arg5: memref<1x256xf32, #tpu.memory_space<vmem>>, %arg6: memref<1x8x256xbf16, #tpu.memory_space<vmem>>, %arg7: memref<10x256xf32, #tpu.memory_space<vmem>>, %arg8: memref<10x256xf32, #tpu.memory_space<vmem>>) attributes {dimension_semantics = [#tpu.dimension_semantics<parallel>], iteration_bounds = array<i64: 2>, scalar_prefetch = 0 : i64, scratch_operands = 2 : i64, tpu.core_type = #tpu.core_type<tc>, window_params = [{transform_indices = @transform_0, window_bounds = array<i64: 1, 8, 256>}, {pipeline_mode = #tpu.pipeline_mode<synchronous>, transform_indices = @transform_1, window_bounds = array<i64: 768, 256>}, {pipeline_mode = #tpu.pipeline_mode<synchronous>, transform_indices = @transform_2, window_bounds = array<i64: 1, 256>}, {pipeline_mode = #tpu.pipeline_mode<synchronous>, transform_indices = @transform_3, window_bounds = array<i64: 768, 256>}, {pipeline_mode = #tpu.pipeline_mode<synchronous>, transform_indices = @transform_4, window_bounds = array<i64: 1, 256>}, {transform_indices = @transform_5, window_bounds = array<i64: 1, 8, 256>}]} {
    %cst = arith.constant 0.000000e+00 : f32
    %0 = vector.broadcast %cst : f32 to vector<10x256xf32>
    %c0 = arith.constant 0 : index
    %c0_0 = arith.constant 0 : index
    %1 = vector.load %arg7[%c0, %c0_0] : memref<10x256xf32, #tpu.memory_space<vmem>>, vector<10x256xf32>
    tpu.vector_store %arg7[%c0, %c0_0], %0 {strides = array<i32>} : memref<10x256xf32, #tpu.memory_space<vmem>>, vector<10x256xf32>,
    %c0_1 = arith.constant 0 : index
    %c0_2 = arith.constant 0 : index
    %c0_3 = arith.constant 0 : index
    %2 = vector.load %arg1[%c0_1, %c0_2, %c0_3] : memref<1x8x256xbf16, #tpu.memory_space<vmem>>, vector<1x8x256xbf16>
    %3 = vector.shape_cast %2 : vector<1x8x256xbf16> to vector<8x256xbf16>
    %4 = arith.extf %3 : vector<8x256xbf16> to vector<8x256xf32>
    %c1 = arith.constant 1 : index
    %c0_4 = arith.constant 0 : index
    %5 = vector.load %arg7[%c1, %c0_4] : memref<10x256xf32, #tpu.memory_space<vmem>>, vector<8x256xf32>
    tpu.vector_store %arg7[%c1, %c0_4], %4 {strides = array<i32>} : memref<10x256xf32, #tpu.memory_space<vmem>>, vector<8x256xf32>,
    %cst_5 = arith.constant 0.000000e+00 : f32
    %6 = vector.broadcast %cst_5 : f32 to vector<8x256xf32>
    %c0_6 = arith.constant 0 : index
    %c0_7 = arith.constant 0 : index
    %7 = vector.load %arg7[%c0_6, %c0_7] : memref<10x256xf32, #tpu.memory_space<vmem>>, vector<8x256xf32>
    %8 = arith.truncf %7 : vector<8x256xf32> to vector<8x256xbf16>
    %c0_8 = arith.constant 0 : index
    %c0_9 = arith.constant 0 : index
    %9 = vector.load %arg2[%c0_8, %c0_9] : memref<768x256xbf16, #tpu.memory_space<vmem>>, vector<256x256xbf16>
    %cst_10 = arith.constant dense<0.000000e+00> : vector<8x256xf32>
    %10 = tpu.matmul %8, %9, %cst_10 {dimension_numbers = #tpu.dot_dimension_numbers<[1], [0], [0], [1], [0, 0, 1, 1], [], []>} : vector<8x256xbf16>, vector<256x256xbf16>, vector<8x256xf32> -> vector<8x256xf32>
    %11 = arith.addf %6, %10 : vector<8x256xf32>
    %c1_11 = arith.constant 1 : index
    %c0_12 = arith.constant 0 : index
    %12 = vector.load %arg7[%c1_11, %c0_12] : memref<10x256xf32, #tpu.memory_space<vmem>>, vector<8x256xf32>
    %13 = arith.truncf %12 : vector<8x256xf32> to vector<8x256xbf16>
    %c256 = arith.constant 256 : index
    %c0_13 = arith.constant 0 : index
    %14 = vector.load %arg2[%c256, %c0_13] : memref<768x256xbf16, #tpu.memory_space<vmem>>, vector<256x256xbf16>
    %cst_14 = arith.constant dense<0.000000e+00> : vector<8x256xf32>
    %15 = tpu.matmul %13, %14, %cst_14 {dimension_numbers = #tpu.dot_dimension_numbers<[1], [0], [0], [1], [0, 0, 1, 1], [], []>} : vector<8x256xbf16>, vector<256x256xbf16>, vector<8x256xf32> -> vector<8x256xf32>
    %16 = arith.addf %11, %15 : vector<8x256xf32>
    %c2 = arith.constant 2 : index
    %c0_15 = arith.constant 0 : index
    %17 = vector.load %arg7[%c2, %c0_15] : memref<10x256xf32, #tpu.memory_space<vmem>>, vector<8x256xf32>
    %18 = arith.truncf %17 : vector<8x256xf32> to vector<8x256xbf16>
    %c512 = arith.constant 512 : index
    %c0_16 = arith.constant 0 : index
    %19 = vector.load %arg2[%c512, %c0_16] : memref<768x256xbf16, #tpu.memory_space<vmem>>, vector<256x256xbf16>
    %cst_17 = arith.constant dense<0.000000e+00> : vector<8x256xf32>
    %20 = tpu.matmul %18, %19, %cst_17 {dimension_numbers = #tpu.dot_dimension_numbers<[1], [0], [0], [1], [0, 0, 1, 1], [], []>} : vector<8x256xbf16>, vector<256x256xbf16>, vector<8x256xf32> -> vector<8x256xf32>
    %21 = arith.addf %16, %20 : vector<8x256xf32>
    %c0_18 = arith.constant 0 : index
    %c0_19 = arith.constant 0 : index
    %22 = vector.load %arg3[%c0_18, %c0_19] : memref<1x256xf32, #tpu.memory_space<vmem>>, vector<1x256xf32>
    %23 = vector.broadcast %22 : vector<1x256xf32> to vector<8x256xf32>
    %24 = arith.addf %21, %23 : vector<8x256xf32>
    %cst_20 = arith.constant 0.000000e+00 : f32
    %25 = vector.broadcast %cst_20 : f32 to vector<8x256xf32>
    %26 = arith.maximumf %24, %25 : vector<8x256xf32>
    %cst_21 = arith.constant 0.000000e+00 : f32
    %27 = vector.broadcast %cst_21 : f32 to vector<10x256xf32>
    %c0_22 = arith.constant 0 : index
    %c0_23 = arith.constant 0 : index
    %28 = vector.load %arg8[%c0_22, %c0_23] : memref<10x256xf32, #tpu.memory_space<vmem>>, vector<10x256xf32>
    tpu.vector_store %arg8[%c0_22, %c0_23], %27 {strides = array<i32>} : memref<10x256xf32, #tpu.memory_space<vmem>>, vector<10x256xf32>,
    %c1_24 = arith.constant 1 : index
    %c0_25 = arith.constant 0 : index
    %29 = vector.load %arg8[%c1_24, %c0_25] : memref<10x256xf32, #tpu.memory_space<vmem>>, vector<8x256xf32>
    tpu.vector_store %arg8[%c1_24, %c0_25], %26 {strides = array<i32>} : memref<10x256xf32, #tpu.memory_space<vmem>>, vector<8x256xf32>,
    %cst_26 = arith.constant 0.000000e+00 : f32
    %30 = vector.broadcast %cst_26 : f32 to vector<8x256xf32>
    %c0_27 = arith.constant 0 : index
    %c0_28 = arith.constant 0 : index
    %31 = vector.load %arg8[%c0_27, %c0_28] : memref<10x256xf32, #tpu.memory_space<vmem>>, vector<8x256xf32>
    %32 = arith.truncf %31 : vector<8x256xf32> to vector<8x256xbf16>
    %c0_29 = arith.constant 0 : index
    %c0_30 = arith.constant 0 : index
    %33 = vector.load %arg4[%c0_29, %c0_30] : memref<768x256xbf16, #tpu.memory_space<vmem>>, vector<256x256xbf16>
    %cst_31 = arith.constant dense<0.000000e+00> : vector<8x256xf32>
    %34 = tpu.matmul %32, %33, %cst_31 {dimension_numbers = #tpu.dot_dimension_numbers<[1], [0], [0], [1], [0, 0, 1, 1], [], []>} : vector<8x256xbf16>, vector<256x256xbf16>, vector<8x256xf32> -> vector<8x256xf32>
    %35 = arith.addf %30, %34 : vector<8x256xf32>
    %c1_32 = arith.constant 1 : index
    %c0_33 = arith.constant 0 : index
    %36 = vector.load %arg8[%c1_32, %c0_33] : memref<10x256xf32, #tpu.memory_space<vmem>>, vector<8x256xf32>
    %37 = arith.truncf %36 : vector<8x256xf32> to vector<8x256xbf16>
    %c256_34 = arith.constant 256 : index
    %c0_35 = arith.constant 0 : index
    %38 = vector.load %arg4[%c256_34, %c0_35] : memref<768x256xbf16, #tpu.memory_space<vmem>>, vector<256x256xbf16>
    %cst_36 = arith.constant dense<0.000000e+00> : vector<8x256xf32>
    %39 = tpu.matmul %37, %38, %cst_36 {dimension_numbers = #tpu.dot_dimension_numbers<[1], [0], [0], [1], [0, 0, 1, 1], [], []>} : vector<8x256xbf16>, vector<256x256xbf16>, vector<8x256xf32> -> vector<8x256xf32>
    %40 = arith.addf %35, %39 : vector<8x256xf32>
    %c2_37 = arith.constant 2 : index
    %c0_38 = arith.constant 0 : index
    %41 = vector.load %arg8[%c2_37, %c0_38] : memref<10x256xf32, #tpu.memory_space<vmem>>, vector<8x256xf32>
    %42 = arith.truncf %41 : vector<8x256xf32> to vector<8x256xbf16>
    %c512_39 = arith.constant 512 : index
    %c0_40 = arith.constant 0 : index
    %43 = vector.load %arg4[%c512_39, %c0_40] : memref<768x256xbf16, #tpu.memory_space<vmem>>, vector<256x256xbf16>
    %cst_41 = arith.constant dense<0.000000e+00> : vector<8x256xf32>
    %44 = tpu.matmul %42, %43, %cst_41 {dimension_numbers = #tpu.dot_dimension_numbers<[1], [0], [0], [1], [0, 0, 1, 1], [], []>} : vector<8x256xbf16>, vector<256x256xbf16>, vector<8x256xf32> -> vector<8x256xf32>
    %45 = arith.addf %40, %44 : vector<8x256xf32>
    %c0_42 = arith.constant 0 : index
    %c0_43 = arith.constant 0 : index
    %46 = vector.load %arg5[%c0_42, %c0_43] : memref<1x256xf32, #tpu.memory_space<vmem>>, vector<1x256xf32>
    %47 = vector.broadcast %46 : vector<1x256xf32> to vector<8x256xf32>
    %48 = arith.addf %45, %47 : vector<8x256xf32>
    %c1_44 = arith.constant 1 : index
    %c0_45 = arith.constant 0 : index
    %49 = vector.load %arg7[%c1_44, %c0_45] : memref<10x256xf32, #tpu.memory_space<vmem>>, vector<8x256xf32>
    %50 = arith.addf %48, %49 : vector<8x256xf32>
    %cst_46 = arith.constant 0.000000e+00 : f32
    %51 = vector.broadcast %cst_46 : f32 to vector<8x256xf32>
    %52 = arith.maximumf %50, %51 : vector<8x256xf32>
    %53 = arith.truncf %52 : vector<8x256xf32> to vector<8x256xbf16>
    %c0_47 = arith.constant 0 : index
    %c0_48 = arith.constant 0 : index
    %c0_49 = arith.constant 0 : index
    %54 = vector.load %arg6[%c0_47, %c0_48, %c0_49] : memref<1x8x256xbf16, #tpu.memory_space<vmem>>, vector<1x8x256xbf16>
    %55 = vector.shape_cast %54 : vector<1x8x256xbf16> to vector<8x256xbf16>
    %56 = vector.shape_cast %53 : vector<8x256xbf16> to vector<1x8x256xbf16>
    tpu.vector_store %arg6[%c0_47, %c0_48, %c0_49], %56 {strides = array<i32>} : memref<1x8x256xbf16, #tpu.memory_space<vmem>>, vector<1x8x256xbf16>,
    return
  }
  func.func @transform_0(%arg0: i32) -> (i32, i32, i32) {
    %c0_i32 = arith.constant 0 : i32
    %c0_i32_0 = arith.constant 0 : i32
    %c0_i32_1 = arith.constant 0 : i32
    return %arg0, %c0_i32, %c0_i32_0 : i32, i32, i32
  }
  func.func @transform_1(%arg0: i32) -> (i32, i32) {
    %c0_i32 = arith.constant 0 : i32
    %c0_i32_0 = arith.constant 0 : i32
    %c0_i32_1 = arith.constant 0 : i32
    return %c0_i32, %c0_i32_0 : i32, i32
  }
  func.func @transform_2(%arg0: i32) -> (i32, i32) {
    %c0_i32 = arith.constant 0 : i32
    %c0_i32_0 = arith.constant 0 : i32
    %c0_i32_1 = arith.constant 0 : i32
    return %c0_i32, %c0_i32_0 : i32, i32
  }
  func.func @transform_3(%arg0: i32) -> (i32, i32) {
    %c0_i32 = arith.constant 0 : i32
    %c0_i32_0 = arith.constant 0 : i32
    %c0_i32_1 = arith.constant 0 : i32
    return %c0_i32, %c0_i32_0 : i32, i32
  }
  func.func @transform_4(%arg0: i32) -> (i32, i32) {
    %c0_i32 = arith.constant 0 : i32
    %c0_i32_0 = arith.constant 0 : i32
    %c0_i32_1 = arith.constant 0 : i32
    return %c0_i32, %c0_i32_0 : i32, i32
  }
  func.func @transform_5(%arg0: i32) -> (i32, i32, i32) {
    %c0_i32 = arith.constant 0 : i32
    %c0_i32_0 = arith.constant 0 : i32
    %c0_i32_1 = arith.constant 0 : i32
    return %arg0, %c0_i32, %c0_i32_0 : i32, i32, i32
  }
}

module attributes {stable_mosaic.version = 11 : i64} {
  func.func @_fc_kernel(%arg0: i32, %arg1: memref<2x2048xbf16, #tpu.memory_space<vmem>>, %arg2: memref<2048x16xbf16, #tpu.memory_space<vmem>>, %arg3: memref<1x16xf32, #tpu.memory_space<vmem>>, %arg4: memref<2x16xf32, #tpu.memory_space<vmem>>, %arg5: memref<2x16xf32, #tpu.memory_space<vmem>>) attributes {dimension_semantics = [#tpu.dimension_semantics<arbitrary>], iteration_bounds = array<i64: 1>, scalar_prefetch = 0 : i64, scratch_operands = 1 : i64, tpu.core_type = #tpu.core_type<tc>, window_params = [{transform_indices = @transform_0, window_bounds = array<i64: 2, 2048>}, {transform_indices = @transform_1, window_bounds = array<i64: 2048, 16>}, {pipeline_mode = #tpu.pipeline_mode<synchronous>, transform_indices = @transform_2, window_bounds = array<i64: 1, 16>}, {pipeline_mode = #tpu.pipeline_mode<synchronous>, transform_indices = @transform_3, window_bounds = array<i64: 2, 16>}]} {
    %c0_i32 = arith.constant 0 : i32
    %0 = arith.cmpi eq, %arg0, %c0_i32 : i32
    %1 = arith.extui %0 : i1 to i32
    %c0_i32_0 = arith.constant 0 : i32
    %2 = arith.cmpi ne, %1, %c0_i32_0 : i32
    scf.if %2 {
      %cst_10 = arith.constant 0.000000e+00 : f32
      %12 = vector.broadcast %cst_10 : f32 to vector<2x16xf32>
      %c0_11 = arith.constant 0 : index
      %c0_12 = arith.constant 0 : index
      %13 = vector.load %arg5[%c0_11, %c0_12] : memref<2x16xf32, #tpu.memory_space<vmem>>, vector<2x16xf32>
      tpu.vector_store %arg5[%c0_11, %c0_12], %12 {strides = array<i32>} : memref<2x16xf32, #tpu.memory_space<vmem>>, vector<2x16xf32>,
    } else {
    }
    %c0 = arith.constant 0 : index
    %c0_1 = arith.constant 0 : index
    %3 = vector.load %arg5[%c0, %c0_1] : memref<2x16xf32, #tpu.memory_space<vmem>>, vector<2x16xf32>
    %c0_2 = arith.constant 0 : index
    %c0_3 = arith.constant 0 : index
    %4 = vector.load %arg1[%c0_2, %c0_3] : memref<2x2048xbf16, #tpu.memory_space<vmem>>, vector<2x2048xbf16>
    %c0_4 = arith.constant 0 : index
    %c0_5 = arith.constant 0 : index
    %5 = vector.load %arg2[%c0_4, %c0_5] : memref<2048x16xbf16, #tpu.memory_space<vmem>>, vector<2048x16xbf16>
    %cst = arith.constant dense<0.000000e+00> : vector<2x16xf32>
    %6 = tpu.matmul %4, %5, %cst {dimension_numbers = #tpu.dot_dimension_numbers<[1], [0], [0], [1], [0, 0, 1, 1], [], []>} : vector<2x2048xbf16>, vector<2048x16xbf16>, vector<2x16xf32> -> vector<2x16xf32>
    %7 = arith.addf %3, %6 : vector<2x16xf32>
    %c0_6 = arith.constant 0 : index
    %c0_7 = arith.constant 0 : index
    %8 = vector.load %arg5[%c0_6, %c0_7] : memref<2x16xf32, #tpu.memory_space<vmem>>, vector<2x16xf32>
    tpu.vector_store %arg5[%c0_6, %c0_7], %7 {strides = array<i32>} : memref<2x16xf32, #tpu.memory_space<vmem>>, vector<2x16xf32>,
    %c0_i32_8 = arith.constant 0 : i32
    %9 = arith.cmpi eq, %arg0, %c0_i32_8 : i32
    %10 = arith.extui %9 : i1 to i32
    %c0_i32_9 = arith.constant 0 : i32
    %11 = arith.cmpi ne, %10, %c0_i32_9 : i32
    scf.if %11 {
      %c0_10 = arith.constant 0 : index
      %c0_11 = arith.constant 0 : index
      %12 = vector.load %arg5[%c0_10, %c0_11] : memref<2x16xf32, #tpu.memory_space<vmem>>, vector<2x16xf32>
      %c0_12 = arith.constant 0 : index
      %c0_13 = arith.constant 0 : index
      %13 = vector.load %arg3[%c0_12, %c0_13] : memref<1x16xf32, #tpu.memory_space<vmem>>, vector<1x16xf32>
      %14 = vector.broadcast %13 : vector<1x16xf32> to vector<2x16xf32>
      %15 = arith.addf %12, %14 : vector<2x16xf32>
      %c0_14 = arith.constant 0 : index
      %c0_15 = arith.constant 0 : index
      %16 = vector.load %arg4[%c0_14, %c0_15] : memref<2x16xf32, #tpu.memory_space<vmem>>, vector<2x16xf32>
      tpu.vector_store %arg4[%c0_14, %c0_15], %15 {strides = array<i32>} : memref<2x16xf32, #tpu.memory_space<vmem>>, vector<2x16xf32>,
    } else {
    }
    return
  }
  func.func @transform_0(%arg0: i32) -> (i32, i32) {
    %c0_i32 = arith.constant 0 : i32
    %c0_i32_0 = arith.constant 0 : i32
    return %c0_i32, %arg0 : i32, i32
  }
  func.func @transform_1(%arg0: i32) -> (i32, i32) {
    %c0_i32 = arith.constant 0 : i32
    %c0_i32_0 = arith.constant 0 : i32
    return %arg0, %c0_i32 : i32, i32
  }
  func.func @transform_2(%arg0: i32) -> (i32, i32) {
    %c0_i32 = arith.constant 0 : i32
    %c0_i32_0 = arith.constant 0 : i32
    %c0_i32_1 = arith.constant 0 : i32
    return %c0_i32, %c0_i32_0 : i32, i32
  }
  func.func @transform_3(%arg0: i32) -> (i32, i32) {
    %c0_i32 = arith.constant 0 : i32
    %c0_i32_0 = arith.constant 0 : i32
    %c0_i32_1 = arith.constant 0 : i32
    return %c0_i32, %c0_i32_0 : i32, i32
  }
}

</mosaic_0001>

<bundles_post_ra>
// kernel: encoder1d_forward.9
= control target key start
LH: loop header
LB: loop body
LE: loop exit
PB: predicated region body
PF: predicated region fallthrough
CT: control target
= control target key end

     0   :  { %10 = vsyncpa [#allocation5], 0  ;;  %s1260_s0 = inlined_call_operand.vmem [shape: bf16[2,32,64], index: 0, kind: input, shape index: {}]   ;;  %s1261_s1 = inlined_call_operand.vmem [shape: bf16[192,64], index: 1, kind: input, shape index: {}]   ;;  %s1262_s2 = inlined_call_operand.hbm [shape: f32[1,64], index: 2, kind: input, shape index: {}]   ;;  %s1263_s3 = inlined_call_operand.vmem [shape: bf16[192,64], index: 3, kind: input, shape index: {}]   ;;  %s1264_s4 = inlined_call_operand.hbm [shape: f32[1,64], index: 4, kind: input, shape index: {}]   ;;  %s1265_s5 = inlined_call_operand.vmem [shape: bf16[2,32,64], index: 5, kind: output, shape index: {}]  }
   0x1   :  { %11 = vsyncpa [#allocation7], 0  ;;  %s1095_s18 = smov 0  }
   0x2 LB: > { %s173_s21 = sshll.u32 %s1262_s2, 4  ;;  %s788_s22 = sadd.s32 4294967295, %s1060_s18   ;;  %s1060_s18 = sphi %s1095_s18, %s17_s18   ;;  %s174_s21 = int_to_ptr.hbm [resolvable:$true] %s173_s21 }
   0x3   : > { %p790_p0 = scmp.ge.s32.totalorder %s1060_s18, 1  ;;  %p158_p1 = scmp.lt.s32.totalorder %s1060_s18, 3 }
   0x4   : > { %p969_p2 = scmp.eq.s32.totalorder %s788_s22, 0  ;;  %s1062_s24 = smov [#allocation4]  }
   0x5   : > { %p1106_p3 = pnand %p790_p0, %p158_p1  ;;  %s175_s25 = sshll.u32 %s1062_s24, 4  ;;  %s176_s25 = int_to_ptr.vmem [resolvable:$true] %s175_s25 }
   0x6   : > { %s188_s28 = sshll.u32 %s1264_s4, 4  ;;  %s1063_s29 = smov [#allocation6]   ;;  %s189_s28 = int_to_ptr.hbm [resolvable:$true] %s188_s28 }
   0x7   : > { %p962_p4 = pneg %p1106_p3  ;;  %s190_s30 = sshll.u32 %s1063_s29, 4  ;;  %s191_s30 = int_to_ptr.vmem [resolvable:$true] %s190_s30 }
   0x8   : > { %211 = sbr.rel (%p1106_p3) target bundleno = 379 (0x17b), region = 40 }
   0x9   : > { %p963_p5 = pnand %p969_p2, %p962_p4 }
   0xb   : > { %965 = dma.hbm_to_vmem [thread:$0]  (!%p963_p5), %s174_s21, 16, %s176_s25, [#allocation5]  }
   0xc   : > { %968 = dma.hbm_to_vmem [thread:$0]  (!%p963_p5), %s189_s28, 16, %s191_s30, [#allocation7]  }
   0xd   : > { %1051 = dma.done.wait (%p969_p2), [#allocation5], 16  }
   0xe   : > { %1053 = vsyncadd (%p969_p2), [#allocation5], 4294967280 }
   0xf   : > { %1055 = dma.done.wait (%p969_p2), [#allocation7], 16  }
  0x10   : > { %1057 = vsyncadd (%p969_p2), [#allocation7], 4294967280  ;;  %p245_p6 = scmp.lt.s32.totalorder %s788_s22, 1  ;;  %vm256_vm0 = vcmask 523264   ;;  %vm261_vm1 = vcmask 517120   ;;  %v1064_v0 = vmov 0.0  }
  0x11   : > { %259 = vst.msk [vmem:[#allocation2 + $0x10] sm:$0xff] %vm256_vm0, %v1064_v0  ;;  %v920_v1 = vld [vmem:[%s1261_s1 + $0x38] sm:$0xff]  ;;  %v919_v3 = vld [vmem:[%s1261_s1 + $0x30] sm:$0xff]  ;;  %v918_v11 = vld [vmem:[%s1261_s1 + $0x28] sm:$0xff]  ;;  %vm706_vm2 = vcmask 519168  }
  0x12   : > { %s1268_s22 = smov (!%p245_p6, %s788_s22), 1  ;;  %260 = vst.msk [vmem:[#allocation2 + $0x18] sm:$0xff] %vm256_vm0, %v1064_v0  ;;  %v916_v2 = vld [vmem:[%s1261_s1 + $0x18] sm:$0xff]  ;;  %946 = vmatpush.bf16.msra.mxu2 %v920_v1  ;;  %v915_v4 = vld [vmem:[%s1261_s1 + $0x10] sm:$0xff]  ;;  %337 = vmatpush.bf16.msra.mxu0 %v920_v1  ;;  %v914_v12 = vld [vmem:[%s1261_s1 + $0x8] sm:$0xff] }
  0x13   : > { %262 = vst.msk [vmem:[#allocation2 + $0x20] sm:$0x3] %vm261_vm1, %v1064_v0  ;;  %s911_s6 = sshll.u32 %s1268_s22, 4  ;;  %950 = vmatpush.bf16.msra.mxu3 %v916_v2  ;;  %386 = vmatpush.bf16.msra.mxu1 %v916_v2  ;;  %v917_v13 = vld [vmem:[%s1261_s1 + $0x20] sm:$0xff]  ;;  %v924_v15 = vld [vmem:[%s1261_s1 + $0x58] sm:$0xff]  ;;  %v923_v21 = vld [vmem:[%s1261_s1 + $0x50] sm:$0xff] }
  0x14   : > { %257 = vst.msk [vmem:[#allocation2] sm:$0xff] %vm256_vm0, %v1064_v0  ;;  %s249_s9 = scalar_lea.vmem %s1260_s0, %s911_s6  ;;  %v913_v14 = vld [vmem:[%s1261_s1] sm:$0xff]  ;;  %v922_v29 = vld [vmem:[%s1261_s1 + $0x48] sm:$0xff]  ;;  %v932_v37 = vld [vmem:[%s1263_s3 + $0x38] sm:$0xff]  ;;  %s254_s16 = scalar_lea.vmem %s1265_s5, %s911_s6 }
  0x15   : > { %258 = vst.msk [vmem:[#allocation2 + $0x8] sm:$0xff] %vm256_vm0, %v1064_v0  ;;  %v945_v5 = vld [vmem:[%s249_s9 + $0x8] sm:$0xff]   ;;  %v938_v8 = vld [vmem:[%s249_s9] sm:$0xff]   ;;  %v928_v38 = vld [vmem:[%s1263_s3 + $0x18] sm:$0xff] }
  0x16   : > { %480 = vst.msk [vmem:[#allocation3] sm:$0xff] %vm256_vm0, %v1064_v0  ;;  %v943_v6 = vunpack.c.l.bf16 %v945_v5  ;;  %v944_v7 = vunpack.c.h.bf16 %v945_v5  ;;  %v940_v9 = vunpack.c.h.bf16 %v938_v8  ;;  %v939_v10 = vunpack.c.l.bf16 %v938_v8  ;;  %947 = vmatpush.bf16.msra.mxu2 %v919_v3  ;;  %338 = vmatpush.bf16.msra.mxu0 %v919_v3  ;;  %v921_v30 = vld [vmem:[%s1261_s1 + $0x40] sm:$0xff]  ;;  %v931_v39 = vld [vmem:[%s1263_s3 + $0x30] sm:$0xff]  ;;  %v930_v42 = vld [vmem:[%s1263_s3 + $0x28] sm:$0xff] }
  0x17   : > { %481 = vst.msk [vmem:[#allocation3 + $0x8] sm:$0xff] %vm256_vm0, %v1064_v0  ;;  %951 = vmatpush.bf16.msra.mxu3 %v915_v4  ;;  %387 = vmatpush.bf16.msra.mxu1 %v915_v4  ;;  %v927_v40 = vld [vmem:[%s1263_s3 + $0x10] sm:$0xff]  ;;  %v936_v43 = vld [vmem:[%s1263_s3 + $0x58] sm:$0xff]  ;;  %v926_v44 = vld [vmem:[%s1263_s3 + $0x8] sm:$0xff] }
  0x18   : > { %482 = vst.msk [vmem:[#allocation3 + $0x10] sm:$0xff] %vm256_vm0, %v1064_v0  ;;  %v929_v45 = vld [vmem:[%s1263_s3 + $0x20] sm:$0xff]  ;;  %v935_v46 = vld [vmem:[%s1263_s3 + $0x50] sm:$0xff]  ;;  %v934_v49 = vld [vmem:[%s1263_s3 + $0x48] sm:$0xff] }
  0x19   : > { %483 = vst.msk [vmem:[#allocation3 + $0x18] sm:$0xff] %vm256_vm0, %v1064_v0  ;;  %v925_v47 = vld [vmem:[%s1263_s3] sm:$0xff]  ;;  %v984_v54 = vld [vmem:[#allocation4] ss:$0 sm:$0xff] }
  0x1a   : > { %484 = vst.msk [vmem:[#allocation3 + $0x20] sm:$0x3] %vm261_vm1, %v1064_v0  ;;  %948 = vmatpush.bf16.msra.mxu2 %v918_v11  ;;  %339 = vmatpush.bf16.msra.mxu0 %v918_v11  ;;  %v933_v52 = vld [vmem:[%s1263_s3 + $0x40] sm:$0xff] }
  0x1b   : > { %273 = vst.msk [vmem:[#allocation2 + $0x11] sm:$0xff] %vm256_vm0, %v943_v6  ;;  %952 = vmatpush.bf16.msra.mxu3 %v914_v12  ;;  %388 = vmatpush.bf16.msra.mxu1 %v914_v12 }
  0x1c   : > { %274 = vst.msk [vmem:[#allocation2 + $0x19] sm:$0xff] %vm256_vm0, %v944_v7 }
  0x1d   : > { %272 = vst.msk [vmem:[#allocation2 + $0x9] sm:$0xff] %vm256_vm0, %v940_v9 }
  0x1e   : > { %271 = vst.msk [vmem:[#allocation2 + $0x1] sm:$0xff] %vm256_vm0, %v939_v10  ;;  %949 = vmatpush.bf16.msra.mxu2 %v917_v13  ;;  %340 = vmatpush.bf16.msra.mxu0 %v917_v13 }
  0x1f   : > { %953 = vmatpush.bf16.msra.mxu3 %v913_v14  ;;  %389 = vmatpush.bf16.msra.mxu1 %v913_v14 }
  0x22   : > { %v1171_v16 = vld [vmem:[#allocation2 + $0x11] sm:$0xff]  ;;  %449 = vmatpush.bf16.msrb.mxu2 %v924_v15  ;;  %600 = vmatpush.bf16.msrb.mxu0 %v928_v38 }
  0x23   : > { %v1173_v17 = vld [vmem:[#allocation2 + $0x19] sm:$0xff]  ;;  %551 = vmatpush.bf16.msrb.mxu3 %v932_v37  ;;  %663 = vmatpush.bf16.msrb.mxu1 %v936_v43 }
  0x24   : > { %v278_v18 = vld [vmem:[#allocation2 + $0x18] sm:$0xff]  ;;  %v294_v19 = vpack.c.bf16 %v1173_v17, %v1171_v16  ;;  %v277_v20 = vld [vmem:[#allocation2 + $0x10] sm:$0xff] }
  0x25   : > { %v1180_v22 = vld [vmem:[#allocation2 + $0x9] sm:$0xff]  ;;  %v280_v23 = vpack.c.bf16 %v278_v18, %v277_v20  ;;  %v1182_v24 = vld [vmem:[#allocation2 + $0x1] sm:$0xff]  ;;  %v403_v34 = vld [vmem:[#allocation2 + $0x12] sm:$0xff] }
  0x26   : > { %v275_v25 = vld [vmem:[#allocation2] sm:$0xff]  ;;  %v276_v26 = vld [vmem:[#allocation2 + $0x8] sm:$0xff]  ;;  %v293_v27 = vpack.c.bf16 %v1180_v22, %v1182_v24  ;;  %818 = vmatmul.msk.bf16.vlgmr.msra.gmra.mxu2 %vm256_vm0, %v294_v19  ;;  %601 = vmatpush.bf16.msrb.mxu0 %v927_v40 }
  0x27   : > { %v279_v28 = vpack.c.bf16 %v276_v26, %v275_v25  ;;  %836 = vmatmul.msk.bf16.vlgmr.msra.gmra.mxu3 %vm256_vm0, %v280_v23  ;;  %450 = vmatpush.bf16.msrb.mxu2 %v923_v21  ;;  %v401_v31 = vld [vmem:[#allocation2 + $0x2] sm:$0xff]  ;;  %v402_v32 = vld [vmem:[#allocation2 + $0xa] sm:$0xff]  ;;  %v404_v35 = vld [vmem:[#allocation2 + $0x1a] sm:$0xff] }
  0x28   : > { %817 = vmatmul.msk.bf16.vlgmr.msra.gmra.mxu0 %vm256_vm0, %v293_v27  ;;  %v405_v33 = vpack.c.bf16 %v402_v32, %v401_v31  ;;  %v406_v36 = vpack.c.bf16 %v404_v35, %v403_v34  ;;  %552 = vmatpush.bf16.msrb.mxu3 %v931_v39  ;;  %v985_v39 = vld [vmem:[#allocation6] ss:$0 sm:$0xff] }
  0x29   : > { %835 = vmatmul.msk.bf16.vlgmr.msra.gmra.mxu1 %vm256_vm0, %v279_v28 }
  0x2a   : > { %602 = vmatpush.bf16.msrb.mxu0 %v926_v44  ;;  %664 = vmatpush.bf16.msrb.mxu1 %v935_v46 }
  0x2b   : > { %451 = vmatpush.bf16.msrb.mxu2 %v922_v29 }
  0x2c   : > { %553 = vmatpush.bf16.msrb.mxu3 %v930_v42 }
  0x2e   : > { %603 = vmatpush.bf16.msrb.mxu0 %v925_v47  ;;  %665 = vmatpush.bf16.msrb.mxu1 %v934_v49 }
  0x2f   : > { %452 = vmatpush.bf16.msrb.mxu2 %v921_v30 }
  0x30   : > { %554 = vmatpush.bf16.msrb.mxu3 %v929_v45 }
  0x32   : > { %666 = vmatpush.bf16.msrb.mxu1 %v933_v52 }
  0x36   : > { %853 = vmatmul.msk.bf16.vlgmr.msrb.gmra.mxu2 %vm256_vm0, %v405_v33 }
  0x46   : > { %854 = vmatmul.msk.bf16.gmra.mxu2 %vm256_vm0, %v406_v36 }
  0xa5   : > { %v342_v50 = vpop.f32.mrf.mxu0 }
  0xa6   : > { %v391_v51 = vpop.f32.mrf.mxu1 }
  0xa7   : > { %v392_v53 = vadd.f32 %v391_v51, %v342_v50 }
  0xa9   : > { %v347_v41 = vpop.f32.mrf.mxu2 }
  0xaa   : > { %v396_v0 = vpop.f32.mrf.mxu3 }
  0xab   : > { %v397_v3 = vadd.f32 %v396_v0, %v347_v41 }
  0xad   : > { %v344_v58 = vpop.f32.mrf.mxu0 }
  0xae   : > { %v393_v59 = vpop.f32.mrf.mxu1 }
  0xaf   : > { %v394_v61 = vadd.f32 %v393_v59, %v344_v58 }
  0xb1   : > { %v349_v48 = vpop.f32.mrf.mxu2 }
  0xb2   : > { %v398_v7 = vpop.f32.mrf.mxu3 }
  0xb3   : > { %v399_v13 = vadd.f32 %v398_v7, %v349_v48 }
  0xb9   : > { %v454_v55 = vpop.f32.mrf.mxu2 }
  0xba   : > { %v464_v56 = vadd.f32 %v454_v55, %v392_v53 }
  0xbc   : > { %v472_v57 = vadd.f32 %v984_v54, %v464_v56 }
  0xbe   : > { %v476_v60 = vmax.f32 %v472_v57, 0.0 }
  0xc0   : > { %485 = vst.msk [vmem:[#allocation3 + $0x1] sm:$0xff] %vm256_vm0, %v476_v60 }
  0xc1   : > { %v456_v62 = vpop.f32.mrf.mxu2 }
  0xc2   : > { %v465_v63 = vadd.f32 %v456_v62, %v394_v61 }
  0xc4   : > { %v473_v1 = vadd.f32 %v984_v54, %v465_v63 }
  0xc6   : > { %v477_v2 = vmax.f32 %v473_v1, 0.0 }
  0xc7   : > { %v503_v9 = vld [vmem:[#allocation3 + $0x1] sm:$0xff] }
  0xc8   : > { %486 = vst.msk [vmem:[#allocation3 + $0x9] sm:$0xff] %vm256_vm0, %v477_v2  ;;  %v489_v11 = vld [vmem:[#allocation3] sm:$0xff] }
  0xc9   : > { %v459_v4 = vpop.f32.mrf.mxu2 }
  0xca   : > { %v466_v5 = vadd.f32 %v459_v4, %v397_v3 }
  0xcc   : > { %v474_v6 = vadd.f32 %v984_v54, %v466_v5 }
  0xce   : > { %v478_v8 = vmax.f32 %v474_v6, 0.0 }
  0xcf   : > { %v504_v10 = vld [vmem:[#allocation3 + $0x9] sm:$0xff] }
  0xd0   : > { %v490_v12 = vld [vmem:[#allocation3 + $0x8] sm:$0xff]  ;;  %487 = vst.msk [vmem:[#allocation3 + $0x11] sm:$0xff] %vm256_vm0, %v478_v8  ;;  %v507_v14 = vpack.c.bf16 %v504_v10, %v503_v9 }
  0xd1   : > { %v493_v15 = vpack.c.bf16 %v490_v12, %v489_v11  ;;  %v461_v18 = vpop.f32.mrf.mxu2  ;;  %v615_v23 = vld [vmem:[#allocation3 + $0x2] sm:$0xff] }
  0xd2   : > { %v467_v19 = vadd.f32 %v461_v18, %v399_v13  ;;  %871 = vmatmul.msk.bf16.vlgmr.msrb.gmra.mxu3 %vm256_vm0, %v507_v14 }
  0xd3   : > { %889 = vmatmul.msk.bf16.vlgmr.msrb.gmra.mxu0 %vm256_vm0, %v493_v15 }
  0xd4   : > { %v475_v20 = vadd.f32 %v984_v54, %v467_v19 }
  0xd6   : > { %v479_v21 = vmax.f32 %v475_v20, 0.0 }
  0xd7   : > { %v616_v25 = vld [vmem:[#allocation3 + $0xa] sm:$0xff] }
  0xd8   : > { %488 = vst.msk [vmem:[#allocation3 + $0x19] sm:$0xff] %vm256_vm0, %v479_v21  ;;  %v619_v26 = vpack.c.bf16 %v616_v25, %v615_v23  ;;  %v505_v27 = vld [vmem:[#allocation3 + $0x11] sm:$0xff] }
  0xd9   : > { %v491_v29 = vld [vmem:[#allocation3 + $0x10] sm:$0xff] }
  0xda   : > { %907 = vmatmul.msk.bf16.vlgmr.msrb.gmra.mxu1 %vm256_vm0, %v619_v26 }
  0xdf   : > { %v506_v28 = vld [vmem:[#allocation3 + $0x19] sm:$0xff] }
  0xe0   : > { %v492_v30 = vld [vmem:[#allocation3 + $0x18] sm:$0xff]  ;;  %v508_v31 = vpack.c.bf16 %v506_v28, %v505_v27 }
  0xe1   : > { %v494_v32 = vpack.c.bf16 %v492_v30, %v491_v29  ;;  %v617_v33 = vld [vmem:[#allocation3 + $0x12] sm:$0xff]  ;;  %v618_v34 = vld [vmem:[#allocation3 + $0x1a] sm:$0xff] }
  0xe2   : > { %872 = vmatmul.msk.bf16.gmra.mxu3 %vm256_vm0, %v508_v31  ;;  %v620_v35 = vpack.c.bf16 %v618_v34, %v617_v33 }
  0xe3   : > { %890 = vmatmul.msk.bf16.gmra.mxu0 %vm256_vm0, %v494_v32 }
  0xea   : > { %908 = vmatmul.msk.bf16.gmra.mxu1 %vm256_vm0, %v620_v35 }
 0x150   : > { %v605_v36 = vpop.f32.mrf.mxu0 }
 0x155   : > { %v556_v37 = vpop.f32.mrf.mxu3 }
 0x156   : > { %v606_v38 = vadd.f32 %v605_v36, %v556_v37 }
 0x157   : > { %v668_v40 = vpop.f32.mrf.mxu1 }
 0x158   : > { %v678_v41 = vadd.f32 %v668_v40, %v606_v38  ;;  %v607_v42 = vpop.f32.mrf.mxu0 }
 0x15a   : > { %v686_v43 = vadd.f32 %v985_v39, %v678_v41 }
 0x15c   : > { %v694_v44 = vadd.f32 %v686_v43, %v1182_v24 }
 0x15d   : > { %v558_v45 = vpop.f32.mrf.mxu3 }
 0x15e   : > { %v698_v46 = vmax.f32 %v694_v44, 0.0  ;;  %v608_v47 = vadd.f32 %v607_v42, %v558_v45 }
 0x15f   : > { %v670_v48 = vpop.f32.mrf.mxu1 }
 0x160   : > { %v702_v49 = vpack.c.bf16 %v698_v46, %v698_v46  ;;  %v679_v50 = vadd.f32 %v670_v48, %v608_v47  ;;  %v610_v52 = vpop.f32.mrf.mxu0 }
 0x162   : > { %707 = vst.msk [vmem:[%s254_s16] sm:$0xf] %vm706_vm2, %v702_v49  ;;  %v687_v51 = vadd.f32 %v985_v39, %v679_v50 }
 0x164   : > { %v695_v53 = vadd.f32 %v687_v51, %v1180_v22 }
 0x165   : > { %v561_v54 = vpop.f32.mrf.mxu3 }
 0x166   : > { %v699_v24 = vmax.f32 %v695_v53, 0.0  ;;  %v611_v55 = vadd.f32 %v610_v52, %v561_v54 }
 0x167   : > { %v673_v56 = vpop.f32.mrf.mxu1 }
 0x168   : > { %v703_v57 = vpack.c.bf16 %v699_v24, %v699_v24  ;;  %v680_v58 = vadd.f32 %v673_v56, %v611_v55  ;;  %v612_v61 = vpop.f32.mrf.mxu0 }
 0x16a   : > { %708 = vst.msk [vmem:[%s254_s16 + $0x4] sm:$0xf] %vm706_vm2, %v703_v57  ;;  %v688_v59 = vadd.f32 %v985_v39, %v680_v58 }
 0x16c   : > { %v696_v60 = vadd.f32 %v688_v59, %v1171_v16 }
 0x16d   : > { %v563_v62 = vpop.f32.mrf.mxu3 }
 0x16e   : > { %v700_v63 = vmax.f32 %v696_v60, 0.0  ;;  %v613_v0 = vadd.f32 %v612_v61, %v563_v62 }
 0x16f   : > { %v675_v1 = vpop.f32.mrf.mxu1 }
 0x170   : > { %v704_v2 = vpack.c.bf16 %v700_v63, %v700_v63  ;;  %v681_v3 = vadd.f32 %v675_v1, %v613_v0 }
 0x172   : > { %709 = vst.msk [vmem:[%s254_s16 + $0x8] sm:$0xf] %vm706_vm2, %v704_v2  ;;  %v689_v22 = vadd.f32 %v985_v39, %v681_v3 }
 0x174   : > { %v697_v4 = vadd.f32 %v689_v22, %v1173_v17 }
 0x176   : > { %v701_v5 = vmax.f32 %v697_v4, 0.0 }
 0x178   : > { %v705_v6 = vpack.c.bf16 %v701_v5, %v701_v5 }
 0x17a   : > { %710 = vst.msk [vmem:[%s254_s16 + $0xc] sm:$0xf] %vm706_vm2, %v705_v6 }
 0x17b PF: > { %s17_s18 = sadd.s32 1, %s1060_s18  }
 0x17c   : > { %p14_p7 = scmp.ge.s32.totalorder %s17_s18, 4  }
 0x17e   :  { %16 = sbr.rel (!%p14_p7) target bundleno = 2 (0x2), region = 79 }
 0x183   :  { %732 = vsyncpa [#allocation5], 1 }
 0x184   :  { %734 = vsyncpa [#allocation5 + $0x1], 1 }
 0x185   :  { %735 = vsyncpa [#allocation7], 1 }

// kernel: encoder1d_forward.8
= control target key start
LH: loop header
LB: loop body
LE: loop exit
PB: predicated region body
PF: predicated region fallthrough
CT: control target
= control target key end

     0   :  { %s986_s12 = smov 0   ;;  %s1263_s0 = inlined_call_operand.vmem [shape: bf16[2,128,1], index: 0, kind: input, shape index: {}]   ;;  %s1264_s1 = inlined_call_operand.vmem [shape: bf16[7,64], index: 1, kind: input, shape index: {}]   ;;  %s1265_s2 = inlined_call_operand.vmem [shape: f32[1,64], index: 2, kind: input, shape index: {}]   ;;  %s1266_s3 = inlined_call_operand.vmem [shape: bf16[2,32,64], index: 3, kind: output, shape index: {}]  }
   0x1 LB: > { %s890_s13 = sadd.s32 4294967295, %s962_s12   ;;  %p894_p0 = scmp.ge.s32.totalorder %s962_s12, 1  ;;  %s962_s12 = sphi %s986_s12, %s13_s12  }
   0x2   : > { %p137_p1 = scmp.lt.s32.totalorder %s962_s12, 3 }
   0x4   : > { %p138_p2 = pnand %p894_p0, %p137_p1 }
   0x5   : > { %p161_p3 = scmp.lt.s32.totalorder (!%p138_p2), %s890_s13, 1 }
   0x6   : > { %141 = sbr.rel (%p138_p2) target bundleno = 326 (0x146), region = 32 }
   0xb   : > { %vm171_vm0 = vcmask 7168   ;;  %v964_v0 = vmov 0   ;;  %v965_v1 = vmov 0.0   ;;  %s1268_s13 = smov (!%p161_p3, %s890_s13), 1  ;;  %vm188_vm1 = vcmask 5120  }
   0xc   : > { %954 = vset.pattern.permute.xlu2 %v964_v0  ;;  %953 = vset.pattern.permute.xlu1 %v964_v0  ;;  %179 = vst.msk [vmem:[#allocation2 + $0x38] sm:$0xff] %vm171_vm0, %v965_v1  ;;  %s901_s14 = sshll.u32 %s1268_s13, 6  ;;  %vm776_vm2 = vcmask 523264   ;;  %vm785_vm3 = vcmask 517120   ;;  %s902_s28 = sshll.u32 %s1268_s13, 4  ;;  %vm830_vm4 = vcmask 519168  }
   0xd   : > { %952 = vset.pattern.permute.xlu0 %v964_v0  ;;  %180 = vst.msk [vmem:[#allocation2 + $0x40] sm:$0xff] %vm171_vm0, %v965_v1  ;;  %s1008_s17 = scalar_lea.vmem %s1263_s0, %s901_s14  ;;  %s170_s4 = scalar_lea.vmem %s1266_s3, %s902_s28 }
   0xe   : > { %181 = vst.msk [vmem:[#allocation2 + $0x48] sm:$0xff] %vm171_vm0, %v965_v1  ;;  %v937_v2 = vld [vmem:[%s1008_s17 + $0x18] sm:$0xff]   ;;  %v938_v3 = vld [vmem:[%s1008_s17 + $0x20] sm:$0xff]   ;;  %v935_v7 = vld [vmem:[%s1008_s17 + $0x8] sm:$0xff]  }
   0xf   : > { %182 = vst.msk [vmem:[#allocation2 + $0x50] sm:$0xff] %vm171_vm0, %v965_v1  ;;  %v918_v4 = vunpack.c.h.bf16 %v937_v2  ;;  %v921_v5 = vunpack.c.l.bf16 %v938_v3  ;;  %v922_v6 = vunpack.c.h.bf16 %v938_v3  ;;  %v936_v8 = vld [vmem:[%s1008_s17 + $0x10] sm:$0xff]   ;;  %v910_v9 = vunpack.c.h.bf16 %v935_v7  ;;  %v904_v10 = vld [vmem:[%s1008_s17] sm:$0xff]   ;;  %v939_v14 = vld [vmem:[%s1008_s17 + $0x28] sm:$0xff]  }
  0x10   : > { %172 = vst.msk [vmem:[#allocation2] sm:$0xff] %vm171_vm0, %v965_v1  ;;  %v913_v11 = vunpack.c.l.bf16 %v936_v8  ;;  %v914_v13 = vunpack.c.h.bf16 %v936_v8  ;;  %v905_v15 = vunpack.c.l.bf16 %v904_v10  ;;  %v906_v16 = vunpack.c.h.bf16 %v904_v10  ;;  %v940_v20 = vld [vmem:[%s1008_s17 + $0x30] sm:$0xff]   ;;  %v941_v22 = vld [vmem:[%s1008_s17 + $0x38] sm:$0xff]   ;;  %v253_v8 = vld [vmem:[%s1264_s1] sm:$0x1] }
  0x11   : > { %173 = vst.msk [vmem:[#allocation2 + $0x8] sm:$0xff] %vm171_vm0, %v965_v1  ;;  %v925_v17 = vunpack.c.l.bf16 %v939_v14  ;;  %v926_v18 = vunpack.c.h.bf16 %v939_v14  ;;  %v917_v19 = vunpack.c.l.bf16 %v937_v2  ;;  %v909_v21 = vunpack.c.l.bf16 %v935_v7 }
  0x12   : > { %174 = vst.msk [vmem:[#allocation2 + $0x10] sm:$0xff] %vm171_vm0, %v965_v1  ;;  %v930_v23 = vunpack.c.h.bf16 %v940_v20  ;;  %v933_v24 = vunpack.c.l.bf16 %v941_v22  ;;  %v934_v25 = vunpack.c.h.bf16 %v941_v22  ;;  %v929_v27 = vunpack.c.l.bf16 %v940_v20 }
  0x13   : > { %175 = vst.msk [vmem:[#allocation2 + $0x18] sm:$0xff] %vm171_vm0, %v965_v1  ;;  %v254_v10 = vunpack.c.l.bf16 %v253_v8 }
  0x14   : > { %229 = vst.msk [vmem:[#allocation2 + $0x3b] sm:$0xff] %vm171_vm0, %v918_v4 }
  0x15   : > { %230 = vst.msk [vmem:[#allocation2 + $0x43] sm:$0xff] %vm171_vm0, %v921_v5 }
  0x16   : > { %231 = vst.msk [vmem:[#allocation2 + $0x4b] sm:$0xff] %vm171_vm0, %v922_v6 }
  0x17   : > { %176 = vst.msk [vmem:[#allocation2 + $0x20] sm:$0xff] %vm171_vm0, %v965_v1 }
  0x18   : > { %177 = vst.msk [vmem:[#allocation2 + $0x28] sm:$0xff] %vm171_vm0, %v965_v1 }
  0x19   : > { %178 = vst.msk [vmem:[#allocation2 + $0x30] sm:$0xff] %vm171_vm0, %v965_v1 }
  0x1a   : > { %183 = vst.msk [vmem:[#allocation2 + $0x58] sm:$0xff] %vm171_vm0, %v965_v1 }
  0x1b   : > { %184 = vst.msk [vmem:[#allocation2 + $0x60] sm:$0xff] %vm171_vm0, %v965_v1 }
  0x1c   : > { %185 = vst.msk [vmem:[#allocation2 + $0x68] sm:$0xff] %vm171_vm0, %v965_v1 }
  0x1d   : > { %v246_v12 = vld [vmem:[#allocation2 + $0x40] ss:$2 sm:$0xff]  ;;  %186 = vst.msk [vmem:[#allocation2 + $0x70] sm:$0xff] %vm171_vm0, %v965_v1  ;;  %v321_v40 = vld [vmem:[#allocation2 + $0x41] ss:$2 sm:$0xff] }
  0x1e   : > { %277 = vperm.xlu2 %954, %v246_v12   ;;  %187 = vst.msk [vmem:[#allocation2 + $0x78] sm:$0xff] %vm171_vm0, %v965_v1  ;;  %v394_v44 = vld [vmem:[#allocation2 + $0x42] ss:$2 sm:$0xff]  ;;  %v469_v54 = vld [vmem:[#allocation2 + $0x43] ss:$2 sm:$0xff] }
  0x1f   : > { %225 = vst.msk [vmem:[#allocation2 + $0x1b] sm:$0xff] %vm171_vm0, %v910_v9  ;;  %v542_v3 = vld [vmem:[#allocation2 + $0x44] ss:$2 sm:$0xff] }
  0x20   : > { %226 = vst.msk [vmem:[#allocation2 + $0x23] sm:$0xff] %vm171_vm0, %v913_v11 }
  0x21   : > { %227 = vst.msk [vmem:[#allocation2 + $0x2b] sm:$0xff] %vm171_vm0, %v914_v13  ;;  %v1066_v13 = vperm.slane %v254_v10, 1 }
  0x22   : > { %222 = vst.msk [vmem:[#allocation2 + $0x3] sm:$0xff] %vm171_vm0, %v905_v15  ;;  %v1068_v15 = vperm.slane %v254_v10, 0 }
  0x23   : > { %223 = vst.msk [vmem:[#allocation2 + $0xb] sm:$0xff] %vm171_vm0, %v906_v16 }
  0x24   : > { %232 = vst.msk [vmem:[#allocation2 + $0x53] sm:$0xff] %vm171_vm0, %v925_v17 }
  0x25   : > { %233 = vst.msk [vmem:[#allocation2 + $0x5b] sm:$0xff] %vm171_vm0, %v926_v18 }
  0x26   : > { %228 = vst.msk [vmem:[#allocation2 + $0x33] sm:$0xff] %vm171_vm0, %v917_v19 }
  0x27   : > { %224 = vst.msk [vmem:[#allocation2 + $0x13] sm:$0xff] %vm171_vm0, %v909_v21 }
  0x28   : > { %v242_v26 = vld [vmem:[#allocation2 + $0x20] ss:$2 sm:$0xff]  ;;  %189 = vst.msk [vmem:[#allocation2 + $0x80] sm:$0x3f] %vm188_vm1, %v965_v1  ;;  %v317_v36 = vld [vmem:[#allocation2 + $0x21] ss:$2 sm:$0xff] }
  0x29   : > { %267 = vperm.xlu1 %953, %v242_v26   ;;  %235 = vst.msk [vmem:[#allocation2 + $0x6b] sm:$0xff] %vm171_vm0, %v930_v23  ;;  %v390_v46 = vld [vmem:[#allocation2 + $0x22] ss:$2 sm:$0xff]  ;;  %v465_v50 = vld [vmem:[#allocation2 + $0x23] ss:$2 sm:$0xff] }
  0x2a   : > { %v238_v28 = vld [vmem:[#allocation2] ss:$2 sm:$0xff]  ;;  %236 = vst.msk [vmem:[#allocation2 + $0x73] sm:$0xff] %vm171_vm0, %v933_v24  ;;  %v313_v32 = vld [vmem:[#allocation2 + $0x1] ss:$2 sm:$0xff] }
  0x2b   : > { %257 = vperm.xlu0 %952, %v238_v28   ;;  %237 = vst.msk [vmem:[#allocation2 + $0x7b] sm:$0xff] %vm171_vm0, %v934_v25  ;;  %v386_v42 = vld [vmem:[#allocation2 + $0x2] ss:$2 sm:$0xff]  ;;  %v461_v52 = vld [vmem:[#allocation2 + $0x3] ss:$2 sm:$0xff] }
  0x2c   : > { %v248_v29 = vld [vmem:[#allocation2 + $0x50] ss:$2 sm:$0xff]  ;;  %234 = vst.msk [vmem:[#allocation2 + $0x63] sm:$0xff] %vm171_vm0, %v929_v27  ;;  %v323_v39 = vld [vmem:[#allocation2 + $0x51] ss:$2 sm:$0xff] }
  0x2d   : > { %282 = vperm.xlu2 %954, %v248_v29   ;;  %v244_v30 = vld [vmem:[#allocation2 + $0x30] ss:$2 sm:$0xff]  ;;  %v319_v35 = vld [vmem:[#allocation2 + $0x31] ss:$2 sm:$0xff]  ;;  %779 = vst.msk [vmem:[#allocation3 + $0x10] sm:$0xff] %vm776_vm2, %v965_v1 }
  0x2e   : > { %v240_v31 = vld [vmem:[#allocation2 + $0x10] ss:$2 sm:$0xff]  ;;  %v315_v37 = vld [vmem:[#allocation2 + $0x11] ss:$2 sm:$0xff]  ;;  %780 = vst.msk [vmem:[#allocation3 + $0x18] sm:$0xff] %vm776_vm2, %v965_v1 }
  0x2f   : > { %v388_v41 = vld [vmem:[#allocation2 + $0x12] ss:$2 sm:$0xff]  ;;  %v463_v51 = vld [vmem:[#allocation2 + $0x13] ss:$2 sm:$0xff]  ;;  %777 = vst.msk [vmem:[#allocation3] sm:$0xff] %vm776_vm2, %v965_v1 }
  0x30   : > { %v392_v45 = vld [vmem:[#allocation2 + $0x32] ss:$2 sm:$0xff]  ;;  %v471_v53 = vld [vmem:[#allocation2 + $0x53] ss:$2 sm:$0xff]  ;;  %778 = vst.msk [vmem:[#allocation3 + $0x8] sm:$0xff] %vm776_vm2, %v965_v1 }
  0x31   : > { %272 = vperm.xlu1 %953, %v244_v30   ;;  %v396_v49 = vld [vmem:[#allocation2 + $0x52] ss:$2 sm:$0xff]  ;;  %v467_v55 = vld [vmem:[#allocation2 + $0x33] ss:$2 sm:$0xff]  ;;  %781 = vst.msk [vmem:[#allocation3 + $0x20] sm:$0xff] %vm776_vm2, %v965_v1 }
  0x32   : > { %v252_v33 = vld [vmem:[#allocation2 + $0x70] ss:$2 sm:$0xff]  ;;  %v327_v43 = vld [vmem:[#allocation2 + $0x71] ss:$2 sm:$0xff]  ;;  %782 = vst.msk [vmem:[#allocation3 + $0x28] sm:$0xff] %vm776_vm2, %v965_v1 }
  0x33   : > { %262 = vperm.xlu0 %952, %v240_v31   ;;  %v250_v34 = vld [vmem:[#allocation2 + $0x60] ss:$2 sm:$0xff]  ;;  %v325_v38 = vld [vmem:[#allocation2 + $0x61] ss:$2 sm:$0xff]  ;;  %783 = vst.msk [vmem:[#allocation3 + $0x30] sm:$0xff] %vm776_vm2, %v965_v1 }
  0x34   : > { %v400_v47 = vld [vmem:[#allocation2 + $0x72] ss:$2 sm:$0xff]  ;;  %v398_v48 = vld [vmem:[#allocation2 + $0x62] ss:$2 sm:$0xff]  ;;  %v475_v57 = vld [vmem:[#allocation2 + $0x73] ss:$2 sm:$0xff] }
  0x35   : > { %330 = vperm.xlu2 %954, %v313_v32   ;;  %v534_v56 = vld [vmem:[#allocation2 + $0x4] ss:$2 sm:$0xff]  ;;  %v473_v58 = vld [vmem:[#allocation2 + $0x63] ss:$2 sm:$0xff]  ;;  %v540_v59 = vld [vmem:[#allocation2 + $0x34] ss:$2 sm:$0xff] }
  0x36   : > { %v538_v61 = vld [vmem:[#allocation2 + $0x24] ss:$2 sm:$0xff]  ;;  %v536_v62 = vld [vmem:[#allocation2 + $0x14] ss:$2 sm:$0xff]  ;;  %v611_v4 = vld [vmem:[#allocation2 + $0x15] ss:$2 sm:$0xff] }
  0x37   : > { %v546_v63 = vld [vmem:[#allocation2 + $0x64] ss:$2 sm:$0xff]  ;;  %v544_v0 = vld [vmem:[#allocation2 + $0x54] ss:$2 sm:$0xff]  ;;  %v609_v5 = vld [vmem:[#allocation2 + $0x5] ss:$2 sm:$0xff] }
  0x38   : > { %v548_v7 = vld [vmem:[#allocation2 + $0x74] ss:$2 sm:$0xff]  ;;  %v617_v9 = vld [vmem:[#allocation2 + $0x45] ss:$2 sm:$0xff]  ;;  %v615_v11 = vld [vmem:[#allocation2 + $0x35] ss:$2 sm:$0xff] }
  0x39   : > { %292 = vperm.xlu1 %953, %v252_v33   ;;  %v613_v14 = vld [vmem:[#allocation2 + $0x25] ss:$2 sm:$0xff]  ;;  %v623_v16 = vld [vmem:[#allocation2 + $0x75] ss:$2 sm:$0xff]  ;;  %v686_v26 = vld [vmem:[#allocation2 + $0x26] ss:$2 sm:$0xff] }
  0x3a   : > { %v621_v21 = vld [vmem:[#allocation2 + $0x65] ss:$2 sm:$0xff]  ;;  %v619_v24 = vld [vmem:[#allocation2 + $0x55] ss:$2 sm:$0xff]  ;;  %v684_v31 = vld [vmem:[#allocation2 + $0x16] ss:$2 sm:$0xff] }
  0x3b   : > { %287 = vperm.xlu0 %952, %v250_v34   ;;  %v682_v33 = vld [vmem:[#allocation2 + $0x6] ss:$2 sm:$0xff]  ;;  %v692_v34 = vld [vmem:[#allocation2 + $0x56] ss:$2 sm:$0xff]  ;;  %784 = vst.msk [vmem:[#allocation3 + $0x38] sm:$0xff] %vm776_vm2, %v965_v1 }
  0x3c   : > { %786 = vst.msk [vmem:[#allocation3 + $0x40] sm:$0x3] %vm785_vm3, %v965_v1 }
  0x3d   : > { %345 = vperm.xlu2 %954, %v319_v35  }
  0x41   : > { %340 = vperm.xlu1 %953, %v317_v36   ;;  %v1077_v36 = vld [vmem:[%s1264_s1] sm:$0x2] }
  0x43   : > { %335 = vperm.xlu0 %952, %v315_v37  }
  0x45   : > { %360 = vperm.xlu2 %954, %v325_v38  }
  0x49   : > { %355 = vperm.xlu1 %953, %v323_v39  }
  0x4b   : > { %350 = vperm.xlu0 %952, %v321_v40   ;;  %v690_v40 = vld [vmem:[#allocation2 + $0x46] ss:$2 sm:$0xff] }
  0x4d   : > { %410 = vperm.xlu2 %954, %v388_v41  }
  0x51   : > { %405 = vperm.xlu1 %953, %v386_v42   ;;  %v402_v42 = vunpack.c.l.bf16 %v1077_v36 }
  0x53   : > { %365 = vperm.xlu0 %952, %v327_v43  }
  0x55   : > { %425 = vperm.xlu2 %954, %v394_v44   ;;  %v688_v44 = vld [vmem:[#allocation2 + $0x36] ss:$2 sm:$0xff] }
  0x59   : > { %420 = vperm.xlu1 %953, %v392_v45  }
  0x5b   : > { %415 = vperm.xlu0 %952, %v390_v46  }
  0x5d   : > { %440 = vperm.xlu2 %954, %v400_v47   ;;  %v1085_v47 = vperm.slane %v402_v42, 2 }
  0x61   : > { %435 = vperm.xlu1 %953, %v398_v48  }
  0x63   : > { %430 = vperm.xlu0 %952, %v396_v49  }
  0x65   : > { %488 = vperm.xlu2 %954, %v465_v50  }
  0x69   : > { %483 = vperm.xlu1 %953, %v463_v51  }
  0x6b   : > { %478 = vperm.xlu0 %952, %v461_v52  }
  0x6d   : > { %503 = vperm.xlu2 %954, %v471_v53   ;;  %v696_v53 = vld [vmem:[#allocation2 + $0x76] ss:$2 sm:$0xff] }
  0x71   : > { %498 = vperm.xlu1 %953, %v469_v54  }
  0x73   : > { %493 = vperm.xlu0 %952, %v467_v55  }
  0x75   : > { %553 = vperm.xlu2 %954, %v534_v56  }
  0x78   : > { %v1059_v60 = vpop.permute.xlu2 %277 }
  0x79   : > { %513 = vperm.xlu1 %953, %v475_v57   ;;  %v694_v57 = vld [vmem:[#allocation2 + $0x66] ss:$2 sm:$0xff] }
  0x7b   : > { %508 = vperm.xlu0 %952, %v473_v58  }
  0x7d   : > { %568 = vperm.xlu2 %954, %v540_v59  }
  0x81   : > { %563 = vperm.xlu1 %953, %v538_v61  }
  0x83   : > { %558 = vperm.xlu0 %952, %v536_v62  }
  0x85   : > { %583 = vperm.xlu2 %954, %v546_v63  }
  0x87   : > { %v1061_v2 = vpop.permute.xlu2 %282 }
  0x88   : > { %v301_v61 = vmul.f32 %v1068_v15, %v1061_v2 }
  0x89   : > { %578 = vperm.xlu1 %953, %v544_v0   ;;  %v300_v0 = vmul.f32 %v1068_v15, %v1059_v60 }
  0x8b   : > { %573 = vperm.xlu0 %952, %v542_v3  }
  0x8d   : > { %631 = vperm.xlu2 %954, %v611_v4  }
  0x8f   : > { %v331_v6 = vpop.permute.xlu2 %330 }
  0x90   : > { %v369_v18 = vmul.f32 %v1066_v13, %v331_v6 }
  0x91   : > { %626 = vperm.xlu1 %953, %v609_v5  }
  0x93   : > { %588 = vperm.xlu0 %952, %v548_v7  }
  0x95   : > { %646 = vperm.xlu2 %954, %v617_v9  }
  0x97   : > { %v346_v12 = vpop.permute.xlu2 %345 }
  0x98   : > { %v372_v25 = vmul.f32 %v1066_v13, %v346_v12 }
  0x99   : > { %641 = vperm.xlu1 %953, %v615_v11  }
  0x9b   : > { %636 = vperm.xlu0 %952, %v613_v14   ;;  %v268_v17 = vpop.permute.xlu1 %267 }
  0x9c   : > { %v298_v46 = vmul.f32 %v1068_v15, %v268_v17 }
  0x9d   : > { %v258_v19 = vpop.permute.xlu0 %257  ;;  %661 = vperm.xlu2 %954, %v623_v16  }
  0x9e   : > { %v296_v20 = vmul.f32 %v1068_v15, %v258_v19 }
  0x9f   : > { %v361_v22 = vpop.permute.xlu2 %360 }
  0xa0   : > { %v377_v23 = vadd.f32 %v369_v18, %v296_v20  ;;  %v375_v38 = vmul.f32 %v1066_v13, %v361_v22 }
  0xa1   : > { %656 = vperm.xlu1 %953, %v621_v21  }
  0xa3   : > { %651 = vperm.xlu0 %952, %v619_v24   ;;  %v273_v27 = vpop.permute.xlu1 %272 }
  0xa4   : > { %v299_v28 = vmul.f32 %v1068_v15, %v273_v27 }
  0xa5   : > { %v263_v29 = vpop.permute.xlu0 %262  ;;  %711 = vperm.xlu2 %954, %v686_v26  }
  0xa6   : > { %v380_v30 = vadd.f32 %v372_v25, %v299_v28  ;;  %v297_v50 = vmul.f32 %v1068_v15, %v263_v29 }
  0xa7   : > { %v411_v32 = vpop.permute.xlu2 %410 }
  0xa8   : > { %v445_v55 = vmul.f32 %v1085_v47, %v411_v32 }
  0xa9   : > { %706 = vperm.xlu1 %953, %v684_v31  }
  0xab   : > { %701 = vperm.xlu0 %952, %v682_v33   ;;  %v293_v35 = vpop.permute.xlu1 %292 }
  0xac   : > { %v303_v11 = vmul.f32 %v1068_v15, %v293_v35 }
  0xad   : > { %v288_v37 = vpop.permute.xlu0 %287  ;;  %726 = vperm.xlu2 %954, %v692_v34  }
  0xae   : > { %v302_v39 = vmul.f32 %v1068_v15, %v288_v37 }
  0xaf   : > { %v426_v41 = vpop.permute.xlu2 %425 }
  0xb0   : > { %v383_v43 = vadd.f32 %v375_v38, %v302_v39  ;;  %v448_v6 = vmul.f32 %v1085_v47, %v426_v41  ;;  %v549_v41 = vld [vmem:[%s1264_s1] sm:$0x4] }
  0xb1   : > { %721 = vperm.xlu1 %953, %v690_v40  }
  0xb3   : > { %716 = vperm.xlu0 %952, %v688_v44   ;;  %v341_v45 = vpop.permute.xlu1 %340 }
  0xb4   : > { %v371_v48 = vmul.f32 %v1066_v13, %v341_v45 }
  0xb5   : > { %v336_v49 = vpop.permute.xlu0 %335 }
  0xb6   : > { %v1089_v51 = vadd.f32 %v371_v48, %v298_v46  ;;  %v370_v52 = vmul.f32 %v1066_v13, %v336_v49  ;;  %v550_v46 = vunpack.c.l.bf16 %v549_v41  ;;  %v697_v48 = vld [vmem:[%s1264_s1] sm:$0x8] }
  0xb7   : > { %v441_v54 = vpop.permute.xlu2 %440 }
  0xb8   : > { %v378_v56 = vadd.f32 %v370_v52, %v297_v50  ;;  %v451_v16 = vmul.f32 %v1085_v47, %v441_v54  ;;  %v1167_v50 = vperm.slane %v402_v42, 3  ;;  %v698_v54 = vunpack.c.l.bf16 %v697_v48 }
  0xb9   : > { %736 = vperm.xlu1 %953, %v696_v53   ;;  %v1170_v53 = vperm.slane %v550_v46, 4 }
  0xba   : > { %v1093_v58 = vadd.f32 %v445_v55, %v378_v56 }
  0xbb   : > { %731 = vperm.xlu0 %952, %v694_v57   ;;  %v356_v59 = vpop.permute.xlu1 %355 }
  0xbc   : > { %v374_v62 = vmul.f32 %v1066_v13, %v356_v59 }
  0xbd   : > { %v351_v63 = vpop.permute.xlu0 %350 }
  0xbe   : > { %v1100_v3 = vadd.f32 %v374_v62, %v301_v61  ;;  %v373_v4 = vmul.f32 %v1066_v13, %v351_v63  ;;  %v1175_v62 = vperm.slane %v550_v46, 5 }
  0xbf   : > { %v489_v5 = vpop.permute.xlu2 %488 }
  0xc0   : > { %v381_v7 = vadd.f32 %v373_v4, %v300_v0  ;;  %v519_v55 = vmul.f32 %v1167_v50, %v489_v5  ;;  %v1177_v0 = vperm.slane %v698_v54, 6  ;;  %v1185_v5 = vld [vmem:[%s1265_s2] ss:$0 sm:$0xff] }
  0xc2   : > { %v1104_v8 = vadd.f32 %v448_v6, %v381_v7 }
  0xc3   : > { %v406_v9 = vpop.permute.xlu1 %405 }
  0xc4   : > { %v444_v10 = vmul.f32 %v1085_v47, %v406_v9 }
  0xc5   : > { %v366_v2 = vpop.permute.xlu0 %365 }
  0xc6   : > { %v1108_v12 = vadd.f32 %v444_v10, %v377_v23  ;;  %v376_v60 = vmul.f32 %v1066_v13, %v366_v2 }
  0xc7   : > { %v504_v14 = vpop.permute.xlu2 %503 }
  0xc8   : > { %v384_v17 = vadd.f32 %v376_v60, %v303_v11 }
  0xca   : > { %v1112_v18 = vadd.f32 %v451_v16, %v384_v17 }
  0xcb   : > { %v421_v19 = vpop.permute.xlu1 %420 }
  0xcc   : > { %v447_v20 = vmul.f32 %v1085_v47, %v421_v19 }
  0xcd   : > { %v416_v21 = vpop.permute.xlu0 %415 }
  0xce   : > { %v1115_v22 = vadd.f32 %v447_v20, %v380_v30  ;;  %v446_v45 = vmul.f32 %v1085_v47, %v416_v21 }
  0xcf   : > { %v1117_v24 = vpop.permute.xlu2 %553 }
  0xd0   : > { %v454_v52 = vadd.f32 %v446_v45, %v1089_v51 }
  0xd2   : > { %v527_v63 = vadd.f32 %v519_v55, %v454_v52 }
  0xd3   : > { %v436_v25 = vpop.permute.xlu1 %435 }
  0xd4   : > { %v450_v15 = vmul.f32 %v1085_v47, %v436_v25 }
  0xd5   : > { %v431_v23 = vpop.permute.xlu0 %430 }
  0xd6   : > { %v1120_v26 = vadd.f32 %v450_v15, %v383_v43  ;;  %v449_v61 = vmul.f32 %v1085_v47, %v431_v23  ;;  %v522_v47 = vmul.f32 %v1167_v50, %v504_v14 }
  0xd7   : > { %v1122_v13 = vpop.permute.xlu2 %568 }
  0xd8   : > { %v457_v4 = vadd.f32 %v449_v61, %v1100_v3 }
  0xda   : > { %v530_v16 = vadd.f32 %v522_v47, %v457_v4 }
  0xdb   : > { %v484_v27 = vpop.permute.xlu1 %483 }
  0xdc   : > { %v518_v9 = vmul.f32 %v1167_v50, %v484_v27 }
  0xdd   : > { %v479_v28 = vpop.permute.xlu0 %478 }
  0xde   : > { %v517_v11 = vmul.f32 %v1167_v50, %v479_v28  ;;  %v526_v21 = vadd.f32 %v518_v9, %v1093_v58 }
  0xdf   : > { %v1126_v31 = vpop.permute.xlu2 %583 }
  0xe0   : > { %v525_v23 = vadd.f32 %v517_v11, %v1108_v12 }
  0xe3   : > { %v1124_v29 = vpop.permute.xlu1 %498 }
  0xe4   : > { %v521_v58 = vmul.f32 %v1167_v50, %v1124_v29 }
  0xe5   : > { %v1128_v32 = vpop.permute.xlu0 %493 }
  0xe6   : > { %v520_v12 = vmul.f32 %v1167_v50, %v1128_v32  ;;  %v529_v29 = vadd.f32 %v521_v58, %v1104_v8 }
  0xe7   : > { %v1132_v33 = vpop.permute.xlu2 %631 }
  0xe8   : > { %v528_v61 = vadd.f32 %v520_v12, %v1115_v22 }
  0xeb   : > { %v1130_v30 = vpop.permute.xlu1 %513 }
  0xec   : > { %v524_v8 = vmul.f32 %v1167_v50, %v1130_v30 }
  0xed   : > { %v1134_v34 = vpop.permute.xlu0 %508 }
  0xef   : > { %v1152_v38 = vpop.permute.xlu2 %646 }
  0xf3   : > { %v564_v35 = vpop.permute.xlu1 %563 }
  0xf4   : > { %v594_v56 = vmul.f32 %v1170_v53, %v564_v35 }
  0xf5   : > { %v559_v37 = vpop.permute.xlu0 %558 }
  0xf6   : > { %v602_v42 = vadd.f32 %v594_v56, %v527_v63  ;;  %v593_v3 = vmul.f32 %v1170_v53, %v559_v37  ;;  %v592_v37 = vmul.f32 %v1170_v53, %v1117_v24 }
  0xf7   : > { %v1157_v43 = vpop.permute.xlu2 %661 }
  0xf8   : > { %v601_v27 = vadd.f32 %v593_v3, %v526_v21  ;;  %v600_v45 = vadd.f32 %v592_v37, %v525_v23 }
  0xfb   : > { %v579_v39 = vpop.permute.xlu1 %578 }
  0xfc   : > { %v597_v10 = vmul.f32 %v1170_v53, %v579_v39  ;;  %v666_v39 = vmul.f32 %v1175_v62, %v1132_v33 }
  0xfd   : > { %v574_v40 = vpop.permute.xlu0 %573 }
  0xfe   : > { %v605_v14 = vadd.f32 %v597_v10, %v530_v16  ;;  %v596_v48 = vmul.f32 %v1170_v53, %v574_v40  ;;  %v674_v54 = vadd.f32 %v666_v39, %v601_v27 }
  0xff   : > { %v712_v57 = vpop.permute.xlu2 %711 }
 0x100   : > { %v742_v6 = vmul.f32 %v1177_v0, %v712_v57  ;;  %v604_v32 = vadd.f32 %v596_v48, %v529_v29 }
 0x103   : > { %v627_v44 = vpop.permute.xlu1 %626 }
 0x104   : > { %v665_v41 = vmul.f32 %v1175_v62, %v627_v44 }
 0x105   : > { %v1163_v49 = vpop.permute.xlu0 %588 }
 0x106   : > { %v673_v56 = vadd.f32 %v665_v41, %v600_v45  ;;  %v599_v9 = vmul.f32 %v1170_v53, %v1163_v49 }
 0x107   : > { %v727_v19 = vpop.permute.xlu2 %726 }
 0x108   : > { %v745_v28 = vmul.f32 %v1177_v0, %v727_v19  ;;  %v672_v19 = vmul.f32 %v1175_v62, %v1157_v43 }
 0x10b   : > { %v642_v59 = vpop.permute.xlu1 %641 }
 0x10d   : > { %v637_v36 = vpop.permute.xlu0 %636 }
 0x10e   : > { %v667_v51 = vmul.f32 %v1175_v62, %v637_v36  ;;  %v595_v36 = vmul.f32 %v1170_v53, %v1122_v13 }
 0x110   : > { %v675_v7 = vadd.f32 %v667_v51, %v602_v42  ;;  %v669_v42 = vmul.f32 %v1175_v62, %v1152_v38  ;;  %v668_v51 = vmul.f32 %v1175_v62, %v642_v59  ;;  %v532_v59 = vadd.f32 %v524_v8, %v1112_v18 }
 0x112   : > { %v750_v2 = vadd.f32 %v742_v6, %v675_v7  ;;  %v523_v6 = vmul.f32 %v1167_v50, %v1134_v34  ;;  %v603_v7 = vadd.f32 %v595_v36, %v528_v61  ;;  %v677_v30 = vadd.f32 %v669_v42, %v604_v32 }
 0x113   : > { %v1191_v60 = vpop.permute.xlu1 %656  ;;  %v607_v3 = vadd.f32 %v599_v9, %v532_v59 }
 0x114   : > { %v762_v17 = vadd.f32 %v1185_v5, %v750_v2  ;;  %v676_v2 = vadd.f32 %v668_v51, %v603_v7  ;;  %v531_v50 = vadd.f32 %v523_v6, %v1120_v26  ;;  %v671_v18 = vmul.f32 %v1175_v62, %v1191_v60 }
 0x115   : > { %v652_v20 = vpop.permute.xlu0 %651 }
 0x116   : > { %v770_v25 = vmax.f32 %v762_v17, 0.0  ;;  %v670_v15 = vmul.f32 %v1175_v62, %v652_v20  ;;  %v598_v17 = vmul.f32 %v1170_v53, %v1126_v31 }
 0x118   : > { %789 = vst.msk [vmem:[#allocation3 + $0x11] sm:$0xff] %vm776_vm2, %v770_v25  ;;  %v678_v35 = vadd.f32 %v670_v15, %v605_v14  ;;  %v606_v25 = vadd.f32 %v598_v17, %v531_v50  ;;  %v680_v15 = vadd.f32 %v672_v19, %v607_v3 }
 0x11a   : > { %v753_v1 = vadd.f32 %v745_v28, %v678_v35  ;;  %v679_v53 = vadd.f32 %v671_v18, %v606_v25 }
 0x11b   : > { %v707_v46 = vpop.permute.xlu1 %706 }
 0x11c   : > { %v765_v52 = vadd.f32 %v1185_v5, %v753_v1  ;;  %v741_v24 = vmul.f32 %v1177_v0, %v707_v46 }
 0x11d   : > { %v702_v55 = vpop.permute.xlu0 %701 }
 0x11e   : > { %v773_v33 = vmax.f32 %v765_v52, 0.0  ;;  %v749_v57 = vadd.f32 %v741_v24, %v674_v54  ;;  %v740_v44 = vmul.f32 %v1177_v0, %v702_v55 }
 0x120   : > { %792 = vst.msk [vmem:[#allocation3 + $0x29] sm:$0xff] %vm776_vm2, %v773_v33  ;;  %v761_v40 = vadd.f32 %v1185_v5, %v749_v57  ;;  %v748_v63 = vadd.f32 %v740_v44, %v673_v56 }
 0x122   : > { %v769_v4 = vmax.f32 %v761_v40, 0.0  ;;  %v760_v22 = vadd.f32 %v1185_v5, %v748_v63 }
 0x123   : > { %v722_v47 = vpop.permute.xlu1 %721 }
 0x124   : > { %788 = vst.msk [vmem:[#allocation3 + $0x9] sm:$0xff] %vm776_vm2, %v769_v4  ;;  %v768_v13 = vmax.f32 %v760_v22, 0.0  ;;  %v744_v10 = vmul.f32 %v1177_v0, %v722_v47 }
 0x125   : > { %v717_v38 = vpop.permute.xlu0 %716 }
 0x126   : > { %787 = vst.msk [vmem:[#allocation3 + $0x1] sm:$0xff] %vm776_vm2, %v768_v13  ;;  %v752_v11 = vadd.f32 %v744_v10, %v677_v30  ;;  %v743_v34 = vmul.f32 %v1177_v0, %v717_v38 }
 0x128   : > { %v764_v49 = vadd.f32 %v1185_v5, %v752_v11  ;;  %v751_v16 = vadd.f32 %v743_v34, %v676_v2 }
 0x12a   : > { %v772_v20 = vmax.f32 %v764_v49, 0.0  ;;  %v763_v21 = vadd.f32 %v1185_v5, %v751_v16 }
 0x12b   : > { %v737_v14 = vpop.permute.xlu1 %736 }
 0x12c   : > { %791 = vst.msk [vmem:[#allocation3 + $0x21] sm:$0xff] %vm776_vm2, %v772_v20  ;;  %v771_v26 = vmax.f32 %v763_v21, 0.0  ;;  %v747_v23 = vmul.f32 %v1177_v0, %v737_v14 }
 0x12d   : > { %v795_v27 = vld [vmem:[#allocation3] ss:$2 sm:$0xff]  ;;  %v803_v28 = vld [vmem:[#allocation3 + $0x1] ss:$2 sm:$0xff]  ;;  %v732_v31 = vpop.permute.xlu0 %731 }
 0x12e   : > { %v818_v43 = vmax.f32 %v795_v27, %v803_v28  ;;  %790 = vst.msk [vmem:[#allocation3 + $0x19] sm:$0xff] %vm776_vm2, %v771_v26  ;;  %v755_v62 = vadd.f32 %v747_v23, %v680_v15  ;;  %v746_v60 = vmul.f32 %v1177_v0, %v732_v31  ;;  %v811_v35 = vld [vmem:[#allocation3 + $0x2] ss:$2 sm:$0xff] }
 0x130   : > { %v822_v37 = vmax.f32 %v818_v43, %v811_v35  ;;  %v767_v58 = vadd.f32 %v1185_v5, %v755_v62  ;;  %v754_v39 = vadd.f32 %v746_v60, %v679_v53 }
 0x132   : > { %v826_v41 = vpack.c.bf16 %v822_v37, %v822_v37  ;;  %v775_v1 = vmax.f32 %v767_v58, 0.0  ;;  %v766_v12 = vadd.f32 %v1185_v5, %v754_v39 }
 0x133   : > { %v807_v45 = vld [vmem:[#allocation3 + $0x21] ss:$2 sm:$0xff]  ;;  %v815_v29 = vld [vmem:[#allocation3 + $0x22] ss:$2 sm:$0xff] }
 0x134   : > { %831 = vst.msk [vmem:[%s170_s4] sm:$0xf] %vm830_vm4, %v826_v41  ;;  %v774_v46 = vmax.f32 %v766_v12, 0.0 }
 0x135   : > { %v797_v48 = vld [vmem:[#allocation3 + $0x10] ss:$2 sm:$0xff]  ;;  %v799_v0 = vld [vmem:[#allocation3 + $0x20] ss:$2 sm:$0xff]  ;;  %v805_v52 = vld [vmem:[#allocation3 + $0x11] ss:$2 sm:$0xff] }
 0x136   : > { %v819_v54 = vmax.f32 %v797_v48, %v805_v52  ;;  %v820_v24 = vmax.f32 %v799_v0, %v807_v45  ;;  %794 = vst.msk [vmem:[#allocation3 + $0x39] sm:$0xff] %vm776_vm2, %v775_v1  ;;  %v813_v55 = vld [vmem:[#allocation3 + $0x12] ss:$2 sm:$0xff] }
 0x137   : > { %793 = vst.msk [vmem:[#allocation3 + $0x31] sm:$0xff] %vm776_vm2, %v774_v46 }
 0x138   : > { %v823_v56 = vmax.f32 %v819_v54, %v813_v55  ;;  %v824_v33 = vmax.f32 %v820_v24, %v815_v29 }
 0x13a   : > { %v827_v57 = vpack.c.bf16 %v823_v56, %v823_v56  ;;  %v828_v44 = vpack.c.bf16 %v824_v33, %v824_v33 }
 0x13c   : > { %832 = vst.msk [vmem:[%s170_s4 + $0x4] sm:$0xf] %vm830_vm4, %v827_v57 }
 0x13d   : > { %833 = vst.msk [vmem:[%s170_s4 + $0x8] sm:$0xf] %vm830_vm4, %v828_v44 }
 0x13e   : > { %v801_v5 = vld [vmem:[#allocation3 + $0x30] ss:$2 sm:$0xff]  ;;  %v809_v61 = vld [vmem:[#allocation3 + $0x31] ss:$2 sm:$0xff] }
 0x13f   : > { %v821_v32 = vmax.f32 %v801_v5, %v809_v61  ;;  %v817_v40 = vld [vmem:[#allocation3 + $0x32] ss:$2 sm:$0xff] }
 0x141   : > { %v825_v63 = vmax.f32 %v821_v32, %v817_v40 }
 0x143   : > { %v829_v36 = vpack.c.bf16 %v825_v63, %v825_v63 }
 0x145   : > { %834 = vst.msk [vmem:[%s170_s4 + $0xc] sm:$0xf] %vm830_vm4, %v829_v36 }
 0x146 PF: > { %s13_s12 = sadd.s32 1, %s962_s12  }
 0x147   : > { %p10_p4 = scmp.ge.s32.totalorder %s13_s12, 4  }
 0x149   :  { %12 = sbr.rel (!%p10_p4) target bundleno = 1 (0x1), region = 128 }

// kernel: encoder1d_forward.10
= control target key start
LH: loop header
LB: loop body
LE: loop exit
PB: predicated region body
PF: predicated region fallthrough
CT: control target
= control target key end

     0   :  { %10 = vsyncpa [#allocation5], 0  ;;  %s1023_s18 = smov 0   ;;  %s1175_s0 = inlined_call_operand.vmem [shape: bf16[2,32,64], index: 0, kind: input, shape index: {}]   ;;  %s1176_s1 = inlined_call_operand.vmem [shape: bf16[192,64], index: 1, kind: input, shape index: {}]   ;;  %s1177_s2 = inlined_call_operand.hbm [shape: f32[1,64], index: 2, kind: input, shape index: {}]   ;;  %s1178_s3 = inlined_call_operand.vmem [shape: bf16[192,64], index: 3, kind: input, shape index: {}]   ;;  %s1179_s4 = inlined_call_operand.vmem [shape: f32[1,64], index: 4, kind: input, shape index: {}]   ;;  %s1180_s5 = inlined_call_operand.vmem [shape: bf16[2,32,64], index: 5, kind: output, shape index: {}]  }
   0x1 LB: > { %s763_s19 = sadd.s32 4294967295, %s989_s18   ;;  %p765_p0 = scmp.ge.s32.totalorder %s989_s18, 1  ;;  %s989_s18 = sphi %s1023_s18, %s16_s18  }
   0x2   : > { %p157_p1 = scmp.lt.s32.totalorder %s989_s18, 3  ;;  %s172_s22 = sshll.u32 %s1177_s2, 4  ;;  %s173_s22 = int_to_ptr.hbm [resolvable:$true] %s172_s22 }
   0x3   : > { %p935_p3 = scmp.eq.s32.totalorder %s763_s19, 0  ;;  %s991_s23 = smov [#allocation4]  }
   0x4   : > { %p158_p2 = pnand %p765_p0, %p157_p1  ;;  %s174_s24 = sshll.u32 %s991_s23, 4  ;;  %s175_s24 = int_to_ptr.vmem [resolvable:$true] %s174_s24 }
   0x6   : > { %p931_p4 = pneg %p158_p2  ;;  %201 = sbr.rel (%p158_p2) target bundleno = 375 (0x177), region = 40 }
   0x8   : > { %p932_p5 = pnand %p935_p3, %p931_p4 }
   0xa   : > { %934 = dma.hbm_to_vmem [thread:$0]  (!%p932_p5), %s173_s22, 16, %s175_s24, [#allocation5]  }
   0xb   : > { %984 = dma.done.wait (%p935_p3), [#allocation5], 16  }
   0xc   : > { %986 = vsyncadd (%p935_p3), [#allocation5], 4294967280  ;;  %p230_p6 = scmp.lt.s32.totalorder %s763_s19, 1  ;;  %vm241_vm0 = vcmask 523264   ;;  %vm246_vm1 = vcmask 517120   ;;  %v992_v0 = vmov 0.0  }
   0xd   : > { %244 = vst.msk [vmem:[#allocation2 + $0x10] sm:$0xff] %vm241_vm0, %v992_v0  ;;  %v893_v1 = vld [vmem:[%s1176_s1 + $0x38] sm:$0xff]  ;;  %v892_v3 = vld [vmem:[%s1176_s1 + $0x30] sm:$0xff]  ;;  %v891_v11 = vld [vmem:[%s1176_s1 + $0x28] sm:$0xff]  ;;  %vm691_vm2 = vcmask 519168  }
   0xe   : > { %s1182_s19 = smov (!%p230_p6, %s763_s19), 1  ;;  %245 = vst.msk [vmem:[#allocation2 + $0x18] sm:$0xff] %vm241_vm0, %v992_v0  ;;  %v889_v2 = vld [vmem:[%s1176_s1 + $0x18] sm:$0xff]  ;;  %919 = vmatpush.bf16.msra.mxu2 %v893_v1  ;;  %v888_v4 = vld [vmem:[%s1176_s1 + $0x10] sm:$0xff]  ;;  %322 = vmatpush.bf16.msra.mxu0 %v893_v1  ;;  %v887_v12 = vld [vmem:[%s1176_s1 + $0x8] sm:$0xff] }
   0xf   : > { %247 = vst.msk [vmem:[#allocation2 + $0x20] sm:$0x3] %vm246_vm1, %v992_v0  ;;  %s884_s25 = sshll.u32 %s1182_s19, 4  ;;  %923 = vmatpush.bf16.msra.mxu3 %v889_v2  ;;  %371 = vmatpush.bf16.msra.mxu1 %v889_v2  ;;  %v890_v13 = vld [vmem:[%s1176_s1 + $0x20] sm:$0xff]  ;;  %v897_v15 = vld [vmem:[%s1176_s1 + $0x58] sm:$0xff]  ;;  %v896_v21 = vld [vmem:[%s1176_s1 + $0x50] sm:$0xff] }
  0x10   : > { %242 = vst.msk [vmem:[#allocation2] sm:$0xff] %vm241_vm0, %v992_v0  ;;  %s234_s28 = scalar_lea.vmem %s1175_s0, %s884_s25  ;;  %v886_v14 = vld [vmem:[%s1176_s1] sm:$0xff]  ;;  %v895_v29 = vld [vmem:[%s1176_s1 + $0x48] sm:$0xff]  ;;  %v905_v37 = vld [vmem:[%s1178_s3 + $0x38] sm:$0xff]  ;;  %s239_s12 = scalar_lea.vmem %s1180_s5, %s884_s25 }
  0x11   : > { %243 = vst.msk [vmem:[#allocation2 + $0x8] sm:$0xff] %vm241_vm0, %v992_v0  ;;  %v918_v5 = vld [vmem:[%s234_s28 + $0x8] sm:$0xff]   ;;  %v911_v8 = vld [vmem:[%s234_s28] sm:$0xff]   ;;  %v901_v38 = vld [vmem:[%s1178_s3 + $0x18] sm:$0xff] }
  0x12   : > { %465 = vst.msk [vmem:[#allocation3] sm:$0xff] %vm241_vm0, %v992_v0  ;;  %v916_v6 = vunpack.c.l.bf16 %v918_v5  ;;  %v917_v7 = vunpack.c.h.bf16 %v918_v5  ;;  %v913_v9 = vunpack.c.h.bf16 %v911_v8  ;;  %v912_v10 = vunpack.c.l.bf16 %v911_v8  ;;  %920 = vmatpush.bf16.msra.mxu2 %v892_v3  ;;  %323 = vmatpush.bf16.msra.mxu0 %v892_v3  ;;  %v894_v30 = vld [vmem:[%s1176_s1 + $0x40] sm:$0xff]  ;;  %v904_v39 = vld [vmem:[%s1178_s3 + $0x30] sm:$0xff]  ;;  %v903_v42 = vld [vmem:[%s1178_s3 + $0x28] sm:$0xff] }
  0x13   : > { %466 = vst.msk [vmem:[#allocation3 + $0x8] sm:$0xff] %vm241_vm0, %v992_v0  ;;  %924 = vmatpush.bf16.msra.mxu3 %v888_v4  ;;  %372 = vmatpush.bf16.msra.mxu1 %v888_v4  ;;  %v900_v40 = vld [vmem:[%s1178_s3 + $0x10] sm:$0xff]  ;;  %v909_v43 = vld [vmem:[%s1178_s3 + $0x58] sm:$0xff]  ;;  %v899_v44 = vld [vmem:[%s1178_s3 + $0x8] sm:$0xff] }
  0x14   : > { %467 = vst.msk [vmem:[#allocation3 + $0x10] sm:$0xff] %vm241_vm0, %v992_v0  ;;  %v902_v45 = vld [vmem:[%s1178_s3 + $0x20] sm:$0xff]  ;;  %v908_v46 = vld [vmem:[%s1178_s3 + $0x50] sm:$0xff]  ;;  %v907_v49 = vld [vmem:[%s1178_s3 + $0x48] sm:$0xff] }
  0x15   : > { %468 = vst.msk [vmem:[#allocation3 + $0x18] sm:$0xff] %vm241_vm0, %v992_v0  ;;  %v898_v47 = vld [vmem:[%s1178_s3] sm:$0xff]  ;;  %v947_v54 = vld [vmem:[#allocation4] ss:$0 sm:$0xff] }
  0x16   : > { %469 = vst.msk [vmem:[#allocation3 + $0x20] sm:$0x3] %vm246_vm1, %v992_v0  ;;  %921 = vmatpush.bf16.msra.mxu2 %v891_v11  ;;  %324 = vmatpush.bf16.msra.mxu0 %v891_v11  ;;  %v906_v52 = vld [vmem:[%s1178_s3 + $0x40] sm:$0xff] }
  0x17   : > { %258 = vst.msk [vmem:[#allocation2 + $0x11] sm:$0xff] %vm241_vm0, %v916_v6  ;;  %925 = vmatpush.bf16.msra.mxu3 %v887_v12  ;;  %373 = vmatpush.bf16.msra.mxu1 %v887_v12 }
  0x18   : > { %259 = vst.msk [vmem:[#allocation2 + $0x19] sm:$0xff] %vm241_vm0, %v917_v7 }
  0x19   : > { %257 = vst.msk [vmem:[#allocation2 + $0x9] sm:$0xff] %vm241_vm0, %v913_v9 }
  0x1a   : > { %256 = vst.msk [vmem:[#allocation2 + $0x1] sm:$0xff] %vm241_vm0, %v912_v10  ;;  %922 = vmatpush.bf16.msra.mxu2 %v890_v13  ;;  %325 = vmatpush.bf16.msra.mxu0 %v890_v13 }
  0x1b   : > { %926 = vmatpush.bf16.msra.mxu3 %v886_v14  ;;  %374 = vmatpush.bf16.msra.mxu1 %v886_v14 }
  0x1e   : > { %v1083_v16 = vld [vmem:[#allocation2 + $0x11] sm:$0xff]  ;;  %434 = vmatpush.bf16.msrb.mxu2 %v897_v15  ;;  %585 = vmatpush.bf16.msrb.mxu0 %v901_v38 }
  0x1f   : > { %v1085_v17 = vld [vmem:[#allocation2 + $0x19] sm:$0xff]  ;;  %536 = vmatpush.bf16.msrb.mxu3 %v905_v37  ;;  %648 = vmatpush.bf16.msrb.mxu1 %v909_v43 }
  0x20   : > { %v263_v18 = vld [vmem:[#allocation2 + $0x18] sm:$0xff]  ;;  %v279_v19 = vpack.c.bf16 %v1085_v17, %v1083_v16  ;;  %v262_v20 = vld [vmem:[#allocation2 + $0x10] sm:$0xff] }
  0x21   : > { %v1092_v22 = vld [vmem:[#allocation2 + $0x9] sm:$0xff]  ;;  %v265_v23 = vpack.c.bf16 %v263_v18, %v262_v20  ;;  %v1094_v24 = vld [vmem:[#allocation2 + $0x1] sm:$0xff]  ;;  %v388_v34 = vld [vmem:[#allocation2 + $0x12] sm:$0xff] }
  0x22   : > { %v260_v25 = vld [vmem:[#allocation2] sm:$0xff]  ;;  %v261_v26 = vld [vmem:[#allocation2 + $0x8] sm:$0xff]  ;;  %v278_v27 = vpack.c.bf16 %v1092_v22, %v1094_v24  ;;  %791 = vmatmul.msk.bf16.vlgmr.msra.gmra.mxu2 %vm241_vm0, %v279_v19  ;;  %586 = vmatpush.bf16.msrb.mxu0 %v900_v40 }
  0x23   : > { %v264_v28 = vpack.c.bf16 %v261_v26, %v260_v25  ;;  %809 = vmatmul.msk.bf16.vlgmr.msra.gmra.mxu3 %vm241_vm0, %v265_v23  ;;  %435 = vmatpush.bf16.msrb.mxu2 %v896_v21  ;;  %v386_v31 = vld [vmem:[#allocation2 + $0x2] sm:$0xff]  ;;  %v387_v32 = vld [vmem:[#allocation2 + $0xa] sm:$0xff]  ;;  %v389_v35 = vld [vmem:[#allocation2 + $0x1a] sm:$0xff] }
  0x24   : > { %790 = vmatmul.msk.bf16.vlgmr.msra.gmra.mxu0 %vm241_vm0, %v278_v27  ;;  %v390_v33 = vpack.c.bf16 %v387_v32, %v386_v31  ;;  %v391_v36 = vpack.c.bf16 %v389_v35, %v388_v34  ;;  %537 = vmatpush.bf16.msrb.mxu3 %v904_v39  ;;  %v948_v39 = vld [vmem:[%s1179_s4] ss:$0 sm:$0xff] }
  0x25   : > { %808 = vmatmul.msk.bf16.vlgmr.msra.gmra.mxu1 %vm241_vm0, %v264_v28 }
  0x26   : > { %587 = vmatpush.bf16.msrb.mxu0 %v899_v44  ;;  %649 = vmatpush.bf16.msrb.mxu1 %v908_v46 }
  0x27   : > { %436 = vmatpush.bf16.msrb.mxu2 %v895_v29 }
  0x28   : > { %538 = vmatpush.bf16.msrb.mxu3 %v903_v42 }
  0x2a   : > { %588 = vmatpush.bf16.msrb.mxu0 %v898_v47  ;;  %650 = vmatpush.bf16.msrb.mxu1 %v907_v49 }
  0x2b   : > { %437 = vmatpush.bf16.msrb.mxu2 %v894_v30 }
  0x2c   : > { %539 = vmatpush.bf16.msrb.mxu3 %v902_v45 }
  0x2e   : > { %651 = vmatpush.bf16.msrb.mxu1 %v906_v52 }
  0x32   : > { %826 = vmatmul.msk.bf16.vlgmr.msrb.gmra.mxu2 %vm241_vm0, %v390_v33 }
  0x42   : > { %827 = vmatmul.msk.bf16.gmra.mxu2 %vm241_vm0, %v391_v36 }
  0xa1   : > { %v327_v50 = vpop.f32.mrf.mxu0 }
  0xa2   : > { %v376_v51 = vpop.f32.mrf.mxu1 }
  0xa3   : > { %v377_v53 = vadd.f32 %v376_v51, %v327_v50 }
  0xa5   : > { %v332_v41 = vpop.f32.mrf.mxu2 }
  0xa6   : > { %v381_v0 = vpop.f32.mrf.mxu3 }
  0xa7   : > { %v382_v3 = vadd.f32 %v381_v0, %v332_v41 }
  0xa9   : > { %v329_v58 = vpop.f32.mrf.mxu0 }
  0xaa   : > { %v378_v59 = vpop.f32.mrf.mxu1 }
  0xab   : > { %v379_v61 = vadd.f32 %v378_v59, %v329_v58 }
  0xad   : > { %v334_v48 = vpop.f32.mrf.mxu2 }
  0xae   : > { %v383_v7 = vpop.f32.mrf.mxu3 }
  0xaf   : > { %v384_v13 = vadd.f32 %v383_v7, %v334_v48 }
  0xb5   : > { %v439_v55 = vpop.f32.mrf.mxu2 }
  0xb6   : > { %v449_v56 = vadd.f32 %v439_v55, %v377_v53 }
  0xb8   : > { %v457_v57 = vadd.f32 %v947_v54, %v449_v56 }
  0xba   : > { %v461_v60 = vmax.f32 %v457_v57, 0.0 }
  0xbc   : > { %470 = vst.msk [vmem:[#allocation3 + $0x1] sm:$0xff] %vm241_vm0, %v461_v60 }
  0xbd   : > { %v441_v62 = vpop.f32.mrf.mxu2 }
  0xbe   : > { %v450_v63 = vadd.f32 %v441_v62, %v379_v61 }
  0xc0   : > { %v458_v1 = vadd.f32 %v947_v54, %v450_v63 }
  0xc2   : > { %v462_v2 = vmax.f32 %v458_v1, 0.0 }
  0xc3   : > { %v488_v9 = vld [vmem:[#allocation3 + $0x1] sm:$0xff] }
  0xc4   : > { %471 = vst.msk [vmem:[#allocation3 + $0x9] sm:$0xff] %vm241_vm0, %v462_v2  ;;  %v474_v11 = vld [vmem:[#allocation3] sm:$0xff] }
  0xc5   : > { %v444_v4 = vpop.f32.mrf.mxu2 }
  0xc6   : > { %v451_v5 = vadd.f32 %v444_v4, %v382_v3 }
  0xc8   : > { %v459_v6 = vadd.f32 %v947_v54, %v451_v5 }
  0xca   : > { %v463_v8 = vmax.f32 %v459_v6, 0.0 }
  0xcb   : > { %v489_v10 = vld [vmem:[#allocation3 + $0x9] sm:$0xff] }
  0xcc   : > { %v475_v12 = vld [vmem:[#allocation3 + $0x8] sm:$0xff]  ;;  %472 = vst.msk [vmem:[#allocation3 + $0x11] sm:$0xff] %vm241_vm0, %v463_v8  ;;  %v492_v14 = vpack.c.bf16 %v489_v10, %v488_v9 }
  0xcd   : > { %v478_v15 = vpack.c.bf16 %v475_v12, %v474_v11  ;;  %v446_v18 = vpop.f32.mrf.mxu2  ;;  %v600_v23 = vld [vmem:[#allocation3 + $0x2] sm:$0xff] }
  0xce   : > { %v452_v19 = vadd.f32 %v446_v18, %v384_v13  ;;  %844 = vmatmul.msk.bf16.vlgmr.msrb.gmra.mxu3 %vm241_vm0, %v492_v14 }
  0xcf   : > { %862 = vmatmul.msk.bf16.vlgmr.msrb.gmra.mxu0 %vm241_vm0, %v478_v15 }
  0xd0   : > { %v460_v20 = vadd.f32 %v947_v54, %v452_v19 }
  0xd2   : > { %v464_v21 = vmax.f32 %v460_v20, 0.0 }
  0xd3   : > { %v601_v25 = vld [vmem:[#allocation3 + $0xa] sm:$0xff] }
  0xd4   : > { %473 = vst.msk [vmem:[#allocation3 + $0x19] sm:$0xff] %vm241_vm0, %v464_v21  ;;  %v604_v26 = vpack.c.bf16 %v601_v25, %v600_v23  ;;  %v490_v27 = vld [vmem:[#allocation3 + $0x11] sm:$0xff] }
  0xd5   : > { %v476_v29 = vld [vmem:[#allocation3 + $0x10] sm:$0xff] }
  0xd6   : > { %880 = vmatmul.msk.bf16.vlgmr.msrb.gmra.mxu1 %vm241_vm0, %v604_v26 }
  0xdb   : > { %v491_v28 = vld [vmem:[#allocation3 + $0x19] sm:$0xff] }
  0xdc   : > { %v477_v30 = vld [vmem:[#allocation3 + $0x18] sm:$0xff]  ;;  %v493_v31 = vpack.c.bf16 %v491_v28, %v490_v27 }
  0xdd   : > { %v479_v32 = vpack.c.bf16 %v477_v30, %v476_v29  ;;  %v602_v33 = vld [vmem:[#allocation3 + $0x12] sm:$0xff]  ;;  %v603_v34 = vld [vmem:[#allocation3 + $0x1a] sm:$0xff] }
  0xde   : > { %845 = vmatmul.msk.bf16.gmra.mxu3 %vm241_vm0, %v493_v31  ;;  %v605_v35 = vpack.c.bf16 %v603_v34, %v602_v33 }
  0xdf   : > { %863 = vmatmul.msk.bf16.gmra.mxu0 %vm241_vm0, %v479_v32 }
  0xe6   : > { %881 = vmatmul.msk.bf16.gmra.mxu1 %vm241_vm0, %v605_v35 }
 0x14c   : > { %v590_v36 = vpop.f32.mrf.mxu0 }
 0x151   : > { %v541_v37 = vpop.f32.mrf.mxu3 }
 0x152   : > { %v591_v38 = vadd.f32 %v590_v36, %v541_v37 }
 0x153   : > { %v653_v40 = vpop.f32.mrf.mxu1 }
 0x154   : > { %v663_v41 = vadd.f32 %v653_v40, %v591_v38  ;;  %v592_v42 = vpop.f32.mrf.mxu0 }
 0x156   : > { %v671_v43 = vadd.f32 %v948_v39, %v663_v41 }
 0x158   : > { %v679_v44 = vadd.f32 %v671_v43, %v1094_v24 }
 0x159   : > { %v543_v45 = vpop.f32.mrf.mxu3 }
 0x15a   : > { %v683_v46 = vmax.f32 %v679_v44, 0.0  ;;  %v593_v47 = vadd.f32 %v592_v42, %v543_v45 }
 0x15b   : > { %v655_v48 = vpop.f32.mrf.mxu1 }
 0x15c   : > { %v687_v49 = vpack.c.bf16 %v683_v46, %v683_v46  ;;  %v664_v50 = vadd.f32 %v655_v48, %v593_v47  ;;  %v595_v52 = vpop.f32.mrf.mxu0 }
 0x15e   : > { %692 = vst.msk [vmem:[%s239_s12] sm:$0xf] %vm691_vm2, %v687_v49  ;;  %v672_v51 = vadd.f32 %v948_v39, %v664_v50 }
 0x160   : > { %v680_v53 = vadd.f32 %v672_v51, %v1092_v22 }
 0x161   : > { %v546_v54 = vpop.f32.mrf.mxu3 }
 0x162   : > { %v684_v24 = vmax.f32 %v680_v53, 0.0  ;;  %v596_v55 = vadd.f32 %v595_v52, %v546_v54 }
 0x163   : > { %v658_v56 = vpop.f32.mrf.mxu1 }
 0x164   : > { %v688_v57 = vpack.c.bf16 %v684_v24, %v684_v24  ;;  %v665_v58 = vadd.f32 %v658_v56, %v596_v55  ;;  %v597_v61 = vpop.f32.mrf.mxu0 }
 0x166   : > { %693 = vst.msk [vmem:[%s239_s12 + $0x4] sm:$0xf] %vm691_vm2, %v688_v57  ;;  %v673_v59 = vadd.f32 %v948_v39, %v665_v58 }
 0x168   : > { %v681_v60 = vadd.f32 %v673_v59, %v1083_v16 }
 0x169   : > { %v548_v62 = vpop.f32.mrf.mxu3 }
 0x16a   : > { %v685_v63 = vmax.f32 %v681_v60, 0.0  ;;  %v598_v0 = vadd.f32 %v597_v61, %v548_v62 }
 0x16b   : > { %v660_v1 = vpop.f32.mrf.mxu1 }
 0x16c   : > { %v689_v2 = vpack.c.bf16 %v685_v63, %v685_v63  ;;  %v666_v3 = vadd.f32 %v660_v1, %v598_v0 }
 0x16e   : > { %694 = vst.msk [vmem:[%s239_s12 + $0x8] sm:$0xf] %vm691_vm2, %v689_v2  ;;  %v674_v22 = vadd.f32 %v948_v39, %v666_v3 }
 0x170   : > { %v682_v4 = vadd.f32 %v674_v22, %v1085_v17 }
 0x172   : > { %v686_v5 = vmax.f32 %v682_v4, 0.0 }
 0x174   : > { %v690_v6 = vpack.c.bf16 %v686_v5, %v686_v5 }
 0x176   : > { %695 = vst.msk [vmem:[%s239_s12 + $0xc] sm:$0xf] %vm691_vm2, %v690_v6 }
 0x177 PF: > { %s16_s18 = sadd.s32 1, %s989_s18  }
 0x178   : > { %p13_p7 = scmp.ge.s32.totalorder %s16_s18, 4  }
 0x17a   :  { %15 = sbr.rel (!%p13_p7) target bundleno = 1 (0x1), region = 75 }
 0x17f   :  { %717 = vsyncpa [#allocation5], 1 }
 0x180   :  { %719 = vsyncpa [#allocation5 + $0x1], 1 }

// kernel: encoder1d_forward.11
= control target key start
LH: loop header
LB: loop body
LE: loop exit
PB: predicated region body
PF: predicated region fallthrough
CT: control target
= control target key end

     0   :  { %12 = vsyncpa [#allocation5], 0  ;;  %s1218_s24 = smov 0   ;;  %s1347_s0 = inlined_call_operand.vmem [shape: bf16[2,32,64], index: 0, kind: input, shape index: {}]   ;;  %s1348_s1 = inlined_call_operand.hbm [shape: bf16[192,128], index: 1, kind: input, shape index: {}]   ;;  %s1349_s2 = inlined_call_operand.vmem [shape: f32[1,128], index: 2, kind: input, shape index: {}]   ;;  %s1350_s3 = inlined_call_operand.vmem [shape: bf16[384,128], index: 3, kind: input, shape index: {}]   ;;  %s1351_s4 = inlined_call_operand.vmem [shape: f32[1,128], index: 4, kind: input, shape index: {}]   ;;  %s1352_s5 = inlined_call_operand.vmem [shape: bf16[64,128], index: 5, kind: input, shape index: {}]   ;;  %s1353_s6 = inlined_call_operand.vmem [shape: f32[1,128], index: 6, kind: input, shape index: {}]   ;;  %s1354_s7 = inlined_call_operand.vmem [shape: bf16[2,16,128], index: 7, kind: output, shape index: {}]  }
   0x1 LB: > { %s212_s27 = sshll.u32 %s1348_s1, 4  ;;  %s874_s28 = sadd.s32 4294967295, %s1172_s24   ;;  %s1172_s24 = sphi %s1218_s24, %s18_s24   ;;  %s213_s27 = int_to_ptr.hbm [resolvable:$true] %s212_s27 }
   0x2   : > { %p876_p0 = scmp.ge.s32.totalorder %s1172_s24, 1  ;;  %p201_p1 = scmp.lt.s32.totalorder %s1172_s24, 3 }
   0x3   : > { %p1115_p2 = scmp.eq.s32.totalorder %s874_s28, 0  ;;  %s1174_s29 = smov [#allocation4]  }
   0x4   : > { %p202_p3 = pnand %p876_p0, %p201_p1  ;;  %s214_s30 = sshll.u32 %s1174_s29, 4  ;;  %s215_s30 = int_to_ptr.vmem [resolvable:$true] %s214_s30 }
   0x5   : > { %s1175_s8 = smov 64   ;;  %s1176_s9 = smov 4  }
   0x6   : > { %p1111_p4 = pneg %p202_p3  ;;  %253 = sbr.rel (%p202_p3) target bundleno = 338 (0x152), region = 48 }
   0x8   : > { %p1112_p5 = pnand %p1115_p2, %p1111_p4 }
   0xa   : > { %1114 = dma.hbm_to_vmem [thread:$0]  (!%p1112_p5), %s213_s27, 1536, %s215_s30, [#allocation5], %s1175_s8, %s1175_s8, %s1176_s9  }
   0xb   : > { %1167 = dma.done.wait (%p1115_p2), [#allocation5], 1536  }
   0xc   : > { %1169 = vsyncadd (%p1115_p2), [#allocation5], 4294965760  ;;  %p286_p6 = scmp.lt.s32.totalorder %s874_s28, 1  ;;  %vm297_vm0 = vcmask 523264   ;;  %v1177_v0 = vmov 0.0   ;;  %vm302_vm1 = vcmask 517120  }
   0xd   : > { %298 = vst.msk [vmem:[#allocation2] sm:$0xff] %vm297_vm0, %v1177_v0  ;;  %v1060_v1 = vld [vmem:[#allocation4 + $0x38] sm:$0xff]  ;;  %v1059_v4 = vld [vmem:[#allocation4 + $0x30] sm:$0xff]  ;;  %v1058_v12 = vld [vmem:[#allocation4 + $0x28] sm:$0xff] }
   0xe   : > { %s1356_s28 = smov (!%p286_p6, %s874_s28), 1  ;;  %299 = vst.msk [vmem:[#allocation2 + $0x8] sm:$0xff] %vm297_vm0, %v1177_v0  ;;  %v1056_v2 = vld [vmem:[#allocation4 + $0x18] sm:$0xff]  ;;  %372 = vmatpush.bf16.msra.mxu0 %v1060_v1  ;;  %v1055_v5 = vld [vmem:[#allocation4 + $0x10] sm:$0xff]  ;;  %v1054_v13 = vld [vmem:[#allocation4 + $0x8] sm:$0xff] }
   0xf   : > { %300 = vst.msk [vmem:[#allocation2 + $0x10] sm:$0xff] %vm297_vm0, %v1177_v0  ;;  %s1051_s10 = sshll.u32 %s1356_s28, 4  ;;  %v1064_v3 = vld [vmem:[#allocation4 + $0x58] sm:$0xff]  ;;  %413 = vmatpush.bf16.msra.mxu1 %v1056_v2  ;;  %v1063_v6 = vld [vmem:[#allocation4 + $0x50] sm:$0xff]  ;;  %v1062_v15 = vld [vmem:[#allocation4 + $0x48] sm:$0xff] }
  0x10   : > { %301 = vst.msk [vmem:[#allocation2 + $0x18] sm:$0xff] %vm297_vm0, %v1177_v0  ;;  %s290_s13 = scalar_lea.vmem %s1347_s0, %s1051_s10  ;;  %467 = vmatpush.bf16.msra.mxu2 %v1064_v3  ;;  %v1057_v16 = vld [vmem:[#allocation4 + $0x20] sm:$0xff]  ;;  %v1080_v28 = vld [vmem:[%s1350_s3 + $0x78] sm:$0xff]  ;;  %v1079_v29 = vld [vmem:[%s1350_s3 + $0x70] sm:$0xff] }
  0x11   : > { %303 = vst.msk [vmem:[#allocation2 + $0x20] sm:$0x3] %vm302_vm1, %v1177_v0  ;;  %v1094_v7 = vld [vmem:[%s290_s13] sm:$0xff]   ;;  %v1106_v8 = vld [vmem:[%s290_s13 + $0x8] sm:$0xff]   ;;  %578 = vmatpush.bf16.msra.mxu3 %v1080_v28  ;;  %v1072_v30 = vld [vmem:[%s1350_s3 + $0x38] sm:$0xff]  ;;  %s1052_s13 = sshll.u32 %s1356_s28, 3 }
  0x12   : > { %487 = vst [vmem:[#allocation3] sm:$0xff] %v1177_v0  ;;  %v1095_v9 = vunpack.c.l.bf16 %v1094_v7  ;;  %v1096_v10 = vunpack.c.h.bf16 %v1094_v7  ;;  %v1099_v11 = vunpack.c.l.bf16 %v1106_v8  ;;  %373 = vmatpush.bf16.msra.mxu0 %v1059_v4  ;;  %v1100_v14 = vunpack.c.h.bf16 %v1106_v8  ;;  %v1053_v17 = vld [vmem:[#allocation4] sm:$0xff]  ;;  %v1088_v31 = vld [vmem:[%s1350_s3 + $0xb8] sm:$0xff]  ;;  %v1078_v32 = vld [vmem:[%s1350_s3 + $0x68] sm:$0xff]  ;;  %s295_s16 = scalar_lea.vmem %s1354_s7, %s1052_s13 }
  0x13   : > { %488 = vst [vmem:[#allocation3 + $0x8] sm:$0xff] %v1177_v0  ;;  %414 = vmatpush.bf16.msra.mxu1 %v1055_v5  ;;  %v1061_v18 = vld [vmem:[#allocation4 + $0x40] sm:$0xff]  ;;  %v1071_v33 = vld [vmem:[%s1350_s3 + $0x30] sm:$0xff]  ;;  %v1092_v36 = vld [vmem:[%s1352_s5 + $0x18] sm:$0xff] }
  0x14   : > { %489 = vst [vmem:[#allocation3 + $0x10] sm:$0x3] %v1177_v0  ;;  %468 = vmatpush.bf16.msra.mxu2 %v1063_v6  ;;  %v1087_v34 = vld [vmem:[%s1350_s3 + $0xb0] sm:$0xff]  ;;  %v1077_v35 = vld [vmem:[%s1350_s3 + $0x60] sm:$0xff]  ;;  %v1070_v37 = vld [vmem:[%s1350_s3 + $0x28] sm:$0xff] }
  0x15   : > { %312 = vst.msk [vmem:[#allocation2 + $0x1] sm:$0xff] %vm297_vm0, %v1095_v9  ;;  %579 = vmatpush.bf16.msra.mxu3 %v1079_v29  ;;  %v1086_v38 = vld [vmem:[%s1350_s3 + $0xa8] sm:$0xff]  ;;  %v1076_v39 = vld [vmem:[%s1350_s3 + $0x58] sm:$0xff]  ;;  %v1091_v40 = vld [vmem:[%s1352_s5 + $0x10] sm:$0xff] }
  0x16   : > { %313 = vst.msk [vmem:[#allocation2 + $0x9] sm:$0xff] %vm297_vm0, %v1096_v10  ;;  %374 = vmatpush.bf16.msra.mxu0 %v1058_v12  ;;  %v1069_v41 = vld [vmem:[%s1350_s3 + $0x20] sm:$0xff]  ;;  %v1075_v43 = vld [vmem:[%s1350_s3 + $0x50] sm:$0xff]  ;;  %v1090_v44 = vld [vmem:[%s1352_s5 + $0x8] sm:$0xff] }
  0x17   : > { %314 = vst.msk [vmem:[#allocation2 + $0x11] sm:$0xff] %vm297_vm0, %v1099_v11  ;;  %415 = vmatpush.bf16.msra.mxu1 %v1054_v13  ;;  %v1085_v42 = vld [vmem:[%s1350_s3 + $0xa0] sm:$0xff]  ;;  %v1068_v45 = vld [vmem:[%s1350_s3 + $0x18] sm:$0xff]  ;;  %v1074_v47 = vld [vmem:[%s1350_s3 + $0x48] sm:$0xff] }
  0x18   : > { %315 = vst.msk [vmem:[#allocation2 + $0x19] sm:$0xff] %vm297_vm0, %v1100_v14  ;;  %469 = vmatpush.bf16.msra.mxu2 %v1062_v15  ;;  %v1084_v46 = vld [vmem:[%s1350_s3 + $0x98] sm:$0xff]  ;;  %v1089_v48 = vld [vmem:[%s1352_s5] sm:$0xff]  ;;  %v1067_v49 = vld [vmem:[%s1350_s3 + $0x10] sm:$0xff] }
  0x19   : > { %580 = vmatpush.bf16.msra.mxu3 %v1078_v32  ;;  %v1083_v50 = vld [vmem:[%s1350_s3 + $0x90] sm:$0xff]  ;;  %v1073_v53 = vld [vmem:[%s1350_s3 + $0x40] sm:$0xff]  ;;  %v1066_v55 = vld [vmem:[%s1350_s3 + $0x8] sm:$0xff] }
  0x1a   : > { %375 = vmatpush.bf16.msra.mxu0 %v1057_v16  ;;  %v1082_v56 = vld [vmem:[%s1350_s3 + $0x88] sm:$0xff]  ;;  %v1065_v57 = vld [vmem:[%s1350_s3] sm:$0xff] }
  0x1b   : > { %416 = vmatpush.bf16.msra.mxu1 %v1053_v17  ;;  %v1081_v58 = vld [vmem:[%s1350_s3 + $0x80] sm:$0xff] }
  0x1c   : > { %470 = vmatpush.bf16.msra.mxu2 %v1061_v18  ;;  %v1129_v62 = vld [vmem:[%s1349_s2] ss:$0 sm:$0xff] }
  0x1d   : > { %v329_v19 = vld [vmem:[#allocation2 + $0x1] ss:$2 sm:$0xff]  ;;  %v316_v20 = vld [vmem:[#allocation2] ss:$2 sm:$0xff]  ;;  %581 = vmatpush.bf16.msra.mxu3 %v1077_v35 }
  0x1e   : > { %v424_v21 = vld [vmem:[#allocation2 + $0x2] ss:$2 sm:$0xff]  ;;  %640 = vmatpush.bf16.msrb.mxu0 %v1072_v30  ;;  %v743_v51 = vld [vmem:[#allocation2 + $0x1] ss:$2 sm:$0xff] }
  0x1f   : > { %v331_v22 = vld [vmem:[#allocation2 + $0x11] ss:$2 sm:$0xff]  ;;  %v318_v23 = vld [vmem:[#allocation2 + $0x10] ss:$2 sm:$0xff]  ;;  %721 = vmatpush.bf16.msrb.mxu1 %v1088_v31 }
  0x20   : > { %v426_v24 = vld [vmem:[#allocation2 + $0x12] ss:$2 sm:$0xff]  ;;  %v332_v25 = vpack.c.bf16 %v331_v22, %v329_v19  ;;  %v319_v26 = vpack.c.bf16 %v318_v23, %v316_v20  ;;  %789 = vmatpush.bf16.msrb.mxu2 %v1092_v36  ;;  %v744_v52 = vld [vmem:[#allocation2 + $0x11] ss:$2 sm:$0xff] }
  0x21   : > { %v427_v27 = vpack.c.bf16 %v426_v24, %v424_v21  ;;  %582 = vmatpush.bf16.msra.mxu3 %v1076_v39  ;;  %v745_v54 = vpack.c.bf16 %v744_v52, %v743_v51  ;;  %v1130_v22 = vld [vmem:[%s1353_s6] ss:$0 sm:$0xff] }
  0x22   : > { %901 = vmatmul.msk.bf16.vlgmr.msra.gmra.mxu0 %vm297_vm0, %v332_v25  ;;  %918 = vmatmul.msk.bf16.vlgmr.msra.gmra.mxu1 %vm297_vm0, %v319_v26  ;;  %v1131_v24 = vld [vmem:[%s1351_s4] ss:$0 sm:$0xff] }
  0x23   : > { %935 = vmatmul.msk.bf16.vlgmr.msra.gmra.mxu2 %vm297_vm0, %v427_v27  ;;  %641 = vmatpush.bf16.msrb.mxu0 %v1071_v33 }
  0x24   : > { %722 = vmatpush.bf16.msrb.mxu1 %v1087_v34  ;;  %790 = vmatpush.bf16.msrb.mxu2 %v1091_v40 }
  0x25   : > { %583 = vmatpush.bf16.msra.mxu3 %v1075_v43 }
  0x27   : > { %642 = vmatpush.bf16.msrb.mxu0 %v1070_v37 }
  0x28   : > { %723 = vmatpush.bf16.msrb.mxu1 %v1086_v38  ;;  %791 = vmatpush.bf16.msrb.mxu2 %v1090_v44 }
  0x29   : > { %584 = vmatpush.bf16.msra.mxu3 %v1074_v47 }
  0x2b   : > { %643 = vmatpush.bf16.msrb.mxu0 %v1069_v41 }
  0x2c   : > { %724 = vmatpush.bf16.msrb.mxu1 %v1085_v42  ;;  %792 = vmatpush.bf16.msrb.mxu2 %v1089_v48 }
  0x2d   : > { %585 = vmatpush.bf16.msra.mxu3 %v1073_v53 }
  0x2f   : > { %644 = vmatpush.bf16.msrb.mxu0 %v1068_v45 }
  0x30   : > { %725 = vmatpush.bf16.msrb.mxu1 %v1084_v46 }
  0x33   : > { %645 = vmatpush.bf16.msrb.mxu0 %v1067_v49  ;;  %1048 = vmatmul.msk.bf16.vlgmr.msrb.gmra.mxu2 %vm297_vm0, %v745_v54 }
  0x34   : > { %726 = vmatpush.bf16.msrb.mxu1 %v1083_v50 }
  0x37   : > { %646 = vmatpush.bf16.msrb.mxu0 %v1066_v55 }
  0x38   : > { %727 = vmatpush.bf16.msrb.mxu1 %v1082_v56 }
  0x3b   : > { %647 = vmatpush.bf16.msrb.mxu0 %v1065_v57 }
  0x3c   : > { %728 = vmatpush.bf16.msrb.mxu1 %v1081_v58 }
  0x9f   : > { %v377_v59 = vpop.f32.mrf.mxu0  ;;  %v418_v60 = vpop.f32.mrf.mxu1 }
  0xa0   : > { %v419_v61 = vadd.f32 %v418_v60, %v377_v59 }
  0xa6   : > { %v472_v63 = vpop.f32.mrf.mxu2 }
  0xa7   : > { %v477_v0 = vadd.f32 %v472_v63, %v419_v61  ;;  %v379_v2 = vpop.f32.mrf.mxu0  ;;  %v420_v3 = vpop.f32.mrf.mxu1 }
  0xa8   : > { %v421_v5 = vadd.f32 %v420_v3, %v379_v2 }
  0xa9   : > { %v483_v1 = vadd.f32 %v1129_v62, %v477_v0 }
  0xab   : > { %v485_v4 = vmax.f32 %v483_v1, 0.0 }
  0xad   : > { %490 = vst [vmem:[#allocation3 + $0x1] sm:$0xff] %v485_v4 }
  0xae   : > { %v474_v6 = vpop.f32.mrf.mxu2 }
  0xaf   : > { %v478_v7 = vadd.f32 %v474_v6, %v421_v5 }
  0xb1   : > { %v484_v8 = vadd.f32 %v1129_v62, %v478_v7 }
  0xb3   : > { %v486_v9 = vmax.f32 %v484_v8, 0.0 }
  0xb4   : > { %v492_v11 = vld [vmem:[#allocation3] sm:$0xff] }
  0xb5   : > { %491 = vst [vmem:[#allocation3 + $0x9] sm:$0xff] %v486_v9  ;;  %v513_v10 = vpack.c.bf16 %v486_v9, %v485_v4 }
  0xb6   : > { %v794_v18 = vpop.f32.mrf.mxu2 }
  0xb7   : > { %586 = vmatmul.bf16.vlgmr.msra.gmra.mxu3 %v513_v10  ;;  %v795_v27 = vadd.f32 %v1130_v22, %v794_v18 }
  0xbc   : > { %v493_v12 = vld [vmem:[#allocation3 + $0x8] sm:$0xff] }
  0xbd   : > { %v654_v13 = vld [vmem:[#allocation3 + $0x2] sm:$0xff]  ;;  %v655_v14 = vld [vmem:[#allocation3 + $0xa] sm:$0xff]  ;;  %v494_v15 = vpack.c.bf16 %v493_v12, %v492_v11 }
  0xbe   : > { %v656_v16 = vpack.c.bf16 %v655_v14, %v654_v13  ;;  %v796_v31 = vpop.f32.mrf.mxu2 }
  0xbf   : > { %648 = vmatmul.bf16.vlgmr.msrb.gmra.mxu0 %v494_v15  ;;  %v797_v34 = vadd.f32 %v1130_v22, %v796_v31 }
  0xc0   : > { %729 = vmatmul.bf16.vlgmr.msrb.gmra.mxu1 %v656_v16 }
 0x13a   : > { %v587_v17 = vpop.f32.mrf.mxu3 }
 0x13c   : > { %v649_v19 = vpop.f32.mrf.mxu0 }
 0x13d   : > { %v730_v20 = vpop.f32.mrf.mxu1  ;;  %v650_v21 = vadd.f32 %v649_v19, %v587_v17 }
 0x13f   : > { %v735_v23 = vadd.f32 %v730_v20, %v650_v21 }
 0x141   : > { %v741_v28 = vadd.f32 %v1131_v24, %v735_v23 }
 0x142   : > { %v589_v26 = vpop.f32.mrf.mxu3 }
 0x143   : > { %v799_v33 = vadd.f32 %v795_v27, %v741_v28 }
 0x144   : > { %v651_v25 = vpop.f32.mrf.mxu0 }
 0x145   : > { %v652_v29 = vadd.f32 %v651_v25, %v589_v26  ;;  %v732_v30 = vpop.f32.mrf.mxu1  ;;  %v801_v37 = vmax.f32 %v799_v33, 0.0 }
 0x147   : > { %v736_v32 = vadd.f32 %v732_v30, %v652_v29 }
 0x149   : > { %v742_v35 = vadd.f32 %v1131_v24, %v736_v32 }
 0x14b   : > { %v800_v36 = vadd.f32 %v797_v34, %v742_v35 }
 0x14d   : > { %v802_v38 = vmax.f32 %v800_v36, 0.0 }
 0x14f   : > { %v1104_v39 = vpack.c.bf16 %v802_v38, %v801_v37 }
 0x151   : > { %1105 = vst [vmem:[%s295_s16] sm:$0xff] %v1104_v39  }
 0x152 PF: > { %s18_s24 = sadd.s32 1, %s1172_s24  }
 0x153   : > { %p15_p7 = scmp.ge.s32.totalorder %s18_s24, 4  }
 0x155   :  { %17 = sbr.rel (!%p15_p7) target bundleno = 1 (0x1), region = 88 }
 0x15a   :  { %828 = vsyncpa [#allocation5], 1 }
 0x15b   :  { %830 = vsyncpa [#allocation5 + $0x1], 1 }

// kernel: encoder1d_forward.12
= control target key start
LH: loop header
LB: loop body
LE: loop exit
PB: predicated region body
PF: predicated region fallthrough
CT: control target
= control target key end

     0   :  { %10 = vsyncpa [#allocation5], 0  ;;  %s1202_s18 = smov 0   ;;  %s1323_s0 = inlined_call_operand.vmem [shape: bf16[2,16,128], index: 0, kind: input, shape index: {}]   ;;  %s1324_s1 = inlined_call_operand.vmem [shape: bf16[384,128], index: 1, kind: input, shape index: {}]   ;;  %s1325_s2 = inlined_call_operand.vmem [shape: f32[1,128], index: 2, kind: input, shape index: {}]   ;;  %s1326_s3 = inlined_call_operand.hbm [shape: bf16[384,128], index: 3, kind: input, shape index: {}]   ;;  %s1327_s4 = inlined_call_operand.vmem [shape: f32[1,128], index: 4, kind: input, shape index: {}]   ;;  %s1328_s5 = inlined_call_operand.vmem [shape: bf16[2,16,128], index: 5, kind: output, shape index: {}]  }
   0x1 LB: > { %s174_s21 = sshll.u32 %s1326_s3, 4  ;;  %s837_s22 = sadd.s32 4294967295, %s1166_s18   ;;  %s1166_s18 = sphi %s1202_s18, %s16_s18   ;;  %s175_s21 = int_to_ptr.hbm [resolvable:$true] %s174_s21 }
   0x2   : > { %p839_p0 = scmp.ge.s32.totalorder %s1166_s18, 1  ;;  %p157_p1 = scmp.lt.s32.totalorder %s1166_s18, 3 }
   0x3   : > { %p1109_p2 = scmp.eq.s32.totalorder %s837_s22, 0  ;;  %s1168_s23 = smov [#allocation4]  }
   0x4   : > { %p158_p3 = pnand %p839_p0, %p157_p1  ;;  %s176_s24 = sshll.u32 %s1168_s23, 4  ;;  %s177_s24 = int_to_ptr.vmem [resolvable:$true] %s176_s24 }
   0x5   : > { %s1169_s25 = smov 64   ;;  %s1170_s26 = smov 4  }
   0x6   : > { %p1105_p4 = pneg %p158_p3  ;;  %203 = sbr.rel (%p158_p3) target bundleno = 349 (0x15d), region = 40 }
   0x8   : > { %p1106_p5 = pnand %p1109_p2, %p1105_p4 }
   0xa   : > { %1108 = dma.hbm_to_vmem [thread:$0]  (!%p1106_p5), %s175_s21, 3072, %s177_s24, [#allocation5], %s1169_s25, %s1169_s25, %s1170_s26  }
   0xb   : > { %1161 = dma.done.wait (%p1109_p2), [#allocation5], 3072  }
   0xc   : > { %1163 = vsyncadd (%p1109_p2), [#allocation5], 4294964224  ;;  %p232_p6 = scmp.lt.s32.totalorder %s837_s22, 1  ;;  %v1171_v0 = vmov 0.0   ;;  %v1059_v1 = vld [vmem:[%s1324_s1 + $0x78] sm:$0xff]  ;;  %v1058_v4 = vld [vmem:[%s1324_s1 + $0x70] sm:$0xff] }
   0xd   : > { %242 = vst [vmem:[#allocation2] sm:$0xff] %v1171_v0  ;;  %v1051_v2 = vld [vmem:[%s1324_s1 + $0x38] sm:$0xff]  ;;  %337 = vmatpush.bf16.msra.mxu0 %v1059_v1  ;;  %v1050_v5 = vld [vmem:[%s1324_s1 + $0x30] sm:$0xff]  ;;  %v1057_v7 = vld [vmem:[%s1324_s1 + $0x68] sm:$0xff] }
   0xe   : > { %243 = vst [vmem:[#allocation2 + $0x8] sm:$0xff] %v1171_v0  ;;  %s1330_s22 = smov (!%p232_p6, %s837_s22), 1  ;;  %v1067_v3 = vld [vmem:[%s1324_s1 + $0xb8] sm:$0xff]  ;;  %399 = vmatpush.bf16.msra.mxu1 %v1051_v2  ;;  %v1066_v6 = vld [vmem:[%s1324_s1 + $0xb0] sm:$0xff]  ;;  %v1049_v8 = vld [vmem:[%s1324_s1 + $0x28] sm:$0xff] }
   0xf   : > { %244 = vst [vmem:[#allocation2 + $0x10] sm:$0x3] %v1171_v0  ;;  %s1042_s12 = sshll.u32 %s1330_s22, 3  ;;  %480 = vmatpush.bf16.msra.mxu2 %v1067_v3  ;;  %v1065_v9 = vld [vmem:[%s1324_s1 + $0xa8] sm:$0xff]  ;;  %v1056_v13 = vld [vmem:[%s1324_s1 + $0x60] sm:$0xff]  ;;  %v1055_v16 = vld [vmem:[%s1324_s1 + $0x58] sm:$0xff] }
  0x10   : > { %504 = vst [vmem:[#allocation3] sm:$0xff] %v1171_v0  ;;  %s1239_s17 = scalar_lea.vmem %s1323_s0, %s1042_s12  ;;  %v1048_v14 = vld [vmem:[%s1324_s1 + $0x20] sm:$0xff]  ;;  %v1047_v17 = vld [vmem:[%s1324_s1 + $0x18] sm:$0xff]  ;;  %v1054_v19 = vld [vmem:[%s1324_s1 + $0x50] sm:$0xff]  ;;  %s241_s16 = scalar_lea.vmem %s1328_s5, %s1042_s12 }
  0x11   : > { %505 = vst [vmem:[#allocation3 + $0x8] sm:$0xff] %v1171_v0  ;;  %338 = vmatpush.bf16.msra.mxu0 %v1058_v4  ;;  %v1251_v10 = vld [vmem:[%s1239_s17] sm:$0xff]   ;;  %v1063_v18 = vld [vmem:[%s1324_s1 + $0x98] sm:$0xff]  ;;  %v1046_v20 = vld [vmem:[%s1324_s1 + $0x10] sm:$0xff] }
  0x12   : > { %506 = vst [vmem:[#allocation3 + $0x10] sm:$0x3] %v1171_v0  ;;  %400 = vmatpush.bf16.msra.mxu1 %v1050_v5  ;;  %v1094_v11 = vunpack.c.l.bf16 %v1251_v10  ;;  %v1095_v12 = vunpack.c.h.bf16 %v1251_v10  ;;  %v1064_v15 = vld [vmem:[%s1324_s1 + $0xa0] sm:$0xff]  ;;  %v1062_v21 = vld [vmem:[%s1324_s1 + $0x90] sm:$0xff]  ;;  %v1053_v22 = vld [vmem:[%s1324_s1 + $0x48] sm:$0xff] }
  0x13   : > { %481 = vmatpush.bf16.msra.mxu2 %v1066_v6  ;;  %v1045_v23 = vld [vmem:[%s1324_s1 + $0x8] sm:$0xff]  ;;  %v1052_v25 = vld [vmem:[%s1324_s1 + $0x40] sm:$0xff]  ;;  %v1081_v39 = vld [vmem:[#allocation4 + $0x68] sm:$0xff] }
  0x14   : > { %249 = vst [vmem:[#allocation2 + $0x1] sm:$0xff] %v1094_v11  ;;  %v1061_v24 = vld [vmem:[%s1324_s1 + $0x88] sm:$0xff]  ;;  %v1044_v26 = vld [vmem:[%s1324_s1] sm:$0xff]  ;;  %v1080_v42 = vld [vmem:[#allocation4 + $0x60] sm:$0xff] }
  0x15   : > { %339 = vmatpush.bf16.msra.mxu0 %v1057_v7  ;;  %250 = vst [vmem:[#allocation2 + $0x9] sm:$0xff] %v1095_v12  ;;  %v1060_v29 = vld [vmem:[%s1324_s1 + $0x80] sm:$0xff]  ;;  %v1083_v35 = vld [vmem:[#allocation4 + $0x78] sm:$0xff]  ;;  %v1073_v43 = vld [vmem:[#allocation4 + $0x28] sm:$0xff] }
  0x16   : > { %401 = vmatpush.bf16.msra.mxu1 %v1049_v8  ;;  %v1123_v32 = vld [vmem:[%s1239_s17] sm:$0xff]  ;;  %595 = vmatpush.bf16.msra.mxu3 %v1083_v35  ;;  %v1075_v37 = vld [vmem:[#allocation4 + $0x38] sm:$0xff]  ;;  %v1089_v44 = vld [vmem:[#allocation4 + $0xa8] sm:$0xff] }
  0x17   : > { %482 = vmatpush.bf16.msra.mxu2 %v1065_v9  ;;  %v1082_v36 = vld [vmem:[#allocation4 + $0x70] sm:$0xff]  ;;  %v1091_v38 = vld [vmem:[#allocation4 + $0xb8] sm:$0xff]  ;;  %v1072_v46 = vld [vmem:[#allocation4 + $0x20] sm:$0xff] }
  0x18   : > { %v1074_v40 = vld [vmem:[#allocation4 + $0x30] sm:$0xff]  ;;  %v1079_v45 = vld [vmem:[#allocation4 + $0x58] sm:$0xff]  ;;  %v1088_v47 = vld [vmem:[#allocation4 + $0xa0] sm:$0xff] }
  0x19   : > { %340 = vmatpush.bf16.msra.mxu0 %v1056_v13  ;;  %v1090_v41 = vld [vmem:[#allocation4 + $0xb0] sm:$0xff]  ;;  %v1071_v49 = vld [vmem:[#allocation4 + $0x18] sm:$0xff]  ;;  %v1077_v51 = vld [vmem:[#allocation4 + $0x48] sm:$0xff] }
  0x1a   : > { %402 = vmatpush.bf16.msra.mxu1 %v1048_v14  ;;  %596 = vmatpush.bf16.msra.mxu3 %v1082_v36  ;;  %v1078_v48 = vld [vmem:[#allocation4 + $0x50] sm:$0xff]  ;;  %v1087_v50 = vld [vmem:[#allocation4 + $0x98] sm:$0xff]  ;;  %v1076_v54 = vld [vmem:[#allocation4 + $0x40] sm:$0xff] }
  0x1b   : > { %483 = vmatpush.bf16.msra.mxu2 %v1064_v15  ;;  %v251_v27 = vld [vmem:[#allocation2] sm:$0xff]  ;;  %v1069_v55 = vld [vmem:[#allocation4 + $0x8] sm:$0xff]  ;;  %v1068_v57 = vld [vmem:[#allocation4] sm:$0xff] }
  0x1c   : > { %v252_v28 = vld [vmem:[#allocation2 + $0x8] sm:$0xff]  ;;  %v1070_v52 = vld [vmem:[#allocation4 + $0x10] sm:$0xff]  ;;  %v1085_v56 = vld [vmem:[#allocation4 + $0x88] sm:$0xff] }
  0x1d   : > { %341 = vmatpush.bf16.msra.mxu0 %v1055_v16  ;;  %v413_v30 = vld [vmem:[#allocation2 + $0x2] sm:$0xff]  ;;  %v414_v31 = vld [vmem:[#allocation2 + $0xa] sm:$0xff]  ;;  %v253_v33 = vpack.c.bf16 %v252_v28, %v251_v27  ;;  %v1124_v62 = vld [vmem:[%s1325_s2] ss:$0 sm:$0xff] }
  0x1e   : > { %403 = vmatpush.bf16.msra.mxu1 %v1047_v17  ;;  %v415_v34 = vpack.c.bf16 %v414_v31, %v413_v30  ;;  %597 = vmatpush.bf16.msra.mxu3 %v1081_v39  ;;  %v1086_v53 = vld [vmem:[#allocation4 + $0x90] sm:$0xff]  ;;  %v1084_v58 = vld [vmem:[#allocation4 + $0x80] sm:$0xff] }
  0x1f   : > { %484 = vmatpush.bf16.msra.mxu2 %v1063_v18 }
  0x21   : > { %342 = vmatpush.bf16.msra.mxu0 %v1054_v19 }
  0x22   : > { %404 = vmatpush.bf16.msra.mxu1 %v1046_v20  ;;  %598 = vmatpush.bf16.msra.mxu3 %v1080_v42 }
  0x23   : > { %485 = vmatpush.bf16.msra.mxu2 %v1062_v21 }
  0x25   : > { %343 = vmatpush.bf16.msra.mxu0 %v1053_v22 }
  0x26   : > { %405 = vmatpush.bf16.msra.mxu1 %v1045_v23  ;;  %599 = vmatpush.bf16.msra.mxu3 %v1079_v45 }
  0x27   : > { %486 = vmatpush.bf16.msra.mxu2 %v1061_v24 }
  0x29   : > { %344 = vmatpush.bf16.msra.mxu0 %v1052_v25  ;;  %v1125_v25 = vld [vmem:[%s1327_s4] ss:$0 sm:$0xff] }
  0x2a   : > { %406 = vmatpush.bf16.msra.mxu1 %v1044_v26  ;;  %600 = vmatpush.bf16.msra.mxu3 %v1078_v48 }
  0x2b   : > { %487 = vmatpush.bf16.msra.mxu2 %v1060_v29 }
  0x2c   : > { %345 = vmatmul.bf16.vlgmr.msra.gmra.mxu0 %v1123_v32 }
  0x2d   : > { %407 = vmatmul.bf16.vlgmr.msra.gmra.mxu1 %v253_v33  ;;  %657 = vmatpush.bf16.msrb.mxu0 %v1075_v37 }
  0x2e   : > { %488 = vmatmul.bf16.vlgmr.msra.gmra.mxu2 %v415_v34  ;;  %738 = vmatpush.bf16.msrb.mxu1 %v1091_v38 }
  0x2f   : > { %601 = vmatpush.bf16.msra.mxu3 %v1077_v51 }
  0x31   : > { %658 = vmatpush.bf16.msrb.mxu0 %v1074_v40 }
  0x32   : > { %739 = vmatpush.bf16.msrb.mxu1 %v1090_v41 }
  0x33   : > { %602 = vmatpush.bf16.msra.mxu3 %v1076_v54 }
  0x35   : > { %659 = vmatpush.bf16.msrb.mxu0 %v1073_v43 }
  0x36   : > { %740 = vmatpush.bf16.msrb.mxu1 %v1089_v44 }
  0x39   : > { %660 = vmatpush.bf16.msrb.mxu0 %v1072_v46 }
  0x3a   : > { %741 = vmatpush.bf16.msrb.mxu1 %v1088_v47 }
  0x3d   : > { %661 = vmatpush.bf16.msrb.mxu0 %v1071_v49 }
  0x3e   : > { %742 = vmatpush.bf16.msrb.mxu1 %v1087_v50 }
  0x41   : > { %662 = vmatpush.bf16.msrb.mxu0 %v1070_v52 }
  0x42   : > { %743 = vmatpush.bf16.msrb.mxu1 %v1086_v53 }
  0x45   : > { %663 = vmatpush.bf16.msrb.mxu0 %v1069_v55 }
  0x46   : > { %744 = vmatpush.bf16.msrb.mxu1 %v1085_v56 }
  0x49   : > { %664 = vmatpush.bf16.msrb.mxu0 %v1068_v57 }
  0x4a   : > { %745 = vmatpush.bf16.msrb.mxu1 %v1084_v58 }
  0xa9   : > { %v346_v59 = vpop.f32.mrf.mxu0 }
  0xaa   : > { %v408_v60 = vpop.f32.mrf.mxu1 }
  0xab   : > { %v409_v61 = vadd.f32 %v408_v60, %v346_v59 }
  0xb1   : > { %v489_v63 = vpop.f32.mrf.mxu2  ;;  %v348_v2 = vpop.f32.mrf.mxu0 }
  0xb2   : > { %v494_v0 = vadd.f32 %v489_v63, %v409_v61  ;;  %v410_v3 = vpop.f32.mrf.mxu1 }
  0xb3   : > { %v411_v5 = vadd.f32 %v410_v3, %v348_v2 }
  0xb4   : > { %v500_v1 = vadd.f32 %v1124_v62, %v494_v0 }
  0xb6   : > { %v502_v4 = vmax.f32 %v500_v1, 0.0 }
  0xb8   : > { %507 = vst [vmem:[#allocation3 + $0x1] sm:$0xff] %v502_v4 }
  0xb9   : > { %v491_v6 = vpop.f32.mrf.mxu2 }
  0xba   : > { %v495_v7 = vadd.f32 %v491_v6, %v411_v5 }
  0xbc   : > { %v501_v8 = vadd.f32 %v1124_v62, %v495_v7 }
  0xbe   : > { %v503_v9 = vmax.f32 %v501_v8, 0.0 }
  0xbf   : > { %v509_v14 = vld [vmem:[#allocation3] sm:$0xff] }
  0xc0   : > { %508 = vst [vmem:[#allocation3 + $0x9] sm:$0xff] %v503_v9  ;;  %v530_v13 = vpack.c.bf16 %v503_v9, %v502_v4 }
  0xc2   : > { %603 = vmatmul.bf16.vlgmr.msra.gmra.mxu3 %v530_v13 }
  0xc7   : > { %v510_v15 = vld [vmem:[#allocation3 + $0x8] sm:$0xff] }
  0xc8   : > { %v671_v16 = vld [vmem:[#allocation3 + $0x2] sm:$0xff]  ;;  %v672_v17 = vld [vmem:[#allocation3 + $0xa] sm:$0xff]  ;;  %v511_v18 = vpack.c.bf16 %v510_v15, %v509_v14 }
  0xc9   : > { %v673_v19 = vpack.c.bf16 %v672_v17, %v671_v16 }
  0xca   : > { %665 = vmatmul.bf16.vlgmr.msrb.gmra.mxu0 %v511_v18 }
  0xcb   : > { %746 = vmatmul.bf16.vlgmr.msrb.gmra.mxu1 %v673_v19 }
 0x145   : > { %v604_v20 = vpop.f32.mrf.mxu3 }
 0x147   : > { %v666_v21 = vpop.f32.mrf.mxu0 }
 0x148   : > { %v747_v22 = vpop.f32.mrf.mxu1  ;;  %v667_v23 = vadd.f32 %v666_v21, %v604_v20 }
 0x14a   : > { %v752_v24 = vadd.f32 %v747_v22, %v667_v23 }
 0x14c   : > { %v758_v28 = vadd.f32 %v1125_v25, %v752_v24 }
 0x14d   : > { %v606_v27 = vpop.f32.mrf.mxu3 }
 0x14e   : > { %v762_v32 = vadd.f32 %v1094_v11, %v758_v28 }
 0x14f   : > { %v668_v26 = vpop.f32.mrf.mxu0 }
 0x150   : > { %v669_v29 = vadd.f32 %v668_v26, %v606_v27  ;;  %v749_v30 = vpop.f32.mrf.mxu1  ;;  %v764_v35 = vmax.f32 %v762_v32, 0.0 }
 0x152   : > { %v753_v31 = vadd.f32 %v749_v30, %v669_v29 }
 0x154   : > { %v759_v33 = vadd.f32 %v1125_v25, %v753_v31 }
 0x156   : > { %v763_v34 = vadd.f32 %v1095_v12, %v759_v33 }
 0x158   : > { %v765_v36 = vmax.f32 %v763_v34, 0.0 }
 0x15a   : > { %v1099_v37 = vpack.c.bf16 %v765_v36, %v764_v35 }
 0x15c   : > { %1100 = vst [vmem:[%s241_s16] sm:$0xff] %v1099_v37  }
 0x15d PF: > { %s16_s18 = sadd.s32 1, %s1166_s18  }
 0x15e   : > { %p13_p7 = scmp.ge.s32.totalorder %s16_s18, 4  }
 0x160   :  { %15 = sbr.rel (!%p13_p7) target bundleno = 1 (0x1), region = 75 }
 0x165   :  { %791 = vsyncpa [#allocation5], 1 }
 0x166   :  { %793 = vsyncpa [#allocation5 + $0x1], 1 }

// kernel: encoder1d_forward.13
= control target key start
LH: loop header
LB: loop body
LE: loop exit
PB: predicated region body
PF: predicated region fallthrough
CT: control target
= control target key end

     0   :  { %12 = vsyncpa [#allocation5], 0  ;;  %s2615_s24 = smov 0   ;;  %s3541_s0 = inlined_call_operand.vmem [shape: bf16[2,16,128], index: 0, kind: input, shape index: {}]   ;;  %s3542_s1 = inlined_call_operand.vmem [shape: bf16[384,256], index: 1, kind: input, shape index: {}]   ;;  %s3543_s2 = inlined_call_operand.vmem [shape: f32[1,256], index: 2, kind: input, shape index: {}]   ;;  %s3544_s3 = inlined_call_operand.vmem [shape: bf16[768,256], index: 3, kind: input, shape index: {}]   ;;  %s3545_s4 = inlined_call_operand.vmem [shape: f32[1,256], index: 4, kind: input, shape index: {}]   ;;  %s3546_s5 = inlined_call_operand.hbm [shape: bf16[128,256], index: 5, kind: input, shape index: {}]   ;;  %s3547_s6 = inlined_call_operand.vmem [shape: f32[1,256], index: 6, kind: input, shape index: {}]   ;;  %s3548_s7 = inlined_call_operand.vmem [shape: bf16[2,8,256], index: 7, kind: output, shape index: {}]  }
   0x1 LB: > { %s224_s27 = sshll.u32 %s3546_s5, 4  ;;  %s2624_s28 = sadd.s32 4294967295, %s2569_s24   ;;  %s2569_s24 = sphi %s2615_s24, %s18_s24   ;;  %s225_s27 = int_to_ptr.hbm [resolvable:$true] %s224_s27 }
   0x2   : > { %p1690_p0 = scmp.ge.s32.totalorder %s2569_s24, 1  ;;  %p201_p1 = scmp.lt.s32.totalorder %s2569_s24, 3 }
   0x3   : > { %p2515_p2 = scmp.eq.s32.totalorder %s2624_s28, 0  ;;  %s2571_s29 = smov [#allocation4]  }
   0x4   : > { %p202_p3 = pnand %p1690_p0, %p201_p1  ;;  %s226_s30 = sshll.u32 %s2571_s29, 4  ;;  %s227_s30 = int_to_ptr.vmem [resolvable:$true] %s226_s30 }
   0x5   : > { %s2572_s8 = smov 128   ;;  %s2573_s9 = smov 8  }
   0x6   : > { %p2511_p4 = pneg %p202_p3  ;;  %253 = sbr.rel (%p202_p3) target bundleno = 437 (0x1b5), region = 48 }
   0x8   : > { %p2512_p5 = pnand %p2515_p2, %p2511_p4 }
   0xa   : > { %2514 = dma.hbm_to_vmem [thread:$0]  (!%p2512_p5), %s225_s27, 2048, %s227_s30, [#allocation5], %s2572_s8, %s2572_s8, %s2573_s9  }
   0xb   : > { %2564 = dma.done.wait (%p2515_p2), [#allocation5], 2048  }
   0xc   : > { %2566 = vsyncadd (%p2515_p2), [#allocation5], 4294965248  ;;  %v2574_v0 = vmov 0.0   ;;  %v1757_v1 = vld [vmem:[%s3542_s1 + $0xf0] sm:$0xf]  ;;  %p286_p6 = scmp.lt.s32.totalorder %s2624_s28, 1 }
   0xd   : > { %296 = vst [vmem:[#allocation2] sm:$0xff] %v2574_v0  ;;  %v2374_v2 = vld [vmem:[%s3542_s1 + $0xf4] sm:$0xf0]  ;;  %v2373_v3 = vld [vmem:[%s3542_s1 + $0xf4] sm:$0xf] }
   0xe   : > { %297 = vst [vmem:[#allocation2 + $0x8] sm:$0xff] %v2574_v0  ;;  %v1758_v4 = vor.u32 %v2374_v2, %v1757_v1  ;;  %v1759_v5 = vld [vmem:[%s3542_s1 + $0xf8] sm:$0xf0]  ;;  %v1749_v6 = vld [vmem:[%s3542_s1 + $0xe0] sm:$0xf]  ;;  %s3550_s28 = smov (!%p286_p6, %s2624_s28), 1 }
   0xf   : > { %298 = vst [vmem:[#allocation2 + $0x10] sm:$0x3] %v2574_v0  ;;  %v2372_v7 = vld [vmem:[%s3542_s1 + $0xe4] sm:$0xf0]  ;;  %v1762_v8 = vor.u32 %v2373_v3, %v1759_v5  ;;  %v2371_v9 = vld [vmem:[%s3542_s1 + $0xe4] sm:$0xf] }
  0x10   : > { %v1751_v10 = vld [vmem:[%s3542_s1 + $0xe8] sm:$0xf0]  ;;  %v1821_v11 = vld [vmem:[%s3542_s1 + $0x70] sm:$0xf]  ;;  %422 = vmatpush.bf16.msra.mxu0 %v1758_v4  ;;  %v1750_v12 = vor.u32 %v2372_v7, %v1749_v6  ;;  %v2358_v13 = vld [vmem:[%s3542_s1 + $0x74] sm:$0xf0] }
  0x11   : > { %v2357_v14 = vld [vmem:[%s3542_s1 + $0x74] sm:$0xf]  ;;  %v1823_v15 = vld [vmem:[%s3542_s1 + $0x78] sm:$0xf0]  ;;  %435 = vmatpush.bf16.msra.mxu1 %v1762_v8  ;;  %v1754_v16 = vor.u32 %v2371_v9, %v1751_v10  ;;  %v1822_v17 = vor.u32 %v2358_v13, %v1821_v11  ;;  %v1741_v19 = vld [vmem:[%s3542_s1 + $0xd0] sm:$0xf] }
  0x12   : > { %v1826_v18 = vor.u32 %v2357_v14, %v1823_v15  ;;  %v2370_v20 = vld [vmem:[%s3542_s1 + $0xd4] sm:$0xf0]  ;;  %v2369_v21 = vld [vmem:[%s3542_s1 + $0xd4] sm:$0xf]  ;;  %v1743_v22 = vld [vmem:[%s3542_s1 + $0xd8] sm:$0xf0] }
  0x13   : > { %v1813_v23 = vld [vmem:[%s3542_s1 + $0x60] sm:$0xf]  ;;  %v2356_v24 = vld [vmem:[%s3542_s1 + $0x64] sm:$0xf0]  ;;  %528 = vmatpush.bf16.msra.mxu2 %v1822_v17  ;;  %v2355_v26 = vld [vmem:[%s3542_s1 + $0x64] sm:$0xf]  ;;  %v1742_v28 = vor.u32 %v2370_v20, %v1741_v19  ;;  %v1746_v32 = vor.u32 %v2369_v21, %v1743_v22 }
  0x14   : > { %541 = vmatpush.bf16.msra.mxu3 %v1826_v18  ;;  %v1814_v25 = vor.u32 %v2356_v24, %v1813_v23  ;;  %v1815_v27 = vld [vmem:[%s3542_s1 + $0x68] sm:$0xf0]  ;;  %423 = vmatpush.bf16.msra.mxu0 %v1750_v12  ;;  %v1733_v30 = vld [vmem:[%s3542_s1 + $0xc0] sm:$0xf]  ;;  %v2368_v31 = vld [vmem:[%s3542_s1 + $0xc4] sm:$0xf0] }
  0x15   : > { %v1818_v29 = vor.u32 %v2355_v26, %v1815_v27  ;;  %436 = vmatpush.bf16.msra.mxu1 %v1754_v16  ;;  %v1805_v33 = vld [vmem:[%s3542_s1 + $0x50] sm:$0xf]  ;;  %v2354_v34 = vld [vmem:[%s3542_s1 + $0x54] sm:$0xf0]  ;;  %v2353_v35 = vld [vmem:[%s3542_s1 + $0x54] sm:$0xf]  ;;  %v1734_v42 = vor.u32 %v2368_v31, %v1733_v30 }
  0x16   : > { %v2367_v36 = vld [vmem:[%s3542_s1 + $0xc4] sm:$0xf]  ;;  %v1735_v37 = vld [vmem:[%s3542_s1 + $0xc8] sm:$0xf0]  ;;  %v1807_v38 = vld [vmem:[%s3542_s1 + $0x58] sm:$0xf0]  ;;  %v1806_v39 = vor.u32 %v2354_v34, %v1805_v33 }
  0x17   : > { %529 = vmatpush.bf16.msra.mxu2 %v1814_v25  ;;  %v1810_v40 = vor.u32 %v2353_v35, %v1807_v38  ;;  %v1797_v41 = vld [vmem:[%s3542_s1 + $0x40] sm:$0xf]  ;;  %v2352_v43 = vld [vmem:[%s3542_s1 + $0x44] sm:$0xf0]  ;;  %v2351_v44 = vld [vmem:[%s3542_s1 + $0x44] sm:$0xf]  ;;  %v1738_v46 = vor.u32 %v2367_v36, %v1735_v37 }
  0x18   : > { %542 = vmatpush.bf16.msra.mxu3 %v1818_v29  ;;  %424 = vmatpush.bf16.msra.mxu0 %v1742_v28  ;;  %v1799_v45 = vld [vmem:[%s3542_s1 + $0x48] sm:$0xf0]  ;;  %v1725_v47 = vld [vmem:[%s3542_s1 + $0xb0] sm:$0xf]  ;;  %v2366_v48 = vld [vmem:[%s3542_s1 + $0xb4] sm:$0xf0]  ;;  %v1798_v51 = vor.u32 %v2352_v43, %v1797_v41 }
  0x19   : > { %437 = vmatpush.bf16.msra.mxu1 %v1746_v32  ;;  %v2365_v49 = vld [vmem:[%s3542_s1 + $0xb4] sm:$0xf]  ;;  %v1727_v50 = vld [vmem:[%s3542_s1 + $0xb8] sm:$0xf0]  ;;  %v1802_v52 = vor.u32 %v2351_v44, %v1799_v45  ;;  %v1789_v53 = vld [vmem:[%s3542_s1 + $0x30] sm:$0xf]  ;;  %v1726_v54 = vor.u32 %v2366_v48, %v1725_v47 }
  0x1a   : > { %v2350_v55 = vld [vmem:[%s3542_s1 + $0x34] sm:$0xf0]  ;;  %v2349_v56 = vld [vmem:[%s3542_s1 + $0x34] sm:$0xf]  ;;  %v1791_v57 = vld [vmem:[%s3542_s1 + $0x38] sm:$0xf0]  ;;  %v1730_v58 = vor.u32 %v2365_v49, %v1727_v50 }
  0x1b   : > { %530 = vmatpush.bf16.msra.mxu2 %v1806_v39  ;;  %v1717_v59 = vld [vmem:[%s3542_s1 + $0xa0] sm:$0xf]  ;;  %v2364_v60 = vld [vmem:[%s3542_s1 + $0xa4] sm:$0xf0]  ;;  %v2363_v61 = vld [vmem:[%s3542_s1 + $0xa4] sm:$0xf]  ;;  %v1790_v63 = vor.u32 %v2350_v55, %v1789_v53  ;;  %v1794_v1 = vor.u32 %v2349_v56, %v1791_v57 }
  0x1c   : > { %543 = vmatpush.bf16.msra.mxu3 %v1810_v40  ;;  %425 = vmatpush.bf16.msra.mxu0 %v1734_v42  ;;  %v1719_v62 = vld [vmem:[%s3542_s1 + $0xa8] sm:$0xf0]  ;;  %v1781_v2 = vld [vmem:[%s3542_s1 + $0x20] sm:$0xf]  ;;  %s2341_s16 = sshll.u32 %s3550_s28, 3  ;;  %v1718_v3 = vor.u32 %v2364_v60, %v1717_v59  ;;  %691 = vst [vmem:[#allocation3 + $0x10] sm:$0xff] %v2574_v0 }
  0x1d   : > { %438 = vmatpush.bf16.msra.mxu1 %v1738_v46  ;;  %v2348_v4 = vld [vmem:[%s3542_s1 + $0x24] sm:$0xf0]  ;;  %v2347_v5 = vld [vmem:[%s3542_s1 + $0x24] sm:$0xf]  ;;  %v1783_v6 = vld [vmem:[%s3542_s1 + $0x28] sm:$0xf0]  ;;  %v1722_v7 = vor.u32 %v2363_v61, %v1719_v62  ;;  %s290_s12 = scalar_lea.vmem %s3541_s0, %s2341_s16  ;;  %s295_s14 = scalar_lea.vmem %s3548_s7, %s2341_s16 }
  0x1e   : > { %v1709_v8 = vld [vmem:[%s3542_s1 + $0x90] sm:$0xf]  ;;  %v2362_v9 = vld [vmem:[%s3542_s1 + $0x94] sm:$0xf0]  ;;  %v2361_v10 = vld [vmem:[%s3542_s1 + $0x94] sm:$0xf]  ;;  %v1782_v12 = vor.u32 %v2348_v4, %v1781_v2  ;;  %v1786_v13 = vor.u32 %v2347_v5, %v1783_v6 }
  0x1f   : > { %531 = vmatpush.bf16.msra.mxu2 %v1798_v51  ;;  %v1711_v11 = vld [vmem:[%s3542_s1 + $0x98] sm:$0xf0]  ;;  %v1701_v14 = vld [vmem:[%s3542_s1 + $0x80] sm:$0xf]  ;;  %v2360_v15 = vld [vmem:[%s3542_s1 + $0x84] sm:$0xf0]  ;;  %v1710_v17 = vor.u32 %v2362_v9, %v1709_v8 }
  0x20   : > { %544 = vmatpush.bf16.msra.mxu3 %v1802_v52  ;;  %426 = vmatpush.bf16.msra.mxu0 %v1726_v54  ;;  %v1773_v16 = vld [vmem:[%s3542_s1 + $0x10] sm:$0xf]  ;;  %v2359_v18 = vld [vmem:[%s3542_s1 + $0x84] sm:$0xf]  ;;  %v1703_v19 = vld [vmem:[%s3542_s1 + $0x88] sm:$0xf0]  ;;  %v1714_v23 = vor.u32 %v2361_v10, %v1711_v11  ;;  %v1702_v35 = vor.u32 %v2360_v15, %v1701_v14 }
  0x21   : > { %439 = vmatpush.bf16.msra.mxu1 %v1730_v58  ;;  %v2346_v20 = vld [vmem:[%s3542_s1 + $0x14] sm:$0xf0]  ;;  %v2345_v21 = vld [vmem:[%s3542_s1 + $0x14] sm:$0xf]  ;;  %v1775_v22 = vld [vmem:[%s3542_s1 + $0x18] sm:$0xf0]  ;;  %v1706_v38 = vor.u32 %v2359_v18, %v1703_v19 }
  0x22   : > { %v1885_v24 = vld [vmem:[%s3542_s1 + $0x170] sm:$0xf]  ;;  %v2390_v25 = vld [vmem:[%s3542_s1 + $0x174] sm:$0xf0]  ;;  %v2504_v26 = vld [vmem:[%s290_s12] sm:$0xff]   ;;  %692 = vst [vmem:[#allocation3] sm:$0xff] %v2574_v0  ;;  %v1774_v31 = vor.u32 %v2346_v20, %v1773_v16  ;;  %v1778_v32 = vor.u32 %v2345_v21, %v1775_v22 }
  0x23   : > { %532 = vmatpush.bf16.msra.mxu2 %v1790_v63  ;;  %v2389_v27 = vld [vmem:[%s3542_s1 + $0x174] sm:$0xf]  ;;  %v1887_v28 = vld [vmem:[%s3542_s1 + $0x178] sm:$0xf0]  ;;  %v2505_v29 = vunpack.c.l.bf16 %v2504_v26  ;;  %v2506_v30 = vunpack.c.h.bf16 %v2504_v26  ;;  %v1765_v33 = vld [vmem:[%s3542_s1] sm:$0xf]  ;;  %v1886_v39 = vor.u32 %v2390_v25, %v1885_v24 }
  0x24   : > { %545 = vmatpush.bf16.msra.mxu3 %v1794_v1  ;;  %427 = vmatpush.bf16.msra.mxu0 %v1718_v3  ;;  %v2344_v34 = vld [vmem:[%s3542_s1 + $0x4] sm:$0xf0]  ;;  %693 = vst [vmem:[#allocation3 + $0x18] sm:$0x3] %v2574_v0  ;;  %v2343_v36 = vld [vmem:[%s3542_s1 + $0x4] sm:$0xf]  ;;  %v1890_v40 = vor.u32 %v2389_v27, %v1887_v28 }
  0x25   : > { %440 = vmatpush.bf16.msra.mxu1 %v1722_v7  ;;  %v1767_v37 = vld [vmem:[%s3542_s1 + $0x8] sm:$0xf0]  ;;  %303 = vst [vmem:[#allocation2 + $0x1] sm:$0xff] %v2505_v29  ;;  %v1877_v41 = vld [vmem:[%s3542_s1 + $0x160] sm:$0xf]  ;;  %v1766_v45 = vor.u32 %v2344_v34, %v1765_v33 }
  0x26   : > { %304 = vst [vmem:[#allocation2 + $0x9] sm:$0xff] %v2506_v30  ;;  %v2388_v42 = vld [vmem:[%s3542_s1 + $0x164] sm:$0xf0]  ;;  %v2387_v43 = vld [vmem:[%s3542_s1 + $0x164] sm:$0xf]  ;;  %v1770_v46 = vor.u32 %v2343_v36, %v1767_v37 }
  0x27   : > { %533 = vmatpush.bf16.msra.mxu2 %v1782_v12  ;;  %694 = vst [vmem:[#allocation3 + $0x8] sm:$0x3] %v2574_v0  ;;  %v1879_v44 = vld [vmem:[%s3542_s1 + $0x168] sm:$0xf0]  ;;  %v1878_v47 = vor.u32 %v2388_v42, %v1877_v41  ;;  %v1869_v0 = vld [vmem:[%s3542_s1 + $0x150] sm:$0xf] }
  0x28   : > { %546 = vmatpush.bf16.msra.mxu3 %v1786_v13  ;;  %428 = vmatpush.bf16.msra.mxu0 %v1710_v17  ;;  %v1882_v48 = vor.u32 %v2387_v43, %v1879_v44  ;;  %v2386_v49 = vld [vmem:[%s3542_s1 + $0x154] sm:$0xf0]  ;;  %v2385_v50 = vld [vmem:[%s3542_s1 + $0x154] sm:$0xf]  ;;  %v1871_v51 = vld [vmem:[%s3542_s1 + $0x158] sm:$0xf0] }
  0x29   : > { %441 = vmatpush.bf16.msra.mxu1 %v1714_v23  ;;  %v1949_v52 = vld [vmem:[%s3544_s3 + $0x170] sm:$0xf]  ;;  %v2438_v53 = vld [vmem:[%s3544_s3 + $0x174] sm:$0xf0]  ;;  %v1870_v59 = vor.u32 %v2386_v49, %v1869_v0  ;;  %v1861_v61 = vld [vmem:[%s3542_s1 + $0x140] sm:$0xf]  ;;  %v1874_v1 = vor.u32 %v2385_v50, %v1871_v51 }
  0x2a   : > { %v2013_v54 = vld [vmem:[%s3544_s3 + $0x1f0] sm:$0xf]  ;;  %v1950_v57 = vor.u32 %v2438_v53, %v1949_v52  ;;  %v2384_v62 = vld [vmem:[%s3542_s1 + $0x144] sm:$0xf0]  ;;  %v2454_v63 = vld [vmem:[%s3544_s3 + $0x1f4] sm:$0xf0] }
  0x2b   : > { %534 = vmatpush.bf16.msra.mxu2 %v1774_v31  ;;  %v2383_v2 = vld [vmem:[%s3542_s1 + $0x144] sm:$0xf]  ;;  %v1863_v3 = vld [vmem:[%s3542_s1 + $0x148] sm:$0xf0]  ;;  %v2014_v4 = vor.u32 %v2454_v63, %v2013_v54  ;;  %v1941_v5 = vld [vmem:[%s3544_s3 + $0x160] sm:$0xf]  ;;  %v1862_v10 = vor.u32 %v2384_v62, %v1861_v61 }
  0x2c   : > { %547 = vmatpush.bf16.msra.mxu3 %v1778_v32  ;;  %429 = vmatpush.bf16.msra.mxu0 %v1702_v35  ;;  %v2436_v6 = vld [vmem:[%s3544_s3 + $0x164] sm:$0xf0]  ;;  %v2005_v7 = vld [vmem:[%s3544_s3 + $0x1e0] sm:$0xf]  ;;  %v1853_v11 = vld [vmem:[%s3542_s1 + $0x130] sm:$0xf]  ;;  %v1866_v15 = vor.u32 %v2383_v2, %v1863_v3 }
  0x2d   : > { %442 = vmatpush.bf16.msra.mxu1 %v1706_v38  ;;  %v324_v55 = vld [vmem:[#allocation2 + $0x1] ss:$2 sm:$0xff]  ;;  %v305_v56 = vld [vmem:[#allocation2] ss:$2 sm:$0xff]  ;;  %v1942_v9 = vor.u32 %v2436_v6, %v1941_v5  ;;  %v1933_v13 = vld [vmem:[%s3544_s3 + $0x150] sm:$0xf] }
  0x2e   : > { %v325_v58 = vpack.c.bf16 %v324_v55, %v324_v55  ;;  %v306_v60 = vpack.c.bf16 %v305_v56, %v305_v56  ;;  %v2452_v8 = vld [vmem:[%s3544_s3 + $0x1e4] sm:$0xf0]  ;;  %v2434_v14 = vld [vmem:[%s3544_s3 + $0x154] sm:$0xf0]  ;;  %v1997_v18 = vld [vmem:[%s3544_s3 + $0x1d0] sm:$0xf] }
  0x2f   : > { %535 = vmatpush.bf16.msra.mxu2 %v1766_v45  ;;  %v2006_v12 = vor.u32 %v2452_v8, %v2005_v7  ;;  %v2382_v16 = vld [vmem:[%s3542_s1 + $0x134] sm:$0xf0]  ;;  %v1934_v17 = vor.u32 %v2434_v14, %v1933_v13  ;;  %v2381_v20 = vld [vmem:[%s3542_s1 + $0x134] sm:$0xf]  ;;  %v1855_v21 = vld [vmem:[%s3542_s1 + $0x138] sm:$0xf0] }
  0x30   : > { %653 = vmatpush.bf16.msrb.mxu0 %v1886_v39  ;;  %548 = vmatpush.bf16.msra.mxu3 %v1770_v46  ;;  %v2450_v19 = vld [vmem:[%s3544_s3 + $0x1d4] sm:$0xf0]  ;;  %v1854_v22 = vor.u32 %v2382_v16, %v1853_v11  ;;  %v1858_v24 = vor.u32 %v2381_v20, %v1855_v21  ;;  %v1845_v25 = vld [vmem:[%s3542_s1 + $0x120] sm:$0xf]  ;;  %v2380_v26 = vld [vmem:[%s3542_s1 + $0x124] sm:$0xf0] }
  0x31   : > { %666 = vmatpush.bf16.msrb.mxu1 %v1890_v40  ;;  %430 = vmatmul.bf16.vlgmr.msra.gmra.mxu0 %v325_v58  ;;  %v1998_v23 = vor.u32 %v2450_v19, %v1997_v18  ;;  %v2379_v27 = vld [vmem:[%s3542_s1 + $0x124] sm:$0xf]  ;;  %v1847_v28 = vld [vmem:[%s3542_s1 + $0x128] sm:$0xf0]  ;;  %v1846_v29 = vor.u32 %v2380_v26, %v1845_v25  ;;  %v1837_v31 = vld [vmem:[%s3542_s1 + $0x110] sm:$0xf] }
  0x32   : > { %443 = vmatmul.bf16.vlgmr.msra.gmra.mxu1 %v325_v58  ;;  %536 = vmatmul.bf16.vlgmr.msra.gmra.mxu2 %v306_v60  ;;  %v1850_v30 = vor.u32 %v2379_v27, %v1847_v28  ;;  %v2378_v32 = vld [vmem:[%s3542_s1 + $0x114] sm:$0xf0]  ;;  %v2377_v33 = vld [vmem:[%s3542_s1 + $0x114] sm:$0xf]  ;;  %v1839_v34 = vld [vmem:[%s3542_s1 + $0x118] sm:$0xf0] }
  0x33   : > { %955 = vmatpush.bf16.msrb.mxu2 %v1950_v57  ;;  %549 = vmatmul.bf16.vlgmr.msra.gmra.mxu3 %v306_v60  ;;  %v1838_v35 = vor.u32 %v2378_v32, %v1837_v31  ;;  %v1842_v36 = vor.u32 %v2377_v33, %v1839_v34  ;;  %v1829_v37 = vld [vmem:[%s3542_s1 + $0x100] sm:$0xf]  ;;  %v2376_v38 = vld [vmem:[%s3542_s1 + $0x104] sm:$0xf0]  ;;  %v2375_v39 = vld [vmem:[%s3542_s1 + $0x104] sm:$0xf] }
  0x34   : > { %654 = vmatpush.bf16.msrb.mxu0 %v1878_v47  ;;  %968 = vmatpush.bf16.msrb.mxu3 %v2014_v4  ;;  %v1831_v40 = vld [vmem:[%s3542_s1 + $0x108] sm:$0xf0]  ;;  %v2437_v41 = vld [vmem:[%s3544_s3 + $0x174] sm:$0xf]  ;;  %v1951_v42 = vld [vmem:[%s3544_s3 + $0x178] sm:$0xf0]  ;;  %v1830_v45 = vor.u32 %v2376_v38, %v1829_v37 }
  0x35   : > { %667 = vmatpush.bf16.msrb.mxu1 %v1882_v48  ;;  %v2453_v43 = vld [vmem:[%s3544_s3 + $0x1f4] sm:$0xf]  ;;  %v2015_v44 = vld [vmem:[%s3544_s3 + $0x1f8] sm:$0xf0]  ;;  %v555_v46 = vld [vmem:[#allocation2 + $0x2] ss:$2 sm:$0xff]  ;;  %v1834_v47 = vor.u32 %v2375_v39, %v1831_v40  ;;  %v1954_v0 = vor.u32 %v2437_v41, %v1951_v42 }
  0x36   : > { %v2018_v48 = vor.u32 %v2453_v43, %v2015_v44  ;;  %v2435_v49 = vld [vmem:[%s3544_s3 + $0x164] sm:$0xf]  ;;  %v1943_v50 = vld [vmem:[%s3544_s3 + $0x168] sm:$0xf0]  ;;  %v556_v51 = vpack.c.bf16 %v555_v46, %v555_v46  ;;  %v2433_v56 = vld [vmem:[%s3544_s3 + $0x154] sm:$0xf] }
  0x37   : > { %956 = vmatpush.bf16.msrb.mxu2 %v1942_v9  ;;  %v2451_v52 = vld [vmem:[%s3544_s3 + $0x1e4] sm:$0xf]  ;;  %v2007_v53 = vld [vmem:[%s3544_s3 + $0x1e8] sm:$0xf0]  ;;  %v1946_v54 = vor.u32 %v2435_v49, %v1943_v50  ;;  %v1935_v57 = vld [vmem:[%s3544_s3 + $0x158] sm:$0xf0] }
  0x38   : > { %655 = vmatpush.bf16.msrb.mxu0 %v1870_v59  ;;  %969 = vmatpush.bf16.msrb.mxu3 %v2006_v12  ;;  %v2010_v55 = vor.u32 %v2451_v52, %v2007_v53  ;;  %v2449_v58 = vld [vmem:[%s3544_s3 + $0x1d4] sm:$0xf]  ;;  %v1938_v59 = vor.u32 %v2433_v56, %v1935_v57  ;;  %v1999_v60 = vld [vmem:[%s3544_s3 + $0x1d8] sm:$0xf0]  ;;  %v1925_v61 = vld [vmem:[%s3544_s3 + $0x140] sm:$0xf] }
  0x39   : > { %668 = vmatpush.bf16.msrb.mxu1 %v1874_v1  ;;  %v2432_v62 = vld [vmem:[%s3544_s3 + $0x144] sm:$0xf0]  ;;  %v2002_v63 = vor.u32 %v2449_v58, %v1999_v60  ;;  %v1989_v2 = vld [vmem:[%s3544_s3 + $0x1c0] sm:$0xf]  ;;  %v2431_v4 = vld [vmem:[%s3544_s3 + $0x144] sm:$0xf] }
  0x3a   : > { %v1926_v1 = vor.u32 %v2432_v62, %v1925_v61  ;;  %v2448_v3 = vld [vmem:[%s3544_s3 + $0x1c4] sm:$0xf0]  ;;  %v1927_v6 = vld [vmem:[%s3544_s3 + $0x148] sm:$0xf0]  ;;  %v2447_v7 = vld [vmem:[%s3544_s3 + $0x1c4] sm:$0xf] }
  0x3b   : > { %957 = vmatpush.bf16.msrb.mxu2 %v1934_v17  ;;  %v1990_v5 = vor.u32 %v2448_v3, %v1989_v2  ;;  %v1991_v8 = vld [vmem:[%s3544_s3 + $0x1c8] sm:$0xf0]  ;;  %v1930_v9 = vor.u32 %v2431_v4, %v1927_v6  ;;  %v1917_v11 = vld [vmem:[%s3544_s3 + $0x130] sm:$0xf]  ;;  %v2430_v12 = vld [vmem:[%s3544_s3 + $0x134] sm:$0xf0] }
  0x3c   : > { %656 = vmatpush.bf16.msrb.mxu0 %v1862_v10  ;;  %970 = vmatpush.bf16.msrb.mxu3 %v1998_v23  ;;  %v1994_v10 = vor.u32 %v2447_v7, %v1991_v8  ;;  %v1981_v13 = vld [vmem:[%s3544_s3 + $0x1b0] sm:$0xf]  ;;  %v1918_v14 = vor.u32 %v2430_v12, %v1917_v11  ;;  %v2429_v17 = vld [vmem:[%s3544_s3 + $0x134] sm:$0xf]  ;;  %v1919_v18 = vld [vmem:[%s3544_s3 + $0x138] sm:$0xf0] }
  0x3d   : > { %669 = vmatpush.bf16.msrb.mxu1 %v1866_v15  ;;  %v2446_v15 = vld [vmem:[%s3544_s3 + $0x1b4] sm:$0xf0]  ;;  %v2445_v19 = vld [vmem:[%s3544_s3 + $0x1b4] sm:$0xf]  ;;  %v1922_v20 = vor.u32 %v2429_v17, %v1919_v18  ;;  %v1983_v21 = vld [vmem:[%s3544_s3 + $0x1b8] sm:$0xf0] }
  0x3e   : > { %v1982_v16 = vor.u32 %v2446_v15, %v1981_v13  ;;  %v2428_v23 = vld [vmem:[%s3544_s3 + $0x124] sm:$0xf0]  ;;  %v1973_v26 = vld [vmem:[%s3544_s3 + $0x1a0] sm:$0xf]  ;;  %v2427_v28 = vld [vmem:[%s3544_s3 + $0x124] sm:$0xf] }
  0x3f   : > { %958 = vmatpush.bf16.msrb.mxu2 %v1926_v1  ;;  %v2444_v27 = vld [vmem:[%s3544_s3 + $0x1a4] sm:$0xf0]  ;;  %v2443_v31 = vld [vmem:[%s3544_s3 + $0x1a4] sm:$0xf]  ;;  %v1975_v32 = vld [vmem:[%s3544_s3 + $0x1a8] sm:$0xf0] }
  0x40   : > { %657 = vmatpush.bf16.msrb.mxu0 %v1854_v22  ;;  %971 = vmatpush.bf16.msrb.mxu3 %v1990_v5  ;;  %v1909_v22 = vld [vmem:[%s3544_s3 + $0x120] sm:$0xf]  ;;  %v1978_v34 = vor.u32 %v2443_v31, %v1975_v32  ;;  %v1965_v37 = vld [vmem:[%s3544_s3 + $0x190] sm:$0xf]  ;;  %v2442_v39 = vld [vmem:[%s3544_s3 + $0x194] sm:$0xf0] }
  0x41   : > { %670 = vmatpush.bf16.msrb.mxu1 %v1858_v24  ;;  %v1986_v24 = vor.u32 %v2445_v19, %v1983_v21  ;;  %v1910_v25 = vor.u32 %v2428_v23, %v1909_v22  ;;  %v2425_v40 = vld [vmem:[%s3544_s3 + $0x114] sm:$0xf]  ;;  %v1903_v41 = vld [vmem:[%s3544_s3 + $0x118] sm:$0xf0]  ;;  %v1966_v42 = vor.u32 %v2442_v39, %v1965_v37  ;;  %v1895_v52 = vld [vmem:[%s3544_s3 + $0x108] sm:$0xf0] }
  0x42   : > { %v2441_v43 = vld [vmem:[%s3544_s3 + $0x194] sm:$0xf]  ;;  %v1967_v44 = vld [vmem:[%s3544_s3 + $0x198] sm:$0xf0]  ;;  %v1906_v46 = vor.u32 %v2425_v40, %v1903_v41  ;;  %v2439_v53 = vld [vmem:[%s3544_s3 + $0x184] sm:$0xf] }
  0x43   : > { %959 = vmatpush.bf16.msrb.mxu2 %v1918_v14  ;;  %v1970_v49 = vor.u32 %v2441_v43, %v1967_v44  ;;  %v2077_v56 = vld [vmem:[%s3544_s3 + $0x70] sm:$0xf]  ;;  %v2406_v57 = vld [vmem:[%s3544_s3 + $0x74] sm:$0xf0]  ;;  %v2405_v61 = vld [vmem:[%s3544_s3 + $0x74] sm:$0xf] }
  0x44   : > { %658 = vmatpush.bf16.msrb.mxu0 %v1846_v29  ;;  %972 = vmatpush.bf16.msrb.mxu3 %v1982_v16  ;;  %v1974_v29 = vor.u32 %v2444_v27, %v1973_v26  ;;  %v2078_v58 = vor.u32 %v2406_v57, %v2077_v56  ;;  %v2422_v60 = vld [vmem:[%s3544_s3 + $0xf4] sm:$0xf0]  ;;  %v2079_v1 = vld [vmem:[%s3544_s3 + $0x78] sm:$0xf0]  ;;  %v2421_v2 = vld [vmem:[%s3544_s3 + $0xf4] sm:$0xf] }
  0x45   : > { %671 = vmatpush.bf16.msrb.mxu1 %v1850_v30  ;;  %v1911_v30 = vld [vmem:[%s3544_s3 + $0x128] sm:$0xf0]  ;;  %v2143_v3 = vld [vmem:[%s3544_s3 + $0xf8] sm:$0xf0]  ;;  %v2082_v5 = vor.u32 %v2405_v61, %v2079_v1  ;;  %v2069_v7 = vld [vmem:[%s3544_s3 + $0x60] sm:$0xf] }
  0x46   : > { %v1914_v33 = vor.u32 %v2427_v28, %v1911_v30  ;;  %v2146_v6 = vor.u32 %v2421_v2, %v2143_v3  ;;  %v2404_v8 = vld [vmem:[%s3544_s3 + $0x64] sm:$0xf0]  ;;  %v2403_v12 = vld [vmem:[%s3544_s3 + $0x64] sm:$0xf]  ;;  %v2071_v14 = vld [vmem:[%s3544_s3 + $0x68] sm:$0xf0] }
  0x47   : > { %960 = vmatpush.bf16.msrb.mxu2 %v1910_v25  ;;  %v2420_v11 = vld [vmem:[%s3544_s3 + $0xe4] sm:$0xf0]  ;;  %v2419_v15 = vld [vmem:[%s3544_s3 + $0xe4] sm:$0xf]  ;;  %v2074_v16 = vor.u32 %v2403_v12, %v2071_v14  ;;  %v2135_v17 = vld [vmem:[%s3544_s3 + $0xe8] sm:$0xf0] }
  0x48   : > { %659 = vmatpush.bf16.msrb.mxu0 %v1838_v35  ;;  %v1901_v35 = vld [vmem:[%s3544_s3 + $0x110] sm:$0xf]  ;;  %973 = vmatpush.bf16.msrb.mxu3 %v1974_v29  ;;  %v2138_v18 = vor.u32 %v2419_v15, %v2135_v17  ;;  %v2418_v23 = vld [vmem:[%s3544_s3 + $0xd4] sm:$0xf0]  ;;  %v2063_v25 = vld [vmem:[%s3544_s3 + $0x58] sm:$0xf0] }
  0x49   : > { %672 = vmatpush.bf16.msrb.mxu1 %v1842_v36  ;;  %v2426_v36 = vld [vmem:[%s3544_s3 + $0x114] sm:$0xf0]  ;;  %v2061_v19 = vld [vmem:[%s3544_s3 + $0x50] sm:$0xf]  ;;  %v2417_v28 = vld [vmem:[%s3544_s3 + $0xd4] sm:$0xf] }
  0x4a   : > { %v1902_v38 = vor.u32 %v2426_v36, %v1901_v35  ;;  %v2125_v21 = vld [vmem:[%s3544_s3 + $0xd0] sm:$0xf]  ;;  %v2127_v29 = vld [vmem:[%s3544_s3 + $0xd8] sm:$0xf0]  ;;  %v2117_v35 = vld [vmem:[%s3544_s3 + $0xc0] sm:$0xf] }
  0x4b   : > { %v2126_v26 = vor.u32 %v2418_v23, %v2125_v21  ;;  %v2130_v32 = vor.u32 %v2417_v28, %v2127_v29  ;;  %v2416_v37 = vld [vmem:[%s3544_s3 + $0xc4] sm:$0xf0]  ;;  %v2055_v39 = vld [vmem:[%s3544_s3 + $0x48] sm:$0xf0]  ;;  %v2111_v56 = vld [vmem:[%s3544_s3 + $0xb8] sm:$0xf0] }
  0x4c   : > { %660 = vmatpush.bf16.msrb.mxu0 %v1830_v45  ;;  %v1893_v45 = vld [vmem:[%s3544_s3 + $0x100] sm:$0xf]  ;;  %961 = vmatpush.bf16.msrb.mxu2 %v1902_v38  ;;  %v2399_v38 = vld [vmem:[%s3544_s3 + $0x44] sm:$0xf]  ;;  %v2118_v40 = vor.u32 %v2416_v37, %v2117_v35  ;;  %v2119_v43 = vld [vmem:[%s3544_s3 + $0xc8] sm:$0xf0] }
  0x4d   : > { %673 = vmatpush.bf16.msrb.mxu1 %v1834_v47  ;;  %v2424_v47 = vld [vmem:[%s3544_s3 + $0x104] sm:$0xf0]  ;;  %974 = vmatpush.bf16.msrb.mxu3 %v1966_v42  ;;  %v2058_v41 = vor.u32 %v2399_v38, %v2055_v39  ;;  %v2415_v42 = vld [vmem:[%s3544_s3 + $0xc4] sm:$0xf]  ;;  %v2037_v57 = vld [vmem:[%s3544_s3 + $0x20] sm:$0xf] }
  0x4e   : > { %v1894_v50 = vor.u32 %v2424_v47, %v1893_v45  ;;  %v2122_v44 = vor.u32 %v2415_v42, %v2119_v43  ;;  %v2045_v45 = vld [vmem:[%s3544_s3 + $0x30] sm:$0xf]  ;;  %v2396_v61 = vld [vmem:[%s3544_s3 + $0x24] sm:$0xf0]  ;;  %v2395_v3 = vld [vmem:[%s3544_s3 + $0x24] sm:$0xf] }
  0x4f   : > { %661 = vmatmul.bf16.vlgmr.msrb.gmra.mxu0 %v556_v51  ;;  %v2109_v47 = vld [vmem:[%s3544_s3 + $0xb0] sm:$0xf]  ;;  %v2038_v1 = vor.u32 %v2396_v61, %v2037_v57  ;;  %v2410_v12 = vld [vmem:[%s3544_s3 + $0x94] sm:$0xf0]  ;;  %v2031_v15 = vld [vmem:[%s3544_s3 + $0x18] sm:$0xf0] }
  0x50   : > { %981 = vmatpush.bf16.msra.mxu0 %v1954_v0  ;;  %674 = vmatmul.bf16.vlgmr.msrb.gmra.mxu1 %v556_v51  ;;  %v1957_v0 = vld [vmem:[%s3544_s3 + $0x180] sm:$0xf]  ;;  %v2423_v51 = vld [vmem:[%s3544_s3 + $0x104] sm:$0xf]  ;;  %v2095_v17 = vld [vmem:[%s3544_s3 + $0x98] sm:$0xf0] }
  0x51   : > { %994 = vmatpush.bf16.msra.mxu1 %v2018_v48  ;;  %v2440_v48 = vld [vmem:[%s3544_s3 + $0x184] sm:$0xf0]  ;;  %v1898_v62 = vor.u32 %v2423_v51, %v1895_v52  ;;  %962 = vmatpush.bf16.msrb.mxu2 %v1894_v50  ;;  %v2047_v50 = vld [vmem:[%s3544_s3 + $0x38] sm:$0xf0]  ;;  %v2391_v29 = vld [vmem:[%s3544_s3 + $0x4] sm:$0xf] }
  0x52   : > { %v2408_v23 = vld [vmem:[%s3544_s3 + $0x84] sm:$0xf0]  ;;  %v2087_v35 = vld [vmem:[%s3544_s3 + $0x88] sm:$0xf0]  ;;  %v681_v37 = vld [vmem:[%s3543_s2] sm:$0x3] }
  0x53   : > { %v683_v39 = vperm.slane %v681_v37, 0  ;;  %v684_v42 = vperm.slane %v681_v37, 1  ;;  %v2470_v57 = vld [vmem:[%s3544_s3 + $0x274] sm:$0xf0]  ;;  %v2207_v61 = vld [vmem:[%s3544_s3 + $0x278] sm:$0xf0] }
  0x54   : > { %982 = vmatpush.bf16.msra.mxu0 %v1946_v54  ;;  %v1958_v54 = vor.u32 %v2440_v48, %v1957_v0  ;;  %v2414_v48 = vld [vmem:[%s3544_s3 + $0xb4] sm:$0xf0] }
  0x55   : > { %995 = vmatpush.bf16.msra.mxu1 %v2010_v55  ;;  %v1959_v55 = vld [vmem:[%s3544_s3 + $0x188] sm:$0xf0]  ;;  %1167 = vmatpush.bf16.msra.mxu2 %v2078_v58 }
  0x56   : > { %v1962_v4 = vor.u32 %v2439_v53, %v1959_v55  ;;  %975 = vmatpush.bf16.msrb.mxu3 %v1958_v54  ;;  %v2110_v53 = vor.u32 %v2414_v48, %v2109_v47  ;;  %v2413_v55 = vld [vmem:[%s3544_s3 + $0xb4] sm:$0xf] }
  0x58   : > { %983 = vmatpush.bf16.msra.mxu0 %v1938_v59  ;;  %v2141_v59 = vld [vmem:[%s3544_s3 + $0xf0] sm:$0xf] }
  0x59   : > { %996 = vmatpush.bf16.msra.mxu1 %v2002_v63  ;;  %v2142_v63 = vor.u32 %v2422_v60, %v2141_v59  ;;  %v2114_v60 = vor.u32 %v2413_v55, %v2111_v56  ;;  %v2205_v56 = vld [vmem:[%s3544_s3 + $0x270] sm:$0xf] }
  0x5b   : > { %1180 = vmatpush.bf16.msra.mxu3 %v2142_v63  ;;  %v2412_v63 = vld [vmem:[%s3544_s3 + $0xa4] sm:$0xf0] }
  0x5c   : > { %984 = vmatpush.bf16.msra.mxu0 %v1930_v9  ;;  %v2133_v9 = vld [vmem:[%s3544_s3 + $0xe0] sm:$0xf] }
  0x5d   : > { %997 = vmatpush.bf16.msra.mxu1 %v1994_v10  ;;  %v2070_v10 = vor.u32 %v2404_v8, %v2069_v7  ;;  %v2134_v13 = vor.u32 %v2420_v11, %v2133_v9  ;;  %v2103_v7 = vld [vmem:[%s3544_s3 + $0xa8] sm:$0xf0]  ;;  %v2029_v8 = vld [vmem:[%s3544_s3 + $0x10] sm:$0xf]  ;;  %v2394_v9 = vld [vmem:[%s3544_s3 + $0x14] sm:$0xf0] }
  0x5e   : > { %v2093_v11 = vld [vmem:[%s3544_s3 + $0x90] sm:$0xf]  ;;  %v2030_v14 = vor.u32 %v2394_v9, %v2029_v8  ;;  %v2197_v8 = vld [vmem:[%s3544_s3 + $0x260] sm:$0xf]  ;;  %v2468_v9 = vld [vmem:[%s3544_s3 + $0x264] sm:$0xf0] }
  0x5f   : > { %1168 = vmatpush.bf16.msra.mxu2 %v2070_v10  ;;  %1181 = vmatpush.bf16.msra.mxu3 %v2134_v13  ;;  %v2393_v13 = vld [vmem:[%s3544_s3 + $0x14] sm:$0xf] }
  0x60   : > { %985 = vmatpush.bf16.msra.mxu0 %v1922_v20  ;;  %v2402_v20 = vld [vmem:[%s3544_s3 + $0x54] sm:$0xf0]  ;;  %v2034_v21 = vor.u32 %v2393_v13, %v2031_v15  ;;  %v2467_v13 = vld [vmem:[%s3544_s3 + $0x264] sm:$0xf] }
  0x61   : > { %998 = vmatpush.bf16.msra.mxu1 %v1986_v24  ;;  %v2062_v22 = vor.u32 %v2402_v20, %v2061_v19  ;;  %v2401_v24 = vld [vmem:[%s3544_s3 + $0x54] sm:$0xf]  ;;  %v2021_v19 = vld [vmem:[%s3544_s3] sm:$0xf]  ;;  %v2392_v20 = vld [vmem:[%s3544_s3 + $0x4] sm:$0xf0] }
  0x62   : > { %v2066_v27 = vor.u32 %v2401_v24, %v2063_v25 }
  0x63   : > { %1169 = vmatpush.bf16.msra.mxu2 %v2062_v22  ;;  %1182 = vmatpush.bf16.msra.mxu3 %v2126_v26  ;;  %v2085_v22 = vld [vmem:[%s3544_s3 + $0x80] sm:$0xf] }
  0x64   : > { %986 = vmatpush.bf16.msra.mxu0 %v1914_v33  ;;  %v2053_v33 = vld [vmem:[%s3544_s3 + $0x40] sm:$0xf]  ;;  %v2086_v28 = vor.u32 %v2408_v23, %v2085_v22  ;;  %v2198_v22 = vor.u32 %v2468_v9, %v2197_v8  ;;  %v2475_v8 = vld [vmem:[%s3544_s3 + $0x2a4] sm:$0xf]  ;;  %v2231_v9 = vld [vmem:[%s3544_s3 + $0x2a8] sm:$0xf0] }
  0x65   : > { %999 = vmatpush.bf16.msra.mxu1 %v1978_v34  ;;  %v2400_v34 = vld [vmem:[%s3544_s3 + $0x44] sm:$0xf0] }
  0x66   : > { %v2054_v36 = vor.u32 %v2400_v34, %v2053_v33  ;;  %v2407_v33 = vld [vmem:[%s3544_s3 + $0x84] sm:$0xf] }
  0x67   : > { %1183 = vmatpush.bf16.msra.mxu3 %v2118_v40 }
  0x68   : > { %987 = vmatpush.bf16.msra.mxu0 %v1906_v46  ;;  %1170 = vmatpush.bf16.msra.mxu2 %v2054_v36  ;;  %v2398_v46 = vld [vmem:[%s3544_s3 + $0x34] sm:$0xf0]  ;;  %v2090_v36 = vor.u32 %v2407_v33, %v2087_v35  ;;  %v2255_v35 = vld [vmem:[%s3544_s3 + $0x2d8] sm:$0xf0] }
  0x69   : > { %1000 = vmatpush.bf16.msra.mxu1 %v1970_v49  ;;  %v2046_v0 = vor.u32 %v2398_v46, %v2045_v45  ;;  %v2397_v49 = vld [vmem:[%s3544_s3 + $0x34] sm:$0xf]  ;;  %v2482_v33 = vld [vmem:[%s3544_s3 + $0x2d4] sm:$0xf0] }
  0x6a   : > { %v2050_v54 = vor.u32 %v2397_v49, %v2047_v50 }
  0x6b   : > { %1184 = vmatpush.bf16.msra.mxu3 %v2110_v53 }
  0x6c   : > { %988 = vmatpush.bf16.msra.mxu0 %v1898_v62  ;;  %1171 = vmatpush.bf16.msra.mxu2 %v2046_v0  ;;  %v2101_v62 = vld [vmem:[%s3544_s3 + $0xa0] sm:$0xf] }
  0x6d   : > { %1001 = vmatpush.bf16.msra.mxu1 %v1962_v4  ;;  %v2102_v2 = vor.u32 %v2412_v63, %v2101_v62  ;;  %v2039_v4 = vld [vmem:[%s3544_s3 + $0x28] sm:$0xf0]  ;;  %v2269_v62 = vld [vmem:[%s3544_s3 + $0x2f0] sm:$0xf]  ;;  %v2486_v63 = vld [vmem:[%s3544_s3 + $0x2f4] sm:$0xf0] }
  0x6e   : > { %v2270_v15 = vor.u32 %v2486_v63, %v2269_v62  ;;  %v2460_v63 = vld [vmem:[%s3544_s3 + $0x224] sm:$0xf0] }
  0x6f   : > { %1185 = vmatpush.bf16.msra.mxu3 %v2102_v2 }
  0x70   : > { %1193 = vmatpush.bf16.msrb.mxu0 %v2082_v5  ;;  %v2411_v5 = vld [vmem:[%s3544_s3 + $0xa4] sm:$0xf]  ;;  %1172 = vmatpush.bf16.msra.mxu2 %v2038_v1  ;;  %v2485_v1 = vld [vmem:[%s3544_s3 + $0x2f4] sm:$0xf] }
  0x71   : > { %1206 = vmatpush.bf16.msrb.mxu1 %v2146_v6  ;;  %v2042_v6 = vor.u32 %v2395_v3, %v2039_v4  ;;  %v2106_v10 = vor.u32 %v2411_v5, %v2103_v7  ;;  %v2271_v5 = vld [vmem:[%s3544_s3 + $0x2f8] sm:$0xf0] }
  0x74   : > { %1194 = vmatpush.bf16.msrb.mxu0 %v2074_v16  ;;  %v2409_v16 = vld [vmem:[%s3544_s3 + $0x94] sm:$0xf]  ;;  %1173 = vmatpush.bf16.msra.mxu2 %v2030_v14  ;;  %v2199_v14 = vld [vmem:[%s3544_s3 + $0x268] sm:$0xf0] }
  0x75   : > { %1207 = vmatpush.bf16.msrb.mxu1 %v2138_v18  ;;  %v2094_v18 = vor.u32 %v2410_v12, %v2093_v11  ;;  %v2098_v26 = vor.u32 %v2409_v16, %v2095_v17  ;;  %v2274_v16 = vor.u32 %v2485_v1, %v2271_v5  ;;  %v2261_v17 = vld [vmem:[%s3544_s3 + $0x2e0] sm:$0xf]  ;;  %v2202_v23 = vor.u32 %v2467_v13, %v2199_v14  ;;  %v2459_v1 = vld [vmem:[%s3544_s3 + $0x224] sm:$0xf]  ;;  %v2458_v13 = vld [vmem:[%s3544_s3 + $0x214] sm:$0xf0] }
  0x76   : > { %v2229_v5 = vld [vmem:[%s3544_s3 + $0x2a0] sm:$0xf]  ;;  %v2457_v14 = vld [vmem:[%s3544_s3 + $0x214] sm:$0xf] }
  0x77   : > { %1186 = vmatpush.bf16.msra.mxu3 %v2094_v18 }
  0x78   : > { %1195 = vmatpush.bf16.msrb.mxu0 %v2066_v27  ;;  %v2022_v27 = vor.u32 %v2392_v20, %v2021_v19  ;;  %v2484_v19 = vld [vmem:[%s3544_s3 + $0x2e4] sm:$0xf0]  ;;  %v2483_v20 = vld [vmem:[%s3544_s3 + $0x2e4] sm:$0xf] }
  0x79   : > { %1208 = vmatpush.bf16.msrb.mxu1 %v2130_v32  ;;  %v2023_v32 = vld [vmem:[%s3544_s3 + $0x8] sm:$0xf0] }
  0x7a   : > { %v2026_v34 = vor.u32 %v2391_v29, %v2023_v32  ;;  %1174 = vmatpush.bf16.msra.mxu2 %v2022_v27  ;;  %v2191_v27 = vld [vmem:[%s3544_s3 + $0x258] sm:$0xf0]  ;;  %v2253_v32 = vld [vmem:[%s3544_s3 + $0x2d0] sm:$0xf] }
  0x7b   : > { %1187 = vmatpush.bf16.msra.mxu3 %v2086_v28  ;;  %v2262_v28 = vor.u32 %v2484_v19, %v2261_v17  ;;  %v2234_v17 = vor.u32 %v2475_v8, %v2231_v9  ;;  %v2474_v19 = vld [vmem:[%s3544_s3 + $0x294] sm:$0xf0]  ;;  %v2493_v8 = vld [vmem:[#allocation4 + $0x34] sm:$0xf]  ;;  %v2303_v9 = vld [vmem:[#allocation4 + $0x38] sm:$0xf0] }
  0x7c   : > { %1196 = vmatpush.bf16.msrb.mxu0 %v2058_v41 }
  0x7d   : > { %1209 = vmatpush.bf16.msrb.mxu1 %v2122_v44 }
  0x80   : > { %1197 = vmatpush.bf16.msrb.mxu0 %v2050_v54 }
  0x81   : > { %1210 = vmatpush.bf16.msrb.mxu1 %v2114_v60  ;;  %v2469_v60 = vld [vmem:[%s3544_s3 + $0x274] sm:$0xf] }
  0x82   : > { %v2210_v7 = vor.u32 %v2469_v60, %v2207_v61  ;;  %v2165_v61 = vld [vmem:[%s3544_s3 + $0x220] sm:$0xf] }
  0x84   : > { %1198 = vmatpush.bf16.msrb.mxu0 %v2042_v6  ;;  %v2206_v6 = vor.u32 %v2470_v57, %v2205_v56  ;;  %v2477_v56 = vld [vmem:[%s3544_s3 + $0x2b4] sm:$0xf]  ;;  %v2239_v57 = vld [vmem:[%s3544_s3 + $0x2b8] sm:$0xf0] }
  0x85   : > { %1211 = vmatpush.bf16.msrb.mxu1 %v2106_v10 }
  0x88   : > { %1199 = vmatpush.bf16.msrb.mxu0 %v2034_v21  ;;  %v2263_v21 = vld [vmem:[%s3544_s3 + $0x2e8] sm:$0xf0] }
  0x89   : > { %1212 = vmatpush.bf16.msrb.mxu1 %v2098_v26  ;;  %v2465_v26 = vld [vmem:[%s3544_s3 + $0x254] sm:$0xf]  ;;  %v2266_v29 = vor.u32 %v2483_v20, %v2263_v21  ;;  %v2223_v21 = vld [vmem:[%s3544_s3 + $0x298] sm:$0xf0] }
  0x8a   : > { %v2194_v37 = vor.u32 %v2465_v26, %v2191_v27  ;;  %v2473_v20 = vld [vmem:[%s3544_s3 + $0x294] sm:$0xf]  ;;  %v2213_v26 = vld [vmem:[%s3544_s3 + $0x280] sm:$0xf]  ;;  %v2472_v27 = vld [vmem:[%s3544_s3 + $0x284] sm:$0xf0] }
  0x8c   : > { %1200 = vmatpush.bf16.msrb.mxu0 %v2026_v34  ;;  %v2481_v34 = vld [vmem:[%s3544_s3 + $0x2d4] sm:$0xf] }
  0x8d   : > { %1213 = vmatpush.bf16.msrb.mxu1 %v2090_v36 }
  0xae   : > { %v3200_v30 = vpop.f32.mrf.mxu0 }
  0xaf   : > { %v3202_v31 = vpop.f32.mrf.mxu1 }
  0xb5   : > { %v3246_v51 = vpop.f32.mrf.mxu2 }
  0xb6   : > { %v3248_v52 = vpop.f32.mrf.mxu3  ;;  %v433_v58 = vpop.f32.mrf.mxu0  ;;  %v538_v38 = vadd.f32 %v3246_v51, %v3200_v30 }
  0xb7   : > { %v446_v59 = vpop.f32.mrf.mxu1  ;;  %v551_v40 = vadd.f32 %v3248_v52, %v3202_v31 }
  0xbd   : > { %v539_v24 = vpop.f32.mrf.mxu2 }
  0xbe   : > { %v552_v25 = vpop.f32.mrf.mxu3  ;;  %v2189_v24 = vld [vmem:[%s3544_s3 + $0x250] sm:$0xf] }
  0xbf   : > { %v2466_v25 = vld [vmem:[%s3544_s3 + $0x254] sm:$0xf0] }
  0xc0   : > { %v2190_v36 = vor.u32 %v2466_v25, %v2189_v24  ;;  %v2149_v24 = vld [vmem:[%s3544_s3 + $0x200] sm:$0xf]  ;;  %v2456_v25 = vld [vmem:[%s3544_s3 + $0x204] sm:$0xf0] }
  0xcc   : > { %v662_v41 = vpop.f32.mrf.mxu0 }
  0xcd   : > { %v679_v43 = vadd.f32 %v662_v41, %v538_v38  ;;  %v675_v44 = vpop.f32.mrf.mxu1  ;;  %v2181_v38 = vld [vmem:[%s3544_s3 + $0x240] sm:$0xf]  ;;  %v2183_v41 = vld [vmem:[%s3544_s3 + $0x248] sm:$0xf0] }
  0xce   : > { %v680_v45 = vadd.f32 %v675_v44, %v551_v40  ;;  %v2463_v40 = vld [vmem:[%s3544_s3 + $0x244] sm:$0xf]  ;;  %v2245_v44 = vld [vmem:[%s3544_s3 + $0x2c0] sm:$0xf] }
  0xcf   : > { %v687_v46 = vadd.f32 %v683_v39, %v679_v43  ;;  %v2464_v39 = vld [vmem:[%s3544_s3 + $0x244] sm:$0xf0]  ;;  %v2258_v43 = vor.u32 %v2481_v34, %v2255_v35  ;;  %v2226_v34 = vor.u32 %v2473_v20, %v2223_v21  ;;  %v2502_v35 = vld [vmem:[#allocation4 + $0x74] sm:$0xf0]  ;;  %v2489_v20 = vld [vmem:[#allocation4 + $0x14] sm:$0xf] }
  0xd0   : > { %v688_v47 = vadd.f32 %v684_v42, %v680_v45  ;;  %v2254_v42 = vor.u32 %v2482_v33, %v2253_v32  ;;  %v2480_v45 = vld [vmem:[%s3544_s3 + $0x2c4] sm:$0xf0]  ;;  %v2287_v21 = vld [vmem:[#allocation4 + $0x18] sm:$0xf0] }
  0xd1   : > { %v689_v0 = vmax.f32 %v687_v46, 0.0  ;;  %v2479_v46 = vld [vmem:[%s3544_s3 + $0x2c4] sm:$0xf]  ;;  %v2333_v32 = vld [vmem:[#allocation4 + $0x70] sm:$0xf] }
  0xd2   : > { %v690_v48 = vmax.f32 %v688_v47, 0.0  ;;  %v2247_v47 = vld [vmem:[%s3544_s3 + $0x2c8] sm:$0xf0] }
  0xd3   : > { %v697_v49 = vrot.slane %v689_v0, 7  ;;  %v2182_v0 = vor.u32 %v2464_v39, %v2181_v38  ;;  %v2471_v38 = vld [vmem:[%s3544_s3 + $0x284] sm:$0xf]  ;;  %v2215_v39 = vld [vmem:[%s3544_s3 + $0x288] sm:$0xf0] }
  0xd4   : > { %v698_v50 = vrot.slane %v690_v48, 7  ;;  %v664_v53 = vpop.f32.mrf.mxu0  ;;  %v2186_v48 = vor.u32 %v2463_v40, %v2183_v41  ;;  %v2501_v40 = vld [vmem:[#allocation4 + $0x74] sm:$0xf]  ;;  %v2150_v41 = vor.u32 %v2456_v25, %v2149_v24  ;;  %v2277_v24 = vld [vmem:[#allocation4] sm:$0xf] }
  0xd5   : > { %701 = vst [vmem:[#allocation3 + $0x10] sm:$0xfe] %v697_v49  ;;  %v677_v54 = vpop.f32.mrf.mxu1  ;;  %v2461_v53 = vld [vmem:[%s3544_s3 + $0x234] sm:$0xf]  ;;  %v2488_v25 = vld [vmem:[#allocation4 + $0x4] sm:$0xf0] }
  0xd6   : > { %703 = vst [vmem:[#allocation3 + $0x18] sm:$0x1] %v697_v49  ;;  %v2173_v49 = vld [vmem:[%s3544_s3 + $0x230] sm:$0xf]  ;;  %v2175_v54 = vld [vmem:[%s3544_s3 + $0x238] sm:$0xf0] }
  0xd7   : > { %702 = vst [vmem:[#allocation3] sm:$0xfe] %v698_v50  ;;  %v2178_v60 = vor.u32 %v2461_v53, %v2175_v54  ;;  %v2325_v53 = vld [vmem:[#allocation4 + $0x60] sm:$0xf]  ;;  %v2500_v54 = vld [vmem:[#allocation4 + $0x64] sm:$0xf0] }
  0xd8   : > { %704 = vst [vmem:[#allocation3 + $0x8] sm:$0x1] %v698_v50  ;;  %v2462_v50 = vld [vmem:[%s3544_s3 + $0x234] sm:$0xf0] }
  0xdc   : > { %v741_v30 = vld [vmem:[#allocation3 + $0x10] sm:$0xfe] }
  0xdd   : > { %v743_v51 = vld [vmem:[#allocation3 + $0x18] sm:$0x1] }
  0xde   : > { %v745_v31 = vpack.c.bf16 %v743_v51, %v741_v30  ;;  %v742_v52 = vld [vmem:[#allocation3] sm:$0xfe]  ;;  %v2246_v30 = vor.u32 %v2480_v45, %v2245_v44  ;;  %v2250_v51 = vor.u32 %v2479_v46, %v2247_v47  ;;  %v2334_v46 = vor.u32 %v2502_v35, %v2333_v32 }
  0xdf   : > { %v744_v55 = vld [vmem:[#allocation3 + $0x8] sm:$0x1]  ;;  %v1220_v44 = vld [vmem:[#allocation3] sm:$0xfc] }
  0xe0   : > { %v782_v58 = vshll.u32 %v745_v31, 16  ;;  %v746_v59 = vpack.c.bf16 %v744_v55, %v742_v52  ;;  %v780_v2 = vshrl.u32 %v745_v31, 16  ;;  %v705_v31 = vld [vmem:[#allocation3 + $0x10] sm:$0xff]  ;;  %v2237_v52 = vld [vmem:[%s3544_s3 + $0x2b0] sm:$0xf] }
  0xe1   : > { %v2478_v55 = vld [vmem:[%s3544_s3 + $0x2b4] sm:$0xf0]  ;;  %v707_v62 = vpack.c.bf16 %v705_v31, %v705_v31  ;;  %v1222_v45 = vld [vmem:[#allocation3 + $0x8] sm:$0x3] }
  0xe2   : > { %v784_v3 = vrot.slane %v782_v58, 1  ;;  %v789_v4 = vshll.u32 %v746_v59, 16  ;;  %v787_v11 = vshrl.u32 %v746_v59, 16  ;;  %v706_v58 = vld [vmem:[#allocation3] sm:$0xff]  ;;  %v2174_v59 = vor.u32 %v2462_v50, %v2173_v49 }
  0xe3   : > { %v1224_v50 = vpack.c.bf16 %v1222_v45, %v1220_v44 }
  0xe4   : > { %v785_v10 = vor.u32 %v784_v3, %v780_v2  ;;  %v791_v12 = vrot.slane %v789_v4, 1  ;;  %v2167_v2 = vld [vmem:[%s3544_s3 + $0x228] sm:$0xf0]  ;;  %v2238_v3 = vor.u32 %v2478_v55, %v2237_v52  ;;  %v2242_v4 = vor.u32 %v2477_v56, %v2239_v57  ;;  %v2317_v57 = vld [vmem:[#allocation4 + $0x50] sm:$0xf] }
  0xe5   : > { %v2326_v52 = vor.u32 %v2500_v54, %v2325_v53  ;;  %v1260_v55 = vrot.slane %v1224_v50, 1 }
  0xe6   : > { %963 = vmatmul.bf16.vlgmr.msrb.gmra.mxu2 %v785_v10  ;;  %v792_v18 = vor.u32 %v791_v12, %v787_v11  ;;  %989 = vmatmul.bf16.vlgmr.msra.gmra.mxu0 %v785_v10  ;;  %v2166_v10 = vor.u32 %v2460_v63, %v2165_v61  ;;  %v2170_v11 = vor.u32 %v2459_v1, %v2167_v2  ;;  %v2157_v12 = vld [vmem:[%s3544_s3 + $0x210] sm:$0xf]  ;;  %v2309_v63 = vld [vmem:[#allocation4 + $0x40] sm:$0xf]  ;;  %v2496_v1 = vld [vmem:[#allocation4 + $0x44] sm:$0xf0] }
  0xe7   : > { %1423 = vmatpush.bf16.msrb.mxu2 %v2206_v6  ;;  %1449 = vmatpush.bf16.msra.mxu0 %v2210_v7  ;;  %v708_v6 = vpack.c.bf16 %v706_v58, %v706_v58  ;;  %v2476_v7 = vld [vmem:[%s3544_s3 + $0x2a4] sm:$0xf0]  ;;  %v2498_v58 = vld [vmem:[#allocation4 + $0x54] sm:$0xf0]  ;;  %v2495_v2 = vld [vmem:[#allocation4 + $0x44] sm:$0xf] }
  0xe8   : > { %976 = vmatmul.bf16.vlgmr.msrb.gmra.mxu3 %v792_v18  ;;  %1002 = vmatmul.bf16.vlgmr.msra.gmra.mxu1 %v792_v18  ;;  %v2221_v18 = vld [vmem:[%s3544_s3 + $0x290] sm:$0xf]  ;;  %v2318_v61 = vor.u32 %v2498_v58, %v2317_v57 }
  0xe9   : > { %1436 = vmatpush.bf16.msrb.mxu3 %v2270_v15  ;;  %1462 = vmatpush.bf16.msra.mxu1 %v2274_v16  ;;  %v2159_v15 = vld [vmem:[%s3544_s3 + $0x218] sm:$0xf0]  ;;  %v2230_v16 = vor.u32 %v2476_v7, %v2229_v5  ;;  %v2222_v33 = vor.u32 %v2474_v19, %v2221_v18  ;;  %v2494_v7 = vld [vmem:[#allocation4 + $0x34] sm:$0xf0]  ;;  %v2285_v18 = vld [vmem:[#allocation4 + $0x10] sm:$0xf] }
  0xea   : > { %v2490_v19 = vld [vmem:[#allocation4 + $0x14] sm:$0xf0] }
  0xeb   : > { %1424 = vmatpush.bf16.msrb.mxu2 %v2198_v22  ;;  %1450 = vmatpush.bf16.msra.mxu0 %v2202_v23  ;;  %v2158_v22 = vor.u32 %v2458_v13, %v2157_v12  ;;  %v2162_v23 = vor.u32 %v2457_v14, %v2159_v15  ;;  %v2293_v12 = vld [vmem:[#allocation4 + $0x20] sm:$0xf]  ;;  %v2492_v13 = vld [vmem:[#allocation4 + $0x24] sm:$0xf0]  ;;  %v2491_v14 = vld [vmem:[#allocation4 + $0x24] sm:$0xf] }
  0xec   : > { %v2295_v15 = vld [vmem:[#allocation4 + $0x28] sm:$0xf0] }
  0xed   : > { %1437 = vmatpush.bf16.msrb.mxu3 %v2262_v28  ;;  %1463 = vmatpush.bf16.msra.mxu1 %v2266_v29  ;;  %v2455_v28 = vld [vmem:[%s3544_s3 + $0x204] sm:$0xf]  ;;  %v2151_v29 = vld [vmem:[%s3544_s3 + $0x208] sm:$0xf0] }
  0xef   : > { %1425 = vmatpush.bf16.msrb.mxu2 %v2190_v36  ;;  %1451 = vmatpush.bf16.msra.mxu0 %v2194_v37  ;;  %v1219_v36 = vld [vmem:[#allocation3 + $0x10] sm:$0xfc]  ;;  %v1221_v37 = vld [vmem:[#allocation3 + $0x18] sm:$0x3] }
  0xf0   : > { %v1223_v47 = vpack.c.bf16 %v1221_v37, %v1219_v36 }
  0xf1   : > { %1438 = vmatpush.bf16.msrb.mxu3 %v2254_v42  ;;  %1464 = vmatpush.bf16.msra.mxu1 %v2258_v43  ;;  %v2154_v42 = vor.u32 %v2455_v28, %v2151_v29  ;;  %v2335_v43 = vld [vmem:[#allocation4 + $0x78] sm:$0xf0]  ;;  %v2278_v28 = vor.u32 %v2488_v25, %v2277_v24  ;;  %v1485_v29 = vld [vmem:[#allocation2 + $0x1] ss:$2 sm:$0xff] }
  0xf2   : > { %v2338_v49 = vor.u32 %v2501_v40, %v2335_v43  ;;  %v1259_v31 = vrot.slane %v1223_v47, 1 }
  0xf3   : > { %1426 = vmatpush.bf16.msrb.mxu2 %v2182_v0  ;;  %1452 = vmatpush.bf16.msra.mxu0 %v2186_v48  ;;  %v2214_v0 = vor.u32 %v2472_v27, %v2213_v26  ;;  %v2218_v48 = vor.u32 %v2471_v38, %v2215_v39  ;;  %v2487_v26 = vld [vmem:[#allocation4 + $0x4] sm:$0xf]  ;;  %v2279_v27 = vld [vmem:[#allocation4 + $0x8] sm:$0xf0] }
  0xf4   : > { %v2282_v32 = vor.u32 %v2487_v26, %v2279_v27 }
  0xf5   : > { %1439 = vmatpush.bf16.msrb.mxu3 %v2246_v30  ;;  %1465 = vmatpush.bf16.msra.mxu1 %v2250_v51  ;;  %v2499_v30 = vld [vmem:[#allocation4 + $0x64] sm:$0xf]  ;;  %v2327_v51 = vld [vmem:[#allocation4 + $0x68] sm:$0xf0] }
  0xf6   : > { %1175 = vmatmul.bf16.vlgmr.msra.gmra.mxu2 %v707_v62  ;;  %1201 = vmatmul.bf16.vlgmr.msrb.gmra.mxu0 %v707_v62  ;;  %v2330_v56 = vor.u32 %v2499_v30, %v2327_v51 }
  0xf7   : > { %1427 = vmatpush.bf16.msrb.mxu2 %v2174_v59  ;;  %1453 = vmatpush.bf16.msra.mxu0 %v2178_v60  ;;  %v2497_v59 = vld [vmem:[#allocation4 + $0x54] sm:$0xf]  ;;  %v2319_v60 = vld [vmem:[#allocation4 + $0x58] sm:$0xf0] }
  0xf8   : > { %1188 = vmatmul.bf16.vlgmr.msra.gmra.mxu3 %v708_v6  ;;  %1214 = vmatmul.bf16.vlgmr.msrb.gmra.mxu1 %v708_v6  ;;  %v2322_v62 = vor.u32 %v2497_v59, %v2319_v60  ;;  %v2301_v6 = vld [vmem:[#allocation4 + $0x30] sm:$0xf] }
  0xf9   : > { %1440 = vmatpush.bf16.msrb.mxu3 %v2238_v3  ;;  %1466 = vmatpush.bf16.msra.mxu1 %v2242_v4  ;;  %v2311_v3 = vld [vmem:[#allocation4 + $0x48] sm:$0xf0]  ;;  %v2310_v4 = vor.u32 %v2496_v1, %v2309_v63  ;;  %v1477_v63 = vld [vmem:[%s3545_s4] sm:$0x3] }
  0xfa   : > { %v2314_v5 = vor.u32 %v2495_v2, %v2311_v3  ;;  %v1479_v3 = vperm.slane %v1477_v63, 0 }
  0xfb   : > { %1428 = vmatpush.bf16.msrb.mxu2 %v2166_v10  ;;  %1454 = vmatpush.bf16.msra.mxu0 %v2170_v11  ;;  %v2302_v10 = vor.u32 %v2494_v7, %v2301_v6  ;;  %v2306_v11 = vor.u32 %v2493_v8, %v2303_v9  ;;  %v1480_v6 = vperm.slane %v1477_v63, 1 }
  0xfd   : > { %1441 = vmatpush.bf16.msrb.mxu3 %v2230_v16  ;;  %1467 = vmatpush.bf16.msra.mxu1 %v2234_v17  ;;  %v2294_v16 = vor.u32 %v2492_v13, %v2293_v12  ;;  %v2298_v17 = vor.u32 %v2491_v14, %v2295_v15 }
  0xff   : > { %1429 = vmatpush.bf16.msrb.mxu2 %v2158_v22  ;;  %1455 = vmatpush.bf16.msra.mxu0 %v2162_v23  ;;  %v2286_v22 = vor.u32 %v2490_v19, %v2285_v18  ;;  %v2290_v23 = vor.u32 %v2489_v20, %v2287_v21 }
 0x101   : > { %1442 = vmatpush.bf16.msrb.mxu3 %v2222_v33  ;;  %1468 = vmatpush.bf16.msra.mxu1 %v2226_v34  ;;  %v1486_v33 = vpack.c.bf16 %v1485_v29, %v1485_v29 }
 0x103   : > { %1430 = vmatpush.bf16.msrb.mxu2 %v2150_v41  ;;  %1456 = vmatpush.bf16.msra.mxu0 %v2154_v42 }
 0x105   : > { %1443 = vmatpush.bf16.msrb.mxu3 %v2214_v0  ;;  %1469 = vmatpush.bf16.msra.mxu1 %v2218_v48 }
 0x106   : > { %1431 = vmatmul.bf16.vlgmr.msrb.gmra.mxu2 %v1259_v31  ;;  %1457 = vmatmul.bf16.vlgmr.msra.gmra.mxu0 %v1259_v31 }
 0x107   : > { %1589 = vmatpush.bf16.msra.mxu2 %v2334_v46 }
 0x108   : > { %1444 = vmatmul.bf16.vlgmr.msrb.gmra.mxu3 %v1260_v55  ;;  %1470 = vmatmul.bf16.vlgmr.msra.gmra.mxu1 %v1260_v55 }
 0x109   : > { %1602 = vmatpush.bf16.msra.mxu3 %v2338_v49 }
 0x10b   : > { %1590 = vmatpush.bf16.msra.mxu2 %v2326_v52 }
 0x10d   : > { %1603 = vmatpush.bf16.msra.mxu3 %v2330_v56 }
 0x10f   : > { %1591 = vmatpush.bf16.msra.mxu2 %v2318_v61  ;;  %v1503_v61 = vld [vmem:[%s3547_s6] sm:$0x3] }
 0x110   : > { %v1506_v7 = vperm.slane %v1503_v61, 1 }
 0x111   : > { %1604 = vmatpush.bf16.msra.mxu3 %v2322_v62 }
 0x113   : > { %1592 = vmatpush.bf16.msra.mxu2 %v2310_v4  ;;  %v1505_v4 = vperm.slane %v1503_v61, 0 }
 0x115   : > { %1605 = vmatpush.bf16.msra.mxu3 %v2314_v5 }
 0x117   : > { %1593 = vmatpush.bf16.msra.mxu2 %v2302_v10 }
 0x119   : > { %1606 = vmatpush.bf16.msra.mxu3 %v2306_v11 }
 0x11b   : > { %1594 = vmatpush.bf16.msra.mxu2 %v2294_v16 }
 0x11d   : > { %1607 = vmatpush.bf16.msra.mxu3 %v2298_v17 }
 0x11f   : > { %1595 = vmatpush.bf16.msra.mxu2 %v2286_v22 }
 0x121   : > { %1608 = vmatpush.bf16.msra.mxu3 %v2290_v23 }
 0x123   : > { %1596 = vmatpush.bf16.msra.mxu2 %v2278_v28 }
 0x125   : > { %1609 = vmatpush.bf16.msra.mxu3 %v2282_v32 }
 0x126   : > { %1597 = vmatmul.bf16.vlgmr.msra.gmra.mxu2 %v1486_v33 }
 0x128   : > { %1610 = vmatmul.bf16.vlgmr.msra.gmra.mxu3 %v1486_v33 }
 0x163   : > { %v990_v34 = vpop.f32.mrf.mxu0 }
 0x165   : > { %v1003_v35 = vpop.f32.mrf.mxu1 }
 0x166   : > { %v1004_v56 = vadd.f32 %v1003_v35, %v990_v34 }
 0x169   : > { %v964_v36 = vpop.f32.mrf.mxu2 }
 0x16b   : > { %v977_v37 = vpop.f32.mrf.mxu3  ;;  %v992_v38 = vpop.f32.mrf.mxu0 }
 0x16c   : > { %v978_v55 = vadd.f32 %v977_v37, %v964_v36 }
 0x16d   : > { %v1005_v39 = vpop.f32.mrf.mxu1 }
 0x171   : > { %v966_v40 = vpop.f32.mrf.mxu2 }
 0x173   : > { %v979_v41 = vpop.f32.mrf.mxu3  ;;  %v1202_v42 = vpop.f32.mrf.mxu0 }
 0x174   : > { %v1203_v58 = vadd.f32 %v1202_v42, %v1004_v56 }
 0x175   : > { %v1215_v43 = vpop.f32.mrf.mxu1 }
 0x176   : > { %v1216_v1 = vadd.f32 %v1215_v43, %v1203_v58 }
 0x179   : > { %v1176_v44 = vpop.f32.mrf.mxu2 }
 0x17a   : > { %v1177_v57 = vadd.f32 %v1176_v44, %v978_v55 }
 0x17b   : > { %v1189_v45 = vpop.f32.mrf.mxu3  ;;  %v1204_v46 = vpop.f32.mrf.mxu0 }
 0x17c   : > { %v1190_v62 = vadd.f32 %v1189_v45, %v1177_v57 }
 0x17d   : > { %v1217_v47 = vpop.f32.mrf.mxu1 }
 0x181   : > { %v1178_v0 = vpop.f32.mrf.mxu2 }
 0x183   : > { %v1191_v48 = vpop.f32.mrf.mxu3  ;;  %v1458_v49 = vpop.f32.mrf.mxu0 }
 0x185   : > { %v1471_v50 = vpop.f32.mrf.mxu1 }
 0x186   : > { %v1472_v60 = vadd.f32 %v1471_v50, %v1458_v49 }
 0x188   : > { %v1476_v5 = vadd.f32 %v1472_v60, %v1216_v1 }
 0x189   : > { %v1432_v53 = vpop.f32.mrf.mxu2 }
 0x18a   : > { %v1484_v12 = vadd.f32 %v1480_v6, %v1476_v5 }
 0x18b   : > { %v1445_v54 = vpop.f32.mrf.mxu3  ;;  %v1460_v30 = vpop.f32.mrf.mxu0 }
 0x18c   : > { %v1446_v59 = vadd.f32 %v1445_v54, %v1432_v53 }
 0x18d   : > { %v1473_v51 = vpop.f32.mrf.mxu1 }
 0x18e   : > { %v1475_v2 = vadd.f32 %v1446_v59, %v1190_v62 }
 0x190   : > { %v1483_v9 = vadd.f32 %v1479_v3, %v1475_v2 }
 0x191   : > { %v1434_v31 = vpop.f32.mrf.mxu2 }
 0x193   : > { %v1447_v52 = vpop.f32.mrf.mxu3 }
 0x1a9   : > { %v1598_v8 = vpop.f32.mrf.mxu2 }
 0x1aa   : > { %v1599_v10 = vadd.f32 %v1598_v8, %v1505_v4 }
 0x1ab   : > { %v1611_v11 = vpop.f32.mrf.mxu3 }
 0x1ac   : > { %v1612_v13 = vadd.f32 %v1611_v11, %v1506_v7  ;;  %v1615_v14 = vadd.f32 %v1599_v10, %v1483_v9 }
 0x1ae   : > { %v1616_v15 = vadd.f32 %v1612_v13, %v1484_v12  ;;  %v1617_v16 = vmax.f32 %v1615_v14, 0.0 }
 0x1b0   : > { %v1618_v17 = vmax.f32 %v1616_v15, 0.0 }
 0x1b1   : > { %v1600_v19 = vpop.f32.mrf.mxu2 }
 0x1b2   : > { %v1619_v18 = vpack.c.bf16 %v1618_v17, %v1617_v16 }
 0x1b3   : > { %v1613_v20 = vpop.f32.mrf.mxu3 }
 0x1b4   : > { %1620 = vst [vmem:[%s295_s14] sm:$0xff] %v1619_v18 }
 0x1b5 PF: > { %s18_s24 = sadd.s32 1, %s2569_s24  }
 0x1b6   : > { %p15_p7 = scmp.ge.s32.totalorder %s18_s24, 4  }
 0x1b8   :  { %17 = sbr.rel (!%p15_p7) target bundleno = 1 (0x1), region = 85 }
 0x1bd   :  { %1642 = vsyncpa [#allocation5], 1 }
 0x1be   :  { %1644 = vsyncpa [#allocation5 + $0x1], 1 }

// kernel: encoder1d_forward.14
= control target key start
LH: loop header
LB: loop body
LE: loop exit
PB: predicated region body
PF: predicated region fallthrough
CT: control target
= control target key end

     0   :  { %10 = vsyncpa [#allocation5], 0  ;;  %s4295_s0 = inlined_call_operand.vmem [shape: bf16[2,8,256], index: 0, kind: input, shape index: {}]   ;;  %s4296_s1 = inlined_call_operand.vmem [shape: bf16[768,256], index: 1, kind: input, shape index: {}]   ;;  %s4297_s2 = inlined_call_operand.hbm [shape: f32[1,256], index: 2, kind: input, shape index: {}]   ;;  %s4298_s3 = inlined_call_operand.vmem [shape: bf16[768,256], index: 3, kind: input, shape index: {}]   ;;  %s4299_s4 = inlined_call_operand.hbm [shape: f32[1,256], index: 4, kind: input, shape index: {}]   ;;  %s4300_s5 = inlined_call_operand.vmem [shape: bf16[2,8,256], index: 5, kind: output, shape index: {}]  }
   0x1   :  { %11 = vsyncpa [#allocation7], 0  ;;  %s3064_s18 = smov 0  }
   0x2 LB: > { %s173_s21 = sshll.u32 %s4297_s2, 4  ;;  %s3073_s22 = sadd.s32 4294967295, %s3029_s18   ;;  %s3029_s18 = sphi %s3064_s18, %s17_s18   ;;  %s174_s21 = int_to_ptr.hbm [resolvable:$true] %s173_s21 }
   0x3   : > { %p1950_p0 = scmp.ge.s32.totalorder %s3029_s18, 1  ;;  %p158_p1 = scmp.lt.s32.totalorder %s3029_s18, 3 }
   0x4   : > { %p2940_p2 = scmp.eq.s32.totalorder %s3073_s22, 0  ;;  %s3031_s24 = smov [#allocation4]  }
   0x5   : > { %p3078_p3 = pnand %p1950_p0, %p158_p1  ;;  %s175_s25 = sshll.u32 %s3031_s24, 4  ;;  %s176_s25 = int_to_ptr.vmem [resolvable:$true] %s175_s25 }
   0x6   : > { %s188_s28 = sshll.u32 %s4299_s4, 4  ;;  %s3032_s29 = smov [#allocation6]   ;;  %s189_s28 = int_to_ptr.hbm [resolvable:$true] %s188_s28 }
   0x7   : > { %p2933_p4 = pneg %p3078_p3  ;;  %s190_s30 = sshll.u32 %s3032_s29, 4  ;;  %s191_s30 = int_to_ptr.vmem [resolvable:$true] %s190_s30 }
   0x8   : > { %211 = sbr.rel (%p3078_p3) target bundleno = 453 (0x1c5), region = 40 }
   0x9   : > { %p2934_p5 = pnand %p2940_p2, %p2933_p4 }
   0xb   : > { %2936 = dma.hbm_to_vmem [thread:$0]  (!%p2934_p5), %s174_s21, 32, %s176_s25, [#allocation5]  }
   0xc   : > { %2939 = dma.hbm_to_vmem [thread:$0]  (!%p2934_p5), %s189_s28, 32, %s191_s30, [#allocation7]  }
   0xd   : > { %3020 = dma.done.wait (%p2940_p2), [#allocation5], 32  }
   0xe   : > { %3022 = vsyncadd (%p2940_p2), [#allocation5], 4294967264 }
   0xf   : > { %3024 = dma.done.wait (%p2940_p2), [#allocation7], 32  }
  0x10   : > { %3026 = vsyncadd (%p2940_p2), [#allocation7], 4294967264  ;;  %v2019_v0 = vld [vmem:[%s4296_s1 + $0x170] sm:$0xf]  ;;  %v2780_v1 = vld [vmem:[%s4296_s1 + $0x174] sm:$0xf0] }
  0x11   : > { %v2083_v2 = vld [vmem:[%s4296_s1 + $0x1f0] sm:$0xf]  ;;  %v2020_v3 = vor.u32 %v2780_v1, %v2019_v0  ;;  %v2796_v4 = vld [vmem:[%s4296_s1 + $0x1f4] sm:$0xf0]  ;;  %v2779_v5 = vld [vmem:[%s4296_s1 + $0x174] sm:$0xf] }
  0x12   : > { %v2021_v6 = vld [vmem:[%s4296_s1 + $0x178] sm:$0xf0]  ;;  %v2084_v7 = vor.u32 %v2796_v4, %v2083_v2  ;;  %v2795_v9 = vld [vmem:[%s4296_s1 + $0x1f4] sm:$0xf]  ;;  %v2011_v11 = vld [vmem:[%s4296_s1 + $0x160] sm:$0xf] }
  0x13   : > { %v2024_v8 = vor.u32 %v2779_v5, %v2021_v6  ;;  %v2085_v10 = vld [vmem:[%s4296_s1 + $0x1f8] sm:$0xf0]  ;;  %522 = vmatpush.bf16.msra.mxu0 %v2020_v3  ;;  %v2778_v13 = vld [vmem:[%s4296_s1 + $0x164] sm:$0xf0]  ;;  %v2075_v14 = vld [vmem:[%s4296_s1 + $0x1e0] sm:$0xf] }
  0x14   : > { %v2088_v12 = vor.u32 %v2795_v9, %v2085_v10  ;;  %v2794_v15 = vld [vmem:[%s4296_s1 + $0x1e4] sm:$0xf0]  ;;  %535 = vmatpush.bf16.msra.mxu1 %v2084_v7  ;;  %v2012_v16 = vor.u32 %v2778_v13, %v2011_v11  ;;  %v2777_v18 = vld [vmem:[%s4296_s1 + $0x164] sm:$0xf]  ;;  %v2013_v19 = vld [vmem:[%s4296_s1 + $0x168] sm:$0xf0] }
  0x15   : > { %548 = vmatpush.bf16.msra.mxu2 %v2024_v8  ;;  %v2076_v17 = vor.u32 %v2794_v15, %v2075_v14  ;;  %v2793_v20 = vld [vmem:[%s4296_s1 + $0x1e4] sm:$0xf]  ;;  %v2016_v21 = vor.u32 %v2777_v18, %v2013_v19  ;;  %v2077_v22 = vld [vmem:[%s4296_s1 + $0x1e8] sm:$0xf0]  ;;  %v2003_v23 = vld [vmem:[%s4296_s1 + $0x150] sm:$0xf] }
  0x16   : > { %561 = vmatpush.bf16.msra.mxu3 %v2088_v12  ;;  %v2776_v24 = vld [vmem:[%s4296_s1 + $0x154] sm:$0xf0]  ;;  %v2080_v25 = vor.u32 %v2793_v20, %v2077_v22  ;;  %v2067_v26 = vld [vmem:[%s4296_s1 + $0x1d0] sm:$0xf]  ;;  %v2775_v28 = vld [vmem:[%s4296_s1 + $0x154] sm:$0xf] }
  0x17   : > { %v2792_v27 = vld [vmem:[%s4296_s1 + $0x1d4] sm:$0xf0]  ;;  %523 = vmatpush.bf16.msra.mxu0 %v2012_v16  ;;  %v2004_v29 = vor.u32 %v2776_v24, %v2003_v23  ;;  %v2005_v30 = vld [vmem:[%s4296_s1 + $0x158] sm:$0xf0]  ;;  %v2791_v31 = vld [vmem:[%s4296_s1 + $0x1d4] sm:$0xf] }
  0x18   : > { %v2069_v32 = vld [vmem:[%s4296_s1 + $0x1d8] sm:$0xf0]  ;;  %536 = vmatpush.bf16.msra.mxu1 %v2076_v17  ;;  %v2068_v33 = vor.u32 %v2792_v27, %v2067_v26  ;;  %v2008_v34 = vor.u32 %v2775_v28, %v2005_v30  ;;  %v1995_v35 = vld [vmem:[%s4296_s1 + $0x140] sm:$0xf]  ;;  %v2774_v36 = vld [vmem:[%s4296_s1 + $0x144] sm:$0xf0] }
  0x19   : > { %549 = vmatpush.bf16.msra.mxu2 %v2016_v21  ;;  %v2059_v37 = vld [vmem:[%s4296_s1 + $0x1c0] sm:$0xf]  ;;  %v2072_v38 = vor.u32 %v2791_v31, %v2069_v32  ;;  %v2790_v39 = vld [vmem:[%s4296_s1 + $0x1c4] sm:$0xf0]  ;;  %v2773_v40 = vld [vmem:[%s4296_s1 + $0x144] sm:$0xf]  ;;  %v1996_v44 = vor.u32 %v2774_v36, %v1995_v35 }
  0x1a   : > { %562 = vmatpush.bf16.msra.mxu3 %v2080_v25  ;;  %v1997_v41 = vld [vmem:[%s4296_s1 + $0x148] sm:$0xf0]  ;;  %v2789_v42 = vld [vmem:[%s4296_s1 + $0x1c4] sm:$0xf]  ;;  %v2060_v45 = vor.u32 %v2790_v39, %v2059_v37  ;;  %v1987_v47 = vld [vmem:[%s4296_s1 + $0x130] sm:$0xf] }
  0x1b   : > { %v2061_v43 = vld [vmem:[%s4296_s1 + $0x1c8] sm:$0xf0]  ;;  %524 = vmatpush.bf16.msra.mxu0 %v2004_v29  ;;  %v2000_v46 = vor.u32 %v2773_v40, %v1997_v41  ;;  %v2772_v48 = vld [vmem:[%s4296_s1 + $0x134] sm:$0xf0]  ;;  %v2051_v49 = vld [vmem:[%s4296_s1 + $0x1b0] sm:$0xf] }
  0x1c   : > { %537 = vmatpush.bf16.msra.mxu1 %v2068_v33  ;;  %v2064_v50 = vor.u32 %v2789_v42, %v2061_v43  ;;  %v2788_v51 = vld [vmem:[%s4296_s1 + $0x1b4] sm:$0xf0]  ;;  %v2771_v52 = vld [vmem:[%s4296_s1 + $0x134] sm:$0xf]  ;;  %v1989_v53 = vld [vmem:[%s4296_s1 + $0x138] sm:$0xf0]  ;;  %v1988_v56 = vor.u32 %v2772_v48, %v1987_v47 }
  0x1d   : > { %550 = vmatpush.bf16.msra.mxu2 %v2008_v34  ;;  %v2787_v54 = vld [vmem:[%s4296_s1 + $0x1b4] sm:$0xf]  ;;  %v2053_v55 = vld [vmem:[%s4296_s1 + $0x1b8] sm:$0xf0]  ;;  %p245_p6 = scmp.lt.s32.totalorder %s3073_s22, 1  ;;  %v2052_v57 = vor.u32 %v2788_v51, %v2051_v49  ;;  %v1992_v58 = vor.u32 %v2771_v52, %v1989_v53  ;;  %vm1856_vm0 = vcmask 1046528  }
  0x1e   : > { %563 = vmatpush.bf16.msra.mxu3 %v2072_v38  ;;  %v1979_v59 = vld [vmem:[%s4296_s1 + $0x120] sm:$0xf]  ;;  %v2770_v60 = vld [vmem:[%s4296_s1 + $0x124] sm:$0xf0]  ;;  %v2056_v62 = vor.u32 %v2787_v54, %v2053_v55  ;;  %v2769_v0 = vld [vmem:[%s4296_s1 + $0x124] sm:$0xf] }
  0x1f   : > { %525 = vmatpush.bf16.msra.mxu0 %v1996_v44  ;;  %v2043_v61 = vld [vmem:[%s4296_s1 + $0x1a0] sm:$0xf]  ;;  %v2786_v63 = vld [vmem:[%s4296_s1 + $0x1a4] sm:$0xf0]  ;;  %v1981_v1 = vld [vmem:[%s4296_s1 + $0x128] sm:$0xf0]  ;;  %v1980_v4 = vor.u32 %v2770_v60, %v1979_v59 }
  0x20   : > { %538 = vmatpush.bf16.msra.mxu1 %v2060_v45  ;;  %v2785_v2 = vld [vmem:[%s4296_s1 + $0x1a4] sm:$0xf]  ;;  %v2045_v3 = vld [vmem:[%s4296_s1 + $0x1a8] sm:$0xf0]  ;;  %s4303_s22 = smov (!%p245_p6, %s3073_s22), 1  ;;  %v2044_v5 = vor.u32 %v2786_v63, %v2043_v61  ;;  %v1984_v6 = vor.u32 %v2769_v0, %v1981_v1 }
  0x21   : > { %551 = vmatpush.bf16.msra.mxu2 %v2000_v46  ;;  %v1971_v7 = vld [vmem:[%s4296_s1 + $0x110] sm:$0xf]  ;;  %v2768_v8 = vld [vmem:[%s4296_s1 + $0x114] sm:$0xf0]  ;;  %v2048_v10 = vor.u32 %v2785_v2, %v2045_v3  ;;  %v2767_v12 = vld [vmem:[%s4296_s1 + $0x114] sm:$0xf] }
  0x22   : > { %564 = vmatpush.bf16.msra.mxu3 %v2064_v50  ;;  %v2035_v9 = vld [vmem:[%s4296_s1 + $0x190] sm:$0xf]  ;;  %v2784_v11 = vld [vmem:[%s4296_s1 + $0x194] sm:$0xf0]  ;;  %v1973_v13 = vld [vmem:[%s4296_s1 + $0x118] sm:$0xf0]  ;;  %v1972_v16 = vor.u32 %v2768_v8, %v1971_v7 }
  0x23   : > { %526 = vmatpush.bf16.msra.mxu0 %v1988_v56  ;;  %v2783_v14 = vld [vmem:[%s4296_s1 + $0x194] sm:$0xf]  ;;  %v2037_v15 = vld [vmem:[%s4296_s1 + $0x198] sm:$0xf0]  ;;  %v1963_v17 = vld [vmem:[%s4296_s1 + $0x100] sm:$0xf]  ;;  %v2036_v19 = vor.u32 %v2784_v11, %v2035_v9  ;;  %v1976_v20 = vor.u32 %v2767_v12, %v1973_v13 }
  0x24   : > { %539 = vmatpush.bf16.msra.mxu1 %v2052_v57  ;;  %v2766_v18 = vld [vmem:[%s4296_s1 + $0x104] sm:$0xf0]  ;;  %s2731_s7 = sshll.u32 %s4303_s22, 3  ;;  %v2027_v21 = vld [vmem:[%s4296_s1 + $0x180] sm:$0xf]  ;;  %v2040_v24 = vor.u32 %v2783_v14, %v2037_v15  ;;  %v3033_v57 = vmov 0.0  }
  0x25   : > { %552 = vmatpush.bf16.msra.mxu2 %v1992_v58  ;;  %v2782_v22 = vld [vmem:[%s4296_s1 + $0x184] sm:$0xf0]  ;;  %v2765_v23 = vld [vmem:[%s4296_s1 + $0x104] sm:$0xf]  ;;  %v1965_v25 = vld [vmem:[%s4296_s1 + $0x108] sm:$0xf0]  ;;  %v1964_v31 = vor.u32 %v2766_v18, %v1963_v17  ;;  %s249_s19 = scalar_lea.vmem %s4295_s0, %s2731_s7  ;;  %s254_s29 = scalar_lea.vmem %s4300_s5, %s2731_s7 }
  0x26   : > { %565 = vmatpush.bf16.msra.mxu3 %v2056_v62  ;;  %v2781_v26 = vld [vmem:[%s4296_s1 + $0x184] sm:$0xf]  ;;  %v2029_v27 = vld [vmem:[%s4296_s1 + $0x188] sm:$0xf0]  ;;  %v2147_v28 = vld [vmem:[%s4296_s1 + $0x70] sm:$0xf]  ;;  %v2028_v35 = vor.u32 %v2782_v22, %v2027_v21  ;;  %v1968_v36 = vor.u32 %v2765_v23, %v1965_v25 }
  0x27   : > { %527 = vmatpush.bf16.msra.mxu0 %v1980_v4  ;;  %v2748_v29 = vld [vmem:[%s4296_s1 + $0x74] sm:$0xf0]  ;;  %v2211_v30 = vld [vmem:[%s4296_s1 + $0xf0] sm:$0xf]  ;;  %v2747_v33 = vld [vmem:[%s4296_s1 + $0x74] sm:$0xf]  ;;  %v2032_v39 = vor.u32 %v2781_v26, %v2029_v27 }
  0x28   : > { %540 = vmatpush.bf16.msra.mxu1 %v2044_v5  ;;  %v2764_v32 = vld [vmem:[%s4296_s1 + $0xf4] sm:$0xf0]  ;;  %v2149_v34 = vld [vmem:[%s4296_s1 + $0x78] sm:$0xf0]  ;;  %v2763_v37 = vld [vmem:[%s4296_s1 + $0xf4] sm:$0xf]  ;;  %v2148_v40 = vor.u32 %v2748_v29, %v2147_v28 }
  0x29   : > { %553 = vmatpush.bf16.msra.mxu2 %v1984_v6  ;;  %v2213_v38 = vld [vmem:[%s4296_s1 + $0xf8] sm:$0xf0]  ;;  %v2139_v41 = vld [vmem:[%s4296_s1 + $0x60] sm:$0xf]  ;;  %v2212_v42 = vor.u32 %v2764_v32, %v2211_v30  ;;  %v2152_v43 = vor.u32 %v2747_v33, %v2149_v34  ;;  %v2746_v44 = vld [vmem:[%s4296_s1 + $0x64] sm:$0xf0] }
  0x2a   : > { %566 = vmatpush.bf16.msra.mxu3 %v2048_v10  ;;  %v2203_v45 = vld [vmem:[%s4296_s1 + $0xe0] sm:$0xf]  ;;  %v2762_v46 = vld [vmem:[%s4296_s1 + $0xe4] sm:$0xf0]  ;;  %v2216_v47 = vor.u32 %v2763_v37, %v2213_v38  ;;  %v2745_v48 = vld [vmem:[%s4296_s1 + $0x64] sm:$0xf]  ;;  %v2140_v54 = vor.u32 %v2746_v44, %v2139_v41 }
  0x2b   : > { %528 = vmatpush.bf16.msra.mxu0 %v1972_v16  ;;  %v2141_v49 = vld [vmem:[%s4296_s1 + $0x68] sm:$0xf0]  ;;  %v2761_v50 = vld [vmem:[%s4296_s1 + $0xe4] sm:$0xf]  ;;  %v2131_v52 = vld [vmem:[%s4296_s1 + $0x50] sm:$0xf]  ;;  %v2204_v59 = vor.u32 %v2762_v46, %v2203_v45 }
  0x2c   : > { %541 = vmatpush.bf16.msra.mxu1 %v2036_v19  ;;  %v2205_v51 = vld [vmem:[%s4296_s1 + $0xe8] sm:$0xf0]  ;;  %v259_v53 = vld [vmem:[%s249_s19] sm:$0xff]  ;;  %v2744_v55 = vld [vmem:[%s4296_s1 + $0x54] sm:$0xf0]  ;;  %255 = vst [vmem:[#allocation2 + $0x10] sm:$0xff] %v3033_v57  ;;  %v2144_v60 = vor.u32 %v2745_v48, %v2141_v49 }
  0x2d   : > { %554 = vmatpush.bf16.msra.mxu2 %v1976_v20  ;;  %v2195_v56 = vld [vmem:[%s4296_s1 + $0xd0] sm:$0xf]  ;;  %v260_v58 = vunpack.c.l.bf16 %v259_v53  ;;  %v2760_v61 = vld [vmem:[%s4296_s1 + $0xd4] sm:$0xf0]  ;;  %v2743_v62 = vld [vmem:[%s4296_s1 + $0x54] sm:$0xf]  ;;  %v2208_v63 = vor.u32 %v2761_v50, %v2205_v51  ;;  %v261_v3 = vunpack.c.h.bf16 %v259_v53  ;;  %v2132_v6 = vor.u32 %v2744_v55, %v2131_v52 }
  0x2e   : > { %567 = vmatpush.bf16.msra.mxu3 %v2040_v24  ;;  %257 = vst [vmem:[#allocation2 + $0x18] sm:$0x3] %v3033_v57  ;;  %v2133_v0 = vld [vmem:[%s4296_s1 + $0x58] sm:$0xf0]  ;;  %v2759_v1 = vld [vmem:[%s4296_s1 + $0xd4] sm:$0xf]  ;;  %v2196_v9 = vor.u32 %v2760_v61, %v2195_v56 }
  0x2f   : > { %529 = vmatpush.bf16.msra.mxu0 %v1964_v31  ;;  %v264_v2 = vrot.slane %v260_v58, 7  ;;  %256 = vst [vmem:[#allocation2] sm:$0xff] %v3033_v57  ;;  %v2197_v4 = vld [vmem:[%s4296_s1 + $0xd8] sm:$0xf0]  ;;  %v2123_v5 = vld [vmem:[%s4296_s1 + $0x40] sm:$0xf]  ;;  %v2136_v10 = vor.u32 %v2743_v62, %v2133_v0 }
  0x30   : > { %542 = vmatpush.bf16.msra.mxu1 %v2028_v35  ;;  %258 = vst [vmem:[#allocation2 + $0x8] sm:$0x3] %v3033_v57  ;;  %v2742_v7 = vld [vmem:[%s4296_s1 + $0x44] sm:$0xf0]  ;;  %v2187_v8 = vld [vmem:[%s4296_s1 + $0xc0] sm:$0xf]  ;;  %v2200_v13 = vor.u32 %v2759_v1, %v2197_v4 }
  0x31   : > { %555 = vmatpush.bf16.msra.mxu2 %v1968_v36  ;;  %268 = vst [vmem:[#allocation2 + $0x10] sm:$0xfe] %v264_v2  ;;  %v2758_v11 = vld [vmem:[%s4296_s1 + $0xc4] sm:$0xf0]  ;;  %v2741_v12 = vld [vmem:[%s4296_s1 + $0x44] sm:$0xf]  ;;  %v2124_v19 = vor.u32 %v2742_v7, %v2123_v5 }
  0x32   : > { %568 = vmatpush.bf16.msra.mxu3 %v2032_v39  ;;  %270 = vst [vmem:[#allocation2 + $0x18] sm:$0x1] %v264_v2  ;;  %v2125_v14 = vld [vmem:[%s4296_s1 + $0x48] sm:$0xf0]  ;;  %v2757_v15 = vld [vmem:[%s4296_s1 + $0xc4] sm:$0xf]  ;;  %v2188_v22 = vor.u32 %v2758_v11, %v2187_v8 }
  0x33   : > { %734 = vmatpush.bf16.msrb.mxu0 %v2148_v40  ;;  %1054 = vst [vmem:[#allocation3] sm:$0xff] %v3033_v57  ;;  %v265_v16 = vrot.slane %v261_v3, 7  ;;  %v2189_v17 = vld [vmem:[%s4296_s1 + $0xc8] sm:$0xf0]  ;;  %v2115_v18 = vld [vmem:[%s4296_s1 + $0x30] sm:$0xf]  ;;  %v2128_v23 = vor.u32 %v2741_v12, %v2125_v14 }
  0x34   : > { %747 = vmatpush.bf16.msrb.mxu1 %v2212_v42  ;;  %1055 = vst [vmem:[#allocation3 + $0x18] sm:$0xff] %v3033_v57  ;;  %v2740_v20 = vld [vmem:[%s4296_s1 + $0x34] sm:$0xf0]  ;;  %v2179_v21 = vld [vmem:[%s4296_s1 + $0xb0] sm:$0xf]  ;;  %v2192_v26 = vor.u32 %v2757_v15, %v2189_v17 }
  0x35   : > { %760 = vmatpush.bf16.msrb.mxu2 %v2152_v43  ;;  %1056 = vst [vmem:[#allocation3 + $0x8] sm:$0x3] %v3033_v57  ;;  %v2756_v24 = vld [vmem:[%s4296_s1 + $0xb4] sm:$0xf0]  ;;  %v2739_v25 = vld [vmem:[%s4296_s1 + $0x34] sm:$0xf]  ;;  %v2116_v32 = vor.u32 %v2740_v20, %v2115_v18 }
  0x36   : > { %773 = vmatpush.bf16.msrb.mxu3 %v2216_v47  ;;  %1057 = vst [vmem:[#allocation3 + $0x10] sm:$0x3] %v3033_v57  ;;  %v2117_v27 = vld [vmem:[%s4296_s1 + $0x38] sm:$0xf0]  ;;  %v2755_v28 = vld [vmem:[%s4296_s1 + $0xb4] sm:$0xf]  ;;  %v2180_v34 = vor.u32 %v2756_v24, %v2179_v21 }
  0x37   : > { %735 = vmatpush.bf16.msrb.mxu0 %v2140_v54  ;;  %269 = vst [vmem:[#allocation2] sm:$0xfe] %v265_v16  ;;  %v2181_v30 = vld [vmem:[%s4296_s1 + $0xb8] sm:$0xf0]  ;;  %v2120_v35 = vor.u32 %v2739_v25, %v2117_v27  ;;  %v2107_v36 = vld [vmem:[%s4296_s1 + $0x20] sm:$0xf] }
  0x38   : > { %748 = vmatpush.bf16.msrb.mxu1 %v2204_v59  ;;  %v308_v29 = vld [vmem:[#allocation2 + $0x10] sm:$0xfe]  ;;  %271 = vst [vmem:[#allocation2 + $0x8] sm:$0x1] %v265_v16  ;;  %v2738_v37 = vld [vmem:[%s4296_s1 + $0x24] sm:$0xf0]  ;;  %v2184_v38 = vor.u32 %v2755_v28, %v2181_v30 }
  0x39   : > { %761 = vmatpush.bf16.msrb.mxu2 %v2144_v60  ;;  %v310_v31 = vld [vmem:[#allocation2 + $0x18] sm:$0x1]  ;;  %v2171_v39 = vld [vmem:[%s4296_s1 + $0xa0] sm:$0xf]  ;;  %v2754_v40 = vld [vmem:[%s4296_s1 + $0xa4] sm:$0xf0]  ;;  %v2108_v45 = vor.u32 %v2738_v37, %v2107_v36 }
  0x3a   : > { %774 = vmatpush.bf16.msrb.mxu3 %v2208_v63  ;;  %v312_v33 = vpack.c.bf16 %v310_v31, %v308_v29  ;;  %v2737_v43 = vld [vmem:[%s4296_s1 + $0x24] sm:$0xf]  ;;  %v2109_v44 = vld [vmem:[%s4296_s1 + $0x28] sm:$0xf0]  ;;  %v2099_v48 = vld [vmem:[%s4296_s1 + $0x10] sm:$0xf]  ;;  %v2172_v53 = vor.u32 %v2754_v40, %v2171_v39 }
  0x3b   : > { %736 = vmatpush.bf16.msrb.mxu0 %v2132_v6  ;;  %v2753_v46 = vld [vmem:[%s4296_s1 + $0xa4] sm:$0xf]  ;;  %v2173_v47 = vld [vmem:[%s4296_s1 + $0xa8] sm:$0xf0]  ;;  %v2736_v51 = vld [vmem:[%s4296_s1 + $0x14] sm:$0xf0]  ;;  %v2112_v54 = vor.u32 %v2737_v43, %v2109_v44 }
  0x3c   : > { %749 = vmatpush.bf16.msrb.mxu1 %v2196_v9  ;;  %v347_v41 = vshrl.u32 %v312_v33, 16  ;;  %v349_v42 = vshll.u32 %v312_v33, 16  ;;  %v2163_v55 = vld [vmem:[%s4296_s1 + $0x90] sm:$0xf]  ;;  %v2752_v56 = vld [vmem:[%s4296_s1 + $0x94] sm:$0xf0]  ;;  %v2176_v59 = vor.u32 %v2753_v46, %v2173_v47  ;;  %v2100_v63 = vor.u32 %v2736_v51, %v2099_v48 }
  0x3d   : > { %762 = vmatpush.bf16.msrb.mxu2 %v2136_v10  ;;  %v2735_v60 = vld [vmem:[%s4296_s1 + $0x14] sm:$0xf]  ;;  %v2101_v61 = vld [vmem:[%s4296_s1 + $0x18] sm:$0xf0]  ;;  %v2091_v1 = vld [vmem:[%s4296_s1] sm:$0xf]  ;;  %v2164_v7 = vor.u32 %v2752_v56, %v2163_v55 }
  0x3e   : > { %775 = vmatpush.bf16.msrb.mxu3 %v2200_v13  ;;  %v351_v49 = vrot.slane %v349_v42, 1  ;;  %v309_v50 = vld [vmem:[#allocation2] sm:$0xfe]  ;;  %v2751_v62 = vld [vmem:[%s4296_s1 + $0x94] sm:$0xf]  ;;  %v2104_v8 = vor.u32 %v2735_v60, %v2101_v61 }
  0x3f   : > { %737 = vmatpush.bf16.msrb.mxu0 %v2124_v19  ;;  %v311_v52 = vld [vmem:[#allocation2 + $0x8] sm:$0x1]  ;;  %v2165_v0 = vld [vmem:[%s4296_s1 + $0x98] sm:$0xf0]  ;;  %v2155_v5 = vld [vmem:[%s4296_s1 + $0x80] sm:$0xf] }
  0x40   : > { %750 = vmatpush.bf16.msrb.mxu1 %v2188_v22  ;;  %v352_v57 = vor.u32 %v351_v49, %v347_v41  ;;  %v313_v58 = vpack.c.bf16 %v311_v52, %v309_v50  ;;  %v2734_v2 = vld [vmem:[%s4296_s1 + $0x4] sm:$0xf0]  ;;  %v2733_v9 = vld [vmem:[%s4296_s1 + $0x4] sm:$0xf]  ;;  %v2275_v10 = vld [vmem:[%s4296_s1 + $0x270] sm:$0xf]  ;;  %v2168_v15 = vor.u32 %v2751_v62, %v2165_v0 }
  0x41   : > { %763 = vmatpush.bf16.msrb.mxu2 %v2128_v23  ;;  %v2750_v6 = vld [vmem:[%s4296_s1 + $0x84] sm:$0xf0]  ;;  %v2812_v11 = vld [vmem:[%s4296_s1 + $0x274] sm:$0xf0]  ;;  %v2093_v13 = vld [vmem:[%s4296_s1 + $0x8] sm:$0xf0]  ;;  %v2092_v16 = vor.u32 %v2734_v2, %v2091_v1 }
  0x42   : > { %776 = vmatpush.bf16.msrb.mxu3 %v2192_v26  ;;  %556 = vmatmul.bf16.vlgmr.msra.gmra.mxu2 %v352_v57  ;;  %v354_v3 = vshrl.u32 %v313_v58, 16  ;;  %v356_v4 = vshll.u32 %v313_v58, 16  ;;  %v2339_v14 = vld [vmem:[%s4296_s1 + $0x2f0] sm:$0xf]  ;;  %v2828_v17 = vld [vmem:[%s4296_s1 + $0x2f4] sm:$0xf0]  ;;  %v2276_v23 = vor.u32 %v2812_v11, %v2275_v10  ;;  %v2156_v25 = vor.u32 %v2750_v6, %v2155_v5 }
  0x43   : > { %738 = vmatpush.bf16.msrb.mxu0 %v2116_v32  ;;  %v2811_v18 = vld [vmem:[%s4296_s1 + $0x274] sm:$0xf]  ;;  %v2277_v19 = vld [vmem:[%s4296_s1 + $0x278] sm:$0xf0]  ;;  %v2749_v21 = vld [vmem:[%s4296_s1 + $0x84] sm:$0xf]  ;;  %v2096_v26 = vor.u32 %v2733_v9, %v2093_v13  ;;  %v2340_v30 = vor.u32 %v2828_v17, %v2339_v14 }
  0x44   : > { %751 = vmatpush.bf16.msrb.mxu1 %v2180_v34  ;;  %530 = vmatmul.bf16.vlgmr.msra.gmra.mxu0 %v352_v57  ;;  %v358_v12 = vrot.slane %v356_v4, 1  ;;  %v2157_v22 = vld [vmem:[%s4296_s1 + $0x88] sm:$0xf0]  ;;  %v2827_v24 = vld [vmem:[%s4296_s1 + $0x2f4] sm:$0xf]  ;;  %v2280_v31 = vor.u32 %v2811_v18, %v2277_v19  ;;  %v273_v56 = vld [vmem:[#allocation2] sm:$0xff] }
  0x45   : > { %764 = vmatpush.bf16.msrb.mxu2 %v2120_v35  ;;  %v2341_v27 = vld [vmem:[%s4296_s1 + $0x2f8] sm:$0xf0]  ;;  %v2267_v28 = vld [vmem:[%s4296_s1 + $0x260] sm:$0xf]  ;;  %v2810_v29 = vld [vmem:[%s4296_s1 + $0x264] sm:$0xf0]  ;;  %v2160_v33 = vor.u32 %v2749_v21, %v2157_v22 }
  0x46   : > { %777 = vmatpush.bf16.msrb.mxu3 %v2184_v38  ;;  %v359_v20 = vor.u32 %v358_v12, %v354_v3  ;;  %v2331_v32 = vld [vmem:[%s4296_s1 + $0x2e0] sm:$0xf]  ;;  %v2826_v34 = vld [vmem:[%s4296_s1 + $0x2e4] sm:$0xf0]  ;;  %v2809_v35 = vld [vmem:[%s4296_s1 + $0x264] sm:$0xf]  ;;  %v2344_v37 = vor.u32 %v2827_v24, %v2341_v27  ;;  %v2268_v38 = vor.u32 %v2810_v29, %v2267_v28  ;;  %v275_v3 = vpack.c.bf16 %v273_v56, %v273_v56 }
  0x47   : > { %739 = vmatpush.bf16.msrb.mxu0 %v2108_v45  ;;  %v2269_v36 = vld [vmem:[%s4296_s1 + $0x268] sm:$0xf0]  ;;  %v272_v39 = vld [vmem:[#allocation2 + $0x10] sm:$0xff]  ;;  %v2825_v40 = vld [vmem:[%s4296_s1 + $0x2e4] sm:$0xf]  ;;  %v2332_v42 = vor.u32 %v2826_v34, %v2331_v32 }
  0x48   : > { %752 = vmatpush.bf16.msrb.mxu1 %v2172_v53  ;;  %569 = vmatmul.bf16.vlgmr.msra.gmra.mxu3 %v359_v20  ;;  %v2333_v41 = vld [vmem:[%s4296_s1 + $0x2e8] sm:$0xf0]  ;;  %v2272_v43 = vor.u32 %v2809_v35, %v2269_v36  ;;  %v2259_v44 = vld [vmem:[%s4296_s1 + $0x250] sm:$0xf]  ;;  %v2808_v45 = vld [vmem:[%s4296_s1 + $0x254] sm:$0xf0]  ;;  %v274_v48 = vpack.c.bf16 %v272_v39, %v272_v39 }
  0x49   : > { %765 = vmatpush.bf16.msrb.mxu2 %v2112_v54  ;;  %543 = vmatmul.bf16.vlgmr.msra.gmra.mxu1 %v359_v20  ;;  %v2323_v46 = vld [vmem:[%s4296_s1 + $0x2d0] sm:$0xf]  ;;  %v2824_v47 = vld [vmem:[%s4296_s1 + $0x2d4] sm:$0xf0]  ;;  %v2336_v49 = vor.u32 %v2825_v40, %v2333_v41  ;;  %v2807_v50 = vld [vmem:[%s4296_s1 + $0x254] sm:$0xf]  ;;  %v2260_v54 = vor.u32 %v2808_v45, %v2259_v44 }
  0x4a   : > { %778 = vmatpush.bf16.msrb.mxu3 %v2176_v59  ;;  %v2261_v51 = vld [vmem:[%s4296_s1 + $0x258] sm:$0xf0]  ;;  %v2823_v52 = vld [vmem:[%s4296_s1 + $0x2d4] sm:$0xf]  ;;  %v2324_v55 = vor.u32 %v2824_v47, %v2323_v46  ;;  %v2251_v58 = vld [vmem:[%s4296_s1 + $0x240] sm:$0xf] }
  0x4b   : > { %740 = vmatpush.bf16.msrb.mxu0 %v2100_v63  ;;  %v2325_v53 = vld [vmem:[%s4296_s1 + $0x2d8] sm:$0xf0]  ;;  %v2264_v57 = vor.u32 %v2807_v50, %v2261_v51  ;;  %v2806_v59 = vld [vmem:[%s4296_s1 + $0x244] sm:$0xf0]  ;;  %v2315_v61 = vld [vmem:[%s4296_s1 + $0x2c0] sm:$0xf] }
  0x4c   : > { %753 = vmatpush.bf16.msrb.mxu1 %v2164_v7  ;;  %v2328_v60 = vor.u32 %v2823_v52, %v2325_v53  ;;  %v2822_v62 = vld [vmem:[%s4296_s1 + $0x2c4] sm:$0xf0]  ;;  %v2805_v63 = vld [vmem:[%s4296_s1 + $0x244] sm:$0xf]  ;;  %v2253_v0 = vld [vmem:[%s4296_s1 + $0x248] sm:$0xf0]  ;;  %v2252_v4 = vor.u32 %v2806_v59, %v2251_v58 }
  0x4d   : > { %766 = vmatpush.bf16.msrb.mxu2 %v2104_v8  ;;  %v2821_v1 = vld [vmem:[%s4296_s1 + $0x2c4] sm:$0xf]  ;;  %v2317_v2 = vld [vmem:[%s4296_s1 + $0x2c8] sm:$0xf0]  ;;  %v2316_v5 = vor.u32 %v2822_v62, %v2315_v61  ;;  %v2243_v6 = vld [vmem:[%s4296_s1 + $0x230] sm:$0xf]  ;;  %v2256_v8 = vor.u32 %v2805_v63, %v2253_v0 }
  0x4e   : > { %779 = vmatpush.bf16.msrb.mxu3 %v2168_v15  ;;  %v2804_v7 = vld [vmem:[%s4296_s1 + $0x234] sm:$0xf0]  ;;  %v2320_v9 = vor.u32 %v2821_v1, %v2317_v2  ;;  %v2307_v10 = vld [vmem:[%s4296_s1 + $0x2b0] sm:$0xf]  ;;  %v2803_v12 = vld [vmem:[%s4296_s1 + $0x234] sm:$0xf] }
  0x4f   : > { %741 = vmatpush.bf16.msrb.mxu0 %v2092_v16  ;;  %v2820_v11 = vld [vmem:[%s4296_s1 + $0x2b4] sm:$0xf0]  ;;  %v2245_v13 = vld [vmem:[%s4296_s1 + $0x238] sm:$0xf0]  ;;  %v2819_v14 = vld [vmem:[%s4296_s1 + $0x2b4] sm:$0xf]  ;;  %v2244_v16 = vor.u32 %v2804_v7, %v2243_v6 }
  0x50   : > { %754 = vmatpush.bf16.msrb.mxu1 %v2156_v25  ;;  %v2309_v15 = vld [vmem:[%s4296_s1 + $0x2b8] sm:$0xf0]  ;;  %v2308_v17 = vor.u32 %v2820_v11, %v2307_v10  ;;  %v2235_v18 = vld [vmem:[%s4296_s1 + $0x220] sm:$0xf]  ;;  %v2802_v19 = vld [vmem:[%s4296_s1 + $0x224] sm:$0xf0]  ;;  %v2248_v20 = vor.u32 %v2803_v12, %v2245_v13 }
  0x51   : > { %767 = vmatpush.bf16.msrb.mxu2 %v2096_v26  ;;  %v2312_v21 = vor.u32 %v2819_v14, %v2309_v15  ;;  %v2299_v22 = vld [vmem:[%s4296_s1 + $0x2a0] sm:$0xf]  ;;  %v2801_v24 = vld [vmem:[%s4296_s1 + $0x224] sm:$0xf]  ;;  %v2237_v25 = vld [vmem:[%s4296_s1 + $0x228] sm:$0xf0]  ;;  %v2236_v28 = vor.u32 %v2802_v19, %v2235_v18 }
  0x52   : > { %780 = vmatpush.bf16.msrb.mxu3 %v2160_v33  ;;  %v2817_v26 = vld [vmem:[%s4296_s1 + $0x2a4] sm:$0xf]  ;;  %v2301_v27 = vld [vmem:[%s4296_s1 + $0x2a8] sm:$0xf0]  ;;  %v2240_v32 = vor.u32 %v2801_v24, %v2237_v25  ;;  %v2291_v34 = vld [vmem:[%s4296_s1 + $0x290] sm:$0xf] }
  0x53   : > { %990 = vmatpush.bf16.msra.mxu0 %v2276_v23  ;;  %v2818_v23 = vld [vmem:[%s4296_s1 + $0x2a4] sm:$0xf0]  ;;  %v2304_v33 = vor.u32 %v2817_v26, %v2301_v27  ;;  %v2816_v35 = vld [vmem:[%s4296_s1 + $0x294] sm:$0xf0]  ;;  %v2799_v36 = vld [vmem:[%s4296_s1 + $0x214] sm:$0xf] }
  0x54   : > { %1003 = vmatpush.bf16.msra.mxu1 %v2340_v30  ;;  %768 = vmatmul.bf16.vlgmr.msrb.gmra.mxu2 %v274_v48  ;;  %v2300_v29 = vor.u32 %v2818_v23, %v2299_v22  ;;  %v2227_v30 = vld [vmem:[%s4296_s1 + $0x210] sm:$0xf]  ;;  %v2293_v39 = vld [vmem:[%s4296_s1 + $0x298] sm:$0xf0]  ;;  %v2219_v40 = vld [vmem:[%s4296_s1 + $0x200] sm:$0xf]  ;;  %v2292_v44 = vor.u32 %v2816_v35, %v2291_v34 }
  0x55   : > { %1016 = vmatpush.bf16.msra.mxu2 %v2280_v31  ;;  %742 = vmatmul.bf16.vlgmr.msrb.gmra.mxu0 %v274_v48  ;;  %v2800_v31 = vld [vmem:[%s4296_s1 + $0x214] sm:$0xf0]  ;;  %v2798_v41 = vld [vmem:[%s4296_s1 + $0x204] sm:$0xf0]  ;;  %v787_v46 = vld [vmem:[#allocation2] sm:$0xfc] }
  0x56   : > { %1029 = vmatpush.bf16.msra.mxu3 %v2344_v37  ;;  %v2229_v37 = vld [vmem:[%s4296_s1 + $0x218] sm:$0xf0]  ;;  %v788_v45 = vld [vmem:[#allocation2 + $0x18] sm:$0x3]  ;;  %v789_v47 = vld [vmem:[#allocation2 + $0x8] sm:$0x3]  ;;  %v2220_v58 = vor.u32 %v2798_v41, %v2219_v40 }
  0x57   : > { %991 = vmatpush.bf16.msra.mxu0 %v2268_v38  ;;  %v2815_v38 = vld [vmem:[%s4296_s1 + $0x294] sm:$0xf]  ;;  %v2232_v48 = vor.u32 %v2799_v36, %v2229_v37  ;;  %v2283_v50 = vld [vmem:[%s4296_s1 + $0x280] sm:$0xf]  ;;  %v2814_v51 = vld [vmem:[%s4296_s1 + $0x284] sm:$0xf0] }
  0x58   : > { %1004 = vmatpush.bf16.msra.mxu1 %v2332_v42  ;;  %781 = vmatmul.bf16.vlgmr.msrb.gmra.mxu3 %v275_v3  ;;  %v786_v42 = vld [vmem:[#allocation2 + $0x10] sm:$0xfc]  ;;  %v2797_v52 = vld [vmem:[%s4296_s1 + $0x204] sm:$0xf]  ;;  %v2221_v53 = vld [vmem:[%s4296_s1 + $0x208] sm:$0xf0]  ;;  %v2284_v59 = vor.u32 %v2814_v51, %v2283_v50 }
  0x59   : > { %1017 = vmatpush.bf16.msra.mxu2 %v2272_v43  ;;  %755 = vmatmul.bf16.vlgmr.msrb.gmra.mxu1 %v275_v3  ;;  %v2228_v43 = vor.u32 %v2800_v31, %v2227_v30  ;;  %v790_v56 = vpack.c.bf16 %v788_v45, %v786_v42  ;;  %v2403_v0 = vld [vmem:[%s4298_s3 + $0x170] sm:$0xf]  ;;  %v2876_v1 = vld [vmem:[%s4298_s3 + $0x174] sm:$0xf0]  ;;  %v2875_v2 = vld [vmem:[%s4298_s3 + $0x174] sm:$0xf] }
  0x5a   : > { %1030 = vmatpush.bf16.msra.mxu3 %v2336_v49  ;;  %v2296_v49 = vor.u32 %v2815_v38, %v2293_v39  ;;  %v2404_v3 = vor.u32 %v2876_v1, %v2403_v0  ;;  %v2395_v6 = vld [vmem:[%s4298_s3 + $0x160] sm:$0xf]  ;;  %v2874_v7 = vld [vmem:[%s4298_s3 + $0x164] sm:$0xf0]  ;;  %v2397_v10 = vld [vmem:[%s4298_s3 + $0x168] sm:$0xf0] }
  0x5b   : > { %992 = vmatpush.bf16.msra.mxu0 %v2260_v54  ;;  %v2813_v54 = vld [vmem:[%s4296_s1 + $0x284] sm:$0xf]  ;;  %v826_v62 = vrot.slane %v790_v56, 1  ;;  %v2467_v11 = vld [vmem:[%s4298_s3 + $0x1f0] sm:$0xf] }
  0x5c   : > { %1005 = vmatpush.bf16.msra.mxu1 %v2324_v55  ;;  %v2285_v55 = vld [vmem:[%s4296_s1 + $0x288] sm:$0xf0]  ;;  %v2892_v12 = vld [vmem:[%s4298_s3 + $0x1f4] sm:$0xf0]  ;;  %v2891_v15 = vld [vmem:[%s4298_s3 + $0x1f4] sm:$0xf] }
  0x5d   : > { %1018 = vmatpush.bf16.msra.mxu2 %v2264_v57  ;;  %v791_v57 = vpack.c.bf16 %v789_v47, %v787_v46  ;;  %v2288_v61 = vor.u32 %v2813_v54, %v2285_v55  ;;  %v2468_v14 = vor.u32 %v2892_v12, %v2467_v11  ;;  %v2387_v18 = vld [vmem:[%s4298_s3 + $0x150] sm:$0xf]  ;;  %v2872_v19 = vld [vmem:[%s4298_s3 + $0x154] sm:$0xf0]  ;;  %v2389_v22 = vld [vmem:[%s4298_s3 + $0x158] sm:$0xf0] }
  0x5e   : > { %1031 = vmatpush.bf16.msra.mxu3 %v2328_v60  ;;  %v2224_v60 = vor.u32 %v2797_v52, %v2221_v53  ;;  %v2459_v24 = vld [vmem:[%s4298_s3 + $0x1e0] sm:$0xf]  ;;  %v2890_v25 = vld [vmem:[%s4298_s3 + $0x1e4] sm:$0xf0]  ;;  %v2889_v26 = vld [vmem:[%s4298_s3 + $0x1e4] sm:$0xf] }
  0x5f   : > { %993 = vmatpush.bf16.msra.mxu0 %v2252_v4  ;;  %v827_v63 = vrot.slane %v791_v57, 1  ;;  %v2405_v4 = vld [vmem:[%s4298_s3 + $0x178] sm:$0xf0]  ;;  %v2460_v27 = vor.u32 %v2890_v25, %v2459_v24  ;;  %v2379_v30 = vld [vmem:[%s4298_s3 + $0x140] sm:$0xf] }
  0x60   : > { %1006 = vmatpush.bf16.msra.mxu1 %v2316_v5  ;;  %v2408_v5 = vor.u32 %v2875_v2, %v2405_v4  ;;  %v2870_v31 = vld [vmem:[%s4298_s3 + $0x144] sm:$0xf0]  ;;  %v2381_v34 = vld [vmem:[%s4298_s3 + $0x148] sm:$0xf0]  ;;  %v2451_v35 = vld [vmem:[%s4298_s3 + $0x1d0] sm:$0xf] }
  0x61   : > { %1019 = vmatpush.bf16.msra.mxu2 %v2256_v8  ;;  %v2873_v8 = vld [vmem:[%s4298_s3 + $0x164] sm:$0xf]  ;;  %v2888_v36 = vld [vmem:[%s4298_s3 + $0x1d4] sm:$0xf0]  ;;  %v2887_v39 = vld [vmem:[%s4298_s3 + $0x1d4] sm:$0xf] }
  0x62   : > { %1032 = vmatpush.bf16.msra.mxu3 %v2320_v9  ;;  %v2396_v9 = vor.u32 %v2874_v7, %v2395_v6  ;;  %v2400_v13 = vor.u32 %v2873_v8, %v2397_v10  ;;  %v2452_v38 = vor.u32 %v2888_v36, %v2451_v35  ;;  %v2453_v40 = vld [vmem:[%s4298_s3 + $0x1d8] sm:$0xf0]  ;;  %v2371_v41 = vld [vmem:[%s4298_s3 + $0x130] sm:$0xf]  ;;  %v2886_v50 = vld [vmem:[%s4298_s3 + $0x1c4] sm:$0xf0] }
  0x63   : > { %994 = vmatpush.bf16.msra.mxu0 %v2244_v16  ;;  %v2469_v16 = vld [vmem:[%s4298_s3 + $0x1f8] sm:$0xf0]  ;;  %v2456_v42 = vor.u32 %v2887_v39, %v2453_v40  ;;  %v2885_v51 = vld [vmem:[%s4298_s3 + $0x1c4] sm:$0xf]  ;;  %v2445_v53 = vld [vmem:[%s4298_s3 + $0x1c8] sm:$0xf0] }
  0x64   : > { %1007 = vmatpush.bf16.msra.mxu1 %v2308_v17  ;;  %v2472_v17 = vor.u32 %v2891_v15, %v2469_v16  ;;  %v2373_v45 = vld [vmem:[%s4298_s3 + $0x138] sm:$0xf0]  ;;  %v2448_v54 = vor.u32 %v2885_v51, %v2445_v53  ;;  %v2363_v55 = vld [vmem:[%s4298_s3 + $0x120] sm:$0xf]  ;;  %v2866_v56 = vld [vmem:[%s4298_s3 + $0x124] sm:$0xf0] }
  0x65   : > { %1020 = vmatpush.bf16.msra.mxu2 %v2248_v20  ;;  %v2871_v20 = vld [vmem:[%s4298_s3 + $0x154] sm:$0xf]  ;;  %v2865_v57 = vld [vmem:[%s4298_s3 + $0x124] sm:$0xf]  ;;  %v2355_v4 = vld [vmem:[%s4298_s3 + $0x110] sm:$0xf] }
  0x66   : > { %1033 = vmatpush.bf16.msra.mxu3 %v2312_v21  ;;  %v2388_v21 = vor.u32 %v2872_v19, %v2387_v18  ;;  %v2392_v23 = vor.u32 %v2871_v20, %v2389_v22  ;;  %v2883_v2 = vld [vmem:[%s4298_s3 + $0x1b4] sm:$0xf]  ;;  %v2864_v6 = vld [vmem:[%s4298_s3 + $0x114] sm:$0xf0]  ;;  %v2357_v8 = vld [vmem:[%s4298_s3 + $0x118] sm:$0xf0] }
  0x67   : > { %995 = vmatpush.bf16.msra.mxu0 %v2236_v28  ;;  %v2461_v28 = vld [vmem:[%s4298_s3 + $0x1e8] sm:$0xf0]  ;;  %v2863_v7 = vld [vmem:[%s4298_s3 + $0x114] sm:$0xf]  ;;  %v2356_v10 = vor.u32 %v2864_v6, %v2355_v4  ;;  %v2427_v12 = vld [vmem:[%s4298_s3 + $0x1a0] sm:$0xf] }
  0x68   : > { %1008 = vmatpush.bf16.msra.mxu1 %v2300_v29  ;;  %v2464_v29 = vor.u32 %v2889_v26, %v2461_v28  ;;  %v2360_v11 = vor.u32 %v2863_v7, %v2357_v8  ;;  %v2429_v16 = vld [vmem:[%s4298_s3 + $0x1a8] sm:$0xf0]  ;;  %v2862_v18 = vld [vmem:[%s4298_s3 + $0x104] sm:$0xf0]  ;;  %v2861_v20 = vld [vmem:[%s4298_s3 + $0x104] sm:$0xf] }
  0x69   : > { %1021 = vmatpush.bf16.msra.mxu2 %v2240_v32  ;;  %v2869_v32 = vld [vmem:[%s4298_s3 + $0x144] sm:$0xf]  ;;  %v2531_v22 = vld [vmem:[%s4298_s3 + $0x70] sm:$0xf]  ;;  %v2844_v24 = vld [vmem:[%s4298_s3 + $0x74] sm:$0xf0] }
  0x6a   : > { %1034 = vmatpush.bf16.msra.mxu3 %v2304_v33  ;;  %v2380_v33 = vor.u32 %v2870_v31, %v2379_v30  ;;  %v2384_v37 = vor.u32 %v2869_v32, %v2381_v34  ;;  %v2843_v25 = vld [vmem:[%s4298_s3 + $0x74] sm:$0xf]  ;;  %v2533_v26 = vld [vmem:[%s4298_s3 + $0x78] sm:$0xf0]  ;;  %v2880_v34 = vld [vmem:[%s4298_s3 + $0x194] sm:$0xf0] }
  0x6b   : > { %996 = vmatpush.bf16.msra.mxu0 %v2228_v43  ;;  %v2868_v43 = vld [vmem:[%s4298_s3 + $0x134] sm:$0xf0]  ;;  %v2536_v30 = vor.u32 %v2843_v25, %v2533_v26  ;;  %v2879_v36 = vld [vmem:[%s4298_s3 + $0x194] sm:$0xf]  ;;  %v2523_v40 = vld [vmem:[%s4298_s3 + $0x60] sm:$0xf] }
  0x6c   : > { %1009 = vmatpush.bf16.msra.mxu1 %v2292_v44  ;;  %v2867_v44 = vld [vmem:[%s4298_s3 + $0x134] sm:$0xf]  ;;  %v2372_v47 = vor.u32 %v2868_v43, %v2371_v41  ;;  %v2842_v41 = vld [vmem:[%s4298_s3 + $0x64] sm:$0xf0]  ;;  %v2413_v51 = vld [vmem:[%s4298_s3 + $0x188] sm:$0xf0] }
  0x6d   : > { %1022 = vmatpush.bf16.msra.mxu2 %v2232_v48  ;;  %v2376_v48 = vor.u32 %v2867_v44, %v2373_v45  ;;  %v2524_v43 = vor.u32 %v2842_v41, %v2523_v40  ;;  %v2525_v44 = vld [vmem:[%s4298_s3 + $0x68] sm:$0xf0]  ;;  %v2411_v45 = vld [vmem:[%s4298_s3 + $0x180] sm:$0xf]  ;;  %v2517_v4 = vld [vmem:[%s4298_s3 + $0x58] sm:$0xf0] }
  0x6e   : > { %1035 = vmatpush.bf16.msra.mxu3 %v2296_v49  ;;  %v2443_v49 = vld [vmem:[%s4298_s3 + $0x1c0] sm:$0xf]  ;;  %v2858_v7 = vld [vmem:[%s4298_s3 + $0xe4] sm:$0xf0]  ;;  %v2857_v8 = vld [vmem:[%s4298_s3 + $0xe4] sm:$0xf] }
  0x6f   : > { %997 = vmatpush.bf16.msra.mxu0 %v2220_v58  ;;  %v2444_v52 = vor.u32 %v2886_v50, %v2443_v49  ;;  %v2364_v58 = vor.u32 %v2866_v56, %v2363_v55  ;;  %v2877_v50 = vld [vmem:[%s4298_s3 + $0x184] sm:$0xf]  ;;  %v2860_v55 = vld [vmem:[%s4298_s3 + $0xf4] sm:$0xf0]  ;;  %v2859_v56 = vld [vmem:[%s4298_s3 + $0xf4] sm:$0xf] }
  0x70   : > { %1010 = vmatpush.bf16.msra.mxu1 %v2284_v59  ;;  %v2365_v59 = vld [vmem:[%s4298_s3 + $0x128] sm:$0xf0]  ;;  %v2587_v6 = vld [vmem:[%s4298_s3 + $0xe0] sm:$0xf]  ;;  %v2499_v26 = vld [vmem:[%s4298_s3 + $0x30] sm:$0xf] }
  0x71   : > { %1023 = vmatpush.bf16.msra.mxu2 %v2224_v60  ;;  %v2435_v60 = vld [vmem:[%s4298_s3 + $0x1b0] sm:$0xf]  ;;  %v2368_v0 = vor.u32 %v2865_v57, %v2365_v59  ;;  %v2597_v57 = vld [vmem:[%s4298_s3 + $0xf8] sm:$0xf0]  ;;  %v2573_v40 = vld [vmem:[%s4298_s3 + $0xc8] sm:$0xf0] }
  0x72   : > { %1036 = vmatpush.bf16.msra.mxu3 %v2288_v61  ;;  %998 = vmatmul.bf16.vlgmr.msra.gmra.mxu0 %v826_v62  ;;  %v2884_v61 = vld [vmem:[%s4298_s3 + $0x1b4] sm:$0xf0]  ;;  %v2600_v59 = vor.u32 %v2859_v56, %v2597_v57  ;;  %v2491_v41 = vld [vmem:[%s4298_s3 + $0x20] sm:$0xf] }
  0x73   : > { %1011 = vmatmul.bf16.vlgmr.msra.gmra.mxu1 %v827_v63  ;;  %1318 = vmatpush.bf16.msrb.mxu0 %v2404_v3  ;;  %v2436_v1 = vor.u32 %v2884_v61, %v2435_v60  ;;  %v2437_v3 = vld [vmem:[%s4298_s3 + $0x1b8] sm:$0xf0]  ;;  %v2515_v60 = vld [vmem:[%s4298_s3 + $0x50] sm:$0xf]  ;;  %v2840_v61 = vld [vmem:[%s4298_s3 + $0x54] sm:$0xf0] }
  0x74   : > { %1024 = vmatmul.bf16.vlgmr.msra.gmra.mxu2 %v826_v62  ;;  %1331 = vmatpush.bf16.msrb.mxu1 %v2468_v14  ;;  %v2881_v14 = vld [vmem:[%s4298_s3 + $0x1a4] sm:$0xf] }
  0x75   : > { %1037 = vmatmul.bf16.vlgmr.msra.gmra.mxu3 %v827_v63  ;;  %1344 = vmatpush.bf16.msrb.mxu2 %v2408_v5  ;;  %v2440_v5 = vor.u32 %v2883_v2, %v2437_v3  ;;  %v2432_v19 = vor.u32 %v2881_v14, %v2429_v16  ;;  %v2516_v3 = vor.u32 %v2840_v61, %v2515_v60  ;;  %v2838_v14 = vld [vmem:[%s4298_s3 + $0x44] sm:$0xf0] }
  0x76   : > { %1357 = vmatpush.bf16.msrb.mxu3 %v2472_v17  ;;  %v2347_v17 = vld [vmem:[%s4298_s3 + $0x100] sm:$0xf]  ;;  %v2850_v61 = vld [vmem:[%s4298_s3 + $0xa4] sm:$0xf0] }
  0x77   : > { %1319 = vmatpush.bf16.msrb.mxu0 %v2396_v9 }
  0x78   : > { %1332 = vmatpush.bf16.msrb.mxu1 %v2460_v27 }
  0x79   : > { %1345 = vmatpush.bf16.msrb.mxu2 %v2400_v13  ;;  %v2882_v13 = vld [vmem:[%s4298_s3 + $0x1a4] sm:$0xf0] }
  0x7a   : > { %1358 = vmatpush.bf16.msrb.mxu3 %v2464_v29  ;;  %v2428_v15 = vor.u32 %v2882_v13, %v2427_v12  ;;  %v2532_v29 = vor.u32 %v2844_v24, %v2531_v22  ;;  %v2507_v13 = vld [vmem:[%s4298_s3 + $0x40] sm:$0xf]  ;;  %v2581_v24 = vld [vmem:[%s4298_s3 + $0xd8] sm:$0xf0] }
  0x7b   : > { %1320 = vmatpush.bf16.msrb.mxu0 %v2388_v21  ;;  %v2349_v21 = vld [vmem:[%s4298_s3 + $0x108] sm:$0xf0]  ;;  %v2508_v16 = vor.u32 %v2838_v14, %v2507_v13  ;;  %v2547_v13 = vld [vmem:[%s4298_s3 + $0x90] sm:$0xf] }
  0x7c   : > { %1333 = vmatpush.bf16.msrb.mxu1 %v2452_v38  ;;  %v2352_v28 = vor.u32 %v2861_v20, %v2349_v21  ;;  %v2856_v20 = vld [vmem:[%s4298_s3 + $0xd4] sm:$0xf0]  ;;  %v2855_v21 = vld [vmem:[%s4298_s3 + $0xd4] sm:$0xf] }
  0x7d   : > { %1346 = vmatpush.bf16.msrb.mxu2 %v2392_v23  ;;  %v2348_v23 = vor.u32 %v2862_v18, %v2347_v17  ;;  %v2509_v17 = vld [vmem:[%s4298_s3 + $0x48] sm:$0xf0]  ;;  %v2584_v25 = vor.u32 %v2855_v21, %v2581_v24 }
  0x7e   : > { %1359 = vmatpush.bf16.msrb.mxu3 %v2456_v42  ;;  %v2841_v42 = vld [vmem:[%s4298_s3 + $0x64] sm:$0xf] }
  0x7f   : > { %1321 = vmatpush.bf16.msrb.mxu0 %v2380_v33  ;;  %v2419_v33 = vld [vmem:[%s4298_s3 + $0x190] sm:$0xf] }
  0x80   : > { %1334 = vmatpush.bf16.msrb.mxu1 %v2444_v52  ;;  %v2420_v35 = vor.u32 %v2880_v34, %v2419_v33  ;;  %v2595_v52 = vld [vmem:[%s4298_s3 + $0xf0] sm:$0xf]  ;;  %v2501_v33 = vld [vmem:[%s4298_s3 + $0x38] sm:$0xf0]  ;;  %v2571_v34 = vld [vmem:[%s4298_s3 + $0xc0] sm:$0xf] }
  0x81   : > { %1347 = vmatpush.bf16.msrb.mxu2 %v2384_v37  ;;  %v2421_v37 = vld [vmem:[%s4298_s3 + $0x198] sm:$0xf0] }
  0x82   : > { %1360 = vmatpush.bf16.msrb.mxu3 %v2448_v54  ;;  %v2424_v38 = vor.u32 %v2879_v36, %v2421_v37  ;;  %v2416_v54 = vor.u32 %v2877_v50, %v2413_v51  ;;  %v2852_v50 = vld [vmem:[%s4298_s3 + $0xb4] sm:$0xf0]  ;;  %v2851_v51 = vld [vmem:[%s4298_s3 + $0xb4] sm:$0xf] }
  0x83   : > { %1322 = vmatpush.bf16.msrb.mxu0 %v2372_v47  ;;  %v2878_v47 = vld [vmem:[%s4298_s3 + $0x184] sm:$0xf0] }
  0x84   : > { %1335 = vmatpush.bf16.msrb.mxu1 %v2436_v1  ;;  %v2412_v49 = vor.u32 %v2878_v47, %v2411_v45  ;;  %v2493_v45 = vld [vmem:[%s4298_s3 + $0x28] sm:$0xf0] }
  0x85   : > { %1348 = vmatpush.bf16.msrb.mxu2 %v2376_v48  ;;  %v2528_v48 = vor.u32 %v2841_v42, %v2525_v44  ;;  %v2833_v44 = vld [vmem:[%s4298_s3 + $0x24] sm:$0xf] }
  0x86   : > { %1361 = vmatpush.bf16.msrb.mxu3 %v2440_v5 }
  0x87   : > { %1323 = vmatpush.bf16.msrb.mxu0 %v2364_v58  ;;  %v2596_v58 = vor.u32 %v2860_v55, %v2595_v52  ;;  %v2832_v55 = vld [vmem:[%s4298_s3 + $0x14] sm:$0xf0] }
  0x88   : > { %1336 = vmatpush.bf16.msrb.mxu1 %v2428_v15  ;;  %v2837_v15 = vld [vmem:[%s4298_s3 + $0x44] sm:$0xf] }
  0x89   : > { %1349 = vmatpush.bf16.msrb.mxu2 %v2368_v0  ;;  %v2839_v0 = vld [vmem:[%s4298_s3 + $0x54] sm:$0xf]  ;;  %v2512_v18 = vor.u32 %v2837_v15, %v2509_v17  ;;  %v2848_v15 = vld [vmem:[%s4298_s3 + $0x94] sm:$0xf0]  ;;  %v2549_v17 = vld [vmem:[%s4298_s3 + $0x98] sm:$0xf0] }
  0x8a   : > { %1362 = vmatpush.bf16.msrb.mxu3 %v2432_v19  ;;  %v2520_v5 = vor.u32 %v2839_v0, %v2517_v4  ;;  %v2579_v19 = vld [vmem:[%s4298_s3 + $0xd0] sm:$0xf]  ;;  %v2849_v0 = vld [vmem:[%s4298_s3 + $0xa4] sm:$0xf] }
  0x8b   : > { %1324 = vmatpush.bf16.msrb.mxu0 %v2356_v10  ;;  %v2589_v10 = vld [vmem:[%s4298_s3 + $0xe8] sm:$0xf0] }
  0x8c   : > { %1337 = vmatpush.bf16.msrb.mxu1 %v2420_v35  ;;  %v2592_v12 = vor.u32 %v2857_v8, %v2589_v10  ;;  %v2854_v35 = vld [vmem:[%s4298_s3 + $0xc4] sm:$0xf0]  ;;  %v2829_v8 = vld [vmem:[%s4298_s3 + $0x4] sm:$0xf] }
  0x8d   : > { %1350 = vmatpush.bf16.msrb.mxu2 %v2360_v11  ;;  %v2572_v37 = vor.u32 %v2854_v35, %v2571_v34 }
  0x8e   : > { %1363 = vmatpush.bf16.msrb.mxu3 %v2424_v38  ;;  %v2853_v38 = vld [vmem:[%s4298_s3 + $0xc4] sm:$0xf] }
  0x8f   : > { %1325 = vmatpush.bf16.msrb.mxu0 %v2348_v23  ;;  %v2580_v23 = vor.u32 %v2856_v20, %v2579_v19  ;;  %v2576_v42 = vor.u32 %v2853_v38, %v2573_v40 }
  0x90   : > { %1338 = vmatpush.bf16.msrb.mxu1 %v2412_v49  ;;  %v2563_v49 = vld [vmem:[%s4298_s3 + $0xb0] sm:$0xf] }
  0x91   : > { %1351 = vmatpush.bf16.msrb.mxu2 %v2352_v28  ;;  %v2836_v28 = vld [vmem:[%s4298_s3 + $0x34] sm:$0xf0]  ;;  %v2564_v56 = vor.u32 %v2852_v50, %v2563_v49 }
  0x92   : > { %1364 = vmatpush.bf16.msrb.mxu3 %v2416_v54  ;;  %v2483_v54 = vld [vmem:[%s4298_s3 + $0x10] sm:$0xf] }
  0x93   : > { %1530 = vmatpush.bf16.msra.mxu0 %v2532_v29  ;;  %v2835_v29 = vld [vmem:[%s4298_s3 + $0x34] sm:$0xf]  ;;  %v2484_v60 = vor.u32 %v2832_v55, %v2483_v54 }
  0x94   : > { %1543 = vmatpush.bf16.msra.mxu1 %v2596_v58  ;;  %v2504_v36 = vor.u32 %v2835_v29, %v2501_v33  ;;  %v2555_v58 = vld [vmem:[%s4298_s3 + $0xa0] sm:$0xf]  ;;  %v2907_v55 = vld [vmem:[%s4298_s3 + $0x274] sm:$0xf] }
  0x95   : > { %1556 = vmatpush.bf16.msra.mxu2 %v2536_v30  ;;  %v2539_v29 = vld [vmem:[%s4298_s3 + $0x80] sm:$0xf] }
  0x96   : > { %1569 = vmatpush.bf16.msra.mxu3 %v2600_v59 }
  0x97   : > { %1531 = vmatpush.bf16.msra.mxu0 %v2524_v43  ;;  %v2834_v43 = vld [vmem:[%s4298_s3 + $0x24] sm:$0xf0] }
  0x98   : > { %v2492_v47 = vor.u32 %v2834_v43, %v2491_v41 }
  0x99   : > { %1557 = vmatpush.bf16.msra.mxu2 %v2528_v48  ;;  %v2496_v48 = vor.u32 %v2833_v44, %v2493_v45 }
  0x9a   : > { %1570 = vmatpush.bf16.msra.mxu3 %v2592_v12 }
  0x9b   : > { %1532 = vmatpush.bf16.msra.mxu0 %v2516_v3  ;;  %v2557_v3 = vld [vmem:[%s4298_s3 + $0xa8] sm:$0xf0] }
  0x9c   : > { %v2560_v10 = vor.u32 %v2849_v0, %v2557_v3  ;;  %v2905_v3 = vld [vmem:[%s4298_s3 + $0x264] sm:$0xf] }
  0x9d   : > { %1558 = vmatpush.bf16.msra.mxu2 %v2520_v5 }
  0x9e   : > { %1571 = vmatpush.bf16.msra.mxu3 %v2584_v25  ;;  %v2548_v25 = vor.u32 %v2848_v15, %v2547_v13  ;;  %v2643_v13 = vld [vmem:[%s4298_s3 + $0x250] sm:$0xf]  ;;  %v2903_v15 = vld [vmem:[%s4298_s3 + $0x254] sm:$0xf] }
  0x9f   : > { %1533 = vmatpush.bf16.msra.mxu0 %v2508_v16  ;;  %v2847_v16 = vld [vmem:[%s4298_s3 + $0x94] sm:$0xf] }
  0xa1   : > { %1559 = vmatpush.bf16.msra.mxu2 %v2512_v18 }
  0xa2   : > { %1572 = vmatpush.bf16.msra.mxu3 %v2576_v42 }
  0xa5   : > { %1560 = vmatpush.bf16.msra.mxu2 %v2504_v36 }
  0xa9   : > { %1561 = vmatpush.bf16.msra.mxu2 %v2496_v48 }
  0xc1   : > { %v3783_v46 = vpop.f32.mrf.mxu0 }
  0xc5   : > { %v3815_v62 = vpop.f32.mrf.mxu2 }
  0xc6   : > { %v3817_v63 = vpop.f32.mrf.mxu1 }
  0xc7   : > { %v545_v52 = vadd.f32 %v3817_v63, %v3783_v46  ;;  %v2831_v46 = vld [vmem:[%s4298_s3 + $0x14] sm:$0xf]  ;;  %v2485_v63 = vld [vmem:[%s4298_s3 + $0x18] sm:$0xf0] }
  0xc8   : > { %v2488_v4 = vor.u32 %v2831_v46, %v2485_v63 }
  0xc9   : > { %v533_v9 = vpop.f32.mrf.mxu0 }
  0xca   : > { %v2588_v9 = vor.u32 %v2858_v7, %v2587_v6  ;;  %v2475_v6 = vld [vmem:[%s4298_s3] sm:$0xf]  ;;  %v2830_v7 = vld [vmem:[%s4298_s3 + $0x4] sm:$0xf0]  ;;  %1562 = vmatpush.bf16.msra.mxu2 %v2488_v4  ;;  %v2653_v4 = vld [vmem:[%s4298_s3 + $0x268] sm:$0xf0] }
  0xcb   : > { %v3873_v27 = vpop.f32.mrf.mxu3  ;;  %v2476_v12 = vor.u32 %v2830_v7, %v2475_v6  ;;  %v2723_v7 = vld [vmem:[%s4298_s3 + $0x2f0] sm:$0xf] }
  0xcc   : > { %1544 = vmatpush.bf16.msra.mxu1 %v2588_v9  ;;  %v2556_v9 = vor.u32 %v2850_v61, %v2555_v58  ;;  %v571_v18 = vadd.f32 %v3873_v27, %v3815_v62  ;;  %v2846_v62 = vld [vmem:[%s4298_s3 + $0x84] sm:$0xf0]  ;;  %v2845_v27 = vld [vmem:[%s4298_s3 + $0x84] sm:$0xf] }
  0xcd   : > { %v559_v31 = vpop.f32.mrf.mxu2 }
  0xce   : > { %v546_v32 = vpop.f32.mrf.mxu1 }
  0xcf   : > { %v2500_v32 = vor.u32 %v2836_v28, %v2499_v26  ;;  %v2552_v26 = vor.u32 %v2847_v16, %v2549_v17  ;;  %v2645_v16 = vld [vmem:[%s4298_s3 + $0x258] sm:$0xf0] }
  0xd0   : > { %1545 = vmatpush.bf16.msra.mxu1 %v2580_v23 }
  0xd1   : > { %1534 = vmatpush.bf16.msra.mxu0 %v2500_v32  ;;  %v2540_v32 = vor.u32 %v2846_v62, %v2539_v29  ;;  %v2717_v29 = vld [vmem:[%s4298_s3 + $0x2e8] sm:$0xf0]  ;;  %v2635_v62 = vld [vmem:[%s4298_s3 + $0x240] sm:$0xf] }
  0xd2   : > { %v3887_v39 = vpop.f32.mrf.mxu0 }
  0xd3   : > { %v572_v53 = vpop.f32.mrf.mxu3  ;;  %v744_v5 = vadd.f32 %v3887_v39, %v545_v52  ;;  %v2477_v39 = vld [vmem:[%s4298_s3 + $0x8] sm:$0xf0]  ;;  %v2659_v52 = vld [vmem:[%s4298_s3 + $0x270] sm:$0xf] }
  0xd4   : > { %v2565_v53 = vld [vmem:[%s4298_s3 + $0xb8] sm:$0xf0]  ;;  %1546 = vmatpush.bf16.msra.mxu1 %v2572_v37  ;;  %v2480_v14 = vor.u32 %v2829_v8, %v2477_v39  ;;  %v2924_v8 = vld [vmem:[%s4298_s3 + $0x2f4] sm:$0xf0]  ;;  %v2656_v39 = vor.u32 %v2905_v3, %v2653_v4  ;;  %v2611_v4 = vld [vmem:[%s4298_s3 + $0x210] sm:$0xf] }
  0xd5   : > { %v2568_v57 = vor.u32 %v2851_v51, %v2565_v53  ;;  %1535 = vmatpush.bf16.msra.mxu0 %v2492_v47  ;;  %v2908_v53 = vld [vmem:[%s4298_s3 + $0x274] sm:$0xf0] }
  0xd6   : > { %v3936_v2 = vpop.f32.mrf.mxu1  ;;  %1563 = vmatpush.bf16.msra.mxu2 %v2480_v14  ;;  %v2660_v63 = vor.u32 %v2908_v53, %v2659_v52  ;;  %v2904_v14 = vld [vmem:[%s4298_s3 + $0x254] sm:$0xf0]  ;;  %v2619_v52 = vld [vmem:[%s4298_s3 + $0x220] sm:$0xf] }
  0xd7   : > { %v3934_v1 = vpop.f32.mrf.mxu2  ;;  %1573 = vmatpush.bf16.msra.mxu3 %v2568_v57  ;;  %v757_v19 = vadd.f32 %v3936_v2, %v744_v5 }
  0xd8   : > { %1547 = vmatpush.bf16.msra.mxu1 %v2564_v56  ;;  %v770_v2 = vadd.f32 %v3934_v1, %v571_v18  ;;  %v2661_v56 = vld [vmem:[%s4298_s3 + $0x278] sm:$0xf0] }
  0xd9   : > { %1536 = vmatpush.bf16.msra.mxu0 %v2484_v60  ;;  %v2664_v58 = vor.u32 %v2907_v55, %v2661_v56  ;;  %v2906_v60 = vld [vmem:[%s4298_s3 + $0x264] sm:$0xf0]  ;;  %v2897_v55 = vld [vmem:[%s4298_s3 + $0x224] sm:$0xf]  ;;  %v2621_v56 = vld [vmem:[%s4298_s3 + $0x228] sm:$0xf0] }
  0xda   : > { %v745_v11 = vpop.f32.mrf.mxu0 }
  0xdb   : > { %v3974_v22 = vpop.f32.mrf.mxu3  ;;  %v1044_v11 = vld [vmem:[#allocation4] sm:$0x3]  ;;  %1574 = vmatpush.bf16.msra.mxu3 %v2560_v10 }
  0xdc   : > { %v1046_v24 = vperm.slane %v1044_v11, 0  ;;  %1548 = vmatpush.bf16.msra.mxu1 %v2556_v9  ;;  %v783_v37 = vadd.f32 %v3974_v22, %v770_v2  ;;  %v1047_v40 = vperm.slane %v1044_v11, 1  ;;  %v2923_v9 = vld [vmem:[%s4298_s3 + $0x2f4] sm:$0xf]  ;;  %v2901_v2 = vld [vmem:[%s4298_s3 + $0x244] sm:$0xf] }
  0xdd   : > { %1537 = vmatpush.bf16.msra.mxu0 %v2476_v12  ;;  %v2725_v12 = vld [vmem:[%s4298_s3 + $0x2f8] sm:$0xf0] }
  0xde   : > { %v758_v30 = vpop.f32.mrf.mxu1 }
  0xdf   : > { %v771_v31 = vpop.f32.mrf.mxu2  ;;  %v2541_v30 = vld [vmem:[%s4298_s3 + $0x88] sm:$0xf0]  ;;  %1575 = vmatpush.bf16.msra.mxu3 %v2552_v26  ;;  %v2648_v26 = vor.u32 %v2903_v15, %v2645_v16  ;;  %v2603_v16 = vld [vmem:[%s4298_s3 + $0x200] sm:$0xf] }
  0xe0   : > { %1549 = vmatpush.bf16.msra.mxu1 %v2548_v25  ;;  %v2544_v33 = vor.u32 %v2845_v27, %v2541_v30  ;;  %v2644_v25 = vor.u32 %v2904_v14, %v2643_v13  ;;  %v2902_v27 = vld [vmem:[%s4298_s3 + $0x244] sm:$0xf0]  ;;  %v2637_v30 = vld [vmem:[%s4298_s3 + $0x248] sm:$0xf0] }
  0xe1   : > { %v2685_v13 = vld [vmem:[%s4298_s3 + $0x2a8] sm:$0xf0] }
  0xe3   : > { %v784_v59 = vpop.f32.mrf.mxu3  ;;  %1576 = vmatpush.bf16.msra.mxu3 %v2544_v33  ;;  %v2707_v33 = vld [vmem:[%s4298_s3 + $0x2d0] sm:$0xf] }
  0xe4   : > { %1550 = vmatpush.bf16.msra.mxu1 %v2540_v32  ;;  %v2651_v59 = vld [vmem:[%s4298_s3 + $0x260] sm:$0xf] }
  0xe5   : > { %v2652_v10 = vor.u32 %v2906_v60, %v2651_v59  ;;  %v2915_v59 = vld [vmem:[%s4298_s3 + $0x2b4] sm:$0xf]  ;;  %v2693_v60 = vld [vmem:[%s4298_s3 + $0x2b8] sm:$0xf0] }
  0xef   : > { %v999_v20 = vpop.f32.mrf.mxu0 }
  0xf0   : > { %v1012_v21 = vpop.f32.mrf.mxu1 }
  0xf1   : > { %v1013_v23 = vadd.f32 %v1012_v21, %v999_v20  ;;  %v2728_v20 = vor.u32 %v2923_v9, %v2725_v12  ;;  %v2715_v21 = vld [vmem:[%s4298_s3 + $0x2e0] sm:$0xf]  ;;  %v2696_v9 = vor.u32 %v2915_v59, %v2693_v60  ;;  %v2913_v12 = vld [vmem:[%s4298_s3 + $0x2a4] sm:$0xf] }
  0xf3   : > { %v1042_v28 = vadd.f32 %v1013_v23, %v757_v19  ;;  %v2724_v19 = vor.u32 %v2924_v8, %v2723_v7  ;;  %v2922_v23 = vld [vmem:[%s4298_s3 + $0x2e4] sm:$0xf0]  ;;  %v2613_v7 = vld [vmem:[%s4298_s3 + $0x218] sm:$0xf0] }
  0xf5   : > { %v1050_v31 = vadd.f32 %v1046_v24, %v1042_v28  ;;  %v2921_v28 = vld [vmem:[%s4298_s3 + $0x2e4] sm:$0xf] }
  0xf6   : > { %v2720_v32 = vor.u32 %v2921_v28, %v2717_v29  ;;  %v2911_v28 = vld [vmem:[%s4298_s3 + $0x294] sm:$0xf]  ;;  %v2677_v29 = vld [vmem:[%s4298_s3 + $0x298] sm:$0xf0] }
  0xf7   : > { %v1052_v34 = vmax.f32 %v1050_v31, 0.0  ;;  %v1025_v35 = vpop.f32.mrf.mxu2  ;;  %v1001_v41 = vpop.f32.mrf.mxu0  ;;  %v2716_v31 = vor.u32 %v2922_v23, %v2715_v21  ;;  %v2688_v21 = vor.u32 %v2913_v12, %v2685_v13  ;;  %v2675_v23 = vld [vmem:[%s4298_s3 + $0x290] sm:$0xf] }
  0xf8   : > { %v1038_v36 = vpop.f32.mrf.mxu3  ;;  %v1014_v42 = vpop.f32.mrf.mxu1  ;;  %v2900_v41 = vld [vmem:[%s4298_s3 + $0x234] sm:$0xf0] }
  0xf9   : > { %v1039_v38 = vadd.f32 %v1038_v36, %v1025_v35  ;;  %v1060_v43 = vrot.slane %v1052_v34, 7  ;;  %v2636_v34 = vor.u32 %v2902_v27, %v2635_v62  ;;  %v2640_v35 = vor.u32 %v2901_v2, %v2637_v30  ;;  %v2920_v36 = vld [vmem:[%s4298_s3 + $0x2d4] sm:$0xf0]  ;;  %v2899_v42 = vld [vmem:[%s4298_s3 + $0x234] sm:$0xf] }
  0xfb   : > { %v1043_v1 = vadd.f32 %v1039_v38, %v783_v37  ;;  %1064 = vst [vmem:[#allocation3] sm:$0xfe] %v1060_v43  ;;  %v2919_v37 = vld [vmem:[%s4298_s3 + $0x2d4] sm:$0xf]  ;;  %v2709_v38 = vld [vmem:[%s4298_s3 + $0x2d8] sm:$0xf0] }
  0xfc   : > { %1066 = vst [vmem:[#allocation3 + $0x8] sm:$0x1] %v1060_v43  ;;  %v2629_v43 = vld [vmem:[%s4298_s3 + $0x238] sm:$0xf0] }
  0xfd   : > { %v1051_v44 = vadd.f32 %v1047_v40, %v1043_v1  ;;  %v2627_v40 = vld [vmem:[%s4298_s3 + $0x230] sm:$0xf]  ;;  %v2708_v1 = vor.u32 %v2920_v36, %v2707_v33  ;;  %v2910_v33 = vld [vmem:[%s4298_s3 + $0x284] sm:$0xf0] }
  0xff   : > { %v1053_v45 = vmax.f32 %v1051_v44, 0.0  ;;  %v1027_v47 = vpop.f32.mrf.mxu2  ;;  %v2712_v44 = vor.u32 %v2919_v37, %v2709_v38 }
 0x100   : > { %v1040_v48 = vpop.f32.mrf.mxu3  ;;  %v2699_v47 = vld [vmem:[%s4298_s3 + $0x2c0] sm:$0xf] }
 0x101   : > { %v1061_v49 = vrot.slane %v1053_v45, 7  ;;  %v2918_v48 = vld [vmem:[%s4298_s3 + $0x2c4] sm:$0xf0] }
 0x102   : > { %v1104_v50 = vld [vmem:[#allocation3] sm:$0xfe] }
 0x103   : > { %1065 = vst [vmem:[#allocation3 + $0x18] sm:$0xfe] %v1061_v49  ;;  %v1106_v51 = vld [vmem:[#allocation3 + $0x8] sm:$0x1]  ;;  %v1068_v45 = vld [vmem:[#allocation3] sm:$0xff] }
 0x104   : > { %1067 = vst [vmem:[#allocation3 + $0x10] sm:$0x1] %v1061_v49  ;;  %v1108_v22 = vpack.c.bf16 %v1106_v51, %v1104_v50  ;;  %v2917_v49 = vld [vmem:[%s4298_s3 + $0x2c4] sm:$0xf]  ;;  %v2701_v50 = vld [vmem:[%s4298_s3 + $0x2c8] sm:$0xf0]  ;;  %v2628_v51 = vor.u32 %v2900_v41, %v2627_v40  ;;  %v1070_v53 = vpack.c.bf16 %v1068_v45, %v1068_v45 }
 0x106   : > { %v1145_v54 = vshll.u32 %v1108_v22, 16  ;;  %v1143_v57 = vshrl.u32 %v1108_v22, 16  ;;  %v2632_v22 = vor.u32 %v2899_v42, %v2629_v43 }
 0x108   : > { %v1147_v46 = vrot.slane %v1145_v54, 1  ;;  %v2898_v54 = vld [vmem:[%s4298_s3 + $0x224] sm:$0xf0] }
 0x10a   : > { %v1105_v61 = vld [vmem:[#allocation3 + $0x18] sm:$0xfe]  ;;  %v1148_v0 = vor.u32 %v1147_v46, %v1143_v57  ;;  %v2700_v57 = vor.u32 %v2918_v48, %v2699_v47  ;;  %v2704_v46 = vor.u32 %v2917_v49, %v2701_v50 }
 0x10b   : > { %v1107_v5 = vld [vmem:[#allocation3 + $0x10] sm:$0x1]  ;;  %v1069_v3 = vld [vmem:[#allocation3 + $0x18] sm:$0xff] }
 0x10c   : > { %v1109_v6 = vpack.c.bf16 %v1107_v5, %v1105_v61  ;;  %1326 = vmatmul.bf16.vlgmr.msrb.gmra.mxu0 %v1148_v0  ;;  %1352 = vmatmul.bf16.vlgmr.msrb.gmra.mxu2 %v1148_v0  ;;  %v2620_v61 = vor.u32 %v2898_v54, %v2619_v52  ;;  %v2624_v0 = vor.u32 %v2897_v55, %v2621_v56  ;;  %v2896_v5 = vld [vmem:[%s4298_s3 + $0x214] sm:$0xf0]  ;;  %v1585_v37 = vld [vmem:[#allocation3 + $0x10] sm:$0x3] }
 0x10d   : > { %1786 = vmatpush.bf16.msrb.mxu0 %v2660_v63  ;;  %1812 = vmatpush.bf16.msrb.mxu2 %v2664_v58  ;;  %v2691_v63 = vld [vmem:[%s4298_s3 + $0x2b0] sm:$0xf]  ;;  %v2916_v58 = vld [vmem:[%s4298_s3 + $0x2b4] sm:$0xf0]  ;;  %v2612_v14 = vor.u32 %v2896_v5, %v2611_v4 }
 0x10e   : > { %v1152_v11 = vshll.u32 %v1109_v6, 16  ;;  %v1150_v17 = vshrl.u32 %v1109_v6, 16  ;;  %v2895_v6 = vld [vmem:[%s4298_s3 + $0x214] sm:$0xf]  ;;  %v2692_v8 = vor.u32 %v2916_v58, %v2691_v63  ;;  %v1583_v36 = vld [vmem:[#allocation3 + $0x18] sm:$0xfc] }
 0x10f   : > { %v2616_v15 = vor.u32 %v2895_v6, %v2613_v7  ;;  %v1587_v42 = vpack.c.bf16 %v1585_v37, %v1583_v36  ;;  %v1848_v5 = vld [vmem:[#allocation2 + $0x10] sm:$0xfe]  ;;  %v1850_v6 = vld [vmem:[#allocation2 + $0x18] sm:$0x1] }
 0x110   : > { %v1154_v18 = vrot.slane %v1152_v11, 1  ;;  %v2914_v11 = vld [vmem:[%s4298_s3 + $0x2a4] sm:$0xf0]  ;;  %v1857_v12 = vrot.slane %v1848_v5, 1  ;;  %v1858_v13 = vrot.slane %v1850_v6, 1 }
 0x111   : > { %1787 = vmatpush.bf16.msrb.mxu0 %v2652_v10  ;;  %1813 = vmatpush.bf16.msrb.mxu2 %v2656_v39  ;;  %v2683_v10 = vld [vmem:[%s4298_s3 + $0x2a0] sm:$0xf]  ;;  %v1071_v39 = vpack.c.bf16 %v1069_v3, %v1069_v3  ;;  %v1623_v43 = vrot.slane %v1587_v42, 1 }
 0x112   : > { %v1155_v24 = vor.u32 %v1154_v18, %v1150_v17  ;;  %v2894_v17 = vld [vmem:[%s4298_s3 + $0x204] sm:$0xf0]  ;;  %v2893_v18 = vld [vmem:[%s4298_s3 + $0x204] sm:$0xf] }
 0x113   : > { %v2604_v62 = vor.u32 %v2894_v17, %v2603_v16 }
 0x114   : > { %1339 = vmatmul.bf16.vlgmr.msrb.gmra.mxu1 %v1155_v24  ;;  %1365 = vmatmul.bf16.vlgmr.msrb.gmra.mxu3 %v1155_v24  ;;  %v1582_v24 = vld [vmem:[#allocation3] sm:$0xfc] }
 0x115   : > { %1799 = vmatpush.bf16.msrb.mxu1 %v2724_v19  ;;  %1825 = vmatpush.bf16.msrb.mxu3 %v2728_v20  ;;  %v2605_v19 = vld [vmem:[%s4298_s3 + $0x208] sm:$0xf0]  ;;  %v2684_v20 = vor.u32 %v2914_v11, %v2683_v10  ;;  %v1851_v11 = vld [vmem:[#allocation2 + $0x8] sm:$0x1] }
 0x116   : > { %1788 = vmatpush.bf16.msrb.mxu0 %v2644_v25  ;;  %1814 = vmatpush.bf16.msrb.mxu2 %v2648_v26  ;;  %v1584_v25 = vld [vmem:[#allocation3 + $0x8] sm:$0x3]  ;;  %v2912_v26 = vld [vmem:[%s4298_s3 + $0x294] sm:$0xf0]  ;;  %v2608_v27 = vor.u32 %v2893_v18, %v2605_v19  ;;  %v1861_v17 = vrot.slane %v1851_v11, 1 }
 0x117   : > { %v1586_v2 = vpack.c.bf16 %v1584_v25, %v1582_v24  ;;  %v2676_v30 = vor.u32 %v2912_v26, %v2675_v23  ;;  %v1859_v23 = vsel %vm1856_vm0, %v1857_v12, %v1858_v13 }
 0x119   : > { %1800 = vmatpush.bf16.msrb.mxu1 %v2716_v31  ;;  %1826 = vmatpush.bf16.msrb.mxu3 %v2720_v32  ;;  %v2680_v31 = vor.u32 %v2911_v28, %v2677_v29  ;;  %v2667_v32 = vld [vmem:[%s4298_s3 + $0x280] sm:$0xf]  ;;  %v1622_v38 = vrot.slane %v1586_v2, 1 }
 0x11a   : > { %1789 = vmatpush.bf16.msrb.mxu0 %v2636_v34  ;;  %1815 = vmatpush.bf16.msrb.mxu2 %v2640_v35  ;;  %v2909_v34 = vld [vmem:[%s4298_s3 + $0x284] sm:$0xf]  ;;  %v2669_v35 = vld [vmem:[%s4298_s3 + $0x288] sm:$0xf0]  ;;  %v2668_v40 = vor.u32 %v2910_v33, %v2667_v32 }
 0x11b   : > { %v2672_v41 = vor.u32 %v2909_v34, %v2669_v35 }
 0x11c   : > { %1538 = vmatmul.bf16.vlgmr.msra.gmra.mxu0 %v1070_v53  ;;  %1564 = vmatmul.bf16.vlgmr.msra.gmra.mxu2 %v1070_v53 }
 0x11d   : > { %1801 = vmatpush.bf16.msrb.mxu1 %v2708_v1  ;;  %1827 = vmatpush.bf16.msrb.mxu3 %v2712_v44 }
 0x11e   : > { %1790 = vmatpush.bf16.msrb.mxu0 %v2628_v51  ;;  %1816 = vmatpush.bf16.msrb.mxu2 %v2632_v22 }
 0x121   : > { %1802 = vmatpush.bf16.msrb.mxu1 %v2700_v57  ;;  %1828 = vmatpush.bf16.msrb.mxu3 %v2704_v46 }
 0x122   : > { %1791 = vmatpush.bf16.msrb.mxu0 %v2620_v61  ;;  %1817 = vmatpush.bf16.msrb.mxu2 %v2624_v0  ;;  %v1840_v61 = vld [vmem:[#allocation6] sm:$0x3] }
 0x123   : > { %v1842_v10 = vperm.slane %v1840_v61, 0 }
 0x124   : > { %1551 = vmatmul.bf16.vlgmr.msra.gmra.mxu1 %v1071_v39  ;;  %1577 = vmatmul.bf16.vlgmr.msra.gmra.mxu3 %v1071_v39  ;;  %v1849_v39 = vld [vmem:[#allocation2] sm:$0xfe] }
 0x125   : > { %1803 = vmatpush.bf16.msrb.mxu1 %v2692_v8  ;;  %1829 = vmatpush.bf16.msrb.mxu3 %v2696_v9  ;;  %v1860_v16 = vrot.slane %v1849_v39, 1 }
 0x126   : > { %1792 = vmatpush.bf16.msrb.mxu0 %v2612_v14  ;;  %1818 = vmatpush.bf16.msrb.mxu2 %v2616_v15 }
 0x127   : > { %v1862_v28 = vsel %vm1856_vm0, %v1860_v16, %v1861_v17 }
 0x129   : > { %1804 = vmatpush.bf16.msrb.mxu1 %v2684_v20  ;;  %1830 = vmatpush.bf16.msrb.mxu3 %v2688_v21  ;;  %v1843_v21 = vperm.slane %v1840_v61, 1 }
 0x12a   : > { %1793 = vmatpush.bf16.msrb.mxu0 %v2604_v62  ;;  %1819 = vmatpush.bf16.msrb.mxu2 %v2608_v27 }
 0x12d   : > { %1805 = vmatpush.bf16.msrb.mxu1 %v2676_v30  ;;  %1831 = vmatpush.bf16.msrb.mxu3 %v2680_v31 }
 0x12e   : > { %1794 = vmatmul.bf16.vlgmr.msrb.gmra.mxu0 %v1622_v38  ;;  %1820 = vmatmul.bf16.vlgmr.msrb.gmra.mxu2 %v1622_v38 }
 0x131   : > { %1806 = vmatpush.bf16.msrb.mxu1 %v2668_v40  ;;  %1832 = vmatpush.bf16.msrb.mxu3 %v2672_v41 }
 0x134   : > { %1807 = vmatmul.bf16.vlgmr.msrb.gmra.mxu1 %v1623_v43  ;;  %1833 = vmatmul.bf16.vlgmr.msrb.gmra.mxu3 %v1623_v43 }
 0x189   : > { %v1327_v1 = vpop.f32.mrf.mxu0 }
 0x18f   : > { %v1353_v44 = vpop.f32.mrf.mxu2 }
 0x191   : > { %v1340_v45 = vpop.f32.mrf.mxu1  ;;  %v1329_v47 = vpop.f32.mrf.mxu0 }
 0x192   : > { %v1341_v63 = vadd.f32 %v1340_v45, %v1327_v1 }
 0x197   : > { %v1366_v48 = vpop.f32.mrf.mxu3  ;;  %v1355_v49 = vpop.f32.mrf.mxu2 }
 0x198   : > { %v1367_v8 = vadd.f32 %v1366_v48, %v1353_v44 }
 0x199   : > { %v1342_v50 = vpop.f32.mrf.mxu1  ;;  %v1539_v51 = vpop.f32.mrf.mxu0 }
 0x19a   : > { %v1540_v59 = vadd.f32 %v1539_v51, %v1341_v63 }
 0x19f   : > { %v1368_v22 = vpop.f32.mrf.mxu3  ;;  %v1565_v53 = vpop.f32.mrf.mxu2 }
 0x1a0   : > { %v1566_v14 = vadd.f32 %v1565_v53, %v1367_v8 }
 0x1a1   : > { %v1552_v52 = vpop.f32.mrf.mxu1  ;;  %v1541_v54 = vpop.f32.mrf.mxu0 }
 0x1a2   : > { %v1553_v3 = vadd.f32 %v1552_v52, %v1540_v59 }
 0x1a7   : > { %v1578_v55 = vpop.f32.mrf.mxu3  ;;  %v1567_v57 = vpop.f32.mrf.mxu2 }
 0x1a8   : > { %v1579_v18 = vadd.f32 %v1578_v55, %v1566_v14 }
 0x1a9   : > { %v1554_v56 = vpop.f32.mrf.mxu1 }
 0x1ab   : > { %v1795_v46 = vpop.f32.mrf.mxu0 }
 0x1af   : > { %v1580_v58 = vpop.f32.mrf.mxu3 }
 0x1b1   : > { %v1808_v60 = vpop.f32.mrf.mxu1  ;;  %v1821_v0 = vpop.f32.mrf.mxu2 }
 0x1b2   : > { %v1809_v4 = vadd.f32 %v1808_v60, %v1795_v46 }
 0x1b3   : > { %v1797_v7 = vpop.f32.mrf.mxu0 }
 0x1b4   : > { %v1838_v9 = vadd.f32 %v1809_v4, %v1553_v3 }
 0x1b6   : > { %v1846_v19 = vadd.f32 %v1842_v10, %v1838_v9 }
 0x1b7   : > { %v1834_v15 = vpop.f32.mrf.mxu3 }
 0x1b8   : > { %v1835_v20 = vadd.f32 %v1834_v15, %v1821_v0  ;;  %v1865_v29 = vadd.f32 %v1859_v23, %v1846_v19 }
 0x1b9   : > { %v1810_v24 = vpop.f32.mrf.mxu1  ;;  %v1823_v25 = vpop.f32.mrf.mxu2 }
 0x1ba   : > { %v1839_v26 = vadd.f32 %v1835_v20, %v1579_v18  ;;  %v1867_v30 = vmax.f32 %v1865_v29, 0.0 }
 0x1bc   : > { %v1847_v62 = vadd.f32 %v1843_v21, %v1839_v26 }
 0x1be   : > { %v1866_v27 = vadd.f32 %v1862_v28, %v1847_v62 }
 0x1bf   : > { %v1836_v2 = vpop.f32.mrf.mxu3 }
 0x1c0   : > { %v1868_v31 = vmax.f32 %v1866_v27, 0.0 }
 0x1c2   : > { %v1869_v32 = vpack.c.bf16 %v1868_v31, %v1867_v30 }
 0x1c4   : > { %1870 = vst [vmem:[%s254_s29] sm:$0xff] %v1869_v32 }
 0x1c5 PF: > { %s17_s18 = sadd.s32 1, %s3029_s18  }
 0x1c6   : > { %p14_p7 = scmp.ge.s32.totalorder %s17_s18, 4  }
 0x1c8   :  { %16 = sbr.rel (!%p14_p7) target bundleno = 2 (0x2), region = 79 }
 0x1cd   :  { %1892 = vsyncpa [#allocation5], 1 }
 0x1ce   :  { %1894 = vsyncpa [#allocation5 + $0x1], 1 }
 0x1cf   :  { %1895 = vsyncpa [#allocation7], 1 }

// kernel: encoder1d_forward.15
= control target key start
LH: loop header
LB: loop body
LE: loop exit
PB: predicated region body
PF: predicated region fallthrough
CT: control target
= control target key end

     0   :  { %s2411_s0 = inlined_call_operand.vmem [shape: bf16[2,2048], index: 0, kind: input, shape index: {}]   ;;  %s2412_s1 = inlined_call_operand.vmem [shape: bf16[2048,16], index: 1, kind: input, shape index: {}]   ;;  %s2413_s2 = inlined_call_operand.vmem [shape: f32[1,16], index: 2, kind: input, shape index: {}]   ;;  %s2414_s3 = inlined_call_operand.hbm [shape: f32[2,16], index: 3, kind: output, shape index: {}]  }
   0x1   :  { %v1840_v0 = vld [vmem:[%s2412_s1 + $0x38] sm:$0xff]  ;;  %v1839_v4 = vld [vmem:[%s2412_s1 + $0x30] sm:$0xff]  ;;  %v1838_v8 = vld [vmem:[%s2412_s1 + $0x28] sm:$0xff] }
   0x2   :  { %v1848_v1 = vld [vmem:[%s2412_s1 + $0x78] sm:$0xff]  ;;  %1084 = vmatpush.bf16.msra.mxu0 %v1840_v0  ;;  %v1847_v5 = vld [vmem:[%s2412_s1 + $0x70] sm:$0xff]  ;;  %v1846_v9 = vld [vmem:[%s2412_s1 + $0x68] sm:$0xff] }
   0x3   :  { %v1856_v2 = vld [vmem:[%s2412_s1 + $0xb8] sm:$0xff]  ;;  %1097 = vmatpush.bf16.msra.mxu1 %v1848_v1  ;;  %v1855_v6 = vld [vmem:[%s2412_s1 + $0xb0] sm:$0xff]  ;;  %v1854_v10 = vld [vmem:[%s2412_s1 + $0xa8] sm:$0xff] }
   0x4   :  { %v1864_v3 = vld [vmem:[%s2412_s1 + $0xf8] sm:$0xff]  ;;  %1110 = vmatpush.bf16.msra.mxu2 %v1856_v2  ;;  %v1863_v7 = vld [vmem:[%s2412_s1 + $0xf0] sm:$0xff]  ;;  %v1862_v11 = vld [vmem:[%s2412_s1 + $0xe8] sm:$0xff] }
   0x5   :  { %1123 = vmatpush.bf16.msra.mxu3 %v1864_v3  ;;  %v1837_v12 = vld [vmem:[%s2412_s1 + $0x20] sm:$0xff]  ;;  %v1836_v16 = vld [vmem:[%s2412_s1 + $0x18] sm:$0xff]  ;;  %v1835_v20 = vld [vmem:[%s2412_s1 + $0x10] sm:$0xff] }
   0x6   :  { %1085 = vmatpush.bf16.msra.mxu0 %v1839_v4  ;;  %v1845_v13 = vld [vmem:[%s2412_s1 + $0x60] sm:$0xff]  ;;  %v1844_v17 = vld [vmem:[%s2412_s1 + $0x58] sm:$0xff]  ;;  %v1843_v21 = vld [vmem:[%s2412_s1 + $0x50] sm:$0xff] }
   0x7   :  { %1098 = vmatpush.bf16.msra.mxu1 %v1847_v5  ;;  %v1853_v14 = vld [vmem:[%s2412_s1 + $0xa0] sm:$0xff]  ;;  %v1852_v18 = vld [vmem:[%s2412_s1 + $0x98] sm:$0xff] }
   0x8   :  { %1111 = vmatpush.bf16.msra.mxu2 %v1855_v6  ;;  %v1861_v15 = vld [vmem:[%s2412_s1 + $0xe0] sm:$0xff]  ;;  %v1860_v19 = vld [vmem:[%s2412_s1 + $0xd8] sm:$0xff] }
   0x9   :  { %1124 = vmatpush.bf16.msra.mxu3 %v1863_v7  ;;  %v22_v22 = vld [vmem:[%s2411_s0] sm:$0xff] }
   0xa   :  { %1086 = vmatpush.bf16.msra.mxu0 %v1838_v8  ;;  %281 = vst [vmem:[#allocation1] ss:$9 sm:$0xff] %v22_v22 }
   0xb   :  { %1099 = vmatpush.bf16.msra.mxu1 %v1846_v9 }
   0xc   :  { %1112 = vmatpush.bf16.msra.mxu2 %v1854_v10 }
   0xd   :  { %1125 = vmatpush.bf16.msra.mxu3 %v1862_v11 }
   0xe   :  { %1087 = vmatpush.bf16.msra.mxu0 %v1837_v12 }
   0xf   :  { %1100 = vmatpush.bf16.msra.mxu1 %v1845_v13 }
  0x10   :  { %1113 = vmatpush.bf16.msra.mxu2 %v1853_v14 }
  0x11   :  { %1126 = vmatpush.bf16.msra.mxu3 %v1861_v15 }
  0x12   :  { %1088 = vmatpush.bf16.msra.mxu0 %v1836_v16 }
  0x13   :  { %1101 = vmatpush.bf16.msra.mxu1 %v1844_v17 }
  0x14   :  { %8 = vsyncpa [#allocation4], 0  ;;  %1114 = vmatpush.bf16.msra.mxu2 %v1852_v18  ;;  %v1851_v23 = vld [vmem:[%s2412_s1 + $0x90] sm:$0xff]  ;;  %v1834_v25 = vld [vmem:[%s2412_s1 + $0x8] sm:$0xff]  ;;  %vm19_vm0 = vcmask 123904   ;;  %s1991_s24 = smov [#allocation3]  }
  0x15   :  { %1127 = vmatpush.bf16.msra.mxu3 %v1860_v19  ;;  %v1859_v24 = vld [vmem:[%s2412_s1 + $0xd0] sm:$0xff]  ;;  %v1842_v26 = vld [vmem:[%s2412_s1 + $0x48] sm:$0xff]  ;;  %v1833_v29 = vld [vmem:[%s2412_s1] sm:$0xff]  ;;  %s1310_s25 = sshll.u32 %s1991_s24, 4  ;;  %s1312_s28 = sshll.u32 %s2414_s3, 4  ;;  %s1311_s25 = int_to_ptr.vmem [resolvable:$true] %s1310_s25  ;;  %s1313_s28 = int_to_ptr.hbm [resolvable:$true] %s1312_s28 }
  0x16   :  { %1089 = vmatpush.bf16.msra.mxu0 %v1835_v20  ;;  %v1850_v27 = vld [vmem:[%s2412_s1 + $0x88] sm:$0xff]  ;;  %v1841_v30 = vld [vmem:[%s2412_s1 + $0x40] sm:$0xff]  ;;  %v1872_v33 = vld [vmem:[%s2412_s1 + $0x138] sm:$0xff] }
  0x17   :  { %1102 = vmatpush.bf16.msra.mxu1 %v1843_v21  ;;  %v1858_v28 = vld [vmem:[%s2412_s1 + $0xc8] sm:$0xff]  ;;  %v1849_v31 = vld [vmem:[%s2412_s1 + $0x80] sm:$0xff]  ;;  %v1880_v34 = vld [vmem:[%s2412_s1 + $0x178] sm:$0xff] }
  0x18   :  { %1115 = vmatpush.bf16.msra.mxu2 %v1851_v23  ;;  %v1857_v32 = vld [vmem:[%s2412_s1 + $0xc0] sm:$0xff]  ;;  %v1888_v35 = vld [vmem:[%s2412_s1 + $0x1b8] sm:$0xff]  ;;  %v1871_v37 = vld [vmem:[%s2412_s1 + $0x130] sm:$0xff] }
  0x19   :  { %1128 = vmatpush.bf16.msra.mxu3 %v1859_v24  ;;  %v1896_v36 = vld [vmem:[%s2412_s1 + $0x1f8] sm:$0xff]  ;;  %v282_v39 = vld [vmem:[#allocation1] sm:$0xff]  ;;  %v1879_v40 = vld [vmem:[%s2412_s1 + $0x170] sm:$0xff] }
  0x1a   :  { %1090 = vmatpush.bf16.msra.mxu0 %v1834_v25  ;;  %v284_v38 = vld [vmem:[#allocation1 + $0x12] sm:$0xff]  ;;  %v285_v41 = vld [vmem:[#allocation1 + $0x1b] sm:$0xff]  ;;  %v283_v42 = vld [vmem:[#allocation1 + $0x9] sm:$0xff] }
  0x1b   :  { %1103 = vmatpush.bf16.msra.mxu1 %v1842_v26  ;;  %v1887_v43 = vld [vmem:[%s2412_s1 + $0x1b0] sm:$0xff]  ;;  %v1870_v45 = vld [vmem:[%s2412_s1 + $0x128] sm:$0xff]  ;;  %v289_v51 = vld [vmem:[#allocation1 + $0x3f] sm:$0xff] }
  0x1c   :  { %1116 = vmatpush.bf16.msra.mxu2 %v1850_v27  ;;  %v1895_v44 = vld [vmem:[%s2412_s1 + $0x1f0] sm:$0xff]  ;;  %v1878_v46 = vld [vmem:[%s2412_s1 + $0x168] sm:$0xff]  ;;  %v1869_v54 = vld [vmem:[%s2412_s1 + $0x120] sm:$0xff] }
  0x1d   :  { %1129 = vmatpush.bf16.msra.mxu3 %v1858_v28  ;;  %v1886_v47 = vld [vmem:[%s2412_s1 + $0x1a8] sm:$0xff]  ;;  %v288_v49 = vld [vmem:[#allocation1 + $0x36] sm:$0xff]  ;;  %v1877_v55 = vld [vmem:[%s2412_s1 + $0x160] sm:$0xff] }
  0x1e   :  { %1091 = vmatpush.bf16.msra.mxu0 %v1833_v29  ;;  %v1894_v48 = vld [vmem:[%s2412_s1 + $0x1e8] sm:$0xff]  ;;  %v1885_v56 = vld [vmem:[%s2412_s1 + $0x1a0] sm:$0xff]  ;;  %v1868_v58 = vld [vmem:[%s2412_s1 + $0x118] sm:$0xff] }
  0x1f   :  { %1104 = vmatpush.bf16.msra.mxu1 %v1841_v30  ;;  %v286_v50 = vld [vmem:[#allocation1 + $0x24] sm:$0xff]  ;;  %v287_v53 = vld [vmem:[#allocation1 + $0x2d] sm:$0xff]  ;;  %v1876_v59 = vld [vmem:[%s2412_s1 + $0x158] sm:$0xff] }
  0x20   :  { %1117 = vmatpush.bf16.msra.mxu2 %v1849_v31  ;;  %v23_v52 = vld [vmem:[%s2411_s0 + $0x8] sm:$0xff]  ;;  %v1893_v57 = vld [vmem:[%s2412_s1 + $0x1e0] sm:$0xff]  ;;  %v1884_v60 = vld [vmem:[%s2412_s1 + $0x198] sm:$0xff] }
  0x21   :  { %1130 = vmatpush.bf16.msra.mxu3 %v1857_v32  ;;  %1092 = vmatmul.bf16.vlgmr.msra.gmra.mxu0 %v282_v39  ;;  %291 = vst [vmem:[#allocation1] ss:$9 sm:$0xff] %v23_v52  ;;  %v1892_v61 = vld [vmem:[%s2412_s1 + $0x1d8] sm:$0xff]  ;;  %v1867_v62 = vld [vmem:[%s2412_s1 + $0x110] sm:$0xff]  ;;  %v1866_v2 = vld [vmem:[%s2412_s1 + $0x108] sm:$0xff] }
  0x22   :  { %1136 = vmatpush.bf16.msrb.mxu0 %v1872_v33  ;;  %1105 = vmatmul.bf16.vlgmr.msra.gmra.mxu1 %v283_v42  ;;  %v1875_v63 = vld [vmem:[%s2412_s1 + $0x150] sm:$0xff]  ;;  %v1874_v3 = vld [vmem:[%s2412_s1 + $0x148] sm:$0xff]  ;;  %v1865_v6 = vld [vmem:[%s2412_s1 + $0x100] sm:$0xff] }
  0x23   :  { %1149 = vmatpush.bf16.msrb.mxu1 %v1880_v34  ;;  %1118 = vmatmul.bf16.vlgmr.msra.gmra.mxu2 %v284_v38  ;;  %v1883_v0 = vld [vmem:[%s2412_s1 + $0x190] sm:$0xff]  ;;  %v1882_v4 = vld [vmem:[%s2412_s1 + $0x188] sm:$0xff]  ;;  %v1873_v7 = vld [vmem:[%s2412_s1 + $0x140] sm:$0xff] }
  0x24   :  { %1162 = vmatpush.bf16.msrb.mxu2 %v1888_v35  ;;  %1131 = vmatmul.bf16.vlgmr.msra.gmra.mxu3 %v285_v41  ;;  %v1891_v1 = vld [vmem:[%s2412_s1 + $0x1d0] sm:$0xff]  ;;  %v1890_v5 = vld [vmem:[%s2412_s1 + $0x1c8] sm:$0xff]  ;;  %v1881_v8 = vld [vmem:[%s2412_s1 + $0x180] sm:$0xff] }
  0x25   :  { %1175 = vmatpush.bf16.msrb.mxu3 %v1896_v36  ;;  %v1889_v9 = vld [vmem:[%s2412_s1 + $0x1c0] sm:$0xff]  ;;  %v1904_v10 = vld [vmem:[%s2412_s1 + $0x238] sm:$0xff]  ;;  %v1903_v14 = vld [vmem:[%s2412_s1 + $0x230] sm:$0xff] }
  0x26   :  { %1137 = vmatpush.bf16.msrb.mxu0 %v1871_v37  ;;  %v1912_v11 = vld [vmem:[%s2412_s1 + $0x278] sm:$0xff]  ;;  %v1911_v15 = vld [vmem:[%s2412_s1 + $0x270] sm:$0xff]  ;;  %v1902_v18 = vld [vmem:[%s2412_s1 + $0x228] sm:$0xff] }
  0x27   :  { %1150 = vmatpush.bf16.msrb.mxu1 %v1879_v40  ;;  %v1920_v12 = vld [vmem:[%s2412_s1 + $0x2b8] sm:$0xff]  ;;  %v1919_v16 = vld [vmem:[%s2412_s1 + $0x2b0] sm:$0xff]  ;;  %v1910_v19 = vld [vmem:[%s2412_s1 + $0x268] sm:$0xff] }
  0x28   :  { %1163 = vmatpush.bf16.msrb.mxu2 %v1887_v43  ;;  %v1928_v13 = vld [vmem:[%s2412_s1 + $0x2f8] sm:$0xff]  ;;  %v1927_v17 = vld [vmem:[%s2412_s1 + $0x2f0] sm:$0xff]  ;;  %v1918_v20 = vld [vmem:[%s2412_s1 + $0x2a8] sm:$0xff] }
  0x29   :  { %1176 = vmatpush.bf16.msrb.mxu3 %v1895_v44  ;;  %v1926_v21 = vld [vmem:[%s2412_s1 + $0x2e8] sm:$0xff]  ;;  %v1901_v22 = vld [vmem:[%s2412_s1 + $0x220] sm:$0xff]  ;;  %v1900_v26 = vld [vmem:[%s2412_s1 + $0x218] sm:$0xff] }
  0x2a   :  { %1138 = vmatpush.bf16.msrb.mxu0 %v1870_v45  ;;  %v1909_v23 = vld [vmem:[%s2412_s1 + $0x260] sm:$0xff]  ;;  %v1908_v27 = vld [vmem:[%s2412_s1 + $0x258] sm:$0xff]  ;;  %v1899_v30 = vld [vmem:[%s2412_s1 + $0x210] sm:$0xff] }
  0x2b   :  { %1151 = vmatpush.bf16.msrb.mxu1 %v1878_v46  ;;  %v1917_v24 = vld [vmem:[%s2412_s1 + $0x2a0] sm:$0xff]  ;;  %v1916_v28 = vld [vmem:[%s2412_s1 + $0x298] sm:$0xff]  ;;  %v1907_v31 = vld [vmem:[%s2412_s1 + $0x250] sm:$0xff] }
  0x2c   :  { %1164 = vmatpush.bf16.msrb.mxu2 %v1886_v47  ;;  %v1925_v25 = vld [vmem:[%s2412_s1 + $0x2e0] sm:$0xff]  ;;  %v1924_v29 = vld [vmem:[%s2412_s1 + $0x2d8] sm:$0xff]  ;;  %v1915_v32 = vld [vmem:[%s2412_s1 + $0x290] sm:$0xff] }
  0x2d   :  { %1177 = vmatpush.bf16.msrb.mxu3 %v1894_v48  ;;  %v1923_v33 = vld [vmem:[%s2412_s1 + $0x2d0] sm:$0xff]  ;;  %v1898_v34 = vld [vmem:[%s2412_s1 + $0x208] sm:$0xff]  ;;  %v1897_v38 = vld [vmem:[%s2412_s1 + $0x200] sm:$0xff] }
  0x2e   :  { %1139 = vmatpush.bf16.msrb.mxu0 %v1869_v54  ;;  %v1906_v35 = vld [vmem:[%s2412_s1 + $0x248] sm:$0xff]  ;;  %v1905_v39 = vld [vmem:[%s2412_s1 + $0x240] sm:$0xff]  ;;  %v1936_v42 = vld [vmem:[%s2412_s1 + $0x338] sm:$0xff] }
  0x2f   :  { %1152 = vmatpush.bf16.msrb.mxu1 %v1877_v55  ;;  %v1914_v36 = vld [vmem:[%s2412_s1 + $0x288] sm:$0xff]  ;;  %v1913_v40 = vld [vmem:[%s2412_s1 + $0x280] sm:$0xff]  ;;  %v1944_v43 = vld [vmem:[%s2412_s1 + $0x378] sm:$0xff] }
  0x30   :  { %1165 = vmatpush.bf16.msrb.mxu2 %v1885_v56  ;;  %v1922_v37 = vld [vmem:[%s2412_s1 + $0x2c8] sm:$0xff]  ;;  %v1921_v41 = vld [vmem:[%s2412_s1 + $0x2c0] sm:$0xff]  ;;  %v1952_v44 = vld [vmem:[%s2412_s1 + $0x3b8] sm:$0xff] }
  0x31   :  { %1178 = vmatpush.bf16.msrb.mxu3 %v1893_v57  ;;  %v1960_v45 = vld [vmem:[%s2412_s1 + $0x3f8] sm:$0xff]  ;;  %v292_v46 = vld [vmem:[#allocation1] sm:$0xff]  ;;  %v293_v48 = vld [vmem:[#allocation1 + $0x9] sm:$0xff] }
  0x32   :  { %1140 = vmatpush.bf16.msrb.mxu0 %v1868_v58  ;;  %v294_v47 = vld [vmem:[#allocation1 + $0x12] sm:$0xff]  ;;  %v1934_v54 = vld [vmem:[%s2412_s1 + $0x328] sm:$0xff]  ;;  %v1933_v58 = vld [vmem:[%s2412_s1 + $0x320] sm:$0xff] }
  0x33   :  { %1153 = vmatpush.bf16.msrb.mxu1 %v1876_v59  ;;  %v1951_v52 = vld [vmem:[%s2412_s1 + $0x3b0] sm:$0xff]  ;;  %v1942_v55 = vld [vmem:[%s2412_s1 + $0x368] sm:$0xff]  ;;  %v1941_v59 = vld [vmem:[%s2412_s1 + $0x360] sm:$0xff] }
  0x34   :  { %1166 = vmatpush.bf16.msrb.mxu2 %v1884_v60  ;;  %v1950_v56 = vld [vmem:[%s2412_s1 + $0x3a8] sm:$0xff]  ;;  %v1949_v60 = vld [vmem:[%s2412_s1 + $0x3a0] sm:$0xff] }
  0x35   :  { %1179 = vmatpush.bf16.msrb.mxu3 %v1892_v61  ;;  %v1958_v57 = vld [vmem:[%s2412_s1 + $0x3e8] sm:$0xff]  ;;  %v1957_v61 = vld [vmem:[%s2412_s1 + $0x3e0] sm:$0xff] }
  0x36   :  { %1141 = vmatpush.bf16.msrb.mxu0 %v1867_v62  ;;  %v1932_v62 = vld [vmem:[%s2412_s1 + $0x318] sm:$0xff] }
  0x37   :  { %1154 = vmatpush.bf16.msrb.mxu1 %v1875_v63  ;;  %v1940_v63 = vld [vmem:[%s2412_s1 + $0x358] sm:$0xff] }
  0x38   :  { %1167 = vmatpush.bf16.msrb.mxu2 %v1883_v0  ;;  %v1948_v0 = vld [vmem:[%s2412_s1 + $0x398] sm:$0xff] }
  0x39   :  { %1180 = vmatpush.bf16.msrb.mxu3 %v1891_v1  ;;  %v1956_v1 = vld [vmem:[%s2412_s1 + $0x3d8] sm:$0xff] }
  0x3a   :  { %1142 = vmatpush.bf16.msrb.mxu0 %v1866_v2  ;;  %v1931_v2 = vld [vmem:[%s2412_s1 + $0x310] sm:$0xff] }
  0x3b   :  { %1155 = vmatpush.bf16.msrb.mxu1 %v1874_v3  ;;  %v1939_v3 = vld [vmem:[%s2412_s1 + $0x350] sm:$0xff] }
  0x3c   :  { %1168 = vmatpush.bf16.msrb.mxu2 %v1882_v4  ;;  %v1947_v4 = vld [vmem:[%s2412_s1 + $0x390] sm:$0xff] }
  0x3d   :  { %1181 = vmatpush.bf16.msrb.mxu3 %v1890_v5  ;;  %v1955_v5 = vld [vmem:[%s2412_s1 + $0x3d0] sm:$0xff] }
  0x3e   :  { %1143 = vmatpush.bf16.msrb.mxu0 %v1865_v6  ;;  %v1930_v6 = vld [vmem:[%s2412_s1 + $0x308] sm:$0xff] }
  0x3f   :  { %1156 = vmatpush.bf16.msrb.mxu1 %v1873_v7  ;;  %v1938_v7 = vld [vmem:[%s2412_s1 + $0x348] sm:$0xff] }
  0x40   :  { %1169 = vmatpush.bf16.msrb.mxu2 %v1881_v8  ;;  %v1946_v8 = vld [vmem:[%s2412_s1 + $0x388] sm:$0xff] }
  0x41   :  { %1182 = vmatpush.bf16.msrb.mxu3 %v1889_v9  ;;  %1144 = vmatmul.bf16.vlgmr.msrb.gmra.mxu0 %v286_v50  ;;  %v1935_v50 = vld [vmem:[%s2412_s1 + $0x330] sm:$0xff]  ;;  %v1954_v9 = vld [vmem:[%s2412_s1 + $0x3c8] sm:$0xff] }
  0x42   :  { %1188 = vmatpush.bf16.msra.mxu0 %v1904_v10  ;;  %1157 = vmatmul.bf16.vlgmr.msrb.gmra.mxu1 %v287_v53  ;;  %v1959_v53 = vld [vmem:[%s2412_s1 + $0x3f0] sm:$0xff]  ;;  %v1929_v10 = vld [vmem:[%s2412_s1 + $0x300] sm:$0xff] }
  0x43   :  { %1201 = vmatpush.bf16.msra.mxu1 %v1912_v11  ;;  %1170 = vmatmul.bf16.vlgmr.msrb.gmra.mxu2 %v288_v49  ;;  %v295_v49 = vld [vmem:[#allocation1 + $0x1b] sm:$0xff] }
  0x44   :  { %1214 = vmatpush.bf16.msra.mxu2 %v1920_v12  ;;  %1183 = vmatmul.bf16.vlgmr.msrb.gmra.mxu3 %v289_v51  ;;  %v1943_v51 = vld [vmem:[%s2412_s1 + $0x370] sm:$0xff]  ;;  %v1937_v11 = vld [vmem:[%s2412_s1 + $0x340] sm:$0xff] }
  0x45   :  { %1227 = vmatpush.bf16.msra.mxu3 %v1928_v13  ;;  %v1945_v12 = vld [vmem:[%s2412_s1 + $0x380] sm:$0xff] }
  0x46   :  { %1189 = vmatpush.bf16.msra.mxu0 %v1903_v14  ;;  %v1953_v13 = vld [vmem:[%s2412_s1 + $0x3c0] sm:$0xff] }
  0x47   :  { %1202 = vmatpush.bf16.msra.mxu1 %v1911_v15  ;;  %v296_v14 = vld [vmem:[#allocation1 + $0x24] sm:$0xff]  ;;  %v297_v15 = vld [vmem:[#allocation1 + $0x2d] sm:$0xff] }
  0x48   :  { %1215 = vmatpush.bf16.msra.mxu2 %v1919_v16  ;;  %v298_v16 = vld [vmem:[#allocation1 + $0x36] sm:$0xff] }
  0x49   :  { %1228 = vmatpush.bf16.msra.mxu3 %v1927_v17  ;;  %v299_v17 = vld [vmem:[#allocation1 + $0x3f] sm:$0xff] }
  0x4a   :  { %1190 = vmatpush.bf16.msra.mxu0 %v1902_v18 }
  0x4b   :  { %1203 = vmatpush.bf16.msra.mxu1 %v1910_v19 }
  0x4c   :  { %1216 = vmatpush.bf16.msra.mxu2 %v1918_v20 }
  0x4d   :  { %1229 = vmatpush.bf16.msra.mxu3 %v1926_v21 }
  0x4e   :  { %1191 = vmatpush.bf16.msra.mxu0 %v1901_v22 }
  0x4f   :  { %1204 = vmatpush.bf16.msra.mxu1 %v1909_v23 }
  0x50   :  { %1217 = vmatpush.bf16.msra.mxu2 %v1917_v24 }
  0x51   :  { %1230 = vmatpush.bf16.msra.mxu3 %v1925_v25 }
  0x52   :  { %1192 = vmatpush.bf16.msra.mxu0 %v1900_v26 }
  0x53   :  { %1205 = vmatpush.bf16.msra.mxu1 %v1908_v27 }
  0x54   :  { %1218 = vmatpush.bf16.msra.mxu2 %v1916_v28 }
  0x55   :  { %1231 = vmatpush.bf16.msra.mxu3 %v1924_v29 }
  0x56   :  { %1193 = vmatpush.bf16.msra.mxu0 %v1899_v30 }
  0x57   :  { %1206 = vmatpush.bf16.msra.mxu1 %v1907_v31 }
  0x58   :  { %1219 = vmatpush.bf16.msra.mxu2 %v1915_v32 }
  0x59   :  { %1232 = vmatpush.bf16.msra.mxu3 %v1923_v33 }
  0x5a   :  { %1194 = vmatpush.bf16.msra.mxu0 %v1898_v34 }
  0x5b   :  { %1207 = vmatpush.bf16.msra.mxu1 %v1906_v35 }
  0x5c   :  { %1220 = vmatpush.bf16.msra.mxu2 %v1914_v36 }
  0x5d   :  { %1233 = vmatpush.bf16.msra.mxu3 %v1922_v37 }
  0x5e   :  { %1195 = vmatpush.bf16.msra.mxu0 %v1897_v38 }
  0x5f   :  { %1208 = vmatpush.bf16.msra.mxu1 %v1905_v39  ;;  %v1990_v39 = vmov 0.0  }
  0x60   :  { %1221 = vmatpush.bf16.msra.mxu2 %v1913_v40  ;;  %20 = vst.msk [vmem:[#allocation2] sm:$0x3] %vm19_vm0, %v1990_v39 }
  0x61   :  { %1234 = vmatpush.bf16.msra.mxu3 %v1921_v41  ;;  %1196 = vmatmul.bf16.vlgmr.msra.gmra.mxu0 %v292_v46 }
  0x62   :  { %1240 = vmatpush.bf16.msrb.mxu0 %v1936_v42  ;;  %1209 = vmatmul.bf16.vlgmr.msra.gmra.mxu1 %v293_v48 }
  0x63   :  { %1253 = vmatpush.bf16.msrb.mxu1 %v1944_v43  ;;  %1222 = vmatmul.bf16.vlgmr.msra.gmra.mxu2 %v294_v47 }
  0x64   :  { %1266 = vmatpush.bf16.msrb.mxu2 %v1952_v44  ;;  %1235 = vmatmul.bf16.vlgmr.msra.gmra.mxu3 %v295_v49 }
  0x65   :  { %1279 = vmatpush.bf16.msrb.mxu3 %v1960_v45 }
  0x66   :  { %1241 = vmatpush.bf16.msrb.mxu0 %v1935_v50 }
  0x67   :  { %1254 = vmatpush.bf16.msrb.mxu1 %v1943_v51 }
  0x68   :  { %1267 = vmatpush.bf16.msrb.mxu2 %v1951_v52 }
  0x69   :  { %1280 = vmatpush.bf16.msrb.mxu3 %v1959_v53 }
  0x6a   :  { %1242 = vmatpush.bf16.msrb.mxu0 %v1934_v54 }
  0x6b   :  { %1255 = vmatpush.bf16.msrb.mxu1 %v1942_v55 }
  0x6c   :  { %1268 = vmatpush.bf16.msrb.mxu2 %v1950_v56 }
  0x6d   :  { %1281 = vmatpush.bf16.msrb.mxu3 %v1958_v57 }
  0x6e   :  { %1243 = vmatpush.bf16.msrb.mxu0 %v1933_v58 }
  0x6f   :  { %1256 = vmatpush.bf16.msrb.mxu1 %v1941_v59 }
  0x70   :  { %1269 = vmatpush.bf16.msrb.mxu2 %v1949_v60 }
  0x71   :  { %1282 = vmatpush.bf16.msrb.mxu3 %v1957_v61 }
  0x72   :  { %1244 = vmatpush.bf16.msrb.mxu0 %v1932_v62 }
  0x73   :  { %1257 = vmatpush.bf16.msrb.mxu1 %v1940_v63  ;;  %v21_v63 = vld [vmem:[#allocation2] sm:$0x3] }
  0x74   :  { %1270 = vmatpush.bf16.msrb.mxu2 %v1948_v0 }
  0x75   :  { %1283 = vmatpush.bf16.msrb.mxu3 %v1956_v1 }
  0x76   :  { %1245 = vmatpush.bf16.msrb.mxu0 %v1931_v2 }
  0x77   :  { %1258 = vmatpush.bf16.msrb.mxu1 %v1939_v3 }
  0x78   :  { %1271 = vmatpush.bf16.msrb.mxu2 %v1947_v4  ;;  %v1963_v4 = vld [vmem:[%s2413_s2] ss:$0 sm:$0xff] }
  0x79   :  { %1284 = vmatpush.bf16.msrb.mxu3 %v1955_v5 }
  0x7a   :  { %1246 = vmatpush.bf16.msrb.mxu0 %v1930_v6 }
  0x7b   :  { %1259 = vmatpush.bf16.msrb.mxu1 %v1938_v7 }
  0x7c   :  { %1272 = vmatpush.bf16.msrb.mxu2 %v1946_v8 }
  0x7d   :  { %1285 = vmatpush.bf16.msrb.mxu3 %v1954_v9 }
  0x7e   :  { %1247 = vmatpush.bf16.msrb.mxu0 %v1929_v10 }
  0x7f   :  { %1260 = vmatpush.bf16.msrb.mxu1 %v1937_v11 }
  0x80   :  { %1273 = vmatpush.bf16.msrb.mxu2 %v1945_v12 }
  0x81   :  { %1286 = vmatpush.bf16.msrb.mxu3 %v1953_v13  ;;  %1248 = vmatmul.bf16.vlgmr.msrb.gmra.mxu0 %v296_v14 }
  0x82   :  { %1261 = vmatmul.bf16.vlgmr.msrb.gmra.mxu1 %v297_v15 }
  0x83   :  { %1274 = vmatmul.bf16.vlgmr.msrb.gmra.mxu2 %v298_v16 }
  0x84   :  { %1287 = vmatmul.bf16.vlgmr.msrb.gmra.mxu3 %v299_v17 }
  0x9e   :  { %v1093_v18 = vpop.f32.mrf.mxu0 }
  0x9f   :  { %v1106_v19 = vpop.f32.mrf.mxu1 }
  0xa0   :  { %v1107_v20 = vadd.f32 %v1106_v19, %v1093_v18 }
  0xa6   :  { %v1119_v21 = vpop.f32.mrf.mxu2  ;;  %v1095_v24 = vpop.f32.mrf.mxu0 }
  0xa7   :  { %v1120_v22 = vadd.f32 %v1119_v21, %v1107_v20  ;;  %v1132_v23 = vpop.f32.mrf.mxu3  ;;  %v1108_v26 = vpop.f32.mrf.mxu1 }
  0xa9   :  { %v1133_v25 = vadd.f32 %v1132_v23, %v1120_v22 }
  0xae   :  { %v1121_v27 = vpop.f32.mrf.mxu2 }
  0xaf   :  { %v1134_v28 = vpop.f32.mrf.mxu3 }
  0xbe   :  { %v1145_v29 = vpop.f32.mrf.mxu0 }
  0xbf   :  { %v1158_v30 = vpop.f32.mrf.mxu1  ;;  %v1146_v40 = vadd.f32 %v1145_v29, %v1133_v25 }
  0xc1   :  { %v1159_v44 = vadd.f32 %v1158_v30, %v1146_v40 }
  0xc6   :  { %v1171_v31 = vpop.f32.mrf.mxu2  ;;  %v1147_v33 = vpop.f32.mrf.mxu0 }
  0xc7   :  { %v1184_v32 = vpop.f32.mrf.mxu3  ;;  %v1160_v34 = vpop.f32.mrf.mxu1  ;;  %v1172_v46 = vadd.f32 %v1171_v31, %v1159_v44 }
  0xc9   :  { %v1185_v49 = vadd.f32 %v1184_v32, %v1172_v46 }
  0xce   :  { %v1173_v35 = vpop.f32.mrf.mxu2 }
  0xcf   :  { %v1186_v36 = vpop.f32.mrf.mxu3 }
  0xde   :  { %v1197_v37 = vpop.f32.mrf.mxu0 }
  0xdf   :  { %v1210_v38 = vpop.f32.mrf.mxu1  ;;  %v1198_v50 = vadd.f32 %v1197_v37, %v1185_v49 }
  0xe1   :  { %v1211_v51 = vadd.f32 %v1210_v38, %v1198_v50 }
  0xe6   :  { %v1223_v41 = vpop.f32.mrf.mxu2  ;;  %v1199_v43 = vpop.f32.mrf.mxu0 }
  0xe7   :  { %v1236_v42 = vpop.f32.mrf.mxu3  ;;  %v1212_v45 = vpop.f32.mrf.mxu1  ;;  %v1224_v52 = vadd.f32 %v1223_v41, %v1211_v51 }
  0xe9   :  { %v1237_v53 = vadd.f32 %v1236_v42, %v1224_v52 }
  0xee   :  { %v1225_v47 = vpop.f32.mrf.mxu2 }
  0xef   :  { %v1238_v48 = vpop.f32.mrf.mxu3 }
  0xfe   :  { %v1249_v54 = vpop.f32.mrf.mxu0 }
  0xff   :  { %v1262_v55 = vpop.f32.mrf.mxu1  ;;  %v1250_v56 = vadd.f32 %v1249_v54, %v1237_v53 }
 0x101   :  { %v1263_v57 = vadd.f32 %v1262_v55, %v1250_v56 }
 0x106   :  { %v1275_v58 = vpop.f32.mrf.mxu2  ;;  %v1251_v61 = vpop.f32.mrf.mxu0 }
 0x107   :  { %v1288_v59 = vpop.f32.mrf.mxu3  ;;  %v1276_v60 = vadd.f32 %v1275_v58, %v1263_v57  ;;  %v1264_v62 = vpop.f32.mrf.mxu1 }
 0x109   :  { %v1289_v0 = vadd.f32 %v1288_v59, %v1276_v60 }
 0x10b   :  { %v1292_v1 = vadd.f32 %v1289_v0, %v21_v63 }
 0x10d   :  { %1294 = vst.msk [vmem:[#allocation2] sm:$0x3] %vm19_vm0, %v1292_v1 }
 0x10e   :  { %v1277_v2 = vpop.f32.mrf.mxu2 }
 0x10f   :  { %v1290_v3 = vpop.f32.mrf.mxu3 }
 0x114   :  { %v1298_v5 = vld [vmem:[#allocation2] sm:$0x3] }
 0x115   :  { %v1303_v6 = vadd.f32 %v1963_v4, %v1298_v5 }
 0x117   :  { %1304 = vst.msk [vmem:[#allocation3] sm:$0x3] %vm19_vm0, %v1303_v6 }
 0x118   :  { %1315 = dma.vmem_to_hbm [thread:$0]  %s1311_s25, 32, %s1313_s28, [#allocation4]  }
 0x119   :  { %1988 = dma.done.wait [#allocation4], 32  }
 0x11a   :  { %1989 = vsyncadd [#allocation4], 4294967264 }
 0x11b   :  { %1320 = vsyncpa [#allocation4], 1 }

</bundles_post_ra>
